<compile_context>
chip_gen: v5e
topology: v5e:2x2
jax: 0.10.0
libtpu: 0.0.40
codegen_flags: <defaults>
</compile_context>

<pallas_src>
import jax
import jax.numpy as jnp
from jax.experimental import pallas as pl
from jax.experimental.pallas import tpu as pltpu

_BATCH_BLOCK = 16          # batch elements per grid step (B*25 = 400 rows, 16-aligned for bf16)
_P2 = 25                   # conv2 output positions (5x5)
_TAPS = 16                 # 4x4 conv taps


# ---------------------------------------------------------------------------
# Fused encoder kernel (one grid step == one block of _BATCH_BLOCK batch elements).
# ---------------------------------------------------------------------------
def _make_encoder_kernel(batch_block, taps, k1):
    p_rows = batch_block * _P2

    def kernel(p_ref, w1_ref, w2_ref, w3_ref, wh_ref,
               c1_ref, c2_ref, c3_ref, bh_ref, out_ref):
        cout1 = w1_ref.shape[1]
        cout2 = w2_ref.shape[2]

        # Condition rows: block row p*B + b belongs to batch element b of this group,
        # so cond rows are the (B, Cout) block tiled 25x along sublanes (tile-aligned
        # reshape since B == 16).  Built once, outside the tap loop.
        c1 = c1_ref[...]
        c2 = c2_ref[...]
        c1rows = jnp.broadcast_to(c1[None, :, :], (_P2, batch_block, cout1)
                                  ).reshape(p_rows, cout1)
        c2rows = jnp.broadcast_to(c2[None, :, :], (_P2, batch_block, cout2)
                                  ).reshape(p_rows, cout2)

        w1 = w1_ref[...]                                   # (k1, 64) bf16, VMEM-resident

        # conv1 + ReLU fused with conv2's im2col: 16 accumulated MXU matmuls, M = B*25.
        acc2 = jnp.zeros((p_rows, cout2), jnp.float32)
        for k in range(taps):
            pk = p_ref[:, k * k1:(k + 1) * k1]             # (B*25, k1) bf16 lane slice
            h1k = jnp.maximum(
                jnp.dot(pk, w1, preferred_element_type=jnp.float32) + c1rows, 0.0)
            acc2 = acc2 + jnp.dot(h1k.astype(w2_ref.dtype), w2_ref[k],
                                  preferred_element_type=jnp.float32)
        h2 = jnp.maximum(acc2 + c2rows, 0.0)               # (B*25, 128) f32 conv2 output

        # conv3 (output spatial 1x1): needs conv2 positions (kh, kw), kh,kw in 0..3, i.e.
        # p = 5*kh + kw.  Rows for position p are the contiguous, tile-aligned slice
        # [p*B, (p+1)*B); concatenate the 16 slices along lanes -> (B, 2048) and do ONE
        # matmul against W3 reshaped to (2048, hidden).
        pieces = []
        for kh in range(4):
            for kw in range(4):
                p = 5 * kh + kw
                pieces.append(h2[p * batch_block:(p + 1) * batch_block, :])
        h2sel = jnp.concatenate(pieces, axis=1).astype(w3_ref.dtype)   # (B, 2048) bf16
        h3 = jnp.maximum(
            jnp.dot(h2sel, w3_ref[...], preferred_element_type=jnp.float32)
            + c3_ref[...], 0.0)                                        # (B, hidden) f32

        # Fused mu/var heads: one matmul against [Wmu || Wvar]; split happens in wrapper.
        head = jnp.dot(h3.astype(wh_ref.dtype), wh_ref[...],
                       preferred_element_type=jnp.float32) + bh_ref[...]
        out_ref[...] = head.astype(out_ref.dtype)

    return kernel


def _encoder_fused(p2d, w1, w2, w3, wh, c1, c2, c3, bh, *, batch_block, latent):
    k1 = w1.shape[0]
    rows_per_block = batch_block * _P2
    g = p2d.shape[0] // rows_per_block
    kernel = _make_encoder_kernel(batch_block, _TAPS, k1)
    return pl.pallas_call(
        kernel,
        out_shape=jax.ShapeDtypeStruct((g * batch_block, 2 * latent), jnp.float32),
        grid=(g,),
        in_specs=[
            pl.BlockSpec((rows_per_block, p2d.shape[1]), lambda i: (i, 0)),  # patches block
            pl.BlockSpec(w1.shape, lambda i: (0, 0)),                        # conv1 W (resident)
            pl.BlockSpec(w2.shape, lambda i: (0, 0, 0)),                     # conv2 W per tap
            pl.BlockSpec(w3.shape, lambda i: (0, 0)),                        # conv3 W (2048, hid)
            pl.BlockSpec(wh.shape, lambda i: (0, 0)),                        # [Wmu || Wvar]
            pl.BlockSpec((batch_block, c1.shape[1]), lambda i: (i, 0)),      # cond1 rows
            pl.BlockSpec((batch_block, c2.shape[1]), lambda i: (i, 0)),      # cond2 rows
            pl.BlockSpec((batch_block, c3.shape[1]), lambda i: (i, 0)),      # cond3 rows
            pl.BlockSpec(bh.shape, lambda i: (0, 0)),                        # [bmu || bvar]
        ],
        out_specs=pl.BlockSpec((batch_block, 2 * latent), lambda i: (i, 0)),
        compiler_params=pltpu.CompilerParams(dimension_semantics=("parallel",)),
    )(p2d, w1, w2, w3, wh, c1, c2, c3, bh)


# ---------------------------------------------------------------------------
# Wrapper-side data-movement glue (static strided slices only — no XLA gather;
# intermediates never leave the kernel).
# ---------------------------------------------------------------------------
def init_encoder_params(key, image_channels, n_condition, hidden_dim, latent_dim):
    # Deterministic synthetic parameters, HWIO conv layout (KH, KW, Cin, Cout).
    chans = [(image_channels, 64), (64, 128), (128, hidden_dim)]
    params = {}
    for i, (cin, cout) in enumerate(chans, start=1):
        key, k1, k2, k3, k4 = jax.random.split(key, 5)
        params[f"conv{i}"] = dict(
            w=jax.random.normal(k1, (4, 4, cin, cout), jnp.float32) * 0.05,
            b=jax.random.normal(k2, (1, cout), jnp.float32) * 0.05,
            wc=jax.random.normal(k3, (n_condition, cout), jnp.float32) * 0.05,
            bc=jax.random.normal(k4, (1, cout), jnp.float32) * 0.05,
        )
    key, k1, k2, k3, k4 = jax.random.split(key, 5)
    params["mu"] = dict(
        w=jax.random.normal(k1, (hidden_dim, latent_dim), jnp.float32) * 0.05,
        b=jax.random.normal(k2, (1, latent_dim), jnp.float32) * 0.05)
    params["var"] = dict(
        w=jax.random.normal(k3, (hidden_dim, latent_dim), jnp.float32) * 0.05,
        b=jax.random.normal(k4, (1, latent_dim), jnp.float32) * 0.05)
    return params


@jax.jit
def encoder_forward(params, x_nchw, c):
    x = jnp.transpose(x_nchw, (0, 2, 3, 1)).astype(jnp.float32)     # NCHW -> NHWC
    n, h, w, cin = x.shape
    sp1 = (h - 4) // 2 + 1
    sp2 = (sp1 - 4) // 2 + 1
    sp3 = (sp2 - 4) // 2 + 1
    # PyTorch's conv3.view(N, -1) -> Linear(hidden_dim) requires conv3 spatial output 1x1.
    assert sp2 == 5 and sp3 == 1, "Encoder requires 28x28 input (k=4, s=2, p=0 conv stack)"
    k1 = _TAPS * cin                                                 # conv1 im2col depth

    # conv1 im2col via static strided slices: (N, 13, 13, 16*Cin), tap-major last dim.
    cols = []
    for kh in range(4):
        for kw in range(4):
            cols.append(x[:, kh:kh + 2 * sp1:2, kw:kw + 2 * sp1:2, :])
    patches1 = jnp.stack(cols, axis=3).reshape(n, sp1, sp1, k1)

    # Pre-gather in conv2-tap order via static strided slices (no advanced-index gather):
    # p1g[n, p, 32*k : 32*(k+1)] = conv1 patch feeding conv2 output position p through tap k.
    taps2 = []
    for kh in range(4):
        for kw in range(4):
            taps2.append(patches1[:, kh:kh + 2 * sp2:2, kw:kw + 2 * sp2:2, :])
    p1g = jnp.stack(taps2, axis=3).reshape(n, _P2, _TAPS * k1)       # (N, 25, 512) lane-dense

    # Hoisted per-layer condition rows (= c @ Wc + bc + conv_bias) and fused head params.
    hp = jax.lax.Precision.HIGHEST
    conds = []
    for name in ("conv1", "conv2", "conv3"):
        p = params[name]
        conds.append(jnp.dot(c, p["wc"], precision=hp) + p["bc"] + p["b"])  # (N, Cout) f32
    hidden = params["conv3"]["w"].shape[-1]
    latent = params["mu"]["w"].shape[1]
    wh = jnp.concatenate([params["mu"]["w"], params["var"]["w"]], axis=1)   # (hidden, 2L)
    bh = jnp.concatenate([params["mu"]["b"], params["var"]["b"]], axis=1)   # (1, 2L)

    # Batch-block: pad N up to a multiple of B and reorder patch rows to
    # (group, conv2-position, batch) so conv3's row selection is contiguous in-kernel.
    B = _BATCH_BLOCK
    g = -(-n // B)
    pad = g * B - n
    p1g = jnp.pad(p1g, ((0, pad), (0, 0), (0, 0)))
    conds = [jnp.pad(ci, ((0, pad), (0, 0))) for ci in conds]
    p2d = (p1g.reshape(g, B, _P2, _TAPS * k1)
               .transpose(0, 2, 1, 3)
               .reshape(g * _P2 * B, _TAPS * k1)
               .astype(jnp.bfloat16))                                # (G*400, 512) bf16

    # bf16 MXU operands (f32 accumulation happens in-kernel).
    w1 = params["conv1"]["w"].reshape(k1, 64).astype(jnp.bfloat16)
    w2 = params["conv2"]["w"].reshape(_TAPS, 64, 128).astype(jnp.bfloat16)
    w3 = params["conv3"]["w"].reshape(_TAPS * 128, hidden).astype(jnp.bfloat16)
    whb = wh.astype(jnp.bfloat16)

    out = _encoder_fused(p2d, w1, w2, w3, whb, conds[0], conds[1], conds[2], bh,
                         batch_block=B, latent=latent)
    out = out[:n]
    return out[:, :latent], out[:, latent:]


# ---------------------------------------------------------------------------
# Plain-JAX reference (lax conv, f32 HIGHEST) for a numerical sanity check.
# ---------------------------------------------------------------------------
@jax.jit
def _reference_forward(params, x_nchw, c):
    hp = jax.lax.Precision.HIGHEST
    x = jnp.transpose(x_nchw, (0, 2, 3, 1)).astype(jnp.float32)
    for name in ("conv1", "conv2", "conv3"):
        p = params[name]
        y = jax.lax.conv_general_dilated(
            x, p["w"], window_strides=(2, 2), padding="VALID",
            dimension_numbers=("NHWC", "HWIO", "NHWC"), precision=hp)
        cond = jnp.dot(c, p["wc"], precision=hp) + p["bc"] + p["b"]
        x = jnp.maximum(y + cond[:, None, None, :], 0.0)
    hidden = x.reshape(x.shape[0], -1)
    mean = jnp.dot(hidden, params["mu"]["w"], precision=hp) + params["mu"]["b"]
    log_var = jnp.dot(hidden, params["var"]["w"], precision=hp) + params["var"]["b"]
    return mean, log_var


if __name__ == "__main__":
    image_channels, n_condition, hidden_dim, latent_dim = 2, 3, 32, 8
    batch, spatial = 2, 28   # 28 -> 13 -> 5 -> 1 under kernel=4, stride=2, padding=0

    key = jax.random.PRNGKey(0)
    kp, kx, kc = jax.random.split(key, 3)
    params = init_encoder_params(kp, image_channels, n_condition, hidden_dim, latent_dim)
    x = jax.random.normal(kx, (batch, image_channels, spatial, spatial), jnp.float32)
    c = jax.random.normal(kc, (batch, n_condition), jnp.float32)

    mean, log_var = encoder_forward(params, x, c)
    jax.block_until_ready((mean, log_var))
    assert mean.shape == (batch, latent_dim)
    assert log_var.shape == (batch, latent_dim)

    # bf16 MXU operands + f32 accumulation vs. an all-f32 HIGHEST reference: expected
    # absolute deviation ~3e-3 on O(0.1) outputs, so 2e-2 tolerances leave ample margin.
    ref_mean, ref_log_var = _reference_forward(params, x, c)
    assert jnp.allclose(mean, ref_mean, atol=2e-2, rtol=2e-2)
    assert jnp.allclose(log_var, ref_log_var, atol=2e-2, rtol=2e-2)
    print("KERNEL_OK")
</pallas_src>

<mosaic_0001>
module attributes {stable_mosaic.version = 11 : i64} {
  func.func @kernel(%arg0: i32, %arg1: memref<400x512xbf16, #tpu.memory_space<vmem>>, %arg2: memref<32x64xbf16, #tpu.memory_space<vmem>>, %arg3: memref<16x64x128xbf16, #tpu.memory_space<vmem>>, %arg4: memref<2048x32xbf16, #tpu.memory_space<vmem>>, %arg5: memref<32x16xbf16, #tpu.memory_space<vmem>>, %arg6: memref<16x64xf32, #tpu.memory_space<vmem>>, %arg7: memref<16x128xf32, #tpu.memory_space<vmem>>, %arg8: memref<16x32xf32, #tpu.memory_space<vmem>>, %arg9: memref<1x16xf32, #tpu.memory_space<vmem>>, %arg10: memref<16x16xf32, #tpu.memory_space<vmem>>) attributes {dimension_semantics = [#tpu.dimension_semantics<parallel>], iteration_bounds = array<i64: 1>, scalar_prefetch = 0 : i64, scratch_operands = 0 : i64, tpu.core_type = #tpu.core_type<tc>, window_params = [{transform_indices = @transform_0, window_bounds = array<i64: 400, 512>}, {pipeline_mode = #tpu.pipeline_mode<synchronous>, transform_indices = @transform_1, window_bounds = array<i64: 32, 64>}, {pipeline_mode = #tpu.pipeline_mode<synchronous>, transform_indices = @transform_2, window_bounds = array<i64: 16, 64, 128>}, {pipeline_mode = #tpu.pipeline_mode<synchronous>, transform_indices = @transform_3, window_bounds = array<i64: 2048, 32>}, {pipeline_mode = #tpu.pipeline_mode<synchronous>, transform_indices = @transform_4, window_bounds = array<i64: 32, 16>}, {transform_indices = @transform_5, window_bounds = array<i64: 16, 64>}, {transform_indices = @transform_6, window_bounds = array<i64: 16, 128>}, {transform_indices = @transform_7, window_bounds = array<i64: 16, 32>}, {pipeline_mode = #tpu.pipeline_mode<synchronous>, transform_indices = @transform_8, window_bounds = array<i64: 1, 16>}, {transform_indices = @transform_9, window_bounds = array<i64: 16, 16>}]} {
    %c0 = arith.constant 0 : index
    %c0_0 = arith.constant 0 : index
    %0 = vector.load %arg6[%c0, %c0_0] : memref<16x64xf32, #tpu.memory_space<vmem>>, vector<16x64xf32>
    %c0_1 = arith.constant 0 : index
    %c0_2 = arith.constant 0 : index
    %1 = vector.load %arg7[%c0_1, %c0_2] : memref<16x128xf32, #tpu.memory_space<vmem>>, vector<16x128xf32>
    %2 = vector.shape_cast %0 : vector<16x64xf32> to vector<1x16x64xf32>
    %3 = vector.shape_cast %2 : vector<1x16x64xf32> to vector<1x16x64xf32>
    %4 = vector.broadcast %3 : vector<1x16x64xf32> to vector<25x16x64xf32>
    %5 = vector.shape_cast %4 : vector<25x16x64xf32> to vector<400x64xf32>
    %6 = vector.shape_cast %1 : vector<16x128xf32> to vector<1x16x128xf32>
    %7 = vector.shape_cast %6 : vector<1x16x128xf32> to vector<1x16x128xf32>
    %8 = vector.broadcast %7 : vector<1x16x128xf32> to vector<25x16x128xf32>
    %9 = vector.shape_cast %8 : vector<25x16x128xf32> to vector<400x128xf32>
    %c0_3 = arith.constant 0 : index
    %c0_4 = arith.constant 0 : index
    %10 = vector.load %arg2[%c0_3, %c0_4] : memref<32x64xbf16, #tpu.memory_space<vmem>>, vector<32x64xbf16>
    %cst = arith.constant 0.000000e+00 : f32
    %11 = vector.broadcast %cst : f32 to vector<400x128xf32>
    %c0_5 = arith.constant 0 : index
    %c0_6 = arith.constant 0 : index
    %12 = vector.load %arg1[%c0_5, %c0_6] : memref<400x512xbf16, #tpu.memory_space<vmem>>, vector<400x32xbf16>
    %cst_7 = arith.constant dense<0.000000e+00> : vector<400x64xf32>
    %13 = tpu.matmul %12, %10, %cst_7 {dimension_numbers = #tpu.dot_dimension_numbers<[1], [0], [0], [1], [0, 0, 1, 1], [], []>} : vector<400x32xbf16>, vector<32x64xbf16>, vector<400x64xf32> -> vector<400x64xf32>
    %14 = arith.addf %13, %5 : vector<400x64xf32>
    %cst_8 = arith.constant 0.000000e+00 : f32
    %15 = vector.broadcast %cst_8 : f32 to vector<400x64xf32>
    %16 = arith.maximumf %14, %15 : vector<400x64xf32>
    %17 = arith.truncf %16 : vector<400x64xf32> to vector<400x64xbf16>
    %c0_9 = arith.constant 0 : index
    %c0_10 = arith.constant 0 : index
    %c0_11 = arith.constant 0 : index
    %18 = vector.load %arg3[%c0_9, %c0_10, %c0_11] : memref<16x64x128xbf16, #tpu.memory_space<vmem>>, vector<1x64x128xbf16>
    %19 = vector.shape_cast %18 : vector<1x64x128xbf16> to vector<64x128xbf16>
    %cst_12 = arith.constant dense<0.000000e+00> : vector<400x128xf32>
    %20 = tpu.matmul %17, %19, %cst_12 {dimension_numbers = #tpu.dot_dimension_numbers<[1], [0], [0], [1], [0, 0, 1, 1], [], []>} : vector<400x64xbf16>, vector<64x128xbf16>, vector<400x128xf32> -> vector<400x128xf32>
    %21 = arith.addf %11, %20 : vector<400x128xf32>
    %c0_13 = arith.constant 0 : index
    %c32 = arith.constant 32 : index
    %22 = vector.load %arg1[%c0_13, %c32] : memref<400x512xbf16, #tpu.memory_space<vmem>>, vector<400x32xbf16>
    %cst_14 = arith.constant dense<0.000000e+00> : vector<400x64xf32>
    %23 = tpu.matmul %22, %10, %cst_14 {dimension_numbers = #tpu.dot_dimension_numbers<[1], [0], [0], [1], [0, 0, 1, 1], [], []>} : vector<400x32xbf16>, vector<32x64xbf16>, vector<400x64xf32> -> vector<400x64xf32>
    %24 = arith.addf %23, %5 : vector<400x64xf32>
    %cst_15 = arith.constant 0.000000e+00 : f32
    %25 = vector.broadcast %cst_15 : f32 to vector<400x64xf32>
    %26 = arith.maximumf %24, %25 : vector<400x64xf32>
    %27 = arith.truncf %26 : vector<400x64xf32> to vector<400x64xbf16>
    %c1 = arith.constant 1 : index
    %c0_16 = arith.constant 0 : index
    %c0_17 = arith.constant 0 : index
    %28 = vector.load %arg3[%c1, %c0_16, %c0_17] : memref<16x64x128xbf16, #tpu.memory_space<vmem>>, vector<1x64x128xbf16>
    %29 = vector.shape_cast %28 : vector<1x64x128xbf16> to vector<64x128xbf16>
    %cst_18 = arith.constant dense<0.000000e+00> : vector<400x128xf32>
    %30 = tpu.matmul %27, %29, %cst_18 {dimension_numbers = #tpu.dot_dimension_numbers<[1], [0], [0], [1], [0, 0, 1, 1], [], []>} : vector<400x64xbf16>, vector<64x128xbf16>, vector<400x128xf32> -> vector<400x128xf32>
    %31 = arith.addf %21, %30 : vector<400x128xf32>
    %c0_19 = arith.constant 0 : index
    %c64 = arith.constant 64 : index
    %32 = vector.load %arg1[%c0_19, %c64] : memref<400x512xbf16, #tpu.memory_space<vmem>>, vector<400x32xbf16>
    %cst_20 = arith.constant dense<0.000000e+00> : vector<400x64xf32>
    %33 = tpu.matmul %32, %10, %cst_20 {dimension_numbers = #tpu.dot_dimension_numbers<[1], [0], [0], [1], [0, 0, 1, 1], [], []>} : vector<400x32xbf16>, vector<32x64xbf16>, vector<400x64xf32> -> vector<400x64xf32>
    %34 = arith.addf %33, %5 : vector<400x64xf32>
    %cst_21 = arith.constant 0.000000e+00 : f32
    %35 = vector.broadcast %cst_21 : f32 to vector<400x64xf32>
    %36 = arith.maximumf %34, %35 : vector<400x64xf32>
    %37 = arith.truncf %36 : vector<400x64xf32> to vector<400x64xbf16>
    %c2 = arith.constant 2 : index
    %c0_22 = arith.constant 0 : index
    %c0_23 = arith.constant 0 : index
    %38 = vector.load %arg3[%c2, %c0_22, %c0_23] : memref<16x64x128xbf16, #tpu.memory_space<vmem>>, vector<1x64x128xbf16>
    %39 = vector.shape_cast %38 : vector<1x64x128xbf16> to vector<64x128xbf16>
    %cst_24 = arith.constant dense<0.000000e+00> : vector<400x128xf32>
    %40 = tpu.matmul %37, %39, %cst_24 {dimension_numbers = #tpu.dot_dimension_numbers<[1], [0], [0], [1], [0, 0, 1, 1], [], []>} : vector<400x64xbf16>, vector<64x128xbf16>, vector<400x128xf32> -> vector<400x128xf32>
    %41 = arith.addf %31, %40 : vector<400x128xf32>
    %c0_25 = arith.constant 0 : index
    %c96 = arith.constant 96 : index
    %42 = vector.load %arg1[%c0_25, %c96] : memref<400x512xbf16, #tpu.memory_space<vmem>>, vector<400x32xbf16>
    %cst_26 = arith.constant dense<0.000000e+00> : vector<400x64xf32>
    %43 = tpu.matmul %42, %10, %cst_26 {dimension_numbers = #tpu.dot_dimension_numbers<[1], [0], [0], [1], [0, 0, 1, 1], [], []>} : vector<400x32xbf16>, vector<32x64xbf16>, vector<400x64xf32> -> vector<400x64xf32>
    %44 = arith.addf %43, %5 : vector<400x64xf32>
    %cst_27 = arith.constant 0.000000e+00 : f32
    %45 = vector.broadcast %cst_27 : f32 to vector<400x64xf32>
    %46 = arith.maximumf %44, %45 : vector<400x64xf32>
    %47 = arith.truncf %46 : vector<400x64xf32> to vector<400x64xbf16>
    %c3 = arith.constant 3 : index
    %c0_28 = arith.constant 0 : index
    %c0_29 = arith.constant 0 : index
    %48 = vector.load %arg3[%c3, %c0_28, %c0_29] : memref<16x64x128xbf16, #tpu.memory_space<vmem>>, vector<1x64x128xbf16>
    %49 = vector.shape_cast %48 : vector<1x64x128xbf16> to vector<64x128xbf16>
    %cst_30 = arith.constant dense<0.000000e+00> : vector<400x128xf32>
    %50 = tpu.matmul %47, %49, %cst_30 {dimension_numbers = #tpu.dot_dimension_numbers<[1], [0], [0], [1], [0, 0, 1, 1], [], []>} : vector<400x64xbf16>, vector<64x128xbf16>, vector<400x128xf32> -> vector<400x128xf32>
    %51 = arith.addf %41, %50 : vector<400x128xf32>
    %c0_31 = arith.constant 0 : index
    %c128 = arith.constant 128 : index
    %52 = vector.load %arg1[%c0_31, %c128] : memref<400x512xbf16, #tpu.memory_space<vmem>>, vector<400x32xbf16>
    %cst_32 = arith.constant dense<0.000000e+00> : vector<400x64xf32>
    %53 = tpu.matmul %52, %10, %cst_32 {dimension_numbers = #tpu.dot_dimension_numbers<[1], [0], [0], [1], [0, 0, 1, 1], [], []>} : vector<400x32xbf16>, vector<32x64xbf16>, vector<400x64xf32> -> vector<400x64xf32>
    %54 = arith.addf %53, %5 : vector<400x64xf32>
    %cst_33 = arith.constant 0.000000e+00 : f32
    %55 = vector.broadcast %cst_33 : f32 to vector<400x64xf32>
    %56 = arith.maximumf %54, %55 : vector<400x64xf32>
    %57 = arith.truncf %56 : vector<400x64xf32> to vector<400x64xbf16>
    %c4 = arith.constant 4 : index
    %c0_34 = arith.constant 0 : index
    %c0_35 = arith.constant 0 : index
    %58 = vector.load %arg3[%c4, %c0_34, %c0_35] : memref<16x64x128xbf16, #tpu.memory_space<vmem>>, vector<1x64x128xbf16>
    %59 = vector.shape_cast %58 : vector<1x64x128xbf16> to vector<64x128xbf16>
    %cst_36 = arith.constant dense<0.000000e+00> : vector<400x128xf32>
    %60 = tpu.matmul %57, %59, %cst_36 {dimension_numbers = #tpu.dot_dimension_numbers<[1], [0], [0], [1], [0, 0, 1, 1], [], []>} : vector<400x64xbf16>, vector<64x128xbf16>, vector<400x128xf32> -> vector<400x128xf32>
    %61 = arith.addf %51, %60 : vector<400x128xf32>
    %c0_37 = arith.constant 0 : index
    %c160 = arith.constant 160 : index
    %62 = vector.load %arg1[%c0_37, %c160] : memref<400x512xbf16, #tpu.memory_space<vmem>>, vector<400x32xbf16>
    %cst_38 = arith.constant dense<0.000000e+00> : vector<400x64xf32>
    %63 = tpu.matmul %62, %10, %cst_38 {dimension_numbers = #tpu.dot_dimension_numbers<[1], [0], [0], [1], [0, 0, 1, 1], [], []>} : vector<400x32xbf16>, vector<32x64xbf16>, vector<400x64xf32> -> vector<400x64xf32>
    %64 = arith.addf %63, %5 : vector<400x64xf32>
    %cst_39 = arith.constant 0.000000e+00 : f32
    %65 = vector.broadcast %cst_39 : f32 to vector<400x64xf32>
    %66 = arith.maximumf %64, %65 : vector<400x64xf32>
    %67 = arith.truncf %66 : vector<400x64xf32> to vector<400x64xbf16>
    %c5 = arith.constant 5 : index
    %c0_40 = arith.constant 0 : index
    %c0_41 = arith.constant 0 : index
    %68 = vector.load %arg3[%c5, %c0_40, %c0_41] : memref<16x64x128xbf16, #tpu.memory_space<vmem>>, vector<1x64x128xbf16>
    %69 = vector.shape_cast %68 : vector<1x64x128xbf16> to vector<64x128xbf16>
    %cst_42 = arith.constant dense<0.000000e+00> : vector<400x128xf32>
    %70 = tpu.matmul %67, %69, %cst_42 {dimension_numbers = #tpu.dot_dimension_numbers<[1], [0], [0], [1], [0, 0, 1, 1], [], []>} : vector<400x64xbf16>, vector<64x128xbf16>, vector<400x128xf32> -> vector<400x128xf32>
    %71 = arith.addf %61, %70 : vector<400x128xf32>
    %c0_43 = arith.constant 0 : index
    %c192 = arith.constant 192 : index
    %72 = vector.load %arg1[%c0_43, %c192] : memref<400x512xbf16, #tpu.memory_space<vmem>>, vector<400x32xbf16>
    %cst_44 = arith.constant dense<0.000000e+00> : vector<400x64xf32>
    %73 = tpu.matmul %72, %10, %cst_44 {dimension_numbers = #tpu.dot_dimension_numbers<[1], [0], [0], [1], [0, 0, 1, 1], [], []>} : vector<400x32xbf16>, vector<32x64xbf16>, vector<400x64xf32> -> vector<400x64xf32>
    %74 = arith.addf %73, %5 : vector<400x64xf32>
    %cst_45 = arith.constant 0.000000e+00 : f32
    %75 = vector.broadcast %cst_45 : f32 to vector<400x64xf32>
    %76 = arith.maximumf %74, %75 : vector<400x64xf32>
    %77 = arith.truncf %76 : vector<400x64xf32> to vector<400x64xbf16>
    %c6 = arith.constant 6 : index
    %c0_46 = arith.constant 0 : index
    %c0_47 = arith.constant 0 : index
    %78 = vector.load %arg3[%c6, %c0_46, %c0_47] : memref<16x64x128xbf16, #tpu.memory_space<vmem>>, vector<1x64x128xbf16>
    %79 = vector.shape_cast %78 : vector<1x64x128xbf16> to vector<64x128xbf16>
    %cst_48 = arith.constant dense<0.000000e+00> : vector<400x128xf32>
    %80 = tpu.matmul %77, %79, %cst_48 {dimension_numbers = #tpu.dot_dimension_numbers<[1], [0], [0], [1], [0, 0, 1, 1], [], []>} : vector<400x64xbf16>, vector<64x128xbf16>, vector<400x128xf32> -> vector<400x128xf32>
    %81 = arith.addf %71, %80 : vector<400x128xf32>
    %c0_49 = arith.constant 0 : index
    %c224 = arith.constant 224 : index
    %82 = vector.load %arg1[%c0_49, %c224] : memref<400x512xbf16, #tpu.memory_space<vmem>>, vector<400x32xbf16>
    %cst_50 = arith.constant dense<0.000000e+00> : vector<400x64xf32>
    %83 = tpu.matmul %82, %10, %cst_50 {dimension_numbers = #tpu.dot_dimension_numbers<[1], [0], [0], [1], [0, 0, 1, 1], [], []>} : vector<400x32xbf16>, vector<32x64xbf16>, vector<400x64xf32> -> vector<400x64xf32>
    %84 = arith.addf %83, %5 : vector<400x64xf32>
    %cst_51 = arith.constant 0.000000e+00 : f32
    %85 = vector.broadcast %cst_51 : f32 to vector<400x64xf32>
    %86 = arith.maximumf %84, %85 : vector<400x64xf32>
    %87 = arith.truncf %86 : vector<400x64xf32> to vector<400x64xbf16>
    %c7 = arith.constant 7 : index
    %c0_52 = arith.constant 0 : index
    %c0_53 = arith.constant 0 : index
    %88 = vector.load %arg3[%c7, %c0_52, %c0_53] : memref<16x64x128xbf16, #tpu.memory_space<vmem>>, vector<1x64x128xbf16>
    %89 = vector.shape_cast %88 : vector<1x64x128xbf16> to vector<64x128xbf16>
    %cst_54 = arith.constant dense<0.000000e+00> : vector<400x128xf32>
    %90 = tpu.matmul %87, %89, %cst_54 {dimension_numbers = #tpu.dot_dimension_numbers<[1], [0], [0], [1], [0, 0, 1, 1], [], []>} : vector<400x64xbf16>, vector<64x128xbf16>, vector<400x128xf32> -> vector<400x128xf32>
    %91 = arith.addf %81, %90 : vector<400x128xf32>
    %c0_55 = arith.constant 0 : index
    %c256 = arith.constant 256 : index
    %92 = vector.load %arg1[%c0_55, %c256] : memref<400x512xbf16, #tpu.memory_space<vmem>>, vector<400x32xbf16>
    %cst_56 = arith.constant dense<0.000000e+00> : vector<400x64xf32>
    %93 = tpu.matmul %92, %10, %cst_56 {dimension_numbers = #tpu.dot_dimension_numbers<[1], [0], [0], [1], [0, 0, 1, 1], [], []>} : vector<400x32xbf16>, vector<32x64xbf16>, vector<400x64xf32> -> vector<400x64xf32>
    %94 = arith.addf %93, %5 : vector<400x64xf32>
    %cst_57 = arith.constant 0.000000e+00 : f32
    %95 = vector.broadcast %cst_57 : f32 to vector<400x64xf32>
    %96 = arith.maximumf %94, %95 : vector<400x64xf32>
    %97 = arith.truncf %96 : vector<400x64xf32> to vector<400x64xbf16>
    %c8 = arith.constant 8 : index
    %c0_58 = arith.constant 0 : index
    %c0_59 = arith.constant 0 : index
    %98 = vector.load %arg3[%c8, %c0_58, %c0_59] : memref<16x64x128xbf16, #tpu.memory_space<vmem>>, vector<1x64x128xbf16>
    %99 = vector.shape_cast %98 : vector<1x64x128xbf16> to vector<64x128xbf16>
    %cst_60 = arith.constant dense<0.000000e+00> : vector<400x128xf32>
    %100 = tpu.matmul %97, %99, %cst_60 {dimension_numbers = #tpu.dot_dimension_numbers<[1], [0], [0], [1], [0, 0, 1, 1], [], []>} : vector<400x64xbf16>, vector<64x128xbf16>, vector<400x128xf32> -> vector<400x128xf32>
    %101 = arith.addf %91, %100 : vector<400x128xf32>
    %c0_61 = arith.constant 0 : index
    %c288 = arith.constant 288 : index
    %102 = vector.load %arg1[%c0_61, %c288] : memref<400x512xbf16, #tpu.memory_space<vmem>>, vector<400x32xbf16>
    %cst_62 = arith.constant dense<0.000000e+00> : vector<400x64xf32>
    %103 = tpu.matmul %102, %10, %cst_62 {dimension_numbers = #tpu.dot_dimension_numbers<[1], [0], [0], [1], [0, 0, 1, 1], [], []>} : vector<400x32xbf16>, vector<32x64xbf16>, vector<400x64xf32> -> vector<400x64xf32>
    %104 = arith.addf %103, %5 : vector<400x64xf32>
    %cst_63 = arith.constant 0.000000e+00 : f32
    %105 = vector.broadcast %cst_63 : f32 to vector<400x64xf32>
    %106 = arith.maximumf %104, %105 : vector<400x64xf32>
    %107 = arith.truncf %106 : vector<400x64xf32> to vector<400x64xbf16>
    %c9 = arith.constant 9 : index
    %c0_64 = arith.constant 0 : index
    %c0_65 = arith.constant 0 : index
    %108 = vector.load %arg3[%c9, %c0_64, %c0_65] : memref<16x64x128xbf16, #tpu.memory_space<vmem>>, vector<1x64x128xbf16>
    %109 = vector.shape_cast %108 : vector<1x64x128xbf16> to vector<64x128xbf16>
    %cst_66 = arith.constant dense<0.000000e+00> : vector<400x128xf32>
    %110 = tpu.matmul %107, %109, %cst_66 {dimension_numbers = #tpu.dot_dimension_numbers<[1], [0], [0], [1], [0, 0, 1, 1], [], []>} : vector<400x64xbf16>, vector<64x128xbf16>, vector<400x128xf32> -> vector<400x128xf32>
    %111 = arith.addf %101, %110 : vector<400x128xf32>
    %c0_67 = arith.constant 0 : index
    %c320 = arith.constant 320 : index
    %112 = vector.load %arg1[%c0_67, %c320] : memref<400x512xbf16, #tpu.memory_space<vmem>>, vector<400x32xbf16>
    %cst_68 = arith.constant dense<0.000000e+00> : vector<400x64xf32>
    %113 = tpu.matmul %112, %10, %cst_68 {dimension_numbers = #tpu.dot_dimension_numbers<[1], [0], [0], [1], [0, 0, 1, 1], [], []>} : vector<400x32xbf16>, vector<32x64xbf16>, vector<400x64xf32> -> vector<400x64xf32>
    %114 = arith.addf %113, %5 : vector<400x64xf32>
    %cst_69 = arith.constant 0.000000e+00 : f32
    %115 = vector.broadcast %cst_69 : f32 to vector<400x64xf32>
    %116 = arith.maximumf %114, %115 : vector<400x64xf32>
    %117 = arith.truncf %116 : vector<400x64xf32> to vector<400x64xbf16>
    %c10 = arith.constant 10 : index
    %c0_70 = arith.constant 0 : index
    %c0_71 = arith.constant 0 : index
    %118 = vector.load %arg3[%c10, %c0_70, %c0_71] : memref<16x64x128xbf16, #tpu.memory_space<vmem>>, vector<1x64x128xbf16>
    %119 = vector.shape_cast %118 : vector<1x64x128xbf16> to vector<64x128xbf16>
    %cst_72 = arith.constant dense<0.000000e+00> : vector<400x128xf32>
    %120 = tpu.matmul %117, %119, %cst_72 {dimension_numbers = #tpu.dot_dimension_numbers<[1], [0], [0], [1], [0, 0, 1, 1], [], []>} : vector<400x64xbf16>, vector<64x128xbf16>, vector<400x128xf32> -> vector<400x128xf32>
    %121 = arith.addf %111, %120 : vector<400x128xf32>
    %c0_73 = arith.constant 0 : index
    %c352 = arith.constant 352 : index
    %122 = vector.load %arg1[%c0_73, %c352] : memref<400x512xbf16, #tpu.memory_space<vmem>>, vector<400x32xbf16>
    %cst_74 = arith.constant dense<0.000000e+00> : vector<400x64xf32>
    %123 = tpu.matmul %122, %10, %cst_74 {dimension_numbers = #tpu.dot_dimension_numbers<[1], [0], [0], [1], [0, 0, 1, 1], [], []>} : vector<400x32xbf16>, vector<32x64xbf16>, vector<400x64xf32> -> vector<400x64xf32>
    %124 = arith.addf %123, %5 : vector<400x64xf32>
    %cst_75 = arith.constant 0.000000e+00 : f32
    %125 = vector.broadcast %cst_75 : f32 to vector<400x64xf32>
    %126 = arith.maximumf %124, %125 : vector<400x64xf32>
    %127 = arith.truncf %126 : vector<400x64xf32> to vector<400x64xbf16>
    %c11 = arith.constant 11 : index
    %c0_76 = arith.constant 0 : index
    %c0_77 = arith.constant 0 : index
    %128 = vector.load %arg3[%c11, %c0_76, %c0_77] : memref<16x64x128xbf16, #tpu.memory_space<vmem>>, vector<1x64x128xbf16>
    %129 = vector.shape_cast %128 : vector<1x64x128xbf16> to vector<64x128xbf16>
    %cst_78 = arith.constant dense<0.000000e+00> : vector<400x128xf32>
    %130 = tpu.matmul %127, %129, %cst_78 {dimension_numbers = #tpu.dot_dimension_numbers<[1], [0], [0], [1], [0, 0, 1, 1], [], []>} : vector<400x64xbf16>, vector<64x128xbf16>, vector<400x128xf32> -> vector<400x128xf32>
    %131 = arith.addf %121, %130 : vector<400x128xf32>
    %c0_79 = arith.constant 0 : index
    %c384 = arith.constant 384 : index
    %132 = vector.load %arg1[%c0_79, %c384] : memref<400x512xbf16, #tpu.memory_space<vmem>>, vector<400x32xbf16>
    %cst_80 = arith.constant dense<0.000000e+00> : vector<400x64xf32>
    %133 = tpu.matmul %132, %10, %cst_80 {dimension_numbers = #tpu.dot_dimension_numbers<[1], [0], [0], [1], [0, 0, 1, 1], [], []>} : vector<400x32xbf16>, vector<32x64xbf16>, vector<400x64xf32> -> vector<400x64xf32>
    %134 = arith.addf %133, %5 : vector<400x64xf32>
    %cst_81 = arith.constant 0.000000e+00 : f32
    %135 = vector.broadcast %cst_81 : f32 to vector<400x64xf32>
    %136 = arith.maximumf %134, %135 : vector<400x64xf32>
    %137 = arith.truncf %136 : vector<400x64xf32> to vector<400x64xbf16>
    %c12 = arith.constant 12 : index
    %c0_82 = arith.constant 0 : index
    %c0_83 = arith.constant 0 : index
    %138 = vector.load %arg3[%c12, %c0_82, %c0_83] : memref<16x64x128xbf16, #tpu.memory_space<vmem>>, vector<1x64x128xbf16>
    %139 = vector.shape_cast %138 : vector<1x64x128xbf16> to vector<64x128xbf16>
    %cst_84 = arith.constant dense<0.000000e+00> : vector<400x128xf32>
    %140 = tpu.matmul %137, %139, %cst_84 {dimension_numbers = #tpu.dot_dimension_numbers<[1], [0], [0], [1], [0, 0, 1, 1], [], []>} : vector<400x64xbf16>, vector<64x128xbf16>, vector<400x128xf32> -> vector<400x128xf32>
    %141 = arith.addf %131, %140 : vector<400x128xf32>
    %c0_85 = arith.constant 0 : index
    %c416 = arith.constant 416 : index
    %142 = vector.load %arg1[%c0_85, %c416] : memref<400x512xbf16, #tpu.memory_space<vmem>>, vector<400x32xbf16>
    %cst_86 = arith.constant dense<0.000000e+00> : vector<400x64xf32>
    %143 = tpu.matmul %142, %10, %cst_86 {dimension_numbers = #tpu.dot_dimension_numbers<[1], [0], [0], [1], [0, 0, 1, 1], [], []>} : vector<400x32xbf16>, vector<32x64xbf16>, vector<400x64xf32> -> vector<400x64xf32>
    %144 = arith.addf %143, %5 : vector<400x64xf32>
    %cst_87 = arith.constant 0.000000e+00 : f32
    %145 = vector.broadcast %cst_87 : f32 to vector<400x64xf32>
    %146 = arith.maximumf %144, %145 : vector<400x64xf32>
    %147 = arith.truncf %146 : vector<400x64xf32> to vector<400x64xbf16>
    %c13 = arith.constant 13 : index
    %c0_88 = arith.constant 0 : index
    %c0_89 = arith.constant 0 : index
    %148 = vector.load %arg3[%c13, %c0_88, %c0_89] : memref<16x64x128xbf16, #tpu.memory_space<vmem>>, vector<1x64x128xbf16>
    %149 = vector.shape_cast %148 : vector<1x64x128xbf16> to vector<64x128xbf16>
    %cst_90 = arith.constant dense<0.000000e+00> : vector<400x128xf32>
    %150 = tpu.matmul %147, %149, %cst_90 {dimension_numbers = #tpu.dot_dimension_numbers<[1], [0], [0], [1], [0, 0, 1, 1], [], []>} : vector<400x64xbf16>, vector<64x128xbf16>, vector<400x128xf32> -> vector<400x128xf32>
    %151 = arith.addf %141, %150 : vector<400x128xf32>
    %c0_91 = arith.constant 0 : index
    %c448 = arith.constant 448 : index
    %152 = vector.load %arg1[%c0_91, %c448] : memref<400x512xbf16, #tpu.memory_space<vmem>>, vector<400x32xbf16>
    %cst_92 = arith.constant dense<0.000000e+00> : vector<400x64xf32>
    %153 = tpu.matmul %152, %10, %cst_92 {dimension_numbers = #tpu.dot_dimension_numbers<[1], [0], [0], [1], [0, 0, 1, 1], [], []>} : vector<400x32xbf16>, vector<32x64xbf16>, vector<400x64xf32> -> vector<400x64xf32>
    %154 = arith.addf %153, %5 : vector<400x64xf32>
    %cst_93 = arith.constant 0.000000e+00 : f32
    %155 = vector.broadcast %cst_93 : f32 to vector<400x64xf32>
    %156 = arith.maximumf %154, %155 : vector<400x64xf32>
    %157 = arith.truncf %156 : vector<400x64xf32> to vector<400x64xbf16>
    %c14 = arith.constant 14 : index
    %c0_94 = arith.constant 0 : index
    %c0_95 = arith.constant 0 : index
    %158 = vector.load %arg3[%c14, %c0_94, %c0_95] : memref<16x64x128xbf16, #tpu.memory_space<vmem>>, vector<1x64x128xbf16>
    %159 = vector.shape_cast %158 : vector<1x64x128xbf16> to vector<64x128xbf16>
    %cst_96 = arith.constant dense<0.000000e+00> : vector<400x128xf32>
    %160 = tpu.matmul %157, %159, %cst_96 {dimension_numbers = #tpu.dot_dimension_numbers<[1], [0], [0], [1], [0, 0, 1, 1], [], []>} : vector<400x64xbf16>, vector<64x128xbf16>, vector<400x128xf32> -> vector<400x128xf32>
    %161 = arith.addf %151, %160 : vector<400x128xf32>
    %c0_97 = arith.constant 0 : index
    %c480 = arith.constant 480 : index
    %162 = vector.load %arg1[%c0_97, %c480] : memref<400x512xbf16, #tpu.memory_space<vmem>>, vector<400x32xbf16>
    %cst_98 = arith.constant dense<0.000000e+00> : vector<400x64xf32>
    %163 = tpu.matmul %162, %10, %cst_98 {dimension_numbers = #tpu.dot_dimension_numbers<[1], [0], [0], [1], [0, 0, 1, 1], [], []>} : vector<400x32xbf16>, vector<32x64xbf16>, vector<400x64xf32> -> vector<400x64xf32>
    %164 = arith.addf %163, %5 : vector<400x64xf32>
    %cst_99 = arith.constant 0.000000e+00 : f32
    %165 = vector.broadcast %cst_99 : f32 to vector<400x64xf32>
    %166 = arith.maximumf %164, %165 : vector<400x64xf32>
    %167 = arith.truncf %166 : vector<400x64xf32> to vector<400x64xbf16>
    %c15 = arith.constant 15 : index
    %c0_100 = arith.constant 0 : index
    %c0_101 = arith.constant 0 : index
    %168 = vector.load %arg3[%c15, %c0_100, %c0_101] : memref<16x64x128xbf16, #tpu.memory_space<vmem>>, vector<1x64x128xbf16>
    %169 = vector.shape_cast %168 : vector<1x64x128xbf16> to vector<64x128xbf16>
    %cst_102 = arith.constant dense<0.000000e+00> : vector<400x128xf32>
    %170 = tpu.matmul %167, %169, %cst_102 {dimension_numbers = #tpu.dot_dimension_numbers<[1], [0], [0], [1], [0, 0, 1, 1], [], []>} : vector<400x64xbf16>, vector<64x128xbf16>, vector<400x128xf32> -> vector<400x128xf32>
    %171 = arith.addf %161, %170 : vector<400x128xf32>
    %172 = arith.addf %171, %9 : vector<400x128xf32>
    %cst_103 = arith.constant 0.000000e+00 : f32
    %173 = vector.broadcast %cst_103 : f32 to vector<400x128xf32>
    %174 = arith.maximumf %172, %173 : vector<400x128xf32>
    %175 = vector.extract_strided_slice %174 {offsets = [0, 0], sizes = [16, 128], strides = [1, 1]} : vector<400x128xf32> to vector<16x128xf32>
    %176 = vector.extract_strided_slice %174 {offsets = [16, 0], sizes = [16, 128], strides = [1, 1]} : vector<400x128xf32> to vector<16x128xf32>
    %177 = vector.extract_strided_slice %174 {offsets = [32, 0], sizes = [16, 128], strides = [1, 1]} : vector<400x128xf32> to vector<16x128xf32>
    %178 = vector.extract_strided_slice %174 {offsets = [48, 0], sizes = [16, 128], strides = [1, 1]} : vector<400x128xf32> to vector<16x128xf32>
    %179 = vector.extract_strided_slice %174 {offsets = [80, 0], sizes = [16, 128], strides = [1, 1]} : vector<400x128xf32> to vector<16x128xf32>
    %180 = vector.extract_strided_slice %174 {offsets = [96, 0], sizes = [16, 128], strides = [1, 1]} : vector<400x128xf32> to vector<16x128xf32>
    %181 = vector.extract_strided_slice %174 {offsets = [112, 0], sizes = [16, 128], strides = [1, 1]} : vector<400x128xf32> to vector<16x128xf32>
    %182 = vector.extract_strided_slice %174 {offsets = [128, 0], sizes = [16, 128], strides = [1, 1]} : vector<400x128xf32> to vector<16x128xf32>
    %183 = vector.extract_strided_slice %174 {offsets = [160, 0], sizes = [16, 128], strides = [1, 1]} : vector<400x128xf32> to vector<16x128xf32>
    %184 = vector.extract_strided_slice %174 {offsets = [176, 0], sizes = [16, 128], strides = [1, 1]} : vector<400x128xf32> to vector<16x128xf32>
    %185 = vector.extract_strided_slice %174 {offsets = [192, 0], sizes = [16, 128], strides = [1, 1]} : vector<400x128xf32> to vector<16x128xf32>
    %186 = vector.extract_strided_slice %174 {offsets = [208, 0], sizes = [16, 128], strides = [1, 1]} : vector<400x128xf32> to vector<16x128xf32>
    %187 = vector.extract_strided_slice %174 {offsets = [240, 0], sizes = [16, 128], strides = [1, 1]} : vector<400x128xf32> to vector<16x128xf32>
    %188 = vector.extract_strided_slice %174 {offsets = [256, 0], sizes = [16, 128], strides = [1, 1]} : vector<400x128xf32> to vector<16x128xf32>
    %189 = vector.extract_strided_slice %174 {offsets = [272, 0], sizes = [16, 128], strides = [1, 1]} : vector<400x128xf32> to vector<16x128xf32>
    %190 = vector.extract_strided_slice %174 {offsets = [288, 0], sizes = [16, 128], strides = [1, 1]} : vector<400x128xf32> to vector<16x128xf32>
    %191 = tpu.concatenate %175, %176, %177, %178, %179, %180, %181, %182, %183, %184, %185, %186, %187, %188, %189, %190 in 1 : vector<16x128xf32>, vector<16x128xf32>, vector<16x128xf32>, vector<16x128xf32>, vector<16x128xf32>, vector<16x128xf32>, vector<16x128xf32>, vector<16x128xf32>, vector<16x128xf32>, vector<16x128xf32>, vector<16x128xf32>, vector<16x128xf32>, vector<16x128xf32>, vector<16x128xf32>, vector<16x128xf32>, vector<16x128xf32> -> vector<16x2048xf32>
    %192 = arith.truncf %191 : vector<16x2048xf32> to vector<16x2048xbf16>
    %c0_104 = arith.constant 0 : index
    %c0_105 = arith.constant 0 : index
    %193 = vector.load %arg4[%c0_104, %c0_105] : memref<2048x32xbf16, #tpu.memory_space<vmem>>, vector<2048x32xbf16>
    %cst_106 = arith.constant dense<0.000000e+00> : vector<16x32xf32>
    %194 = tpu.matmul %192, %193, %cst_106 {dimension_numbers = #tpu.dot_dimension_numbers<[1], [0], [0], [1], [0, 0, 1, 1], [], []>} : vector<16x2048xbf16>, vector<2048x32xbf16>, vector<16x32xf32> -> vector<16x32xf32>
    %c0_107 = arith.constant 0 : index
    %c0_108 = arith.constant 0 : index
    %195 = vector.load %arg8[%c0_107, %c0_108] : memref<16x32xf32, #tpu.memory_space<vmem>>, vector<16x32xf32>
    %196 = arith.addf %194, %195 : vector<16x32xf32>
    %cst_109 = arith.constant 0.000000e+00 : f32
    %197 = vector.broadcast %cst_109 : f32 to vector<16x32xf32>
    %198 = arith.maximumf %196, %197 : vector<16x32xf32>
    %199 = arith.truncf %198 : vector<16x32xf32> to vector<16x32xbf16>
    %c0_110 = arith.constant 0 : index
    %c0_111 = arith.constant 0 : index
    %200 = vector.load %arg5[%c0_110, %c0_111] : memref<32x16xbf16, #tpu.memory_space<vmem>>, vector<32x16xbf16>
    %cst_112 = arith.constant dense<0.000000e+00> : vector<16x16xf32>
    %201 = tpu.matmul %199, %200, %cst_112 {dimension_numbers = #tpu.dot_dimension_numbers<[1], [0], [0], [1], [0, 0, 1, 1], [], []>} : vector<16x32xbf16>, vector<32x16xbf16>, vector<16x16xf32> -> vector<16x16xf32>
    %c0_113 = arith.constant 0 : index
    %c0_114 = arith.constant 0 : index
    %202 = vector.load %arg9[%c0_113, %c0_114] : memref<1x16xf32, #tpu.memory_space<vmem>>, vector<1x16xf32>
    %203 = vector.broadcast %202 : vector<1x16xf32> to vector<16x16xf32>
    %204 = arith.addf %201, %203 : vector<16x16xf32>
    %c0_115 = arith.constant 0 : index
    %c0_116 = arith.constant 0 : index
    %205 = vector.load %arg10[%c0_115, %c0_116] : memref<16x16xf32, #tpu.memory_space<vmem>>, vector<16x16xf32>
    tpu.vector_store %arg10[%c0_115, %c0_116], %204 {strides = array<i32>} : memref<16x16xf32, #tpu.memory_space<vmem>>, vector<16x16xf32>,
    return
  }
  func.func @transform_0(%arg0: i32) -> (i32, i32) {
    %c0_i32 = arith.constant 0 : i32
    %c0_i32_0 = arith.constant 0 : i32
    return %arg0, %c0_i32 : i32, i32
  }
  func.func @transform_1(%arg0: i32) -> (i32, i32) {
    %c0_i32 = arith.constant 0 : i32
    %c0_i32_0 = arith.constant 0 : i32
    %c0_i32_1 = arith.constant 0 : i32
    return %c0_i32, %c0_i32_0 : i32, i32
  }
  func.func @transform_2(%arg0: i32) -> (i32, i32, i32) {
    %c0_i32 = arith.constant 0 : i32
    %c0_i32_0 = arith.constant 0 : i32
    %c0_i32_1 = arith.constant 0 : i32
    %c0_i32_2 = arith.constant 0 : i32
    return %c0_i32, %c0_i32_0, %c0_i32_1 : i32, i32, i32
  }
  func.func @transform_3(%arg0: i32) -> (i32, i32) {
    %c0_i32 = arith.constant 0 : i32
    %c0_i32_0 = arith.constant 0 : i32
    %c0_i32_1 = arith.constant 0 : i32
    return %c0_i32, %c0_i32_0 : i32, i32
  }
  func.func @transform_4(%arg0: i32) -> (i32, i32) {
    %c0_i32 = arith.constant 0 : i32
    %c0_i32_0 = arith.constant 0 : i32
    %c0_i32_1 = arith.constant 0 : i32
    return %c0_i32, %c0_i32_0 : i32, i32
  }
  func.func @transform_5(%arg0: i32) -> (i32, i32) {
    %c0_i32 = arith.constant 0 : i32
    %c0_i32_0 = arith.constant 0 : i32
    return %arg0, %c0_i32 : i32, i32
  }
  func.func @transform_6(%arg0: i32) -> (i32, i32) {
    %c0_i32 = arith.constant 0 : i32
    %c0_i32_0 = arith.constant 0 : i32
    return %arg0, %c0_i32 : i32, i32
  }
  func.func @transform_7(%arg0: i32) -> (i32, i32) {
    %c0_i32 = arith.constant 0 : i32
    %c0_i32_0 = arith.constant 0 : i32
    return %arg0, %c0_i32 : i32, i32
  }
  func.func @transform_8(%arg0: i32) -> (i32, i32) {
    %c0_i32 = arith.constant 0 : i32
    %c0_i32_0 = arith.constant 0 : i32
    %c0_i32_1 = arith.constant 0 : i32
    return %c0_i32, %c0_i32_0 : i32, i32
  }
  func.func @transform_9(%arg0: i32) -> (i32, i32) {
    %c0_i32 = arith.constant 0 : i32
    %c0_i32_0 = arith.constant 0 : i32
    return %arg0, %c0_i32 : i32, i32
  }
}

</mosaic_0001>

<bundles_post_ra>
// kernel: encoder_forward.1
= control target key start
LH: loop header
LB: loop body
LE: loop exit
PB: predicated region body
PF: predicated region fallthrough
CT: control target
= control target key end

     0   :  { %s13744_s21 = smov 96   ;;  %vm228_vm0 = vcmask 261120   ;;  %vm888_vm1 = vcmask 523264   ;;  %s13745_s26 = smov 32   ;;  %vm11300_vm2 = vcmask 130048   ;;  %s19699_s1 = inlined_call_operand.vmem [shape: bf16[32,64], index: 1, kind: input, shape index: {}]   ;;  %s19700_s0 = inlined_call_operand.vmem [shape: bf16[400,512], index: 0, kind: input, shape index: {}]   ;;  %s19701_s2 = inlined_call_operand.vmem [shape: bf16[16,64,128], index: 2, kind: input, shape index: {}]   ;;  %s19702_s5 = inlined_call_operand.vmem [shape: f32[16,64], index: 5, kind: input, shape index: {}]   ;;  %s19703_s3 = inlined_call_operand.vmem [shape: bf16[2048,32], index: 3, kind: input, shape index: {}]   ;;  %s19704_s6 = inlined_call_operand.vmem [shape: f32[16,128], index: 6, kind: input, shape index: {}]   ;;  %s19705_s8 = inlined_call_operand.vmem [shape: f32[1,16], index: 8, kind: input, shape index: {}]   ;;  %s19706_s4 = inlined_call_operand.vmem [shape: bf16[32,16], index: 4, kind: input, shape index: {}]   ;;  %s19707_s7 = inlined_call_operand.vmem [shape: f32[16,32], index: 7, kind: input, shape index: {}]   ;;  %s19708_s9 = inlined_call_operand.vmem [shape: f32[16,16], index: 9, kind: output, shape index: {}]  }
   0x1   :  { %v13800_v0 = vld [vmem:[%s19699_s1 + $0x8] sm:$0xff]  ;;  %v11309_v1 = vld [vmem:[%s19700_s0] sm:$0xf]  ;;  %v13414_v2 = vld [vmem:[%s19700_s0 + $0xc] sm:$0xf0]  ;;  %s13746_s14 = smov 64  }
   0x2   :  { %v13808_v3 = vor.u32 %v13414_v2, %v11309_v1  ;;  %310 = vmatpush.bf16.msra.mxu0 %v13800_v0  ;;  %v13814_v4 = vld [vmem:[%s19699_s1] sm:$0xff]  ;;  %v13416_v6 = vld [vmem:[%s19700_s0 + $0x4c] sm:$0xf0]  ;;  %652 = vmatpush.bf16.msra.mxu1 %v13800_v0  ;;  %v13446_v2 = vld [vmem:[%s19701_s2 + $0x38] sm:$0xff] }
   0x3   :  { %v11317_v5 = vld [vmem:[%s19700_s0 + $0x40] sm:$0xf]  ;;  %v13415_v9 = vld [vmem:[%s19700_s0 + $0x2c] sm:$0xf0]  ;;  %968 = vmatpush.bf16.msra.mxu2 %v13446_v2 }
   0x4   :  { %521 = vrot.lane.b32.xlu0 %v13808_v3, %s13744_s21  ;;  %v13825_v7 = vor.u32 %v13416_v6, %v11317_v5  ;;  %v11313_v8 = vld [vmem:[%s19700_s0 + $0x20] sm:$0xf]  ;;  %v13417_v12 = vld [vmem:[%s19700_s0 + $0x6c] sm:$0xf0]  ;;  %v13442_v5 = vld [vmem:[%s19701_s2 + $0x18] sm:$0xff] }
   0x5   :  { %v13837_v10 = vor.u32 %v13415_v9, %v11313_v8  ;;  %v11321_v11 = vld [vmem:[%s19700_s0 + $0x60] sm:$0xf]  ;;  %v13418_v15 = vld [vmem:[%s19700_s0 + $0x8c] sm:$0xf0]  ;;  %1183 = vmatpush.bf16.msra.mxu3 %v13442_v5  ;;  %v14032_v9 = vld [vmem:[%s19702_s5 + $0x8] sm:$0xff] }
   0x6   :  { %525 = vrot.lane.b32.xlu1 %v13825_v7, %s13744_s21  ;;  %311 = vmatpush.bf16.msra.mxu0 %v13814_v4  ;;  %v13848_v13 = vor.u32 %v13417_v12, %v11321_v11  ;;  %v11325_v14 = vld [vmem:[%s19700_s0 + $0x80] sm:$0xf]  ;;  %v13419_v18 = vld [vmem:[%s19700_s0 + $0xac] sm:$0xf0] }
   0x7   :  { %653 = vmatpush.bf16.msra.mxu1 %v13814_v4  ;;  %v13865_v16 = vor.u32 %v13418_v15, %v11325_v14  ;;  %v11329_v17 = vld [vmem:[%s19700_s0 + $0xa0] sm:$0xf]  ;;  %v13420_v21 = vld [vmem:[%s19700_s0 + $0xcc] sm:$0xf0] }
   0x8   :  { %v13877_v19 = vor.u32 %v13419_v18, %v11329_v17  ;;  %v11333_v20 = vld [vmem:[%s19700_s0 + $0xc0] sm:$0xf]  ;;  %v13421_v24 = vld [vmem:[%s19700_s0 + $0xec] sm:$0xf0] }
   0x9   :  { %11415 = vmatmul.msk.bf16.vlgmr.msra.gmra.mxu0 %vm228_vm0, %v13808_v3  ;;  %529 = vrot.lane.b32.xlu2 %v13865_v16, %s13744_s21  ;;  %v13889_v22 = vor.u32 %v13420_v21, %v11333_v20  ;;  %v11337_v23 = vld [vmem:[%s19700_s0 + $0xe0] sm:$0xf]  ;;  %v13422_v27 = vld [vmem:[%s19700_s0 + $0x10c] sm:$0xf0]  ;;  %v13444_v20 = vld [vmem:[%s19701_s2 + $0x28] sm:$0xff] }
   0xa   :  { %1426 = vmatpush.bf16.msrb.mxu0 %v13800_v0  ;;  %v13901_v25 = vor.u32 %v13421_v24, %v11337_v23  ;;  %v11341_v26 = vld [vmem:[%s19700_s0 + $0x100] sm:$0xf]  ;;  %v13423_v30 = vld [vmem:[%s19700_s0 + $0x12c] sm:$0xf0]  ;;  %v13440_v21 = vld [vmem:[%s19701_s2 + $0x8] sm:$0xff] }
   0xb   :  { %v13913_v28 = vor.u32 %v13422_v27, %v11341_v26  ;;  %v11345_v29 = vld [vmem:[%s19700_s0 + $0x120] sm:$0xf]  ;;  %v13424_v34 = vld [vmem:[%s19700_s0 + $0x14c] sm:$0xf0] }
   0xc   :  { %523 = vrot.lane.b32.xlu0 %v13837_v10, %s13744_s21  ;;  %v13925_v31 = vor.u32 %v13423_v30, %v11345_v29  ;;  %v11349_v33 = vld [vmem:[%s19700_s0 + $0x140] sm:$0xf]  ;;  %v13425_v42 = vld [vmem:[%s19700_s0 + $0x16c] sm:$0xf0] }
   0xd   :  { %v13938_v35 = vor.u32 %v13424_v34, %v11349_v33  ;;  %v11353_v41 = vld [vmem:[%s19700_s0 + $0x160] sm:$0xf]  ;;  %v13426_v46 = vld [vmem:[%s19700_s0 + $0x18c] sm:$0xf0] }
   0xe   :  { %1427 = vmatpush.bf16.msrb.mxu0 %v13814_v4  ;;  %527 = vrot.lane.b32.xlu1 %v13848_v13, %s13744_s21  ;;  %v13954_v43 = vor.u32 %v13425_v42, %v11353_v41  ;;  %v11357_v45 = vld [vmem:[%s19700_s0 + $0x180] sm:$0xf]  ;;  %v13427_v52 = vld [vmem:[%s19700_s0 + $0x1ac] sm:$0xf0] }
   0xf   :  { %v13968_v47 = vor.u32 %v13426_v46, %v11357_v45  ;;  %v11361_v51 = vld [vmem:[%s19700_s0 + $0x1a0] sm:$0xf]  ;;  %v13428_v60 = vld [vmem:[%s19700_s0 + $0x1cc] sm:$0xf0] }
  0x10   :  { %v13985_v53 = vor.u32 %v13427_v52, %v11361_v51  ;;  %v11365_v59 = vld [vmem:[%s19700_s0 + $0x1c0] sm:$0xf]  ;;  %v13429_v1 = vld [vmem:[%s19700_s0 + $0x1ec] sm:$0xf0] }
  0x11   :  { %531 = vrot.lane.b32.xlu2 %v13877_v19, %s13744_s21  ;;  %v14005_v61 = vor.u32 %v13428_v60, %v11365_v59  ;;  %v11369_v63 = vld [vmem:[%s19700_s0 + $0x1e0] sm:$0xf]  ;;  %v13445_v11 = vld [vmem:[%s19701_s2 + $0x30] sm:$0xff] }
  0x12   :  { %2731 = vmatpush.bf16.msra.mxu0 %v13800_v0  ;;  %v14025_v6 = vor.u32 %v13429_v1, %v11369_v63  ;;  %v13441_v12 = vld [vmem:[%s19701_s2 + $0x10] sm:$0xff]  ;;  %v14046_v15 = vld [vmem:[%s19702_s5] sm:$0xff]  ;;  %969 = vmatpush.bf16.msra.mxu2 %v13445_v11 }
  0x13   :  { %1184 = vmatpush.bf16.msra.mxu3 %v13441_v12  ;;  %v13443_v26 = vld [vmem:[%s19701_s2 + $0x20] sm:$0xff]  ;;  %v13430_v33 = vld [vmem:[%s19700_s0 + $0x20c] sm:$0xf0] }
  0x14   :  { %533 = vrot.lane.b32.xlu0 %v13889_v22, %s13744_s21  ;;  %v13439_v27 = vld [vmem:[%s19701_s2] sm:$0xff] }
  0x15   :  { %v11385_v1 = vld [vmem:[%s19700_s0 + $0x260] sm:$0xf] }
  0x16   :  { %2732 = vmatpush.bf16.msra.mxu0 %v13814_v4  ;;  %535 = vrot.lane.b32.xlu1 %v13901_v25, %s13744_s21 }
  0x17   :  { %970 = vmatpush.bf16.msra.mxu2 %v13444_v20  ;;  %1185 = vmatpush.bf16.msra.mxu3 %v13440_v21  ;;  %v11381_v21 = vld [vmem:[%s19700_s0 + $0x240] sm:$0xf] }
  0x19   :  { %11416 = vmatmul.msk.bf16.gmra.mxu0 %vm228_vm0, %v13837_v10  ;;  %537 = vrot.lane.b32.xlu2 %v13913_v28, %s13744_s21 }
  0x1b   :  { %971 = vmatpush.bf16.msra.mxu2 %v13443_v26  ;;  %1186 = vmatpush.bf16.msra.mxu3 %v13439_v27 }
  0x1c   :  { %539 = vrot.lane.b32.xlu0 %v13925_v31, %s13744_s21 }
  0x1e   :  { %541 = vrot.lane.b32.xlu1 %v13938_v35, %s13744_s21 }
  0x1f   :  { %2016 = vmatpush.bf16.msrb.mxu2 %v13800_v0 }
  0x21   :  { %543 = vrot.lane.b32.xlu2 %v13954_v43, %s13744_s21 }
  0x23   :  { %2017 = vmatpush.bf16.msrb.mxu2 %v13814_v4 }
  0x24   :  { %545 = vrot.lane.b32.xlu0 %v13968_v47, %s13744_s21 }
  0x26   :  { %547 = vrot.lane.b32.xlu1 %v13985_v53, %s13744_s21 }
  0x29   :  { %11417 = vmatmul.msk.bf16.gmra.mxu0 %vm228_vm0, %v13825_v7  ;;  %549 = vrot.lane.b32.xlu2 %v14005_v61, %s13744_s21 }
  0x2c   :  { %551 = vrot.lane.b32.xlu0 %v14025_v6, %s13744_s21 }
  0x39   :  { %11418 = vmatmul.msk.bf16.gmra.mxu0 %vm228_vm0, %v13848_v13 }
  0x49   :  { %11419 = vmatmul.msk.bf16.gmra.mxu0 %vm228_vm0, %v13865_v16 }
  0x59   :  { %11420 = vmatmul.msk.bf16.gmra.mxu0 %vm228_vm0, %v13877_v19 }
  0x63   :  { %v530_v54 = vpop.permute.xlu2 %529 }
  0x69   :  { %11421 = vmatmul.msk.bf16.gmra.mxu0 %vm228_vm0, %v13889_v22 }
  0x6b   :  { %v532_v57 = vpop.permute.xlu2 %531 }
  0x73   :  { %v538_v51 = vpop.permute.xlu2 %537 }
  0x76   :  { %v522_v32 = vpop.permute.xlu0 %521 }
  0x77   :  { %11440 = vmatmul.msk.bf16.vlgmr.msra.gmra.mxu1 %vm228_vm0, %v522_v32  ;;  %v11373_v32 = vld [vmem:[%s19700_s0 + $0x200] sm:$0xf] }
  0x78   :  { %v526_v39 = vpop.permute.xlu1 %525  ;;  %v14073_v34 = vor.u32 %v13430_v33, %v11373_v32  ;;  %v13436_v32 = vld [vmem:[%s19700_s0 + $0x2cc] sm:$0xf0] }
  0x79   :  { %11422 = vmatmul.msk.bf16.gmra.mxu0 %vm228_vm0, %v13901_v25 }
  0x7a   :  { %553 = vrot.lane.b32.xlu1 %v14073_v34, %s13744_s21 }
  0x7e   :  { %v524_v36 = vpop.permute.xlu0 %523 }
  0x80   :  { %v528_v48 = vpop.permute.xlu1 %527 }
  0x86   :  { %v313_v37 = vpop.f32.mrf.mxu0  ;;  %v534_v8 = vpop.permute.xlu0 %533 }
  0x87   :  { %11441 = vmatmul.msk.bf16.gmra.mxu1 %vm228_vm0, %v524_v36  ;;  %v314_v17 = vadd.f32 %v313_v37, %v14046_v15 }
  0x88   :  { %v536_v36 = vpop.permute.xlu1 %535 }
  0x89   :  { %11423 = vmatmul.msk.bf16.gmra.mxu0 %vm228_vm0, %v13913_v28  ;;  %v438_v23 = vmax.f32 %v314_v17, 0.0 }
  0x8e   :  { %v315_v38 = vpop.f32.mrf.mxu0  ;;  %v540_v27 = vpop.permute.xlu0 %539 }
  0x8f   :  { %v316_v18 = vadd.f32 %v315_v38, %v14032_v9 }
  0x91   :  { %v439_v24 = vmax.f32 %v316_v18, 0.0 }
  0x93   :  { %v488_v30 = vpack.c.bf16 %v439_v24, %v438_v23  ;;  %v13432_v23 = vld [vmem:[%s19700_s0 + $0x24c] sm:$0xf0] }
  0x94   :  { %v14130_v24 = vor.u32 %v13432_v23, %v11381_v21  ;;  %v13438_v21 = vld [vmem:[%s19700_s0 + $0x30c] sm:$0xf0] }
  0x95   :  { %11530 = vmatmul.msk.bf16.vlgmr.msra.gmra.mxu3 %vm888_vm1, %v488_v30  ;;  %v11397_v30 = vld [vmem:[%s19700_s0 + $0x2c0] sm:$0xf] }
  0x96   :  { %v13946_v40 = vpop.f32.mrf.mxu0  ;;  %557 = vrot.lane.b32.xlu0 %v14130_v24, %s13744_s21  ;;  %v14143_v33 = vor.u32 %v13436_v32, %v11397_v30 }
  0x97   :  { %11442 = vmatmul.msk.bf16.gmra.mxu1 %vm228_vm0, %v526_v39  ;;  %v319_v38 = vadd.f32 %v13946_v40, %v14046_v15  ;;  %v11377_v40 = vld [vmem:[%s19700_s0 + $0x220] sm:$0xf] }
  0x99   :  { %11424 = vmatmul.msk.bf16.gmra.mxu0 %vm228_vm0, %v13925_v31  ;;  %v440_v41 = vmax.f32 %v319_v38, 0.0 }
  0x9e   :  { %v13960_v44 = vpop.f32.mrf.mxu0 }
  0x9f   :  { %v321_v39 = vadd.f32 %v13960_v44, %v14032_v9  ;;  %v13431_v44 = vld [vmem:[%s19700_s0 + $0x22c] sm:$0xf0] }
  0xa1   :  { %v441_v42 = vmax.f32 %v321_v39, 0.0 }
  0xa3   :  { %v489_v46 = vpack.c.bf16 %v441_v42, %v440_v41 }
  0xa5   :  { %11531 = vmatmul.msk.bf16.gmra.mxu3 %vm888_vm1, %v489_v46  ;;  %v11389_v46 = vld [vmem:[%s19700_s0 + $0x280] sm:$0xf] }
  0xa6   :  { %v13973_v49 = vpop.f32.mrf.mxu0 }
  0xa7   :  { %11443 = vmatmul.msk.bf16.gmra.mxu1 %vm228_vm0, %v528_v48 }
  0xa9   :  { %11425 = vmatmul.msk.bf16.gmra.mxu0 %vm228_vm0, %v13938_v35 }
  0xae   :  { %v13977_v50 = vpop.f32.mrf.mxu0 }
  0xaf   :  { %v326_v59 = vadd.f32 %v13977_v50, %v14032_v9 }
  0xb1   :  { %v443_v5 = vmax.f32 %v326_v59, 0.0 }
  0xb6   :  { %v13990_v55 = vpop.f32.mrf.mxu0 }
  0xb7   :  { %11444 = vmatmul.msk.bf16.gmra.mxu1 %vm228_vm0, %v530_v54  ;;  %v14100_v54 = vor.u32 %v13431_v44, %v11377_v40  ;;  %v329_v38 = vadd.f32 %v13990_v55, %v14046_v15  ;;  %v11393_v55 = vld [vmem:[%s19700_s0 + $0x2a0] sm:$0xf] }
  0xb9   :  { %11426 = vmatmul.msk.bf16.gmra.mxu0 %vm228_vm0, %v13954_v43  ;;  %555 = vrot.lane.b32.xlu2 %v14100_v54, %s13744_s21 }
  0xbe   :  { %v13994_v56 = vpop.f32.mrf.mxu0 }
  0xbf   :  { %v331_v39 = vadd.f32 %v13994_v56, %v14032_v9 }
  0xc1   :  { %v445_v56 = vmax.f32 %v331_v39, 0.0 }
  0xc6   :  { %v13997_v58 = vpop.f32.mrf.mxu0 }
  0xc7   :  { %11445 = vmatmul.msk.bf16.gmra.mxu1 %vm228_vm0, %v532_v57  ;;  %v324_v57 = vadd.f32 %v13973_v49, %v14046_v15  ;;  %v13433_v49 = vld [vmem:[%s19700_s0 + $0x26c] sm:$0xf0] }
  0xc9   :  { %11427 = vmatmul.msk.bf16.gmra.mxu0 %vm228_vm0, %v13968_v47  ;;  %v442_v2 = vmax.f32 %v324_v57, 0.0  ;;  %v13435_v57 = vld [vmem:[%s19700_s0 + $0x2ac] sm:$0xf0] }
  0xca   :  { %v14173_v59 = vor.u32 %v13435_v57, %v11393_v55 }
  0xcb   :  { %v490_v20 = vpack.c.bf16 %v443_v5, %v442_v2 }
  0xcc   :  { %563 = vrot.lane.b32.xlu0 %v14173_v59, %s13744_s21 }
  0xcd   :  { %11532 = vmatmul.msk.bf16.gmra.mxu3 %vm888_vm1, %v490_v20 }
  0xce   :  { %v14011_v62 = vpop.f32.mrf.mxu0 }
  0xcf   :  { %v336_v30 = vadd.f32 %v14011_v62, %v14032_v9 }
  0xd6   :  { %v14041_v14 = vpop.f32.mrf.mxu0 }
  0xd7   :  { %11446 = vmatmul.msk.bf16.gmra.mxu1 %vm228_vm0, %v534_v8  ;;  %v14118_v8 = vor.u32 %v13433_v49, %v11385_v1 }
  0xd9   :  { %11428 = vmatmul.msk.bf16.gmra.mxu0 %vm228_vm0, %v13985_v53  ;;  %559 = vrot.lane.b32.xlu1 %v14118_v8, %s13744_s21 }
  0xde   :  { %v14064_v29 = vpop.f32.mrf.mxu0 }
  0xe1   :  { %565 = vrot.lane.b32.xlu1 %v14143_v33, %s13744_s21 }
  0xe6   :  { %v14080_v37 = vpop.f32.mrf.mxu0 }
  0xe7   :  { %11447 = vmatmul.msk.bf16.gmra.mxu1 %vm228_vm0, %v536_v36 }
  0xe9   :  { %11429 = vmatmul.msk.bf16.gmra.mxu0 %vm228_vm0, %v14005_v61  ;;  %1885 = vrot.lane.b32.xlu1 %v13808_v3, %s13745_s26 }
  0xee   :  { %v14088_v45 = vpop.f32.mrf.mxu0 }
  0xf1   :  { %1297 = vrot.lane.b32.xlu1 %v13837_v10, %s13746_s14 }
  0xf4   :  { %v655_v48 = vpop.f32.mrf.mxu1 }
  0xf5   :  { %v656_v60 = vadd.f32 %v655_v48, %v14046_v15  ;;  %v13434_v48 = vld [vmem:[%s19700_s0 + $0x28c] sm:$0xf0] }
  0xf6   :  { %v14092_v52 = vpop.f32.mrf.mxu0  ;;  %v14168_v44 = vor.u32 %v13434_v48, %v11389_v46 }
  0xf7   :  { %11448 = vmatmul.msk.bf16.gmra.mxu1 %vm228_vm0, %v538_v51  ;;  %v780_v11 = vmax.f32 %v656_v60, 0.0  ;;  %v444_v51 = vmax.f32 %v329_v38, 0.0 }
  0xf8   :  { %561 = vrot.lane.b32.xlu2 %v14168_v44, %s13744_s21 }
  0xf9   :  { %11430 = vmatmul.msk.bf16.gmra.mxu0 %vm228_vm0, %v14025_v6  ;;  %v491_v2 = vpack.c.bf16 %v445_v56, %v444_v51  ;;  %1891 = vrot.lane.b32.xlu1 %v13848_v13, %s13745_s26  ;;  %v544_v56 = vpop.permute.xlu2 %543 }
  0xfb   :  { %11533 = vmatmul.msk.bf16.gmra.mxu3 %vm888_vm1, %v491_v2 }
  0xfc   :  { %v657_v63 = vpop.f32.mrf.mxu1 }
  0xfd   :  { %v658_v50 = vadd.f32 %v657_v63, %v14032_v9 }
  0xfe   :  { %v14120_v17 = vpop.f32.mrf.mxu0 }
  0xff   :  { %v781_v12 = vmax.f32 %v658_v50, 0.0  ;;  %v542_v50 = vpop.permute.xlu1 %541 }
 0x101   :  { %v830_v18 = vpack.c.bf16 %v781_v12, %v780_v11  ;;  %v11401_v11 = vld [vmem:[%s19700_s0 + $0x2e0] sm:$0xf]  ;;  %v13437_v12 = vld [vmem:[%s19700_s0 + $0x2ec] sm:$0xf0]  ;;  %1303 = vrot.lane.b32.xlu1 %v13865_v16, %s13746_s14 }
 0x102   :  { %v14194_v20 = vor.u32 %v13437_v12, %v11401_v11  ;;  %v546_v12 = vpop.permute.xlu0 %545 }
 0x103   :  { %11489 = vmatmul.msk.bf16.vlgmr.msra.gmra.mxu2 %vm888_vm1, %v830_v18  ;;  %v11405_v18 = vld [vmem:[%s19700_s0 + $0x300] sm:$0xf] }
 0x104   :  { %v660_v26 = vpop.f32.mrf.mxu1  ;;  %3321 = vmatpush.bf16.msra.mxu2 %v13800_v0  ;;  %v14199_v23 = vor.u32 %v13438_v21, %v11405_v18  ;;  %567 = vrot.lane.b32.xlu2 %v14194_v20, %s13744_s21 }
 0x105   :  { %v661_v41 = vadd.f32 %v660_v26, %v14046_v15 }
 0x106   :  { %v14146_v36 = vpop.f32.mrf.mxu0  ;;  %569 = vrot.lane.b32.xlu0 %v14199_v23, %s13744_s21 }
 0x107   :  { %11449 = vmatmul.msk.bf16.gmra.mxu1 %vm228_vm0, %v540_v27  ;;  %v782_v60 = vmax.f32 %v661_v41, 0.0  ;;  %v334_v27 = vadd.f32 %v13997_v58, %v14046_v15  ;;  %v447_v41 = vmax.f32 %v336_v30, 0.0 }
 0x108   :  { %3322 = vmatpush.bf16.msra.mxu2 %v13814_v4 }
 0x109   :  { %11431 = vmatmul.msk.bf16.gmra.mxu0 %vm228_vm0, %v14073_v34  ;;  %v446_v39 = vmax.f32 %v334_v27, 0.0  ;;  %1897 = vrot.lane.b32.xlu1 %v13889_v22, %s13745_s26 }
 0x10b   :  { %v492_v62 = vpack.c.bf16 %v447_v41, %v446_v39 }
 0x10c   :  { %v662_v42 = vpop.f32.mrf.mxu1  ;;  %1295 = vrot.lane.b32.xlu2 %v13808_v3, %s13746_s14  ;;  %v339_v3 = vadd.f32 %v14041_v14, %v14046_v15 }
 0x10d   :  { %v663_v40 = vadd.f32 %v662_v42, %v14032_v9  ;;  %11534 = vmatmul.msk.bf16.gmra.mxu3 %vm888_vm1, %v492_v62 }
 0x10e   :  { %v14175_v1 = vpop.f32.mrf.mxu0  ;;  %1887 = vrot.lane.b32.xlu0 %v13837_v10, %s13745_s26  ;;  %v341_v10 = vadd.f32 %v14064_v29, %v14032_v9 }
 0x10f   :  { %v783_v63 = vmax.f32 %v663_v40, 0.0 }
 0x111   :  { %v831_v49 = vpack.c.bf16 %v783_v63, %v782_v60  ;;  %v448_v63 = vmax.f32 %v339_v3, 0.0  ;;  %1309 = vrot.lane.b32.xlu1 %v13901_v25, %s13746_s14 }
 0x113   :  { %11490 = vmatmul.msk.bf16.gmra.mxu2 %vm888_vm1, %v831_v49  ;;  %v449_v49 = vmax.f32 %v341_v10, 0.0 }
 0x114   :  { %v665_v5 = vpop.f32.mrf.mxu1  ;;  %1889 = vrot.lane.b32.xlu2 %v13825_v7, %s13745_s26 }
 0x115   :  { %v666_v32 = vadd.f32 %v665_v5, %v14046_v15  ;;  %v493_v29 = vpack.c.bf16 %v449_v49, %v448_v63 }
 0x116   :  { %v14202_v26 = vpop.f32.mrf.mxu0  ;;  %1299 = vrot.lane.b32.xlu0 %v13825_v7, %s13746_s14 }
 0x117   :  { %11450 = vmatmul.msk.bf16.gmra.mxu1 %vm228_vm0, %v542_v50  ;;  %v784_v46 = vmax.f32 %v666_v32, 0.0 }
 0x119   :  { %11432 = vmatmul.msk.bf16.gmra.mxu0 %vm228_vm0, %v14100_v54  ;;  %1903 = vrot.lane.b32.xlu1 %v13925_v31, %s13745_s26 }
 0x11c   :  { %v667_v38 = vpop.f32.mrf.mxu1  ;;  %1301 = vrot.lane.b32.xlu2 %v13848_v13, %s13746_s14  ;;  %v344_v13 = vadd.f32 %v14080_v37, %v14046_v15 }
 0x11d   :  { %v668_v42 = vadd.f32 %v667_v38, %v14032_v9  ;;  %11535 = vmatmul.msk.bf16.gmra.mxu3 %vm888_vm1, %v493_v29  ;;  %v356_v29 = vadd.f32 %v14175_v1, %v14032_v9 }
 0x11e   :  { %v14218_v55 = vpop.f32.mrf.mxu0  ;;  %1893 = vrot.lane.b32.xlu0 %v13865_v16, %s13745_s26  ;;  %v346_v16 = vadd.f32 %v14088_v45, %v14032_v9  ;;  %v450_v30 = vmax.f32 %v344_v13, 0.0 }
 0x11f   :  { %v785_v48 = vmax.f32 %v668_v42, 0.0 }
 0x120   :  { %v451_v32 = vmax.f32 %v346_v16, 0.0 }
 0x121   :  { %v832_v58 = vpack.c.bf16 %v785_v48, %v784_v46  ;;  %v548_v46 = vpop.permute.xlu1 %547  ;;  %1315 = vrot.lane.b32.xlu1 %v13938_v35, %s13746_s14 }
 0x122   :  { %v494_v45 = vpack.c.bf16 %v451_v32, %v450_v30 }
 0x123   :  { %11491 = vmatmul.msk.bf16.gmra.mxu2 %vm888_vm1, %v832_v58 }
 0x124   :  { %v670_v51 = vpop.f32.mrf.mxu1  ;;  %1895 = vrot.lane.b32.xlu2 %v13877_v19, %s13745_s26 }
 0x125   :  { %v671_v57 = vadd.f32 %v670_v51, %v14046_v15 }
 0x126   :  { %v14229_v40 = vpop.f32.mrf.mxu0  ;;  %1305 = vrot.lane.b32.xlu0 %v13877_v19, %s13746_s14 }
 0x127   :  { %11451 = vmatmul.msk.bf16.gmra.mxu1 %vm228_vm0, %v544_v56  ;;  %v786_v7 = vmax.f32 %v671_v57, 0.0 }
 0x129   :  { %11433 = vmatmul.msk.bf16.gmra.mxu0 %vm228_vm0, %v14130_v24  ;;  %1909 = vrot.lane.b32.xlu1 %v13968_v47, %s13745_s26 }
 0x12c   :  { %v672_v60 = vpop.f32.mrf.mxu1  ;;  %1307 = vrot.lane.b32.xlu2 %v13889_v22, %s13746_s14  ;;  %v349_v22 = vadd.f32 %v14092_v52, %v14046_v15 }
 0x12d   :  { %v673_v2 = vadd.f32 %v672_v60, %v14032_v9  ;;  %11536 = vmatmul.msk.bf16.gmra.mxu3 %vm888_vm1, %v494_v45 }
 0x12e   :  { %v14245_v50 = vpop.f32.mrf.mxu0  ;;  %1899 = vrot.lane.b32.xlu0 %v13901_v25, %s13745_s26  ;;  %v351_v25 = vadd.f32 %v14120_v17, %v14032_v9  ;;  %v452_v56 = vmax.f32 %v349_v22, 0.0 }
 0x12f   :  { %v787_v5 = vmax.f32 %v673_v2, 0.0 }
 0x130   :  { %v453_v3 = vmax.f32 %v351_v25, 0.0 }
 0x131   :  { %v833_v14 = vpack.c.bf16 %v787_v5, %v786_v7  ;;  %1321 = vrot.lane.b32.xlu1 %v13985_v53, %s13746_s14 }
 0x132   :  { %v495_v49 = vpack.c.bf16 %v453_v3, %v452_v56 }
 0x133   :  { %11492 = vmatmul.msk.bf16.gmra.mxu2 %vm888_vm1, %v833_v14 }
 0x134   :  { %v675_v11 = vpop.f32.mrf.mxu1  ;;  %1901 = vrot.lane.b32.xlu2 %v13913_v28, %s13745_s26 }
 0x135   :  { %v676_v21 = vadd.f32 %v675_v11, %v14046_v15 }
 0x136   :  { %v14256_v18 = vpop.f32.mrf.mxu0  ;;  %1311 = vrot.lane.b32.xlu0 %v13913_v28, %s13746_s14 }
 0x137   :  { %11452 = vmatmul.msk.bf16.gmra.mxu1 %vm228_vm0, %v546_v12  ;;  %v788_v19 = vmax.f32 %v676_v21, 0.0  ;;  %v455_v21 = vmax.f32 %v356_v29, 0.0 }
 0x139   :  { %11434 = vmatmul.msk.bf16.gmra.mxu0 %vm228_vm0, %v14118_v8  ;;  %1915 = vrot.lane.b32.xlu1 %v14025_v6, %s13745_s26 }
 0x13c   :  { %v677_v27 = vpop.f32.mrf.mxu1  ;;  %1313 = vrot.lane.b32.xlu2 %v13925_v31, %s13746_s14  ;;  %v550_v31 = vpop.permute.xlu2 %549 }
 0x13d   :  { %v678_v38 = vadd.f32 %v677_v27, %v14032_v9  ;;  %11537 = vmatmul.msk.bf16.gmra.mxu3 %vm888_vm1, %v495_v49 }
 0x13e   :  { %v14272_v41 = vpop.f32.mrf.mxu0  ;;  %1905 = vrot.lane.b32.xlu0 %v13938_v35, %s13745_s26  ;;  %v354_v35 = vadd.f32 %v14146_v36, %v14046_v15 }
 0x13f   :  { %v789_v39 = vmax.f32 %v678_v38, 0.0 }
 0x140   :  { %v454_v16 = vmax.f32 %v354_v35, 0.0 }
 0x141   :  { %v834_v37 = vpack.c.bf16 %v789_v39, %v788_v19  ;;  %1327 = vrot.lane.b32.xlu1 %v14073_v34, %s13746_s14 }
 0x142   :  { %v496_v19 = vpack.c.bf16 %v455_v21, %v454_v16 }
 0x143   :  { %11493 = vmatmul.msk.bf16.gmra.mxu2 %vm888_vm1, %v834_v37 }
 0x144   :  { %v680_v42 = vpop.f32.mrf.mxu1  ;;  %1907 = vrot.lane.b32.xlu2 %v13954_v43, %s13745_s26 }
 0x145   :  { %v681_v58 = vadd.f32 %v680_v42, %v14046_v15  ;;  %v14336_v42 = vpop.f32.mrf.mxu3 }
 0x146   :  { %v373_v48 = vpop.f32.mrf.mxu0  ;;  %1317 = vrot.lane.b32.xlu0 %v13954_v43, %s13746_s14 }
 0x147   :  { %11453 = vmatmul.msk.bf16.gmra.mxu1 %vm228_vm0, %v548_v46  ;;  %v374_v62 = vadd.f32 %v373_v48, %v14046_v15  ;;  %v790_v10 = vmax.f32 %v681_v58, 0.0  ;;  %v361_v48 = vadd.f32 %v14218_v55, %v14032_v9 }
 0x149   :  { %11435 = vmatmul.msk.bf16.gmra.mxu0 %vm228_vm0, %v14168_v44  ;;  %v462_v52 = vmax.f32 %v374_v62, 0.0  ;;  %1921 = vrot.lane.b32.xlu1 %v14130_v24, %s13745_s26 }
 0x14c   :  { %v682_v51 = vpop.f32.mrf.mxu1  ;;  %1319 = vrot.lane.b32.xlu2 %v13968_v47, %s13746_s14  ;;  %v552_v47 = vpop.permute.xlu0 %551 }
 0x14d   :  { %v683_v28 = vadd.f32 %v682_v51, %v14032_v9  ;;  %11538 = vmatmul.msk.bf16.gmra.mxu3 %vm888_vm1, %v496_v19  ;;  %v457_v51 = vmax.f32 %v361_v48, 0.0  ;;  %v14354_v56 = vpop.f32.mrf.mxu3 }
 0x14e   :  { %v375_v60 = vpop.f32.mrf.mxu0  ;;  %1911 = vrot.lane.b32.xlu0 %v13985_v53, %s13745_s26  ;;  %v359_v53 = vadd.f32 %v14202_v26, %v14046_v15 }
 0x14f   :  { %v791_v57 = vmax.f32 %v683_v28, 0.0  ;;  %v376_v17 = vadd.f32 %v375_v60, %v14032_v9 }
 0x150   :  { %v456_v62 = vmax.f32 %v359_v53, 0.0  ;;  %v371_v53 = vadd.f32 %v14272_v41, %v14032_v9 }
 0x151   :  { %v835_v63 = vpack.c.bf16 %v791_v57, %v790_v10  ;;  %v463_v2 = vmax.f32 %v376_v17, 0.0  ;;  %1333 = vrot.lane.b32.xlu1 %v14118_v8, %s13746_s14 }
 0x152   :  { %v497_v60 = vpack.c.bf16 %v457_v51, %v456_v62 }
 0x153   :  { %11494 = vmatmul.msk.bf16.gmra.mxu2 %vm888_vm1, %v835_v63  ;;  %v14307_v7 = vpack.c.bf16 %v463_v2, %v462_v52 }
 0x154   :  { %v685_v5 = vpop.f32.mrf.mxu1  ;;  %1913 = vrot.lane.b32.xlu2 %v14005_v61, %s13745_s26 }
 0x155   :  { %v686_v11 = vadd.f32 %v685_v5, %v14046_v15  ;;  %v14367_v49 = vpop.f32.mrf.mxu3  ;;  %v366_v5 = vadd.f32 %v14245_v50, %v14032_v9 }
 0x156   :  { %v378_v14 = vpop.f32.mrf.mxu0  ;;  %1323 = vrot.lane.b32.xlu0 %v14005_v61, %s13746_s14 }
 0x157   :  { %11454 = vmatmul.msk.bf16.gmra.mxu1 %vm228_vm0, %v550_v31  ;;  %v379_v12 = vadd.f32 %v378_v14, %v14046_v15  ;;  %v792_v27 = vmax.f32 %v686_v11, 0.0  ;;  %v556_v31 = vpop.permute.xlu2 %555 }
 0x159   :  { %11436 = vmatmul.msk.bf16.gmra.mxu0 %vm228_vm0, %v14173_v59  ;;  %v464_v36 = vmax.f32 %v379_v12, 0.0  ;;  %1927 = vrot.lane.b32.xlu1 %v14173_v59, %s13745_s26 }
 0x15c   :  { %v687_v13 = vpop.f32.mrf.mxu1  ;;  %1325 = vrot.lane.b32.xlu2 %v14025_v6, %s13746_s14  ;;  %v554_v6 = vpop.permute.xlu1 %553 }
 0x15d   :  { %v688_v43 = vadd.f32 %v687_v13, %v14032_v9  ;;  %11539 = vmatmul.msk.bf16.gmra.mxu3 %vm888_vm1, %v497_v60  ;;  %v14385_v13 = vpop.f32.mrf.mxu3  ;;  %v558_v60 = vpop.permute.xlu0 %557 }
 0x15e   :  { %v380_v32 = vpop.f32.mrf.mxu0  ;;  %1917 = vrot.lane.b32.xlu0 %v14073_v34, %s13745_s26  ;;  %v364_v34 = vadd.f32 %v14229_v40, %v14046_v15 }
 0x15f   :  { %v793_v30 = vmax.f32 %v688_v43, 0.0  ;;  %v381_v1 = vadd.f32 %v380_v32, %v14032_v9 }
 0x160   :  { %v458_v11 = vmax.f32 %v364_v34, 0.0 }
 0x161   :  { %v836_v38 = vpack.c.bf16 %v793_v30, %v792_v27  ;;  %v465_v39 = vmax.f32 %v381_v1, 0.0  ;;  %1339 = vrot.lane.b32.xlu1 %v14143_v33, %s13746_s14 }
 0x163   :  { %11495 = vmatmul.msk.bf16.gmra.mxu2 %vm888_vm1, %v836_v38  ;;  %v14334_v37 = vpack.c.bf16 %v465_v39, %v464_v36  ;;  %v14395_v36 = vpop.permute.xlu2 %561  ;;  %v13454_v38 = vld [vmem:[%s19701_s2 + $0x78] sm:$0xff] }
 0x164   :  { %v690_v45 = vpop.f32.mrf.mxu1  ;;  %1919 = vrot.lane.b32.xlu2 %v14100_v54, %s13745_s26  ;;  %2331 = vmatpush.bf16.msrb.mxu3 %v13454_v38 }
 0x165   :  { %v691_v22 = vadd.f32 %v690_v45, %v14046_v15  ;;  %v14406_v39 = vpop.f32.mrf.mxu3 }
 0x166   :  { %v383_v46 = vpop.f32.mrf.mxu0  ;;  %1329 = vrot.lane.b32.xlu0 %v14100_v54, %s13746_s14  ;;  %v459_v54 = vmax.f32 %v366_v5, 0.0 }
 0x167   :  { %11455 = vmatmul.msk.bf16.gmra.mxu1 %vm228_vm0, %v552_v47  ;;  %v384_v25 = vadd.f32 %v383_v46, %v14046_v15  ;;  %v794_v3 = vmax.f32 %v691_v22, 0.0  ;;  %v369_v46 = vadd.f32 %v14256_v18, %v14046_v15 }
 0x168   :  { %v498_v30 = vpack.c.bf16 %v459_v54, %v458_v11 }
 0x169   :  { %11437 = vmatmul.msk.bf16.gmra.mxu0 %vm228_vm0, %v14143_v33  ;;  %v466_v55 = vmax.f32 %v384_v25, 0.0  ;;  %1933 = vrot.lane.b32.xlu1 %v14199_v23, %s13745_s26 }
 0x16b   :  { %v14429_v51 = vpop.permute.xlu2 %567 }
 0x16c   :  { %v692_v58 = vpop.f32.mrf.mxu1  ;;  %1331 = vrot.lane.b32.xlu2 %v14130_v24, %s13746_s14 }
 0x16d   :  { %v693_v61 = vadd.f32 %v692_v58, %v14032_v9  ;;  %11540 = vmatmul.msk.bf16.gmra.mxu3 %vm888_vm1, %v498_v30  ;;  %v461_v58 = vmax.f32 %v371_v53, 0.0 }
 0x16e   :  { %v385_v26 = vpop.f32.mrf.mxu0  ;;  %1923 = vrot.lane.b32.xlu0 %v14118_v8, %s13745_s26  ;;  %v13450_v8 = vld [vmem:[%s19701_s2 + $0x58] sm:$0xff] }
 0x16f   :  { %v795_v28 = vmax.f32 %v693_v61, 0.0  ;;  %v386_v10 = vadd.f32 %v385_v26, %v14032_v9  ;;  %1741 = vmatpush.bf16.msrb.mxu1 %v13450_v8  ;;  %v14431_v61 = vpop.f32.mrf.mxu3 }
 0x171   :  { %v837_v57 = vpack.c.bf16 %v795_v28, %v794_v3  ;;  %v467_v52 = vmax.f32 %v386_v10, 0.0 }
 0x173   :  { %11496 = vmatmul.msk.bf16.gmra.mxu2 %vm888_vm1, %v837_v57  ;;  %v14365_v17 = vpack.c.bf16 %v467_v52, %v466_v55 }
 0x174   :  { %v695_v63 = vpop.f32.mrf.mxu1  ;;  %1925 = vrot.lane.b32.xlu2 %v14168_v44, %s13745_s26 }
 0x175   :  { %v696_v14 = vadd.f32 %v695_v63, %v14046_v15 }
 0x176   :  { %v388_v2 = vpop.f32.mrf.mxu0  ;;  %1335 = vrot.lane.b32.xlu0 %v14168_v44, %s13746_s14  ;;  %v460_v44 = vmax.f32 %v369_v46, 0.0 }
 0x177   :  { %11456 = vmatmul.msk.bf16.gmra.mxu1 %vm228_vm0, %v554_v6  ;;  %v389_v35 = vadd.f32 %v388_v2, %v14046_v15  ;;  %v796_v16 = vmax.f32 %v696_v14, 0.0  ;;  %v14457_v14 = vpop.permute.xlu0 %563 }
 0x178   :  { %v499_v52 = vpack.c.bf16 %v461_v58, %v460_v44 }
 0x179   :  { %11438 = vmatmul.msk.bf16.gmra.mxu0 %vm228_vm0, %v14194_v20  ;;  %v468_v50 = vmax.f32 %v389_v35, 0.0 }
 0x17c   :  { %v697_v29 = vpop.f32.mrf.mxu1  ;;  %1337 = vrot.lane.b32.xlu2 %v14173_v59, %s13746_s14 }
 0x17d   :  { %v698_v12 = vadd.f32 %v697_v29, %v14032_v9  ;;  %11541 = vmatmul.msk.bf16.gmra.mxu3 %vm888_vm1, %v499_v52 }
 0x17e   :  { %v390_v21 = vpop.f32.mrf.mxu0  ;;  %1929 = vrot.lane.b32.xlu0 %v14143_v33, %s13745_s26  ;;  %v1203_v34 = vpop.f32.mrf.mxu3 }
 0x17f   :  { %v797_v40 = vmax.f32 %v698_v12, 0.0  ;;  %v391_v43 = vadd.f32 %v390_v21, %v14032_v9 }
 0x181   :  { %v838_v27 = vpack.c.bf16 %v797_v40, %v796_v16  ;;  %v469_v32 = vmax.f32 %v391_v43, 0.0 }
 0x183   :  { %11497 = vmatmul.msk.bf16.gmra.mxu2 %vm888_vm1, %v838_v27  ;;  %v14398_v1 = vpack.c.bf16 %v469_v32, %v468_v50  ;;  %v14474_v32 = vpop.permute.xlu0 %569 }
 0x184   :  { %v700_v24 = vpop.f32.mrf.mxu1  ;;  %1931 = vrot.lane.b32.xlu2 %v14194_v20, %s13745_s26 }
 0x185   :  { %v701_v48 = vadd.f32 %v700_v24, %v14046_v15 }
 0x186   :  { %v973_v19 = vpop.f32.mrf.mxu2  ;;  %v393_v47 = vpop.f32.mrf.mxu0  ;;  %1341 = vrot.lane.b32.xlu0 %v14194_v20, %s13746_s14 }
 0x187   :  { %v14409_v45 = vadd.f32 %v14336_v42, %v973_v19  ;;  %11457 = vmatmul.msk.bf16.gmra.mxu1 %vm228_vm0, %v556_v31  ;;  %v14422_v42 = vpop.permute.xlu1 %559  ;;  %v394_v22 = vadd.f32 %v393_v47, %v14046_v15  ;;  %v798_v41 = vmax.f32 %v701_v48, 0.0  ;;  %v1296_v31 = vpop.permute.xlu2 %1295 }
 0x188   :  { %v1205_v16 = vpop.f32.mrf.mxu3 }
 0x189   :  { %11439 = vmatmul.msk.bf16.gmra.mxu0 %vm228_vm0, %v14199_v23  ;;  %v470_v55 = vmax.f32 %v394_v22, 0.0 }
 0x18b   :  { %v14489_v48 = vpop.permute.xlu0 %1887 }
 0x18c   :  { %v702_v25 = vpop.f32.mrf.mxu1  ;;  %1343 = vrot.lane.b32.xlu2 %v14199_v23, %s13746_s14 }
 0x18d   :  { %v703_v62 = vadd.f32 %v702_v25, %v14032_v9  ;;  %11542 = vmatmul.msk.bf16.gmra.mxu3 %vm888_vm1, %v14307_v7 }
 0x18e   :  { %v975_v18 = vpop.f32.mrf.mxu2  ;;  %v395_v26 = vpop.f32.mrf.mxu0 }
 0x18f   :  { %v799_v3 = vmax.f32 %v703_v62, 0.0  ;;  %v14434_v28 = vadd.f32 %v14354_v56, %v975_v18  ;;  %v396_v10 = vadd.f32 %v395_v26, %v14032_v9  ;;  %v14444_v56 = vpop.permute.xlu1 %565 }
 0x190   :  { %v1208_v8 = vpop.f32.mrf.mxu3 }
 0x191   :  { %v839_v57 = vpack.c.bf16 %v799_v3, %v798_v41  ;;  %v471_v63 = vmax.f32 %v396_v10, 0.0 }
 0x193   :  { %11498 = vmatmul.msk.bf16.gmra.mxu2 %vm888_vm1, %v839_v57  ;;  %v14447_v59 = vpack.c.bf16 %v471_v63, %v470_v55  ;;  %v1300_v52 = vpop.permute.xlu0 %1299 }
 0x194   :  { %v705_v6 = vpop.f32.mrf.mxu1 }
 0x195   :  { %v706_v35 = vadd.f32 %v705_v6, %v14046_v15 }
 0x196   :  { %v978_v2 = vpop.f32.mrf.mxu2  ;;  %v398_v5 = vpop.f32.mrf.mxu0 }
 0x197   :  { %v14450_v33 = vadd.f32 %v14367_v49, %v978_v2  ;;  %11458 = vmatmul.msk.bf16.gmra.mxu1 %vm228_vm0, %v558_v60  ;;  %v399_v49 = vadd.f32 %v398_v5, %v14046_v15  ;;  %v14464_v54 = vpop.permute.xlu1 %1885  ;;  %v800_v40 = vmax.f32 %v706_v35, 0.0  ;;  %v14508_v5 = vpop.permute.xlu2 %1889 }
 0x198   :  { %v1209_v25 = vpop.f32.mrf.mxu3 }
 0x199   :  { %11555 = vmatmul.msk.bf16.vlgmr.msrb.gmra.mxu0 %vm228_vm0, %v1296_v31 }
 0x19a   :  { %3911 = vmatpush.bf16.msrb.mxu0 %v13800_v0  ;;  %v472_v0 = vmax.f32 %v399_v49, 0.0 }
 0x19c   :  { %v707_v29 = vpop.f32.mrf.mxu1 }
 0x19d   :  { %v708_v11 = vadd.f32 %v707_v29, %v14032_v9  ;;  %11543 = vmatmul.msk.bf16.gmra.mxu3 %vm888_vm1, %v14334_v37 }
 0x19e   :  { %v980_v12 = vpop.f32.mrf.mxu2  ;;  %v400_v50 = vpop.f32.mrf.mxu0  ;;  %3912 = vmatpush.bf16.msrb.mxu0 %v13814_v4 }
 0x19f   :  { %v801_v21 = vmax.f32 %v708_v11, 0.0  ;;  %v14467_v20 = vadd.f32 %v14385_v13, %v980_v12  ;;  %v401_v43 = vadd.f32 %v400_v50, %v14032_v9  ;;  %v1298_v19 = vpop.permute.xlu1 %1297 }
 0x1a0   :  { %v1211_v57 = vpop.f32.mrf.mxu3 }
 0x1a1   :  { %v840_v27 = vpack.c.bf16 %v801_v21, %v800_v40  ;;  %v473_v30 = vmax.f32 %v401_v43, 0.0 }
 0x1a3   :  { %11499 = vmatmul.msk.bf16.gmra.mxu2 %vm888_vm1, %v840_v27  ;;  %v14478_v13 = vpack.c.bf16 %v473_v30, %v472_v0  ;;  %v1302_v30 = vpop.permute.xlu2 %1301 }
 0x1a4   :  { %v710_v24 = vpop.f32.mrf.mxu1 }
 0x1a5   :  { %v711_v47 = vadd.f32 %v710_v24, %v14046_v15 }
 0x1a6   :  { %v983_v38 = vpop.f32.mrf.mxu2  ;;  %v403_v4 = vpop.f32.mrf.mxu0 }
 0x1a7   :  { %v14481_v23 = vadd.f32 %v14406_v39, %v983_v38  ;;  %11459 = vmatmul.msk.bf16.gmra.mxu1 %vm228_vm0, %v14422_v42  ;;  %v404_v46 = vadd.f32 %v403_v4, %v14046_v15  ;;  %v802_v39 = vmax.f32 %v711_v47, 0.0 }
 0x1a8   :  { %v1213_v35 = vpop.f32.mrf.mxu3 }
 0x1a9   :  { %11556 = vmatmul.msk.bf16.gmra.mxu0 %vm228_vm0, %v1298_v19  ;;  %v474_v62 = vmax.f32 %v404_v46, 0.0 }
 0x1ac   :  { %v712_v7 = vpop.f32.mrf.mxu1 }
 0x1ad   :  { %v713_v53 = vadd.f32 %v712_v7, %v14032_v9  ;;  %11544 = vmatmul.msk.bf16.gmra.mxu3 %vm888_vm1, %v14365_v17  ;;  %v14524_v17 = vpop.permute.xlu1 %1891 }
 0x1ae   :  { %v985_v22 = vpop.f32.mrf.mxu2  ;;  %v405_v42 = vpop.f32.mrf.mxu0 }
 0x1af   :  { %v803_v44 = vmax.f32 %v713_v53, 0.0  ;;  %v14492_v58 = vadd.f32 %v14431_v61, %v985_v22  ;;  %v406_v18 = vadd.f32 %v405_v42, %v14032_v9 }
 0x1b0   :  { %v1216_v27 = vpop.f32.mrf.mxu3 }
 0x1b1   :  { %v841_v41 = vpack.c.bf16 %v803_v44, %v802_v39  ;;  %v475_v3 = vmax.f32 %v406_v18, 0.0 }
 0x1b3   :  { %11500 = vmatmul.msk.bf16.gmra.mxu2 %vm888_vm1, %v841_v41  ;;  %v14498_v26 = vpack.c.bf16 %v475_v3, %v474_v62 }
 0x1b4   :  { %v715_v55 = vpop.f32.mrf.mxu1 }
 0x1b5   :  { %v716_v63 = vadd.f32 %v715_v55, %v14046_v15  ;;  %v1304_v55 = vpop.permute.xlu1 %1303 }
 0x1b6   :  { %v988_v10 = vpop.f32.mrf.mxu2  ;;  %v408_v61 = vpop.f32.mrf.mxu0 }
 0x1b7   :  { %v14500_v60 = vadd.f32 %v1203_v34, %v988_v10  ;;  %11460 = vmatmul.msk.bf16.gmra.mxu1 %vm228_vm0, %v14395_v36  ;;  %v409_v6 = vadd.f32 %v408_v61, %v14046_v15  ;;  %v804_v34 = vmax.f32 %v716_v63, 0.0  ;;  %v14540_v63 = vpop.permute.xlu0 %1893 }
 0x1b8   :  { %v1218_v47 = vpop.f32.mrf.mxu3 }
 0x1b9   :  { %11557 = vmatmul.msk.bf16.gmra.mxu0 %vm228_vm0, %v1300_v52  ;;  %v476_v11 = vmax.f32 %v409_v6, 0.0 }
 0x1bc   :  { %v717_v2 = vpop.f32.mrf.mxu1 }
 0x1bd   :  { %v718_v37 = vadd.f32 %v717_v2, %v14032_v9  ;;  %11545 = vmatmul.msk.bf16.gmra.mxu3 %vm888_vm1, %v14398_v1 }
 0x1be   :  { %v990_v31 = vpop.f32.mrf.mxu2  ;;  %v410_v36 = vpop.f32.mrf.mxu0 }
 0x1bf   :  { %v805_v49 = vmax.f32 %v718_v37, 0.0  ;;  %v14510_v29 = vadd.f32 %v1205_v16, %v990_v31  ;;  %v411_v12 = vadd.f32 %v410_v36, %v14032_v9 }
 0x1c0   :  { %v1221_v18 = vpop.f32.mrf.mxu3 }
 0x1c1   :  { %v842_v40 = vpack.c.bf16 %v805_v49, %v804_v34  ;;  %v477_v21 = vmax.f32 %v411_v12, 0.0 }
 0x1c3   :  { %11501 = vmatmul.msk.bf16.gmra.mxu2 %vm888_vm1, %v842_v40  ;;  %v14516_v50 = vpack.c.bf16 %v477_v21, %v476_v11 }
 0x1c4   :  { %v720_v0 = vpop.f32.mrf.mxu1 }
 0x1c5   :  { %v721_v24 = vadd.f32 %v720_v0, %v14046_v15 }
 0x1c6   :  { %v993_v43 = vpop.f32.mrf.mxu2  ;;  %v413_v16 = vpop.f32.mrf.mxu0 }
 0x1c7   :  { %11461 = vmatmul.msk.bf16.gmra.mxu1 %vm228_vm0, %v14457_v14  ;;  %v414_v38 = vadd.f32 %v413_v16, %v14046_v15  ;;  %v806_v46 = vmax.f32 %v721_v24, 0.0  ;;  %v1306_v16 = vpop.permute.xlu0 %1305 }
 0x1c8   :  { %v1223_v2 = vpop.f32.mrf.mxu3 }
 0x1c9   :  { %11558 = vmatmul.msk.bf16.gmra.mxu0 %vm228_vm0, %v1302_v30  ;;  %v478_v22 = vmax.f32 %v414_v38, 0.0  ;;  %v13453_v30 = vld [vmem:[%s19701_s2 + $0x70] sm:$0xff] }
 0x1ca   :  { %2332 = vmatpush.bf16.msrb.mxu3 %v13453_v30 }
 0x1cc   :  { %v722_v8 = vpop.f32.mrf.mxu1 }
 0x1cd   :  { %v723_v4 = vadd.f32 %v722_v8, %v14032_v9  ;;  %11546 = vmatmul.msk.bf16.gmra.mxu3 %vm888_vm1, %v14447_v59  ;;  %v13449_v59 = vld [vmem:[%s19701_s2 + $0x50] sm:$0xff]  ;;  %v14566_v8 = vpop.permute.xlu2 %1895 }
 0x1ce   :  { %v994_v19 = vpop.f32.mrf.mxu2  ;;  %v415_v53 = vpop.f32.mrf.mxu0  ;;  %1742 = vmatpush.bf16.msrb.mxu1 %v13449_v59 }
 0x1cf   :  { %v807_v7 = vmax.f32 %v723_v4, 0.0  ;;  %v416_v14 = vadd.f32 %v415_v53, %v14032_v9 }
 0x1d0   :  { %v14550_v0 = vpop.f32.mrf.mxu3 }
 0x1d1   :  { %v843_v25 = vpack.c.bf16 %v807_v7, %v806_v46  ;;  %v479_v39 = vmax.f32 %v416_v14, 0.0 }
 0x1d3   :  { %11502 = vmatmul.msk.bf16.gmra.mxu2 %vm888_vm1, %v843_v25  ;;  %v14530_v44 = vpack.c.bf16 %v479_v39, %v478_v22  ;;  %v14573_v25 = vld [vmem:[%s19702_s5 + $0x8] sm:$0xff] }
 0x1d4   :  { %v725_v42 = vpop.f32.mrf.mxu1 }
 0x1d5   :  { %v726_v10 = vadd.f32 %v725_v42, %v14046_v15 }
 0x1d6   :  { %v996_v62 = vpop.f32.mrf.mxu2  ;;  %v418_v3 = vpop.f32.mrf.mxu0 }
 0x1d7   :  { %v14532_v41 = vadd.f32 %v1211_v57, %v996_v62  ;;  %11462 = vmatmul.msk.bf16.gmra.mxu1 %vm228_vm0, %v14444_v56  ;;  %v419_v61 = vadd.f32 %v418_v3, %v14046_v15  ;;  %v808_v57 = vmax.f32 %v726_v10, 0.0 }
 0x1d8   :  { %v1228_v19 = vpop.f32.mrf.mxu3 }
 0x1d9   :  { %11559 = vmatmul.msk.bf16.gmra.mxu0 %vm228_vm0, %v1304_v55  ;;  %v480_v34 = vmax.f32 %v419_v61, 0.0  ;;  %v1308_v61 = vpop.permute.xlu2 %1307 }
 0x1dc   :  { %v727_v52 = vpop.f32.mrf.mxu1 }
 0x1dd   :  { %v728_v1 = vadd.f32 %v727_v52, %v14032_v9  ;;  %11547 = vmatmul.msk.bf16.gmra.mxu3 %vm888_vm1, %v14478_v13  ;;  %v14589_v52 = vld [vmem:[%s19702_s5] sm:$0xff] }
 0x1de   :  { %v998_v6 = vpop.f32.mrf.mxu2  ;;  %v420_v56 = vpop.f32.mrf.mxu0 }
 0x1df   :  { %v809_v37 = vmax.f32 %v728_v1, 0.0  ;;  %v14542_v31 = vadd.f32 %v1213_v35, %v998_v6  ;;  %v421_v49 = vadd.f32 %v420_v56, %v14032_v9 }
 0x1e0   :  { %v1231_v3 = vpop.f32.mrf.mxu3 }
 0x1e1   :  { %v844_v36 = vpack.c.bf16 %v809_v37, %v808_v57  ;;  %v481_v11 = vmax.f32 %v421_v49, 0.0  ;;  %v14594_v57 = vpop.permute.xlu1 %1897 }
 0x1e3   :  { %11503 = vmatmul.msk.bf16.gmra.mxu2 %vm888_vm1, %v844_v36  ;;  %v14548_v12 = vpack.c.bf16 %v481_v11, %v480_v34 }
 0x1e4   :  { %v730_v40 = vpop.f32.mrf.mxu1 }
 0x1e6   :  { %v1001_v21 = vpop.f32.mrf.mxu2  ;;  %v423_v35 = vpop.f32.mrf.mxu0 }
 0x1e7   :  { %v14552_v43 = vadd.f32 %v1216_v27, %v1001_v21  ;;  %11463 = vmatmul.msk.bf16.gmra.mxu1 %vm228_vm0, %v14429_v51  ;;  %v731_v27 = vadd.f32 %v730_v40, %v14046_v15  ;;  %v424_v24 = vadd.f32 %v423_v35, %v14046_v15 }
 0x1e8   :  { %v1232_v56 = vpop.f32.mrf.mxu3 }
 0x1e9   :  { %11560 = vmatmul.msk.bf16.gmra.mxu0 %vm228_vm0, %v1306_v16  ;;  %v810_v46 = vmax.f32 %v731_v27, 0.0  ;;  %v482_v14 = vmax.f32 %v424_v24, 0.0  ;;  %v13447_v16 = vld [vmem:[%s19701_s2 + $0x40] sm:$0xff] }
 0x1ec   :  { %v732_v38 = vpop.f32.mrf.mxu1 }
 0x1ed   :  { %v733_v51 = vadd.f32 %v732_v38, %v14032_v9  ;;  %11548 = vmatmul.msk.bf16.gmra.mxu3 %vm888_vm1, %v14498_v26 }
 0x1ee   :  { %v1003_v4 = vpop.f32.mrf.mxu2  ;;  %v425_v22 = vpop.f32.mrf.mxu0 }
 0x1ef   :  { %v811_v7 = vmax.f32 %v733_v51, 0.0  ;;  %v14568_v53 = vadd.f32 %v1218_v47, %v1003_v4  ;;  %v426_v15 = vadd.f32 %v14573_v25, %v425_v22  ;;  %v1310_v4 = vpop.permute.xlu1 %1309 }
 0x1f0   :  { %v1234_v24 = vpop.f32.mrf.mxu3 }
 0x1f1   :  { %v845_v39 = vpack.c.bf16 %v811_v7, %v810_v46  ;;  %v483_v42 = vmax.f32 %v426_v15, 0.0 }
 0x1f3   :  { %11504 = vmatmul.msk.bf16.gmra.mxu2 %vm888_vm1, %v845_v39  ;;  %v14579_v9 = vpack.c.bf16 %v483_v42, %v482_v14  ;;  %v14617_v14 = vpop.permute.xlu0 %1899 }
 0x1f4   :  { %v735_v47 = vpop.f32.mrf.mxu1 }
 0x1f5   :  { %v736_v13 = vadd.f32 %v14589_v52, %v735_v47 }
 0x1f6   :  { %v1006_v62 = vpop.f32.mrf.mxu2  ;;  %v428_v10 = vpop.f32.mrf.mxu0 }
 0x1f7   :  { %v14581_v55 = vadd.f32 %v1221_v18, %v1006_v62  ;;  %11464 = vmatmul.msk.bf16.gmra.mxu1 %vm228_vm0, %v14474_v32  ;;  %v429_v1 = vadd.f32 %v14589_v52, %v428_v10  ;;  %v13448_v32 = vld [vmem:[%s19701_s2 + $0x48] sm:$0xff]  ;;  %v812_v34 = vmax.f32 %v736_v13, 0.0 }
 0x1f8   :  { %1743 = vmatpush.bf16.msrb.mxu1 %v13448_v32  ;;  %v1236_v39 = vpop.f32.mrf.mxu3 }
 0x1f9   :  { %11561 = vmatmul.msk.bf16.gmra.mxu0 %vm228_vm0, %v1308_v61  ;;  %v484_v40 = vmax.f32 %v429_v1, 0.0 }
 0x1fb   :  { %v1312_v56 = vpop.permute.xlu0 %1311 }
 0x1fc   :  { %v737_v6 = vpop.f32.mrf.mxu1  ;;  %1744 = vmatpush.bf16.msrb.mxu1 %v13447_v16 }
 0x1fd   :  { %v738_v18 = vadd.f32 %v14573_v25, %v737_v6  ;;  %11549 = vmatmul.msk.bf16.gmra.mxu3 %vm888_vm1, %v14516_v50 }
 0x1fe   :  { %v1008_v37 = vpop.f32.mrf.mxu2  ;;  %v430_v11 = vpop.f32.mrf.mxu0 }
 0x1ff   :  { %v813_v49 = vmax.f32 %v738_v18, 0.0  ;;  %v14599_v36 = vadd.f32 %v1223_v2, %v1008_v37  ;;  %v431_v21 = vadd.f32 %v14573_v25, %v430_v11 }
 0x200   :  { %v1239_v32 = vpop.f32.mrf.mxu3 }
 0x201   :  { %v846_v35 = vpack.c.bf16 %v813_v49, %v812_v34  ;;  %v485_v30 = vmax.f32 %v431_v21, 0.0 }
 0x203   :  { %11505 = vmatmul.msk.bf16.gmra.mxu2 %vm888_vm1, %v846_v35  ;;  %v14608_v59 = vpack.c.bf16 %v485_v30, %v484_v40  ;;  %v14631_v40 = vpop.permute.xlu2 %1901 }
 0x204   :  { %v740_v2 = vpop.f32.mrf.mxu1 }
 0x205   :  { %v741_v46 = vadd.f32 %v14589_v52, %v740_v2 }
 0x206   :  { %v1011_v27 = vpop.f32.mrf.mxu2  ;;  %v433_v51 = vpop.f32.mrf.mxu0 }
 0x207   :  { %v14611_v38 = vadd.f32 %v14550_v0, %v1011_v27  ;;  %v434_v7 = vadd.f32 %v14589_v52, %v433_v51  ;;  %v814_v42 = vmax.f32 %v741_v46, 0.0 }
 0x208   :  { %v1241_v50 = vpop.f32.mrf.mxu3 }
 0x209   :  { %11562 = vmatmul.msk.bf16.gmra.mxu0 %vm228_vm0, %v1310_v4  ;;  %v486_v3 = vmax.f32 %v434_v7, 0.0 }
 0x20c   :  { %v742_v22 = vpop.f32.mrf.mxu1 }
 0x20d   :  { %v743_v26 = vadd.f32 %v14573_v25, %v742_v22  ;;  %11550 = vmatmul.msk.bf16.gmra.mxu3 %vm888_vm1, %v14530_v44  ;;  %v14644_v44 = vpop.permute.xlu1 %1903 }
 0x20e   :  { %v1013_v15 = vpop.f32.mrf.mxu2  ;;  %v435_v0 = vpop.f32.mrf.mxu0 }
 0x20f   :  { %v815_v47 = vmax.f32 %v743_v26, 0.0  ;;  %v14619_v62 = vadd.f32 %v1228_v19, %v1013_v15  ;;  %v436_v10 = vadd.f32 %v14573_v25, %v435_v0 }
 0x210   :  { %v1244_v26 = vpop.f32.mrf.mxu3 }
 0x211   :  { %v847_v61 = vpack.c.bf16 %v815_v47, %v814_v42  ;;  %v487_v13 = vmax.f32 %v436_v10, 0.0  ;;  %v1314_v47 = vpop.permute.xlu2 %1313 }
 0x213   :  { %11506 = vmatmul.msk.bf16.gmra.mxu2 %vm888_vm1, %v847_v61  ;;  %v14625_v1 = vpack.c.bf16 %v487_v13, %v486_v3 }
 0x214   :  { %v745_v6 = vpop.f32.mrf.mxu1 }
 0x215   :  { %v746_v19 = vadd.f32 %v14589_v52, %v745_v6 }
 0x216   :  { %v1016_v18 = vpop.f32.mrf.mxu2  ;;  %v1429_v37 = vpop.f32.mrf.mxu0 }
 0x217   :  { %v1430_v34 = vadd.f32 %v14589_v52, %v1429_v37  ;;  %v816_v35 = vmax.f32 %v746_v19, 0.0 }
 0x218   :  { %v1246_v6 = vpop.f32.mrf.mxu3 }
 0x219   :  { %11563 = vmatmul.msk.bf16.gmra.mxu0 %vm228_vm0, %v1312_v56  ;;  %v1554_v2 = vmax.f32 %v1430_v34, 0.0 }
 0x21c   :  { %v747_v49 = vpop.f32.mrf.mxu1 }
 0x21d   :  { %v748_v11 = vadd.f32 %v14573_v25, %v747_v49  ;;  %11551 = vmatmul.msk.bf16.gmra.mxu3 %vm888_vm1, %v14548_v12  ;;  %v14659_v12 = vpop.permute.xlu0 %1905 }
 0x21e   :  { %v1017_v21 = vpop.f32.mrf.mxu2  ;;  %v1431_v30 = vpop.f32.mrf.mxu0 }
 0x21f   :  { %v817_v16 = vmax.f32 %v748_v11, 0.0  ;;  %v1432_v27 = vadd.f32 %v14573_v25, %v1431_v30 }
 0x220   :  { %v1249_v30 = vpop.f32.mrf.mxu3 }
 0x221   :  { %v848_v51 = vpack.c.bf16 %v817_v16, %v816_v35  ;;  %v1555_v4 = vmax.f32 %v1432_v27, 0.0  ;;  %v1316_v27 = vpop.permute.xlu1 %1315 }
 0x223   :  { %11507 = vmatmul.msk.bf16.gmra.mxu2 %vm888_vm1, %v848_v51  ;;  %v1604_v46 = vpack.c.bf16 %v1555_v4, %v1554_v2 }
 0x224   :  { %v750_v7 = vpop.f32.mrf.mxu1 }
 0x225   :  { %11604 = vmatmul.msk.bf16.vlgmr.msrb.gmra.mxu1 %vm888_vm1, %v1604_v46  ;;  %v751_v0 = vadd.f32 %v14589_v52, %v750_v7 }
 0x226   :  { %v1019_v22 = vpop.f32.mrf.mxu2  ;;  %v1434_v42 = vpop.f32.mrf.mxu0 }
 0x227   :  { %v14638_v15 = vadd.f32 %v1234_v24, %v1019_v22  ;;  %v1435_v3 = vadd.f32 %v14589_v52, %v1434_v42  ;;  %v818_v18 = vmax.f32 %v751_v0, 0.0 }
 0x228   :  { %v14661_v42 = vpop.f32.mrf.mxu3 }
 0x229   :  { %11564 = vmatmul.msk.bf16.gmra.mxu0 %vm228_vm0, %v1314_v47  ;;  %v1556_v19 = vmax.f32 %v1435_v3, 0.0 }
 0x22c   :  { %v752_v10 = vpop.f32.mrf.mxu1 }
 0x22d   :  { %v753_v61 = vadd.f32 %v14573_v25, %v752_v10  ;;  %11552 = vmatmul.msk.bf16.gmra.mxu3 %vm888_vm1, %v14579_v9 }
 0x22e   :  { %v1021_v13 = vpop.f32.mrf.mxu2  ;;  %v1436_v24 = vpop.f32.mrf.mxu0 }
 0x22f   :  { %v819_v37 = vmax.f32 %v753_v61, 0.0  ;;  %v14646_v56 = vadd.f32 %v1236_v39, %v1021_v13  ;;  %v1437_v34 = vadd.f32 %v14573_v25, %v1436_v24 }
 0x231   :  { %v849_v49 = vpack.c.bf16 %v819_v37, %v818_v18  ;;  %v1557_v11 = vmax.f32 %v1437_v34, 0.0  ;;  %v1254_v34 = vpop.f32.mrf.mxu3 }
 0x233   :  { %11508 = vmatmul.msk.bf16.gmra.mxu2 %vm888_vm1, %v849_v49  ;;  %v1605_v21 = vpack.c.bf16 %v1557_v11, %v1556_v19  ;;  %v1318_v11 = vpop.permute.xlu0 %1317 }
 0x234   :  { %v755_v35 = vpop.f32.mrf.mxu1 }
 0x235   :  { %11605 = vmatmul.msk.bf16.gmra.mxu1 %vm888_vm1, %v1605_v21  ;;  %v756_v51 = vadd.f32 %v14589_v52, %v755_v35  ;;  %v13452_v21 = vld [vmem:[%s19701_s2 + $0x68] sm:$0xff] }
 0x236   :  { %v1024_v16 = vpop.f32.mrf.mxu2  ;;  %v1439_v39 = vpop.f32.mrf.mxu0  ;;  %2333 = vmatpush.bf16.msrb.mxu3 %v13452_v21 }
 0x237   :  { %v14653_v2 = vadd.f32 %v1239_v32, %v1024_v16  ;;  %v1440_v4 = vadd.f32 %v14589_v52, %v1439_v39  ;;  %v820_v47 = vmax.f32 %v756_v51, 0.0 }
 0x239   :  { %11565 = vmatmul.msk.bf16.gmra.mxu0 %vm228_vm0, %v1316_v27  ;;  %v1558_v10 = vmax.f32 %v1440_v4, 0.0  ;;  %v14679_v27 = vpop.permute.xlu2 %1907  ;;  %v1255_v51 = vpop.f32.mrf.mxu3 }
 0x23c   :  { %v757_v46 = vpop.f32.mrf.mxu1 }
 0x23d   :  { %v758_v7 = vadd.f32 %v14573_v25, %v757_v46  ;;  %11553 = vmatmul.msk.bf16.gmra.mxu3 %vm888_vm1, %v14608_v59  ;;  %v14694_v59 = vpop.permute.xlu1 %1909 }
 0x23e   :  { %v1026_v22 = vpop.f32.mrf.mxu2  ;;  %v1441_v3 = vpop.f32.mrf.mxu0 }
 0x23f   :  { %v821_v0 = vmax.f32 %v758_v7, 0.0  ;;  %v14663_v32 = vadd.f32 %v1241_v50, %v1026_v22  ;;  %v1442_v61 = vadd.f32 %v14573_v25, %v1441_v3 }
 0x241   :  { %v850_v13 = vpack.c.bf16 %v821_v0, %v820_v47  ;;  %v1559_v18 = vmax.f32 %v1442_v61, 0.0 }
 0x243   :  { %11509 = vmatmul.msk.bf16.gmra.mxu2 %vm888_vm1, %v850_v13  ;;  %v1606_v37 = vpack.c.bf16 %v1559_v18, %v1558_v10 }
 0x244   :  { %v760_v24 = vpop.f32.mrf.mxu1 }
 0x245   :  { %11606 = vmatmul.msk.bf16.gmra.mxu1 %vm888_vm1, %v1606_v37  ;;  %v761_v35 = vadd.f32 %v14589_v52, %v760_v24  ;;  %v1257_v37 = vpop.f32.mrf.mxu3 }
 0x246   :  { %v1029_v19 = vpop.f32.mrf.mxu2  ;;  %v1444_v50 = vpop.f32.mrf.mxu0 }
 0x247   :  { %v14670_v49 = vadd.f32 %v1244_v26, %v1029_v19  ;;  %v1445_v9 = vadd.f32 %v14589_v52, %v1444_v50  ;;  %v822_v4 = vmax.f32 %v761_v35, 0.0  ;;  %v1320_v19 = vpop.permute.xlu2 %1319 }
 0x249   :  { %11566 = vmatmul.msk.bf16.gmra.mxu0 %vm228_vm0, %v1318_v11  ;;  %v1560_v47 = vmax.f32 %v1445_v9, 0.0 }
 0x24c   :  { %v762_v16 = vpop.f32.mrf.mxu1 }
 0x24d   :  { %v763_v39 = vadd.f32 %v14573_v25, %v762_v16  ;;  %v14698_v9 = vpop.f32.mrf.mxu3  ;;  %11554 = vmatmul.msk.bf16.gmra.mxu3 %vm888_vm1, %v14625_v1 }
 0x24e   :  { %v1031_v26 = vpop.f32.mrf.mxu2  ;;  %v1446_v22 = vpop.f32.mrf.mxu0 }
 0x24f   :  { %v823_v46 = vmax.f32 %v763_v39, 0.0  ;;  %v14681_v7 = vadd.f32 %v1246_v6, %v1031_v26  ;;  %v1447_v0 = vadd.f32 %v14573_v25, %v1446_v22 }
 0x251   :  { %v851_v3 = vpack.c.bf16 %v823_v46, %v822_v4  ;;  %v1561_v10 = vmax.f32 %v1447_v0, 0.0 }
 0x253   :  { %11510 = vmatmul.msk.bf16.gmra.mxu2 %vm888_vm1, %v851_v3  ;;  %v1607_v61 = vpack.c.bf16 %v1561_v10, %v1560_v47 }
 0x254   :  { %v765_v13 = vpop.f32.mrf.mxu1 }
 0x255   :  { %11607 = vmatmul.msk.bf16.gmra.mxu1 %vm888_vm1, %v1607_v61  ;;  %v766_v34 = vadd.f32 %v14589_v52, %v765_v13  ;;  %v1262_v3 = vpop.f32.mrf.mxu3  ;;  %v1322_v61 = vpop.permute.xlu1 %1321 }
 0x256   :  { %v1034_v18 = vpop.f32.mrf.mxu2  ;;  %v1449_v6 = vpop.f32.mrf.mxu0 }
 0x257   :  { %v14688_v24 = vadd.f32 %v1249_v30, %v1034_v18  ;;  %v1450_v50 = vadd.f32 %v14589_v52, %v1449_v6  ;;  %v824_v16 = vmax.f32 %v766_v34, 0.0  ;;  %v14709_v34 = vpop.permute.xlu0 %1911 }
 0x259   :  { %11567 = vmatmul.msk.bf16.gmra.mxu0 %vm228_vm0, %v1320_v19  ;;  %v1562_v26 = vmax.f32 %v1450_v50, 0.0 }
 0x25c   :  { %v767_v11 = vpop.f32.mrf.mxu1 }
 0x25d   :  { %v768_v21 = vadd.f32 %v14573_v25, %v767_v11  ;;  %v14711_v50 = vpop.f32.mrf.mxu3 }
 0x25e   :  { %v14696_v35 = vpop.f32.mrf.mxu2  ;;  %v1451_v39 = vpop.f32.mrf.mxu0  ;;  %19713 = vst [vmem:[#allocation2_spill] sm:$0xff] %v14711_v50 }
 0x25f   :  { %v825_v30 = vmax.f32 %v768_v21, 0.0  ;;  %v1452_v51 = vadd.f32 %v14573_v25, %v1451_v39 }
 0x261   :  { %v852_v4 = vpack.c.bf16 %v825_v30, %v824_v16  ;;  %v1563_v46 = vmax.f32 %v1452_v51, 0.0 }
 0x263   :  { %11511 = vmatmul.msk.bf16.gmra.mxu2 %vm888_vm1, %v852_v4  ;;  %v1608_v22 = vpack.c.bf16 %v1563_v46, %v1562_v26 }
 0x264   :  { %v770_v47 = vpop.f32.mrf.mxu1 }
 0x265   :  { %11608 = vmatmul.msk.bf16.gmra.mxu1 %vm888_vm1, %v1608_v22  ;;  %v771_v13 = vadd.f32 %v14589_v52, %v770_v47  ;;  %v1267_v47 = vpop.f32.mrf.mxu3 }
 0x266   :  { %v1039_v0 = vpop.f32.mrf.mxu2  ;;  %v1454_v10 = vpop.f32.mrf.mxu0 }
 0x267   :  { %v1455_v18 = vadd.f32 %v14589_v52, %v1454_v10  ;;  %v826_v11 = vmax.f32 %v771_v13, 0.0 }
 0x269   :  { %11568 = vmatmul.msk.bf16.gmra.mxu0 %vm228_vm0, %v1322_v61  ;;  %v1564_v30 = vmax.f32 %v1455_v18, 0.0  ;;  %v1324_v61 = vpop.permute.xlu0 %1323 }
 0x26c   :  { %v772_v6 = vpop.f32.mrf.mxu1 }
 0x26d   :  { %v773_v19 = vadd.f32 %v14573_v25, %v772_v6 }
 0x26e   :  { %v1040_v1 = vpop.f32.mrf.mxu2  ;;  %v1456_v16 = vpop.f32.mrf.mxu0 }
 0x26f   :  { %v827_v21 = vmax.f32 %v773_v19, 0.0  ;;  %v1457_v39 = vadd.f32 %v14573_v25, %v1456_v16  ;;  %v14722_v1 = vpop.permute.xlu2 %1913 }
 0x271   :  { %v853_v26 = vpack.c.bf16 %v827_v21, %v826_v11  ;;  %v1565_v51 = vmax.f32 %v1457_v39, 0.0  ;;  %v14726_v21 = vpop.f32.mrf.mxu3 }
 0x272   :  { %19714 = vst [vmem:[#allocation3_spill] sm:$0xff] %v14726_v21 }
 0x273   :  { %11512 = vmatmul.msk.bf16.gmra.mxu2 %vm888_vm1, %v853_v26  ;;  %v1609_v4 = vpack.c.bf16 %v1565_v51, %v1564_v30 }
 0x274   :  { %v775_v46 = vpop.f32.mrf.mxu1 }
 0x275   :  { %11609 = vmatmul.msk.bf16.gmra.mxu1 %vm888_vm1, %v1609_v4  ;;  %v776_v13 = vadd.f32 %v14589_v52, %v775_v46 }
 0x276   :  { %v1042_v22 = vpop.f32.mrf.mxu2  ;;  %v1459_v10 = vpop.f32.mrf.mxu0 }
 0x277   :  { %v14716_v0 = vadd.f32 %v1257_v37, %v1042_v22  ;;  %v1460_v18 = vadd.f32 %v14589_v52, %v1459_v10  ;;  %v828_v16 = vmax.f32 %v776_v13, 0.0  ;;  %v1326_v50 = vpop.permute.xlu2 %1325 }
 0x279   :  { %11569 = vmatmul.msk.bf16.gmra.mxu0 %vm228_vm0, %v1324_v61  ;;  %v1566_v39 = vmax.f32 %v1460_v18, 0.0  ;;  %v1272_v10 = vpop.f32.mrf.mxu3  ;;  %v14735_v18 = vpop.permute.xlu1 %1915 }
 0x27c   :  { %v777_v6 = vpop.f32.mrf.mxu1 }
 0x27d   :  { %v778_v19 = vadd.f32 %v14573_v25, %v777_v6 }
 0x27e   :  { %v14724_v11 = vpop.f32.mrf.mxu2  ;;  %v1461_v30 = vpop.f32.mrf.mxu0 }
 0x27f   :  { %v829_v37 = vmax.f32 %v778_v19, 0.0  ;;  %v1462_v26 = vadd.f32 %v14573_v25, %v1461_v30 }
 0x281   :  { %v854_v51 = vpack.c.bf16 %v829_v37, %v828_v16  ;;  %v1567_v4 = vmax.f32 %v1462_v26, 0.0  ;;  %v14739_v16 = vpop.f32.mrf.mxu3 }
 0x282   :  { %19715 = vst [vmem:[#allocation4_spill] sm:$0xff] %v14739_v16 }
 0x283   :  { %11513 = vmatmul.msk.bf16.gmra.mxu2 %vm888_vm1, %v854_v51  ;;  %v1610_v46 = vpack.c.bf16 %v1567_v4, %v1566_v39 }
 0x285   :  { %11610 = vmatmul.msk.bf16.gmra.mxu1 %vm888_vm1, %v1610_v46 }
 0x286   :  { %v1047_v22 = vpop.f32.mrf.mxu2  ;;  %v1464_v6 = vpop.f32.mrf.mxu0 }
 0x287   :  { %v14731_v61 = vadd.f32 %v1262_v3, %v1047_v22  ;;  %v1465_v13 = vadd.f32 %v14589_v52, %v1464_v6  ;;  %v1328_v6 = vpop.permute.xlu1 %1327 }
 0x289   :  { %11570 = vmatmul.msk.bf16.gmra.mxu0 %vm228_vm0, %v1326_v50  ;;  %v1568_v30 = vmax.f32 %v1465_v13, 0.0  ;;  %v14747_v50 = vld [vmem:[%s19699_s1 + $0x8] sm:$0xff]  ;;  %v1277_v4 = vpop.f32.mrf.mxu3 }
 0x28e   :  { %v14737_v19 = vpop.f32.mrf.mxu2  ;;  %v1466_v37 = vpop.f32.mrf.mxu0 }
 0x28f   :  { %v1467_v39 = vadd.f32 %v14573_v25, %v1466_v37  ;;  %v14761_v37 = vpop.permute.xlu0 %1917 }
 0x291   :  { %v1569_v26 = vmax.f32 %v1467_v39, 0.0  ;;  %v1278_v39 = vpop.f32.mrf.mxu3 }
 0x293   :  { %11629 = vmatmul.msk.bf16.vlgmr.msrb.gmra.mxu2 %vm228_vm0, %v14464_v54  ;;  %v1611_v3 = vpack.c.bf16 %v1569_v26, %v1568_v30  ;;  %v14756_v54 = vld [vmem:[%s19699_s1] sm:$0xff] }
 0x294   :  { %4501 = vmatpush.bf16.msrb.mxu2 %v14747_v50 }
 0x295   :  { %11611 = vmatmul.msk.bf16.gmra.mxu1 %vm888_vm1, %v1611_v3 }
 0x296   :  { %v1052_v51 = vpop.f32.mrf.mxu2  ;;  %v1469_v22 = vpop.f32.mrf.mxu0 }
 0x297   :  { %v14751_v46 = vadd.f32 %v1267_v47, %v1052_v51  ;;  %v1470_v13 = vadd.f32 %v14589_v52, %v1469_v22 }
 0x298   :  { %4502 = vmatpush.bf16.msrb.mxu2 %v14756_v54 }
 0x299   :  { %19716 = vst [vmem:[#allocation5_spill] sm:$0xff] %v14751_v46  ;;  %11571 = vmatmul.msk.bf16.gmra.mxu0 %vm228_vm0, %v1328_v6  ;;  %v1570_v26 = vmax.f32 %v1470_v13, 0.0  ;;  %v1280_v22 = vpop.f32.mrf.mxu3 }
 0x29e   :  { %v14763_v30 = vpop.f32.mrf.mxu2  ;;  %v1471_v47 = vpop.f32.mrf.mxu0 }
 0x29f   :  { %19717 = vst [vmem:[#allocation6_spill] sm:$0xff] %v14763_v30  ;;  %v1472_v3 = vadd.f32 %v14573_v25, %v1471_v47  ;;  %v1330_v30 = vpop.permute.xlu0 %1329 }
 0x2a1   :  { %v1571_v51 = vmax.f32 %v1472_v3, 0.0 }
 0x2a2   :  { %v1746_v4 = vpop.f32.mrf.mxu1 }
 0x2a3   :  { %11630 = vmatmul.msk.bf16.gmra.mxu2 %vm228_vm0, %v14489_v48  ;;  %v1612_v16 = vpack.c.bf16 %v1571_v51, %v1570_v26  ;;  %v14769_v21 = vadd.f32 %v1746_v4, %v14409_v45  ;;  %v13451_v45 = vld [vmem:[%s19701_s2 + $0x60] sm:$0xff]  ;;  %v14782_v26 = vpop.permute.xlu2 %1919 }
 0x2a4   :  { %2334 = vmatpush.bf16.msrb.mxu3 %v13451_v45 }
 0x2a5   :  { %11612 = vmatmul.msk.bf16.gmra.mxu1 %vm888_vm1, %v1612_v16 }
 0x2a6   :  { %v1057_v6 = vpop.f32.mrf.mxu2  ;;  %v1474_v39 = vpop.f32.mrf.mxu0 }
 0x2a7   :  { %v14772_v46 = vadd.f32 %v1272_v10, %v1057_v6  ;;  %v1475_v47 = vadd.f32 %v14589_v52, %v1474_v39  ;;  %v1281_v10 = vpop.f32.mrf.mxu3 }
 0x2a9   :  { %11572 = vmatmul.msk.bf16.gmra.mxu0 %vm228_vm0, %v1330_v30  ;;  %v1572_v51 = vmax.f32 %v1475_v47, 0.0 }
 0x2aa   :  { %v1748_v13 = vpop.f32.mrf.mxu1 }
 0x2ab   :  { %v14777_v48 = vadd.f32 %v1748_v13, %v14434_v28  ;;  %v1332_v45 = vpop.permute.xlu2 %1331 }
 0x2ae   :  { %v14784_v16 = vpop.f32.mrf.mxu2  ;;  %v1476_v3 = vpop.f32.mrf.mxu0 }
 0x2af   :  { %19718 = vst [vmem:[#allocation7_spill] sm:$0xff] %v14784_v16  ;;  %v1477_v30 = vadd.f32 %v14573_v25, %v1476_v3  ;;  %v1283_v13 = vpop.f32.mrf.mxu3 }
 0x2b1   :  { %v1573_v4 = vmax.f32 %v1477_v30, 0.0 }
 0x2b2   :  { %v1751_v28 = vpop.f32.mrf.mxu1 }
 0x2b3   :  { %11631 = vmatmul.msk.bf16.gmra.mxu2 %vm228_vm0, %v14508_v5  ;;  %v1613_v6 = vpack.c.bf16 %v1573_v4, %v1572_v51  ;;  %v14790_v22 = vadd.f32 %v1751_v28, %v14450_v33  ;;  %v14798_v5 = vpop.permute.xlu1 %1921 }
 0x2b5   :  { %11613 = vmatmul.msk.bf16.gmra.mxu1 %vm888_vm1, %v1613_v6 }
 0x2b6   :  { %v1062_v39 = vpop.f32.mrf.mxu2  ;;  %v1479_v16 = vpop.f32.mrf.mxu0 }
 0x2b7   :  { %v1480_v10 = vadd.f32 %v14589_v52, %v1479_v16  ;;  %v1284_v30 = vpop.f32.mrf.mxu3 }
 0x2b9   :  { %11573 = vmatmul.msk.bf16.gmra.mxu0 %vm228_vm0, %v1332_v45  ;;  %v1574_v4 = vmax.f32 %v1480_v10, 0.0 }
 0x2ba   :  { %v1753_v47 = vpop.f32.mrf.mxu1 }
 0x2bb   :  { %v14796_v3 = vadd.f32 %v1753_v47, %v14467_v20 }
 0x2be   :  { %v1063_v51 = vpop.f32.mrf.mxu2  ;;  %v1481_v33 = vpop.f32.mrf.mxu0 }
 0x2bf   :  { %v1482_v28 = vadd.f32 %v14573_v25, %v1481_v33  ;;  %v1286_v20 = vpop.f32.mrf.mxu3  ;;  %v1334_v51 = vpop.permute.xlu1 %1333 }
 0x2c1   :  { %v1575_v6 = vmax.f32 %v1482_v28, 0.0 }
 0x2c2   :  { %v1756_v39 = vpop.f32.mrf.mxu1 }
 0x2c3   :  { %11632 = vmatmul.msk.bf16.gmra.mxu2 %vm228_vm0, %v14524_v17  ;;  %v1614_v13 = vpack.c.bf16 %v1575_v6, %v1574_v4  ;;  %v14804_v45 = vadd.f32 %v1756_v39, %v14481_v23  ;;  %v14812_v17 = vpop.permute.xlu0 %1923 }
 0x2c5   :  { %11614 = vmatmul.msk.bf16.gmra.mxu1 %vm888_vm1, %v1614_v13 }
 0x2c6   :  { %v1065_v16 = vpop.f32.mrf.mxu2  ;;  %v1484_v47 = vpop.f32.mrf.mxu0 }
 0x2c7   :  { %v1485_v30 = vadd.f32 %v14589_v52, %v1484_v47  ;;  %v1287_v28 = vpop.f32.mrf.mxu3 }
 0x2c9   :  { %11574 = vmatmul.msk.bf16.gmra.mxu0 %vm228_vm0, %v1334_v51  ;;  %v1576_v6 = vmax.f32 %v1485_v30, 0.0 }
 0x2ca   :  { %v1758_v10 = vpop.f32.mrf.mxu1 }
 0x2cb   :  { %v14810_v33 = vadd.f32 %v1758_v10, %v14492_v58 }
 0x2ce   :  { %v1066_v4 = vpop.f32.mrf.mxu2  ;;  %v1486_v23 = vpop.f32.mrf.mxu0 }
 0x2cf   :  { %v1487_v39 = vadd.f32 %v14573_v25, %v1486_v23  ;;  %v1289_v58 = vpop.f32.mrf.mxu3  ;;  %v1336_v4 = vpop.permute.xlu0 %1335 }
 0x2d1   :  { %v1577_v13 = vmax.f32 %v1487_v39, 0.0 }
 0x2d2   :  { %v1761_v16 = vpop.f32.mrf.mxu1 }
 0x2d3   :  { %11633 = vmatmul.msk.bf16.gmra.mxu2 %vm228_vm0, %v14540_v63  ;;  %v1615_v20 = vpack.c.bf16 %v1577_v13, %v1576_v6  ;;  %v14818_v51 = vadd.f32 %v1761_v16, %v14500_v60  ;;  %v14826_v63 = vpop.permute.xlu2 %1925 }
 0x2d5   :  { %19719 = vst [vmem:[#allocation8_spill] sm:$0xff] %v14818_v51  ;;  %11615 = vmatmul.msk.bf16.gmra.mxu1 %vm888_vm1, %v1615_v20 }
 0x2d6   :  { %v1068_v47 = vpop.f32.mrf.mxu2  ;;  %v1489_v10 = vpop.f32.mrf.mxu0 }
 0x2d7   :  { %v1490_v28 = vadd.f32 %v14589_v52, %v1489_v10  ;;  %v1290_v39 = vpop.f32.mrf.mxu3 }
 0x2d9   :  { %11575 = vmatmul.msk.bf16.gmra.mxu0 %vm228_vm0, %v1336_v4  ;;  %v1578_v13 = vmax.f32 %v1490_v28, 0.0  ;;  %v14834_v28 = vpop.permute.xlu1 %1927 }
 0x2da   :  { %v1763_v30 = vpop.f32.mrf.mxu1 }
 0x2db   :  { %v14824_v23 = vadd.f32 %v1763_v30, %v14510_v29  ;;  %v1338_v30 = vpop.permute.xlu2 %1337 }
 0x2dd   :  { %19720 = vst [vmem:[#allocation9_spill] sm:$0xff] %v14824_v23 }
 0x2de   :  { %v1069_v6 = vpop.f32.mrf.mxu2  ;;  %v1491_v60 = vpop.f32.mrf.mxu0 }
 0x2df   :  { %v1492_v16 = vadd.f32 %v14573_v25, %v1491_v60  ;;  %v1292_v10 = vpop.f32.mrf.mxu3 }
 0x2e1   :  { %v1579_v20 = vmax.f32 %v1492_v16, 0.0 }
 0x2e2   :  { %v1766_v47 = vpop.f32.mrf.mxu1 }
 0x2e3   :  { %11634 = vmatmul.msk.bf16.gmra.mxu2 %vm228_vm0, %v14566_v8  ;;  %v1616_v58 = vpack.c.bf16 %v1579_v20, %v1578_v13 }
 0x2e5   :  { %11616 = vmatmul.msk.bf16.gmra.mxu1 %vm888_vm1, %v1616_v58 }
 0x2e6   :  { %v1071_v4 = vpop.f32.mrf.mxu2  ;;  %v1494_v29 = vpop.f32.mrf.mxu0 }
 0x2e7   :  { %v1495_v39 = vadd.f32 %v14589_v52, %v1494_v29  ;;  %v1293_v16 = vpop.f32.mrf.mxu3  ;;  %v1340_v29 = vpop.permute.xlu1 %1339 }
 0x2e9   :  { %11576 = vmatmul.msk.bf16.gmra.mxu0 %vm228_vm0, %v1338_v30  ;;  %v1580_v51 = vmax.f32 %v1495_v39, 0.0  ;;  %v14848_v39 = vpop.permute.xlu0 %1929 }
 0x2ea   :  { %v1767_v6 = vpop.f32.mrf.mxu1 }
 0x2ee   :  { %v1072_v60 = vpop.f32.mrf.mxu2  ;;  %v1496_v23 = vpop.f32.mrf.mxu0 }
 0x2ef   :  { %v1497_v8 = vadd.f32 %v14573_v25, %v1496_v23 }
 0x2f1   :  { %v1581_v13 = vmax.f32 %v1497_v8, 0.0 }
 0x2f2   :  { %v1769_v20 = vpop.f32.mrf.mxu1 }
 0x2f3   :  { %11635 = vmatmul.msk.bf16.gmra.mxu2 %vm228_vm0, %v14594_v57  ;;  %v1617_v47 = vpack.c.bf16 %v1581_v13, %v1580_v51  ;;  %v14840_v58 = vadd.f32 %v1769_v20, %v14532_v41 }
 0x2f5   :  { %11617 = vmatmul.msk.bf16.gmra.mxu1 %vm888_vm1, %v1617_v47 }
 0x2f6   :  { %v1074_v4 = vpop.f32.mrf.mxu2  ;;  %v1499_v10 = vpop.f32.mrf.mxu0 }
 0x2f7   :  { %v1500_v6 = vadd.f32 %v14589_v52, %v1499_v10  ;;  %v1342_v4 = vpop.permute.xlu0 %1341  ;;  %v11705_v10 = vld [vmem:[%s19700_s0 + $0x4] sm:$0xf] }
 0x2f9   :  { %11577 = vmatmul.msk.bf16.gmra.mxu0 %vm228_vm0, %v1340_v29  ;;  %v1582_v60 = vmax.f32 %v1500_v6, 0.0  ;;  %v13455_v29 = vld [vmem:[%s19700_s0 + $0x10] sm:$0xf0] }
 0x2fa   :  { %v1771_v30 = vpop.f32.mrf.mxu1 }
 0x2fb   :  { %v14846_v23 = vadd.f32 %v1771_v30, %v14542_v31  ;;  %v14863_v30 = vor.u32 %v13455_v29, %v11705_v10 }
 0x2fd   :  { %3190 = vrot.lane.b32.xlu0 %v14863_v30, %s13744_s21 }
 0x2fe   :  { %v1075_v57 = vpop.f32.mrf.mxu2  ;;  %v1501_v51 = vpop.f32.mrf.mxu0 }
 0x2ff   :  { %v1502_v41 = vadd.f32 %v14573_v25, %v1501_v51  ;;  %v14872_v57 = vpop.permute.xlu2 %1931 }
 0x301   :  { %v1583_v16 = vmax.f32 %v1502_v41, 0.0 }
 0x302   :  { %v1774_v8 = vpop.f32.mrf.mxu1 }
 0x303   :  { %11636 = vmatmul.msk.bf16.gmra.mxu2 %vm228_vm0, %v14617_v14  ;;  %v1618_v13 = vpack.c.bf16 %v1583_v16, %v1582_v60  ;;  %v14854_v20 = vadd.f32 %v1774_v8, %v14552_v43 }
 0x305   :  { %11618 = vmatmul.msk.bf16.gmra.mxu1 %vm888_vm1, %v1618_v13 }
 0x306   :  { %v1077_v47 = vpop.f32.mrf.mxu2  ;;  %v1504_v31 = vpop.f32.mrf.mxu0 }
 0x307   :  { %v1505_v14 = vadd.f32 %v14589_v52, %v1504_v31  ;;  %v13483_v31 = vld [vmem:[%s19701_s2 + $0x98] sm:$0xff] }
 0x308   :  { %3046 = vmatpush.bf16.msra.mxu1 %v13483_v31 }
 0x309   :  { %11578 = vmatmul.msk.bf16.gmra.mxu0 %vm228_vm0, %v1342_v4  ;;  %v1584_v41 = vmax.f32 %v1505_v14, 0.0 }
 0x30a   :  { %v1776_v43 = vpop.f32.mrf.mxu1 }
 0x30b   :  { %v14870_v6 = vadd.f32 %v1776_v43, %v14568_v53  ;;  %v13487_v53 = vld [vmem:[%s19701_s2 + $0xb8] sm:$0xff]  ;;  %v1344_v43 = vpop.permute.xlu2 %1343 }
 0x30c   :  { %3636 = vmatpush.bf16.msra.mxu3 %v13487_v53 }
 0x30d   :  { %19721 = vst [vmem:[#allocation10_spill] sm:$0xff] %v14870_v6 }
 0x30e   :  { %v1078_v51 = vpop.f32.mrf.mxu2  ;;  %v1506_v60 = vpop.f32.mrf.mxu0 }
 0x30f   :  { %v1507_v16 = vadd.f32 %v14573_v25, %v1506_v60 }
 0x311   :  { %v1585_v8 = vmax.f32 %v1507_v16, 0.0 }
 0x312   :  { %v1779_v13 = vpop.f32.mrf.mxu1 }
 0x313   :  { %11637 = vmatmul.msk.bf16.gmra.mxu2 %vm228_vm0, %v14631_v40  ;;  %v1619_v47 = vpack.c.bf16 %v1585_v8, %v1584_v41  ;;  %v14878_v4 = vadd.f32 %v1779_v13, %v14581_v55  ;;  %v11709_v55 = vld [vmem:[%s19700_s0 + $0x24] sm:$0xf]  ;;  %v13456_v40 = vld [vmem:[%s19700_s0 + $0x30] sm:$0xf0] }
 0x314   :  { %v14893_v14 = vor.u32 %v13456_v40, %v11709_v55 }
 0x315   :  { %19722 = vst [vmem:[#allocation11_spill] sm:$0xff] %v14878_v4  ;;  %11619 = vmatmul.msk.bf16.gmra.mxu1 %vm888_vm1, %v1619_v47 }
 0x316   :  { %v2019_v10 = vpop.f32.mrf.mxu2  ;;  %v1509_v29 = vpop.f32.mrf.mxu0  ;;  %3192 = vrot.lane.b32.xlu1 %v14893_v14, %s13744_s21 }
 0x317   :  { %v1510_v60 = vadd.f32 %v14589_v52, %v1509_v29  ;;  %v2020_v16 = vadd.f32 %v14589_v52, %v2019_v10 }
 0x319   :  { %11579 = vmatmul.msk.bf16.gmra.mxu0 %vm228_vm0, %v1344_v43  ;;  %v1586_v53 = vmax.f32 %v1510_v60, 0.0  ;;  %v2144_v55 = vmax.f32 %v2020_v16, 0.0  ;;  %v11713_v60 = vld [vmem:[%s19700_s0 + $0x44] sm:$0xf]  ;;  %v13457_v16 = vld [vmem:[%s19700_s0 + $0x50] sm:$0xf0] }
 0x31a   :  { %v1781_v51 = vpop.f32.mrf.mxu1 }
 0x31b   :  { %v14900_v41 = vadd.f32 %v1781_v51, %v14599_v36 }
 0x31e   :  { %v2021_v8 = vpop.f32.mrf.mxu2  ;;  %v1511_v47 = vpop.f32.mrf.mxu0 }
 0x31f   :  { %v2022_v13 = vadd.f32 %v14573_v25, %v2021_v8  ;;  %v1512_v31 = vadd.f32 %v14573_v25, %v1511_v47 }
 0x321   :  { %v2145_v43 = vmax.f32 %v2022_v13, 0.0  ;;  %v1587_v40 = vmax.f32 %v1512_v31, 0.0 }
 0x322   :  { %v1784_v29 = vpop.f32.mrf.mxu1 }
 0x323   :  { %v2194_v4 = vpack.c.bf16 %v2145_v43, %v2144_v55  ;;  %11638 = vmatmul.msk.bf16.gmra.mxu2 %vm228_vm0, %v14644_v44  ;;  %v1620_v6 = vpack.c.bf16 %v1587_v40, %v1586_v53  ;;  %v14908_v36 = vadd.f32 %v1784_v29, %v14611_v38  ;;  %v14918_v44 = vor.u32 %v13457_v16, %v11713_v60  ;;  %v13458_v16 = vld [vmem:[%s19700_s0 + $0x70] sm:$0xf0] }
 0x325   :  { %11678 = vmatmul.msk.bf16.vlgmr.msrb.gmra.mxu3 %vm888_vm1, %v2194_v4  ;;  %11620 = vmatmul.msk.bf16.gmra.mxu1 %vm888_vm1, %v1620_v6 }
 0x326   :  { %v2024_v10 = vpop.f32.mrf.mxu2  ;;  %v1514_v51 = vpop.f32.mrf.mxu0  ;;  %3194 = vrot.lane.b32.xlu2 %v14918_v44, %s13744_s21 }
 0x327   :  { %v1515_v6 = vadd.f32 %v14589_v52, %v1514_v51  ;;  %v2025_v8 = vadd.f32 %v14589_v52, %v2024_v10 }
 0x329   :  { %11803 = vmatmul.msk.bf16.vlgmr.msra.gmra.mxu0 %vm228_vm0, %v14863_v30  ;;  %v1588_v31 = vmax.f32 %v1515_v6, 0.0  ;;  %v2146_v43 = vmax.f32 %v2025_v8, 0.0 }
 0x32a   :  { %v1786_v38 = vpop.f32.mrf.mxu1  ;;  %5216 = vmatpush.bf16.msra.mxu0 %v14747_v50 }
 0x32b   :  { %v14927_v4 = vadd.f32 %v1786_v38, %v14619_v62 }
 0x32e   :  { %v2026_v13 = vpop.f32.mrf.mxu2  ;;  %v1516_v53 = vpop.f32.mrf.mxu0  ;;  %5217 = vmatpush.bf16.msra.mxu0 %v14756_v54  ;;  %v11717_v54 = vld [vmem:[%s19700_s0 + $0x64] sm:$0xf] }
 0x32f   :  { %v2027_v47 = vadd.f32 %v14573_v25, %v2026_v13  ;;  %v1517_v55 = vadd.f32 %v14573_v25, %v1516_v53  ;;  %v14943_v38 = vor.u32 %v13458_v16, %v11717_v54  ;;  %v11721_v16 = vld [vmem:[%s19700_s0 + $0x84] sm:$0xf] }
 0x331   :  { %v2147_v40 = vmax.f32 %v2027_v47, 0.0  ;;  %v1589_v29 = vmax.f32 %v1517_v55, 0.0  ;;  %3196 = vrot.lane.b32.xlu0 %v14943_v38, %s13744_s21 }
 0x332   :  { %v1789_v62 = vpop.f32.mrf.mxu1 }
 0x333   :  { %v2195_v50 = vpack.c.bf16 %v2147_v40, %v2146_v43  ;;  %11639 = vmatmul.msk.bf16.gmra.mxu2 %vm228_vm0, %v14659_v12  ;;  %v1621_v51 = vpack.c.bf16 %v1589_v29, %v1588_v31 }
 0x335   :  { %11679 = vmatmul.msk.bf16.gmra.mxu3 %vm888_vm1, %v2195_v50  ;;  %11621 = vmatmul.msk.bf16.gmra.mxu1 %vm888_vm1, %v1621_v51 }
 0x336   :  { %v2029_v10 = vpop.f32.mrf.mxu2  ;;  %v1519_v60 = vpop.f32.mrf.mxu0 }
 0x337   :  { %v1520_v6 = vadd.f32 %v14589_v52, %v1519_v60  ;;  %v2030_v8 = vadd.f32 %v14589_v52, %v2029_v10 }
 0x339   :  { %11804 = vmatmul.msk.bf16.gmra.mxu0 %vm228_vm0, %v14893_v14  ;;  %v1590_v31 = vmax.f32 %v1520_v6, 0.0  ;;  %v2148_v43 = vmax.f32 %v2030_v8, 0.0 }
 0x33a   :  { %v1790_v12 = vpop.f32.mrf.mxu1 }
 0x33b   :  { %v13459_v12 = vld [vmem:[%s19700_s0 + $0x90] sm:$0xf0] }
 0x33e   :  { %v2031_v13 = vpop.f32.mrf.mxu2  ;;  %v1521_v53 = vpop.f32.mrf.mxu0 }
 0x33f   :  { %v2032_v47 = vadd.f32 %v14573_v25, %v2031_v13  ;;  %v1522_v55 = vadd.f32 %v14573_v25, %v1521_v53 }
 0x341   :  { %v2149_v40 = vmax.f32 %v2032_v47, 0.0  ;;  %v1591_v29 = vmax.f32 %v1522_v55, 0.0 }
 0x342   :  { %v1792_v62 = vpop.f32.mrf.mxu1 }
 0x343   :  { %v2196_v50 = vpack.c.bf16 %v2149_v40, %v2148_v43  ;;  %11640 = vmatmul.msk.bf16.gmra.mxu2 %vm228_vm0, %v14679_v27  ;;  %v1622_v51 = vpack.c.bf16 %v1591_v29, %v1590_v31  ;;  %v14956_v60 = vadd.f32 %v1792_v62, %v14638_v15  ;;  %v14966_v27 = vor.u32 %v13459_v12, %v11721_v16  ;;  %v14981_v43 = vld [vmem:[%s19702_s5 + $0x8] sm:$0xff]  ;;  %v11725_v16 = vld [vmem:[%s19700_s0 + $0xa4] sm:$0xf]  ;;  %v13460_v12 = vld [vmem:[%s19700_s0 + $0xb0] sm:$0xf0] }
 0x345   :  { %11680 = vmatmul.msk.bf16.gmra.mxu3 %vm888_vm1, %v2196_v50  ;;  %11622 = vmatmul.msk.bf16.gmra.mxu1 %vm888_vm1, %v1622_v51 }
 0x346   :  { %v2034_v10 = vpop.f32.mrf.mxu2  ;;  %v1524_v54 = vpop.f32.mrf.mxu0  ;;  %3198 = vrot.lane.b32.xlu1 %v14966_v27, %s13744_s21 }
 0x347   :  { %v1525_v6 = vadd.f32 %v14589_v52, %v1524_v54  ;;  %v2035_v13 = vadd.f32 %v14589_v52, %v2034_v10 }
 0x349   :  { %11805 = vmatmul.msk.bf16.gmra.mxu0 %vm228_vm0, %v14918_v44  ;;  %v1592_v55 = vmax.f32 %v1525_v6, 0.0  ;;  %v2150_v29 = vmax.f32 %v2035_v13, 0.0 }
 0x34a   :  { %v1794_v15 = vpop.f32.mrf.mxu1 }
 0x34b   :  { %v14974_v8 = vadd.f32 %v1794_v15, %v14646_v56  ;;  %v15006_v15 = vld [vmem:[%s19702_s5] sm:$0xff] }
 0x34e   :  { %v2036_v47 = vpop.f32.mrf.mxu2  ;;  %v1526_v31 = vpop.f32.mrf.mxu0 }
 0x34f   :  { %v2037_v53 = vadd.f32 %v14573_v25, %v2036_v47  ;;  %v1527_v40 = vadd.f32 %v14981_v43, %v1526_v31 }
 0x351   :  { %v2151_v50 = vmax.f32 %v2037_v53, 0.0  ;;  %v1593_v62 = vmax.f32 %v1527_v40, 0.0 }
 0x352   :  { %v1797_v52 = vpop.f32.mrf.mxu1 }
 0x353   :  { %v2197_v51 = vpack.c.bf16 %v2151_v50, %v2150_v29  ;;  %11641 = vmatmul.msk.bf16.gmra.mxu2 %vm228_vm0, %v14694_v59  ;;  %v1623_v56 = vpack.c.bf16 %v1593_v62, %v1592_v55  ;;  %v14987_v25 = vadd.f32 %v1797_v52, %v14653_v2  ;;  %v14997_v59 = vor.u32 %v13460_v12, %v11725_v16  ;;  %v11729_v12 = vld [vmem:[%s19700_s0 + $0xc4] sm:$0xf] }
 0x355   :  { %11681 = vmatmul.msk.bf16.gmra.mxu3 %vm888_vm1, %v2197_v51  ;;  %11623 = vmatmul.msk.bf16.gmra.mxu1 %vm888_vm1, %v1623_v56 }
 0x356   :  { %v2039_v10 = vpop.f32.mrf.mxu2  ;;  %v1529_v54 = vpop.f32.mrf.mxu0  ;;  %3200 = vrot.lane.b32.xlu2 %v14997_v59, %s13744_s21 }
 0x357   :  { %v1530_v6 = vadd.f32 %v15006_v15, %v1529_v54  ;;  %v2040_v47 = vadd.f32 %v15006_v15, %v2039_v10 }
 0x359   :  { %11806 = vmatmul.msk.bf16.gmra.mxu0 %vm228_vm0, %v14943_v38  ;;  %v1594_v40 = vmax.f32 %v1530_v6, 0.0  ;;  %v2152_v50 = vmax.f32 %v2040_v47, 0.0 }
 0x35a   :  { %v1799_v2 = vpop.f32.mrf.mxu1 }
 0x35b   :  { %v15010_v13 = vadd.f32 %v1799_v2, %v14663_v32  ;;  %v13461_v2 = vld [vmem:[%s19700_s0 + $0xd0] sm:$0xf0] }
 0x35e   :  { %v2041_v53 = vpop.f32.mrf.mxu2  ;;  %v1531_v55 = vpop.f32.mrf.mxu0 }
 0x35f   :  { %v2042_v31 = vadd.f32 %v14981_v43, %v2041_v53  ;;  %v1532_v29 = vadd.f32 %v14981_v43, %v1531_v55 }
 0x361   :  { %v2153_v62 = vmax.f32 %v2042_v31, 0.0  ;;  %v1595_v51 = vmax.f32 %v1532_v29, 0.0 }
 0x362   :  { %v1802_v56 = vpop.f32.mrf.mxu1 }
 0x363   :  { %v2198_v52 = vpack.c.bf16 %v2153_v62, %v2152_v50  ;;  %11642 = vmatmul.msk.bf16.gmra.mxu2 %vm228_vm0, %v14709_v34  ;;  %v1624_v54 = vpack.c.bf16 %v1595_v51, %v1594_v40  ;;  %v15018_v32 = vadd.f32 %v1802_v56, %v14670_v49  ;;  %v15028_v34 = vor.u32 %v13461_v2, %v11729_v12 }
 0x365   :  { %11682 = vmatmul.msk.bf16.gmra.mxu3 %vm888_vm1, %v2198_v52  ;;  %11624 = vmatmul.msk.bf16.gmra.mxu1 %vm888_vm1, %v1624_v54 }
 0x366   :  { %v2044_v10 = vpop.f32.mrf.mxu2  ;;  %v1534_v16 = vpop.f32.mrf.mxu0  ;;  %3202 = vrot.lane.b32.xlu0 %v15028_v34, %s13744_s21 }
 0x367   :  { %v1535_v6 = vadd.f32 %v15006_v15, %v1534_v16  ;;  %v2045_v53 = vadd.f32 %v15006_v15, %v2044_v10  ;;  %v13486_v10 = vld [vmem:[%s19701_s2 + $0xb0] sm:$0xff] }
 0x368   :  { %3637 = vmatpush.bf16.msra.mxu3 %v13486_v10 }
 0x369   :  { %11807 = vmatmul.msk.bf16.gmra.mxu0 %vm228_vm0, %v14966_v27  ;;  %v1596_v29 = vmax.f32 %v1535_v6, 0.0  ;;  %v2154_v62 = vmax.f32 %v2045_v53, 0.0  ;;  %v13482_v6 = vld [vmem:[%s19701_s2 + $0x90] sm:$0xff]  ;;  %v1252_v53 = vadd.f32 %v14661_v42, %v14696_v35 }
 0x36a   :  { %v1804_v49 = vpop.f32.mrf.mxu1  ;;  %3047 = vmatpush.bf16.msra.mxu1 %v13482_v6  ;;  %v13463_v6 = vld [vmem:[%s19700_s0 + $0x110] sm:$0xf0] }
 0x36b   :  { %v15036_v47 = vadd.f32 %v1804_v49, %v14681_v7 }
 0x36e   :  { %v2046_v31 = vpop.f32.mrf.mxu2  ;;  %v1536_v40 = vpop.f32.mrf.mxu0 }
 0x36f   :  { %v2047_v55 = vadd.f32 %v14981_v43, %v2046_v31  ;;  %v1537_v50 = vadd.f32 %v14981_v43, %v1536_v40 }
 0x371   :  { %v2155_v51 = vmax.f32 %v2047_v55, 0.0  ;;  %v1597_v52 = vmax.f32 %v1537_v50, 0.0 }
 0x372   :  { %v1807_v54 = vpop.f32.mrf.mxu1 }
 0x373   :  { %v2199_v56 = vpack.c.bf16 %v2155_v51, %v2154_v62  ;;  %11643 = vmatmul.msk.bf16.gmra.mxu2 %vm228_vm0, %v14722_v1  ;;  %v1625_v16 = vpack.c.bf16 %v1597_v52, %v1596_v29  ;;  %v15044_v7 = vadd.f32 %v1807_v54, %v14688_v24  ;;  %v11733_v1 = vld [vmem:[%s19700_s0 + $0xe4] sm:$0xf]  ;;  %v13462_v24 = vld [vmem:[%s19700_s0 + $0xf0] sm:$0xf0] }
 0x374   :  { %v15057_v49 = vor.u32 %v13462_v24, %v11733_v1  ;;  %v11737_v24 = vld [vmem:[%s19700_s0 + $0x104] sm:$0xf] }
 0x375   :  { %11683 = vmatmul.msk.bf16.gmra.mxu3 %vm888_vm1, %v2199_v56  ;;  %11625 = vmatmul.msk.bf16.gmra.mxu1 %vm888_vm1, %v1625_v16 }
 0x376   :  { %v2049_v12 = vpop.f32.mrf.mxu2  ;;  %v1539_v2 = vpop.f32.mrf.mxu0  ;;  %3204 = vrot.lane.b32.xlu1 %v15057_v49, %s13744_s21 }
 0x377   :  { %v1540_v55 = vadd.f32 %v15006_v15, %v1539_v2  ;;  %v2050_v29 = vadd.f32 %v15006_v15, %v2049_v12 }
 0x379   :  { %11808 = vmatmul.msk.bf16.gmra.mxu0 %vm228_vm0, %v14997_v59  ;;  %v1598_v52 = vmax.f32 %v1540_v55, 0.0  ;;  %v2156_v35 = vmax.f32 %v2050_v29, 0.0  ;;  %v13481_v29 = vld [vmem:[%s19701_s2 + $0x88] sm:$0xff] }
 0x37a   :  { %v1809_v31 = vpop.f32.mrf.mxu1  ;;  %3048 = vmatpush.bf16.msra.mxu1 %v13481_v29 }
 0x37b   :  { %v15069_v40 = vadd.f32 %v1809_v31, %v1252_v53  ;;  %v15084_v53 = vor.u32 %v13463_v6, %v11737_v24 }
 0x37d   :  { %3206 = vrot.lane.b32.xlu2 %v15084_v53, %s13744_s21 }
 0x37e   :  { %v2051_v50 = vpop.f32.mrf.mxu2  ;;  %v1541_v51 = vpop.f32.mrf.mxu0 }
 0x37f   :  { %v2052_v62 = vadd.f32 %v14981_v43, %v2051_v50  ;;  %v1542_v42 = vadd.f32 %v14981_v43, %v1541_v51 }
 0x381   :  { %v2157_v56 = vmax.f32 %v2052_v62, 0.0  ;;  %v1599_v54 = vmax.f32 %v1542_v42, 0.0 }
 0x382   :  { %v1812_v10 = vpop.f32.mrf.mxu1 }
 0x383   :  { %v2200_v16 = vpack.c.bf16 %v2157_v56, %v2156_v35  ;;  %11644 = vmatmul.msk.bf16.gmra.mxu2 %vm228_vm0, %v14735_v18  ;;  %v1626_v2 = vpack.c.bf16 %v1599_v54, %v1598_v52  ;;  %v13480_v54 = vld [vmem:[%s19701_s2 + $0x80] sm:$0xff] }
 0x384   :  { %3049 = vmatpush.bf16.msra.mxu1 %v13480_v54 }
 0x385   :  { %11684 = vmatmul.msk.bf16.gmra.mxu3 %vm888_vm1, %v2200_v16  ;;  %11626 = vmatmul.msk.bf16.gmra.mxu1 %vm888_vm1, %v1626_v2 }
 0x386   :  { %v2054_v1 = vpop.f32.mrf.mxu2  ;;  %v1544_v12 = vpop.f32.mrf.mxu0 }
 0x387   :  { %v1545_v31 = vadd.f32 %v15006_v15, %v1544_v12  ;;  %v2055_v55 = vadd.f32 %v15006_v15, %v2054_v1 }
 0x389   :  { %11809 = vmatmul.msk.bf16.gmra.mxu0 %vm228_vm0, %v15028_v34  ;;  %v1600_v52 = vmax.f32 %v1545_v31, 0.0  ;;  %v2158_v35 = vmax.f32 %v2055_v55, 0.0 }
 0x38a   :  { %v1813_v18 = vpop.f32.mrf.mxu1 }
 0x38b   :  { %v11741_v18 = vld [vmem:[%s19700_s0 + $0x124] sm:$0xf] }
 0x38e   :  { %v2056_v50 = vpop.f32.mrf.mxu2  ;;  %v1546_v51 = vpop.f32.mrf.mxu0 }
 0x38f   :  { %v2057_v62 = vadd.f32 %v14981_v43, %v2056_v50  ;;  %v1547_v42 = vadd.f32 %v14981_v43, %v1546_v51 }
 0x391   :  { %v2159_v56 = vmax.f32 %v2057_v62, 0.0  ;;  %v1601_v16 = vmax.f32 %v1547_v42, 0.0 }
 0x392   :  { %v1815_v2 = vpop.f32.mrf.mxu1 }
 0x393   :  { %v2201_v10 = vpack.c.bf16 %v2159_v56, %v2158_v35  ;;  %11645 = vmatmul.msk.bf16.gmra.mxu2 %vm228_vm0, %v14761_v37  ;;  %v1627_v1 = vpack.c.bf16 %v1601_v16, %v1600_v52  ;;  %v15103_v12 = vadd.f32 %v1815_v2, %v14716_v0  ;;  %v13464_v37 = vld [vmem:[%s19700_s0 + $0x130] sm:$0xf0]  ;;  %v1260_v0 = vadd.f32 %v14698_v9, %v14724_v11 }
 0x394   :  { %v15113_v31 = vor.u32 %v13464_v37, %v11741_v18  ;;  %v11745_v18 = vld [vmem:[%s19700_s0 + $0x144] sm:$0xf]  ;;  %v13465_v37 = vld [vmem:[%s19700_s0 + $0x150] sm:$0xf0] }
 0x395   :  { %11685 = vmatmul.msk.bf16.gmra.mxu3 %vm888_vm1, %v2201_v10  ;;  %11627 = vmatmul.msk.bf16.gmra.mxu1 %vm888_vm1, %v1627_v1 }
 0x396   :  { %v2059_v24 = vpop.f32.mrf.mxu2  ;;  %v1549_v6 = vpop.f32.mrf.mxu0  ;;  %3208 = vrot.lane.b32.xlu0 %v15113_v31, %s13744_s21 }
 0x397   :  { %v1550_v29 = vadd.f32 %v15006_v15, %v1549_v6  ;;  %v2060_v62 = vadd.f32 %v15006_v15, %v2059_v24 }
 0x399   :  { %11810 = vmatmul.msk.bf16.gmra.mxu0 %vm228_vm0, %v15057_v49  ;;  %v1602_v35 = vmax.f32 %v1550_v29, 0.0  ;;  %v2160_v11 = vmax.f32 %v2060_v62, 0.0 }
 0x39a   :  { %v1817_v55 = vpop.f32.mrf.mxu1 }
 0x39b   :  { %v15122_v50 = vadd.f32 %v1817_v55, %v1260_v0  ;;  %v15140_v0 = vor.u32 %v13465_v37, %v11745_v18  ;;  %v19724_v55 = vld [vmem:[#allocation2_spill] sm:$0xff]  ;;  %v19726_v37 = vld [vmem:[#allocation5_spill] sm:$0xff] }
 0x39c   :  { %v1265_v29 = vadd.f32 %v19724_v55, %v14737_v19 }
 0x39d   :  { %3210 = vrot.lane.b32.xlu1 %v15140_v0, %s13744_s21 }
 0x39e   :  { %v2061_v51 = vpop.f32.mrf.mxu2  ;;  %v1551_v42 = vpop.f32.mrf.mxu0 }
 0x39f   :  { %v2062_v52 = vadd.f32 %v14981_v43, %v2061_v51  ;;  %v1552_v9 = vadd.f32 %v14981_v43, %v1551_v42 }
 0x3a1   :  { %v2161_v56 = vmax.f32 %v2062_v52, 0.0  ;;  %v1603_v54 = vmax.f32 %v1552_v9, 0.0 }
 0x3a2   :  { %v1820_v10 = vpop.f32.mrf.mxu1 }
 0x3a3   :  { %v2202_v16 = vpack.c.bf16 %v2161_v56, %v2160_v11  ;;  %11646 = vmatmul.msk.bf16.gmra.mxu2 %vm228_vm0, %v14782_v26  ;;  %v1628_v2 = vpack.c.bf16 %v1603_v54, %v1602_v35  ;;  %v15130_v1 = vadd.f32 %v1820_v10, %v14731_v61 }
 0x3a5   :  { %19723 = vst [vmem:[#allocation12_spill] sm:$0xff] %v15130_v1  ;;  %11686 = vmatmul.msk.bf16.gmra.mxu3 %vm888_vm1, %v2202_v16  ;;  %11628 = vmatmul.msk.bf16.gmra.mxu1 %vm888_vm1, %v1628_v2 }
 0x3a6   :  { %v2064_v24 = vpop.f32.mrf.mxu2  ;;  %v2734_v6 = vpop.f32.mrf.mxu0 }
 0x3a7   :  { %v2735_v51 = vadd.f32 %v15006_v15, %v2734_v6  ;;  %v2065_v42 = vadd.f32 %v15006_v15, %v2064_v24 }
 0x3a8   :  { %v2336_v26 = vpop.f32.mrf.mxu3 }
 0x3a9   :  { %v15143_v61 = vadd.f32 %v2336_v26, %v14769_v21  ;;  %11811 = vmatmul.msk.bf16.gmra.mxu0 %vm228_vm0, %v15084_v53  ;;  %v2859_v11 = vmax.f32 %v2735_v51, 0.0  ;;  %v2162_v54 = vmax.f32 %v2065_v42, 0.0 }
 0x3aa   :  { %v1822_v62 = vpop.f32.mrf.mxu1 }
 0x3ab   :  { %v15152_v52 = vadd.f32 %v1822_v62, %v1265_v29  ;;  %v13466_v62 = vld [vmem:[%s19700_s0 + $0x170] sm:$0xf0] }
 0x3ad   :  { %19725 = vst [vmem:[#allocation2_spill] sm:$0xff] %v15152_v52  ;;  %v11793_v52 = vld [vmem:[%s19700_s0 + $0x2c4] sm:$0xf] }
 0x3ae   :  { %v2066_v35 = vpop.f32.mrf.mxu2  ;;  %v2736_v9 = vpop.f32.mrf.mxu0 }
 0x3af   :  { %v2067_v21 = vadd.f32 %v14981_v43, %v2066_v35  ;;  %v2737_v19 = vadd.f32 %v14981_v43, %v2736_v9  ;;  %v19728_v35 = vld [vmem:[#allocation6_spill] sm:$0xff] }
 0x3b0   :  { %v2338_v56 = vpop.f32.mrf.mxu3 }
 0x3b1   :  { %v2163_v16 = vmax.f32 %v2067_v21, 0.0  ;;  %v15158_v10 = vadd.f32 %v2338_v56, %v14777_v48  ;;  %v2860_v2 = vmax.f32 %v2737_v19, 0.0  ;;  %v11749_v48 = vld [vmem:[%s19700_s0 + $0x164] sm:$0xf]  ;;  %v19729_v21 = vld [vmem:[#allocation3_spill] sm:$0xff] }
 0x3b2   :  { %v1825_v6 = vpop.f32.mrf.mxu1  ;;  %v15173_v51 = vor.u32 %v13466_v62, %v11749_v48  ;;  %v1270_v9 = vadd.f32 %v19729_v21, %v19728_v35 }
 0x3b3   :  { %v2203_v18 = vpack.c.bf16 %v2163_v16, %v2162_v54  ;;  %11647 = vmatmul.msk.bf16.gmra.mxu2 %vm228_vm0, %v14798_v5  ;;  %v2909_v24 = vpack.c.bf16 %v2860_v2, %v2859_v11  ;;  %v15163_v26 = vadd.f32 %v1825_v6, %v19726_v37 }
 0x3b4   :  { %3212 = vrot.lane.b32.xlu2 %v15173_v51, %s13744_s21 }
 0x3b5   :  { %19727 = vst [vmem:[#allocation5_spill] sm:$0xff] %v15163_v26  ;;  %11687 = vmatmul.msk.bf16.gmra.mxu3 %vm888_vm1, %v2203_v18  ;;  %11852 = vmatmul.msk.bf16.vlgmr.msra.gmra.mxu1 %vm888_vm1, %v2909_v24 }
 0x3b6   :  { %v2069_v55 = vpop.f32.mrf.mxu2  ;;  %v2739_v29 = vpop.f32.mrf.mxu0 }
 0x3b7   :  { %v2740_v56 = vadd.f32 %v15006_v15, %v2739_v29  ;;  %v2070_v54 = vadd.f32 %v15006_v15, %v2069_v55 }
 0x3b8   :  { %v2341_v5 = vpop.f32.mrf.mxu3 }
 0x3b9   :  { %v15176_v42 = vadd.f32 %v2341_v5, %v14790_v22  ;;  %11812 = vmatmul.msk.bf16.gmra.mxu0 %vm228_vm0, %v15113_v31  ;;  %v2861_v18 = vmax.f32 %v2740_v56, 0.0  ;;  %v2164_v37 = vmax.f32 %v2070_v54, 0.0  ;;  %v13467_v56 = vld [vmem:[%s19700_s0 + $0x190] sm:$0xf0] }
 0x3ba   :  { %v1827_v11 = vpop.f32.mrf.mxu1 }
 0x3bb   :  { %v15185_v19 = vadd.f32 %v1827_v11, %v1270_v9 }
 0x3bd   :  { %19730 = vst [vmem:[#allocation6_spill] sm:$0xff] %v15185_v19 }
 0x3be   :  { %v2071_v16 = vpop.f32.mrf.mxu2  ;;  %v2741_v2 = vpop.f32.mrf.mxu0 }
 0x3bf   :  { %v2072_v22 = vadd.f32 %v14981_v43, %v2071_v16  ;;  %v2742_v24 = vadd.f32 %v14981_v43, %v2741_v2  ;;  %v19732_v16 = vld [vmem:[#allocation7_spill] sm:$0xff] }
 0x3c0   :  { %v2343_v6 = vpop.f32.mrf.mxu3 }
 0x3c1   :  { %v2165_v48 = vmax.f32 %v2072_v22, 0.0  ;;  %v15191_v62 = vadd.f32 %v2343_v6, %v14796_v3  ;;  %v2862_v5 = vmax.f32 %v2742_v24, 0.0  ;;  %v11753_v3 = vld [vmem:[%s19700_s0 + $0x184] sm:$0xf]  ;;  %v19733_v22 = vld [vmem:[#allocation4_spill] sm:$0xff] }
 0x3c2   :  { %v1830_v29 = vpop.f32.mrf.mxu1  ;;  %v15206_v54 = vor.u32 %v13467_v56, %v11753_v3  ;;  %v1275_v2 = vadd.f32 %v19733_v22, %v19732_v16 }
 0x3c3   :  { %v2204_v35 = vpack.c.bf16 %v2165_v48, %v2164_v37  ;;  %11648 = vmatmul.msk.bf16.gmra.mxu2 %vm228_vm0, %v14812_v17  ;;  %v2910_v55 = vpack.c.bf16 %v2862_v5, %v2861_v18  ;;  %v15196_v21 = vadd.f32 %v1830_v29, %v14772_v46 }
 0x3c4   :  { %3214 = vrot.lane.b32.xlu0 %v15206_v54, %s13744_s21 }
 0x3c5   :  { %19731 = vst [vmem:[#allocation3_spill] sm:$0xff] %v15196_v21  ;;  %11688 = vmatmul.msk.bf16.gmra.mxu3 %vm888_vm1, %v2204_v35  ;;  %11853 = vmatmul.msk.bf16.gmra.mxu1 %vm888_vm1, %v2910_v55 }
 0x3c6   :  { %v2074_v9 = vpop.f32.mrf.mxu2  ;;  %v2744_v11 = vpop.f32.mrf.mxu0 }
 0x3c7   :  { %v2745_v6 = vadd.f32 %v15006_v15, %v2744_v11  ;;  %v2075_v37 = vadd.f32 %v15006_v15, %v2074_v9 }
 0x3c8   :  { %v2346_v17 = vpop.f32.mrf.mxu3 }
 0x3c9   :  { %v15209_v46 = vadd.f32 %v2346_v17, %v14804_v45  ;;  %11813 = vmatmul.msk.bf16.gmra.mxu0 %vm228_vm0, %v15140_v0  ;;  %v2863_v35 = vmax.f32 %v2745_v6, 0.0  ;;  %v2166_v3 = vmax.f32 %v2075_v37, 0.0  ;;  %v11757_v6 = vld [vmem:[%s19700_s0 + $0x1a4] sm:$0xf] }
 0x3ca   :  { %v1832_v18 = vpop.f32.mrf.mxu1 }
 0x3cb   :  { %v15218_v24 = vadd.f32 %v1832_v18, %v1275_v2 }
 0x3cd   :  { %19734 = vst [vmem:[#allocation7_spill] sm:$0xff] %v15218_v24 }
 0x3ce   :  { %v2076_v48 = vpop.f32.mrf.mxu2  ;;  %v2746_v5 = vpop.f32.mrf.mxu0 }
 0x3cf   :  { %v2077_v45 = vadd.f32 %v14981_v43, %v2076_v48  ;;  %v2747_v55 = vadd.f32 %v14981_v43, %v2746_v5  ;;  %v13485_v5 = vld [vmem:[%s19701_s2 + $0xa8] sm:$0xff] }
 0x3d0   :  { %v2348_v29 = vpop.f32.mrf.mxu3  ;;  %3638 = vmatpush.bf16.msra.mxu3 %v13485_v5 }
 0x3d1   :  { %v2167_v56 = vmax.f32 %v2077_v45, 0.0  ;;  %v15224_v17 = vadd.f32 %v2348_v29, %v14810_v33  ;;  %v2864_v16 = vmax.f32 %v2747_v55, 0.0  ;;  %v13468_v33 = vld [vmem:[%s19700_s0 + $0x1b0] sm:$0xf0] }
 0x3d2   :  { %v1835_v11 = vpop.f32.mrf.mxu1  ;;  %v15236_v48 = vor.u32 %v13468_v33, %v11757_v6 }
 0x3d3   :  { %v2205_v22 = vpack.c.bf16 %v2167_v56, %v2166_v3  ;;  %11649 = vmatmul.msk.bf16.gmra.mxu2 %vm228_vm0, %v14826_v63  ;;  %v2911_v9 = vpack.c.bf16 %v2864_v16, %v2863_v35  ;;  %v19735_v63 = vld [vmem:[#allocation8_spill] sm:$0xff] }
 0x3d4   :  { %3216 = vrot.lane.b32.xlu1 %v15236_v48, %s13744_s21 }
 0x3d5   :  { %11689 = vmatmul.msk.bf16.gmra.mxu3 %vm888_vm1, %v2205_v22  ;;  %11854 = vmatmul.msk.bf16.gmra.mxu1 %vm888_vm1, %v2911_v9 }
 0x3d6   :  { %v2079_v2 = vpop.f32.mrf.mxu2  ;;  %v2749_v18 = vpop.f32.mrf.mxu0 }
 0x3d7   :  { %v2750_v29 = vadd.f32 %v15006_v15, %v2749_v18  ;;  %v2080_v55 = vadd.f32 %v15006_v15, %v2079_v2 }
 0x3d8   :  { %v2351_v37 = vpop.f32.mrf.mxu3 }
 0x3d9   :  { %v15239_v45 = vadd.f32 %v2351_v37, %v19735_v63  ;;  %11814 = vmatmul.msk.bf16.gmra.mxu0 %vm228_vm0, %v15173_v51  ;;  %v2865_v22 = vmax.f32 %v2750_v29, 0.0  ;;  %v2168_v6 = vmax.f32 %v2080_v55, 0.0  ;;  %v19736_v37 = vld [vmem:[#allocation9_spill] sm:$0xff]  ;;  %v11761_v55 = vld [vmem:[%s19700_s0 + $0x1c4] sm:$0xf] }
 0x3da   :  { %v1836_v35 = vpop.f32.mrf.mxu1 }
 0x3de   :  { %v2081_v3 = vpop.f32.mrf.mxu2  ;;  %v2751_v16 = vpop.f32.mrf.mxu0 }
 0x3df   :  { %v2082_v56 = vadd.f32 %v14981_v43, %v2081_v3  ;;  %v2752_v9 = vadd.f32 %v14981_v43, %v2751_v16  ;;  %v13469_v3 = vld [vmem:[%s19700_s0 + $0x1d0] sm:$0xf0] }
 0x3e0   :  { %v2353_v11 = vpop.f32.mrf.mxu3  ;;  %v15265_v16 = vor.u32 %v13469_v3, %v11761_v55 }
 0x3e1   :  { %v2169_v33 = vmax.f32 %v2082_v56, 0.0  ;;  %v15253_v63 = vadd.f32 %v2353_v11, %v19736_v37  ;;  %v2866_v24 = vmax.f32 %v2752_v9, 0.0 }
 0x3e2   :  { %v1838_v18 = vpop.f32.mrf.mxu1  ;;  %3218 = vrot.lane.b32.xlu2 %v15265_v16, %s13744_s21 }
 0x3e3   :  { %v2206_v35 = vpack.c.bf16 %v2169_v33, %v2168_v6  ;;  %11650 = vmatmul.msk.bf16.gmra.mxu2 %vm228_vm0, %v14834_v28  ;;  %v2912_v2 = vpack.c.bf16 %v2866_v24, %v2865_v22 }
 0x3e5   :  { %11690 = vmatmul.msk.bf16.gmra.mxu3 %vm888_vm1, %v2206_v35  ;;  %11855 = vmatmul.msk.bf16.gmra.mxu1 %vm888_vm1, %v2912_v2 }
 0x3e6   :  { %v2084_v5 = vpop.f32.mrf.mxu2  ;;  %v2754_v29 = vpop.f32.mrf.mxu0 }
 0x3e7   :  { %v2755_v24 = vadd.f32 %v15006_v15, %v2754_v29  ;;  %v2085_v22 = vadd.f32 %v15006_v15, %v2084_v5 }
 0x3e8   :  { %v2356_v56 = vpop.f32.mrf.mxu3 }
 0x3e9   :  { %11815 = vmatmul.msk.bf16.gmra.mxu0 %vm228_vm0, %v15206_v54  ;;  %v2867_v33 = vmax.f32 %v2755_v24, 0.0  ;;  %v2170_v18 = vmax.f32 %v2085_v22, 0.0  ;;  %v11765_v24 = vld [vmem:[%s19700_s0 + $0x1e4] sm:$0xf]  ;;  %v13470_v22 = vld [vmem:[%s19700_s0 + $0x1f0] sm:$0xf0] }
 0x3ea   :  { %v1839_v28 = vpop.f32.mrf.mxu1 }
 0x3ee   :  { %v2086_v11 = vpop.f32.mrf.mxu2  ;;  %v2756_v6 = vpop.f32.mrf.mxu0 }
 0x3ef   :  { %v2087_v9 = vadd.f32 %v14981_v43, %v2086_v11  ;;  %v2757_v35 = vadd.f32 %v14981_v43, %v2756_v6 }
 0x3f0   :  { %v2357_v37 = vpop.f32.mrf.mxu3 }
 0x3f1   :  { %v2171_v2 = vmax.f32 %v2087_v9, 0.0  ;;  %v2868_v55 = vmax.f32 %v2757_v35, 0.0  ;;  %v15285_v9 = vor.u32 %v13470_v22, %v11765_v24 }
 0x3f2   :  { %v1841_v56 = vpop.f32.mrf.mxu1 }
 0x3f3   :  { %v2207_v3 = vpack.c.bf16 %v2171_v2, %v2170_v18  ;;  %11651 = vmatmul.msk.bf16.gmra.mxu2 %vm228_vm0, %v14848_v39  ;;  %v2913_v28 = vpack.c.bf16 %v2868_v55, %v2867_v33  ;;  %3220 = vrot.lane.b32.xlu0 %v15285_v9, %s13744_s21 }
 0x3f5   :  { %11691 = vmatmul.msk.bf16.gmra.mxu3 %vm888_vm1, %v2207_v3  ;;  %11856 = vmatmul.msk.bf16.gmra.mxu1 %vm888_vm1, %v2913_v28 }
 0x3f6   :  { %v2089_v5 = vpop.f32.mrf.mxu2  ;;  %v2759_v29 = vpop.f32.mrf.mxu0 }
 0x3f7   :  { %v2760_v33 = vadd.f32 %v15006_v15, %v2759_v29  ;;  %v2090_v37 = vadd.f32 %v15006_v15, %v2089_v5 }
 0x3f8   :  { %v2359_v11 = vpop.f32.mrf.mxu3 }
 0x3f9   :  { %v15288_v39 = vadd.f32 %v2359_v11, %v14840_v58  ;;  %11816 = vmatmul.msk.bf16.gmra.mxu0 %vm228_vm0, %v15236_v48  ;;  %v2869_v55 = vmax.f32 %v2760_v33, 0.0  ;;  %v2172_v56 = vmax.f32 %v2090_v37, 0.0  ;;  %v11769_v37 = vld [vmem:[%s19700_s0 + $0x204] sm:$0xf] }
 0x3fa   :  { %v1842_v6 = vpop.f32.mrf.mxu1 }
 0x3fe   :  { %v2091_v35 = vpop.f32.mrf.mxu2  ;;  %v2761_v2 = vpop.f32.mrf.mxu0 }
 0x3ff   :  { %v2092_v18 = vadd.f32 %v14981_v43, %v2091_v35  ;;  %v2762_v58 = vadd.f32 %v14981_v43, %v2761_v2 }
 0x400   :  { %v2361_v3 = vpop.f32.mrf.mxu3 }
 0x401   :  { %v2173_v28 = vmax.f32 %v2092_v18, 0.0  ;;  %v15299_v24 = vadd.f32 %v2361_v3, %v14846_v23  ;;  %v2870_v22 = vmax.f32 %v2762_v58, 0.0  ;;  %v13471_v23 = vld [vmem:[%s19700_s0 + $0x210] sm:$0xf0] }
 0x402   :  { %v1844_v29 = vpop.f32.mrf.mxu1  ;;  %v15311_v18 = vor.u32 %v13471_v23, %v11769_v37  ;;  %v19737_v23 = vld [vmem:[#allocation10_spill] sm:$0xff] }
 0x403   :  { %v2208_v11 = vpack.c.bf16 %v2173_v28, %v2172_v56  ;;  %11652 = vmatmul.msk.bf16.gmra.mxu2 %vm228_vm0, %v14872_v57  ;;  %v2914_v5 = vpack.c.bf16 %v2870_v22, %v2869_v55  ;;  %v1934_v29 = vpop.permute.xlu1 %1933 }
 0x404   :  { %3222 = vrot.lane.b32.xlu1 %v15311_v18, %s13744_s21 }
 0x405   :  { %11692 = vmatmul.msk.bf16.gmra.mxu3 %vm888_vm1, %v2208_v11  ;;  %11857 = vmatmul.msk.bf16.gmra.mxu1 %vm888_vm1, %v2914_v5 }
 0x406   :  { %v2094_v6 = vpop.f32.mrf.mxu2  ;;  %v2764_v33 = vpop.f32.mrf.mxu0 }
 0x407   :  { %v2765_v55 = vadd.f32 %v15006_v15, %v2764_v33  ;;  %v2095_v3 = vadd.f32 %v15006_v15, %v2094_v6 }
 0x408   :  { %v2364_v35 = vpop.f32.mrf.mxu3 }
 0x409   :  { %v15314_v57 = vadd.f32 %v2364_v35, %v14854_v20  ;;  %11817 = vmatmul.msk.bf16.gmra.mxu0 %vm228_vm0, %v15265_v16  ;;  %v2871_v22 = vmax.f32 %v2765_v55, 0.0  ;;  %v2174_v5 = vmax.f32 %v2095_v3, 0.0  ;;  %v11773_v3 = vld [vmem:[%s19700_s0 + $0x224] sm:$0xf] }
 0x40a   :  { %v1845_v2 = vpop.f32.mrf.mxu1 }
 0x40e   :  { %v2096_v58 = vpop.f32.mrf.mxu2  ;;  %v2766_v28 = vpop.f32.mrf.mxu0 }
 0x40f   :  { %v2097_v56 = vadd.f32 %v14981_v43, %v2096_v58  ;;  %v2767_v20 = vadd.f32 %v14981_v43, %v2766_v28 }
 0x410   :  { %v2366_v11 = vpop.f32.mrf.mxu3 }
 0x411   :  { %v2175_v37 = vmax.f32 %v2097_v56, 0.0  ;;  %v15325_v35 = vadd.f32 %v2366_v11, %v19737_v23  ;;  %v2872_v21 = vmax.f32 %v2767_v20, 0.0  ;;  %v13472_v56 = vld [vmem:[%s19700_s0 + $0x230] sm:$0xf0]  ;;  %v19738_v20 = vld [vmem:[#allocation11_spill] sm:$0xff] }
 0x412   :  { %v1847_v33 = vpop.f32.mrf.mxu1  ;;  %v15336_v11 = vor.u32 %v13472_v56, %v11773_v3 }
 0x413   :  { %v2209_v2 = vpack.c.bf16 %v2175_v37, %v2174_v5  ;;  %11653 = vmatmul.msk.bf16.gmra.mxu2 %vm228_vm0, %v1934_v29  ;;  %v2915_v6 = vpack.c.bf16 %v2872_v21, %v2871_v22  ;;  %v11781_v5 = vld [vmem:[%s19700_s0 + $0x264] sm:$0xf]  ;;  %v13474_v37 = vld [vmem:[%s19700_s0 + $0x270] sm:$0xf0] }
 0x414   :  { %3224 = vrot.lane.b32.xlu2 %v15336_v11, %s13744_s21 }
 0x415   :  { %11693 = vmatmul.msk.bf16.gmra.mxu3 %vm888_vm1, %v2209_v2  ;;  %11858 = vmatmul.msk.bf16.gmra.mxu1 %vm888_vm1, %v2915_v6  ;;  %v15353_v2 = vor.u32 %v13474_v37, %v11781_v5 }
 0x416   :  { %v2099_v58 = vpop.f32.mrf.mxu2  ;;  %v2769_v55 = vpop.f32.mrf.mxu0 }
 0x417   :  { %v2770_v22 = vadd.f32 %v15006_v15, %v2769_v55  ;;  %v2100_v23 = vadd.f32 %v15006_v15, %v2099_v58  ;;  %3228 = vrot.lane.b32.xlu1 %v15353_v2, %s13744_s21 }
 0x418   :  { %v2369_v28 = vpop.f32.mrf.mxu3 }
 0x419   :  { %v15339_v29 = vadd.f32 %v2369_v28, %v19738_v20  ;;  %11818 = vmatmul.msk.bf16.gmra.mxu0 %vm228_vm0, %v15285_v9  ;;  %v2873_v55 = vmax.f32 %v2770_v22, 0.0  ;;  %v3191_v20 = vpop.permute.xlu0 %3190  ;;  %v13477_v22 = vld [vmem:[%s19700_s0 + $0x2d0] sm:$0xf0] }
 0x41a   :  { %v1848_v21 = vpop.f32.mrf.mxu1 }
 0x41b   :  { %v2176_v21 = vmax.f32 %v2100_v23, 0.0  ;;  %v11777_v23 = vld [vmem:[%s19700_s0 + $0x244] sm:$0xf] }
 0x41e   :  { %v2101_v33 = vpop.f32.mrf.mxu2  ;;  %v2771_v3 = vpop.f32.mrf.mxu0 }
 0x41f   :  { %v2102_v6 = vadd.f32 %v14981_v43, %v2101_v33  ;;  %v2772_v28 = vadd.f32 %v14981_v43, %v2771_v3 }
 0x420   :  { %v2371_v56 = vpop.f32.mrf.mxu3 }
 0x421   :  { %v2177_v19 = vmax.f32 %v2102_v6, 0.0  ;;  %v15360_v26 = vadd.f32 %v2371_v56, %v14900_v41  ;;  %v2874_v58 = vmax.f32 %v2772_v28, 0.0  ;;  %v15375_v41 = vld [vmem:[%s19699_s1 + $0x8] sm:$0xff]  ;;  %v13473_v6 = vld [vmem:[%s19700_s0 + $0x250] sm:$0xf0] }
 0x422   :  { %v1850_v37 = vpop.f32.mrf.mxu1  ;;  %19740 = vst [vmem:[#allocation8_spill] sm:$0xff] %v15375_v41 }
 0x423   :  { %19739 = vst [vmem:[#allocation4_spill] sm:$0xff] %v15360_v26  ;;  %v2210_v5 = vpack.c.bf16 %v2177_v19, %v2176_v21  ;;  %11877 = vmatmul.msk.bf16.vlgmr.msra.gmra.mxu2 %vm228_vm0, %v3191_v20  ;;  %v2916_v33 = vpack.c.bf16 %v2874_v58, %v2873_v55  ;;  %v15379_v19 = vor.u32 %v13477_v22, %v11793_v52  ;;  %v15394_v52 = vld [vmem:[%s19699_s1] sm:$0xff]  ;;  %v13475_v37 = vld [vmem:[%s19700_s0 + $0x290] sm:$0xf0] }
 0x424   :  { %5806 = vmatpush.bf16.msra.mxu2 %v15375_v41  ;;  %v15385_v55 = vor.u32 %v13473_v6, %v11777_v23  ;;  %19741 = vst [vmem:[#allocation9_spill] sm:$0xff] %v15394_v52  ;;  %v13476_v23 = vld [vmem:[%s19700_s0 + $0x2b0] sm:$0xf0] }
 0x425   :  { %11694 = vmatmul.msk.bf16.gmra.mxu3 %vm888_vm1, %v2210_v5  ;;  %11859 = vmatmul.msk.bf16.gmra.mxu1 %vm888_vm1, %v2916_v33  ;;  %v11785_v5 = vld [vmem:[%s19700_s0 + $0x284] sm:$0xf] }
 0x426   :  { %v2104_v3 = vpop.f32.mrf.mxu2  ;;  %v2774_v56 = vpop.f32.mrf.mxu0  ;;  %3234 = vrot.lane.b32.xlu1 %v15379_v19, %s13744_s21  ;;  %3226 = vrot.lane.b32.xlu0 %v15385_v55, %s13744_s21  ;;  %v11789_v33 = vld [vmem:[%s19700_s0 + $0x2a4] sm:$0xf]  ;;  %v15413_v22 = vor.u32 %v13475_v37, %v11785_v5 }
 0x427   :  { %v2775_v58 = vadd.f32 %v15006_v15, %v2774_v56  ;;  %v15418_v56 = vor.u32 %v13476_v23, %v11789_v33  ;;  %v3193_v37 = vpop.permute.xlu1 %3192 }
 0x428   :  { %v2374_v28 = vpop.f32.mrf.mxu3  ;;  %5807 = vmatpush.bf16.msra.mxu2 %v15394_v52  ;;  %3230 = vrot.lane.b32.xlu2 %v15413_v22, %s13744_s21 }
 0x429   :  { %v15398_v20 = vadd.f32 %v2374_v28, %v14908_v36  ;;  %11819 = vmatmul.msk.bf16.gmra.mxu0 %vm228_vm0, %v15311_v18  ;;  %v2105_v36 = vadd.f32 %v15006_v15, %v2104_v3  ;;  %v2875_v52 = vmax.f32 %v2775_v58, 0.0 }
 0x42a   :  { %v1851_v21 = vpop.f32.mrf.mxu1 }
 0x42b   :  { %19742 = vst [vmem:[#allocation10_spill] sm:$0xff] %v15398_v20  ;;  %v2178_v41 = vmax.f32 %v2105_v36, 0.0  ;;  %v13478_v36 = vld [vmem:[%s19700_s0 + $0x2f0] sm:$0xf0] }
 0x42e   :  { %v2106_v6 = vpop.f32.mrf.mxu2  ;;  %v2776_v21 = vpop.f32.mrf.mxu0  ;;  %4370 = vrot.lane.b32.xlu1 %v14863_v30, %s13745_s26  ;;  %3232 = vrot.lane.b32.xlu0 %v15418_v56, %s13744_s21 }
 0x42f   :  { %v2107_v28 = vadd.f32 %v14981_v43, %v2106_v6  ;;  %v2777_v5 = vadd.f32 %v14981_v43, %v2776_v21  ;;  %v11797_v21 = vld [vmem:[%s19700_s0 + $0x2e4] sm:$0xf] }
 0x430   :  { %v2376_v3 = vpop.f32.mrf.mxu3 }
 0x431   :  { %v2179_v33 = vmax.f32 %v2107_v28, 0.0  ;;  %v15429_v23 = vadd.f32 %v2376_v3, %v14927_v4  ;;  %v2876_v6 = vmax.f32 %v2777_v5, 0.0  ;;  %v11801_v4 = vld [vmem:[%s19700_s0 + $0x304] sm:$0xf] }
 0x432   :  { %v3051_v26 = vpop.f32.mrf.mxu1 }
 0x433   :  { %v2211_v20 = vpack.c.bf16 %v2179_v33, %v2178_v41  ;;  %11878 = vmatmul.msk.bf16.gmra.mxu2 %vm228_vm0, %v3193_v37  ;;  %v2917_v1 = vpack.c.bf16 %v2876_v6, %v2875_v52  ;;  %v15433_v58 = vadd.f32 %v3051_v26, %v15143_v61  ;;  %v15445_v41 = vor.u32 %v13478_v36, %v11797_v21  ;;  %v13479_v61 = vld [vmem:[%s19700_s0 + $0x310] sm:$0xf0]  ;;  %v13484_v37 = vld [vmem:[%s19701_s2 + $0xa0] sm:$0xff] }
 0x434   :  { %v15451_v52 = vor.u32 %v13479_v61, %v11801_v4  ;;  %3639 = vmatpush.bf16.msra.mxu3 %v13484_v37 }
 0x435   :  { %11695 = vmatmul.msk.bf16.gmra.mxu3 %vm888_vm1, %v2211_v20  ;;  %11860 = vmatmul.msk.bf16.gmra.mxu1 %vm888_vm1, %v2917_v1 }
 0x436   :  { %v2109_v26 = vpop.f32.mrf.mxu2  ;;  %v2779_v28 = vpop.f32.mrf.mxu0  ;;  %3236 = vrot.lane.b32.xlu2 %v15445_v41, %s13744_s21  ;;  %3782 = vrot.lane.b32.xlu1 %v14893_v14, %s13746_s14 }
 0x437   :  { %3238 = vrot.lane.b32.xlu0 %v15451_v52, %s13744_s21  ;;  %v2780_v5 = vadd.f32 %v15006_v15, %v2779_v28  ;;  %v2110_v33 = vadd.f32 %v15006_v15, %v2109_v26  ;;  %v3195_v28 = vpop.permute.xlu2 %3194 }
 0x438   :  { %v2379_v3 = vpop.f32.mrf.mxu3 }
 0x439   :  { %11820 = vmatmul.msk.bf16.gmra.mxu0 %vm228_vm0, %v15336_v11  ;;  %v2877_v4 = vmax.f32 %v2780_v5, 0.0  ;;  %v2180_v26 = vmax.f32 %v2110_v33, 0.0 }
 0x43a   :  { %v3053_v20 = vpop.f32.mrf.mxu1 }
 0x43b   :  { %v15463_v1 = vadd.f32 %v3053_v20, %v15158_v10 }
 0x43d   :  { %19743 = vst [vmem:[#allocation11_spill] sm:$0xff] %v15463_v1 }
 0x43e   :  { %v2111_v6 = vpop.f32.mrf.mxu2  ;;  %v2781_v36 = vpop.f32.mrf.mxu0  ;;  %3780 = vrot.lane.b32.xlu2 %v14863_v30, %s13746_s14  ;;  %4376 = vrot.lane.b32.xlu1 %v14943_v38, %s13745_s26 }
 0x43f   :  { %v2112_v21 = vadd.f32 %v14981_v43, %v2111_v6  ;;  %v2782_v61 = vadd.f32 %v14981_v43, %v2781_v36  ;;  %4372 = vrot.lane.b32.xlu0 %v14893_v14, %s13745_s26 }
 0x440   :  { %v2380_v10 = vpop.f32.mrf.mxu3 }
 0x441   :  { %v2181_v3 = vmax.f32 %v2112_v21, 0.0  ;;  %v2878_v20 = vmax.f32 %v2782_v61, 0.0 }
 0x442   :  { %v3056_v6 = vpop.f32.mrf.mxu1 }
 0x443   :  { %v2212_v37 = vpack.c.bf16 %v2181_v3, %v2180_v26  ;;  %11879 = vmatmul.msk.bf16.gmra.mxu2 %vm228_vm0, %v3195_v28  ;;  %v2918_v1 = vpack.c.bf16 %v2878_v20, %v2877_v4  ;;  %v15479_v30 = vadd.f32 %v3056_v6, %v15176_v42  ;;  %v3197_v3 = vpop.permute.xlu0 %3196 }
 0x445   :  { %11696 = vmatmul.msk.bf16.gmra.mxu3 %vm888_vm1, %v2212_v37  ;;  %11861 = vmatmul.msk.bf16.gmra.mxu1 %vm888_vm1, %v2918_v1 }
 0x446   :  { %v2114_v5 = vpop.f32.mrf.mxu2  ;;  %v2784_v36 = vpop.f32.mrf.mxu0  ;;  %4374 = vrot.lane.b32.xlu2 %v14918_v44, %s13745_s26  ;;  %3788 = vrot.lane.b32.xlu1 %v14966_v27, %s13746_s14 }
 0x447   :  { %3784 = vrot.lane.b32.xlu0 %v14918_v44, %s13746_s14  ;;  %v2785_v1 = vadd.f32 %v15006_v15, %v2784_v36  ;;  %v2115_v4 = vadd.f32 %v15006_v15, %v2114_v5 }
 0x448   :  { %v2382_v14 = vpop.f32.mrf.mxu3 }
 0x449   :  { %v15490_v33 = vadd.f32 %v2382_v14, %v14956_v60  ;;  %11821 = vmatmul.msk.bf16.gmra.mxu0 %vm228_vm0, %v15385_v55  ;;  %v2879_v44 = vmax.f32 %v2785_v1, 0.0 }
 0x44a   :  { %v3058_v42 = vpop.f32.mrf.mxu1 }
 0x44b   :  { %v15496_v21 = vadd.f32 %v3058_v42, %v15191_v62  ;;  %v2182_v62 = vmax.f32 %v2115_v4, 0.0 }
 0x44e   :  { %v2116_v10 = vpop.f32.mrf.mxu2  ;;  %v2786_v28 = vpop.f32.mrf.mxu0  ;;  %3786 = vrot.lane.b32.xlu2 %v14943_v38, %s13746_s14  ;;  %4382 = vrot.lane.b32.xlu1 %v15028_v34, %s13745_s26 }
 0x44f   :  { %v2117_v61 = vadd.f32 %v14981_v43, %v2116_v10  ;;  %v2787_v26 = vadd.f32 %v14981_v43, %v2786_v28  ;;  %4378 = vrot.lane.b32.xlu0 %v14966_v27, %s13745_s26  ;;  %v15535_v28 = vld [vmem:[%s19702_s5 + $0x8] sm:$0xff] }
 0x450   :  { %v2384_v60 = vpop.f32.mrf.mxu3 }
 0x451   :  { %v2183_v20 = vmax.f32 %v2117_v61, 0.0  ;;  %v15508_v37 = vadd.f32 %v2384_v60, %v14974_v8  ;;  %v2880_v6 = vmax.f32 %v2787_v26, 0.0 }
 0x452   :  { %v3061_v38 = vpop.f32.mrf.mxu1 }
 0x453   :  { %v2213_v5 = vpack.c.bf16 %v2183_v20, %v2182_v62  ;;  %11880 = vmatmul.msk.bf16.gmra.mxu2 %vm228_vm0, %v3197_v3  ;;  %v2919_v36 = vpack.c.bf16 %v2880_v6, %v2879_v44  ;;  %v15512_v14 = vadd.f32 %v3061_v38, %v15209_v46 }
 0x455   :  { %11697 = vmatmul.msk.bf16.gmra.mxu3 %vm888_vm1, %v2213_v5  ;;  %11862 = vmatmul.msk.bf16.gmra.mxu1 %vm888_vm1, %v2919_v36 }
 0x456   :  { %v2119_v43 = vpop.f32.mrf.mxu2  ;;  %v2789_v27 = vpop.f32.mrf.mxu0  ;;  %4380 = vrot.lane.b32.xlu2 %v14997_v59, %s13745_s26  ;;  %3794 = vrot.lane.b32.xlu1 %v15057_v49, %s13746_s14 }
 0x457   :  { %3790 = vrot.lane.b32.xlu0 %v14997_v59, %s13746_s14  ;;  %v2790_v1 = vadd.f32 %v15006_v15, %v2789_v27  ;;  %v2120_v10 = vadd.f32 %v15006_v15, %v2119_v43  ;;  %v3199_v15 = vpop.permute.xlu1 %3198  ;;  %v15568_v27 = vld [vmem:[%s19702_s5] sm:$0xff] }
 0x458   :  { %v2387_v8 = vpop.f32.mrf.mxu3 }
 0x459   :  { %v15523_v42 = vadd.f32 %v2387_v8, %v14987_v25  ;;  %11822 = vmatmul.msk.bf16.gmra.mxu0 %vm228_vm0, %v15353_v2  ;;  %v2881_v44 = vmax.f32 %v2790_v1, 0.0  ;;  %v2184_v26 = vmax.f32 %v2120_v10, 0.0 }
 0x45a   :  { %v3063_v46 = vpop.f32.mrf.mxu1 }
 0x45b   :  { %v15529_v4 = vadd.f32 %v3063_v46, %v15224_v17 }
 0x45e   :  { %v2121_v61 = vpop.f32.mrf.mxu2  ;;  %v2791_v59 = vpop.f32.mrf.mxu0  ;;  %3792 = vrot.lane.b32.xlu2 %v15028_v34, %s13746_s14  ;;  %4388 = vrot.lane.b32.xlu1 %v15113_v31, %s13745_s26 }
 0x45f   :  { %v2122_v25 = vadd.f32 %v15535_v28, %v2121_v61  ;;  %v2792_v60 = vadd.f32 %v15535_v28, %v2791_v59  ;;  %4384 = vrot.lane.b32.xlu0 %v15057_v49, %s13745_s26 }
 0x460   :  { %v2389_v17 = vpop.f32.mrf.mxu3 }
 0x461   :  { %v2185_v3 = vmax.f32 %v2122_v25, 0.0  ;;  %v15546_v62 = vadd.f32 %v2389_v17, %v15010_v13  ;;  %v2882_v20 = vmax.f32 %v2792_v60, 0.0 }
 0x462   :  { %v3066_v34 = vpop.f32.mrf.mxu1 }
 0x463   :  { %v2214_v6 = vpack.c.bf16 %v2185_v3, %v2184_v26  ;;  %11881 = vmatmul.msk.bf16.gmra.mxu2 %vm228_vm0, %v3199_v15  ;;  %v2920_v5 = vpack.c.bf16 %v2882_v20, %v2881_v44  ;;  %v15550_v38 = vadd.f32 %v3066_v34, %v15239_v45  ;;  %v3201_v44 = vpop.permute.xlu2 %3200 }
 0x465   :  { %11698 = vmatmul.msk.bf16.gmra.mxu3 %vm888_vm1, %v2214_v6  ;;  %11863 = vmatmul.msk.bf16.gmra.mxu1 %vm888_vm1, %v2920_v5 }
 0x466   :  { %v2124_v36 = vpop.f32.mrf.mxu2  ;;  %v2794_v49 = vpop.f32.mrf.mxu0  ;;  %4386 = vrot.lane.b32.xlu2 %v15084_v53, %s13745_s26  ;;  %3800 = vrot.lane.b32.xlu1 %v15140_v0, %s13746_s14 }
 0x467   :  { %3796 = vrot.lane.b32.xlu0 %v15084_v53, %s13746_s14  ;;  %v2795_v8 = vadd.f32 %v15568_v27, %v2794_v49  ;;  %v2125_v1 = vadd.f32 %v15568_v27, %v2124_v36 }
 0x468   :  { %v2392_v13 = vpop.f32.mrf.mxu3 }
 0x469   :  { %v15561_v43 = vadd.f32 %v2392_v13, %v15018_v32  ;;  %11823 = vmatmul.msk.bf16.gmra.mxu0 %vm228_vm0, %v15413_v22  ;;  %v2883_v61 = vmax.f32 %v2795_v8, 0.0 }
 0x46a   :  { %v3068_v45 = vpop.f32.mrf.mxu1 }
 0x46b   :  { %v15572_v46 = vadd.f32 %v3068_v45, %v15253_v63  ;;  %v2186_v63 = vmax.f32 %v2125_v1, 0.0  ;;  %v15600_v5 = vpop.permute.xlu2 %3206 }
 0x46e   :  { %v2126_v53 = vpop.f32.mrf.mxu2  ;;  %v2796_v10 = vpop.f32.mrf.mxu0  ;;  %3798 = vrot.lane.b32.xlu2 %v15113_v31, %s13746_s14  ;;  %4394 = vrot.lane.b32.xlu1 %v15206_v54, %s13745_s26 }
 0x46f   :  { %v2127_v32 = vadd.f32 %v15535_v28, %v2126_v53  ;;  %v2797_v59 = vadd.f32 %v15535_v28, %v2796_v10  ;;  %4390 = vrot.lane.b32.xlu0 %v15140_v0, %s13745_s26  ;;  %v3203_v53 = vpop.permute.xlu0 %3202 }
 0x470   :  { %v2394_v25 = vpop.f32.mrf.mxu3 }
 0x471   :  { %v2187_v17 = vmax.f32 %v2127_v32, 0.0  ;;  %v15584_v60 = vadd.f32 %v2394_v25, %v15036_v47  ;;  %v2884_v15 = vmax.f32 %v2797_v59, 0.0  ;;  %v3205_v25 = vpop.permute.xlu1 %3204 }
 0x472   :  { %v3071_v31 = vpop.f32.mrf.mxu1 }
 0x473   :  { %v2215_v26 = vpack.c.bf16 %v2187_v17, %v2186_v63  ;;  %11882 = vmatmul.msk.bf16.gmra.mxu2 %vm228_vm0, %v3201_v44  ;;  %v2921_v3 = vpack.c.bf16 %v2884_v15, %v2883_v61  ;;  %v15620_v15 = vpop.permute.xlu2 %3212 }
 0x475   :  { %11699 = vmatmul.msk.bf16.gmra.mxu3 %vm888_vm1, %v2215_v26  ;;  %11864 = vmatmul.msk.bf16.gmra.mxu1 %vm888_vm1, %v2921_v3 }
 0x476   :  { %v2129_v20 = vpop.f32.mrf.mxu2  ;;  %v2799_v6 = vpop.f32.mrf.mxu0  ;;  %4392 = vrot.lane.b32.xlu2 %v15173_v51, %s13745_s26  ;;  %3806 = vrot.lane.b32.xlu1 %v15236_v48, %s13746_s14 }
 0x477   :  { %3802 = vrot.lane.b32.xlu0 %v15173_v51, %s13746_s14  ;;  %v2800_v36 = vadd.f32 %v15568_v27, %v2799_v6  ;;  %v2130_v49 = vadd.f32 %v15568_v27, %v2129_v20 }
 0x478   :  { %v2397_v47 = vpop.f32.mrf.mxu3 }
 0x479   :  { %v15596_v0 = vadd.f32 %v2397_v47, %v15044_v7  ;;  %11824 = vmatmul.msk.bf16.gmra.mxu0 %vm228_vm0, %v15418_v56  ;;  %v2885_v7 = vmax.f32 %v2800_v36, 0.0  ;;  %v2188_v32 = vmax.f32 %v2130_v49, 0.0  ;;  %v15631_v31 = vpop.permute.xlu1 %3210 }
 0x47a   :  { %v3072_v34 = vpop.f32.mrf.mxu1 }
 0x47b   :  { %v15639_v49 = vpop.permute.xlu2 %3218 }
 0x47e   :  { %v2131_v13 = vpop.f32.mrf.mxu2  ;;  %v2801_v8 = vpop.f32.mrf.mxu0  ;;  %3804 = vrot.lane.b32.xlu2 %v15206_v54, %s13746_s14  ;;  %4400 = vrot.lane.b32.xlu1 %v15285_v9, %s13745_s26 }
 0x47f   :  { %v2132_v45 = vadd.f32 %v15535_v28, %v2131_v13  ;;  %v2802_v1 = vadd.f32 %v15535_v28, %v2801_v8  ;;  %4396 = vrot.lane.b32.xlu0 %v15236_v48, %s13745_s26 }
 0x480   :  { %v2399_v51 = vpop.f32.mrf.mxu3 }
 0x481   :  { %v2189_v10 = vmax.f32 %v2132_v45, 0.0  ;;  %v15613_v61 = vadd.f32 %v2399_v51, %v15069_v40  ;;  %v2886_v59 = vmax.f32 %v2802_v1, 0.0 }
 0x482   :  { %v3074_v54 = vpop.f32.mrf.mxu1 }
 0x483   :  { %v2216_v44 = vpack.c.bf16 %v2189_v10, %v2188_v32  ;;  %11883 = vmatmul.msk.bf16.gmra.mxu2 %vm228_vm0, %v3203_v53  ;;  %v2922_v63 = vpack.c.bf16 %v2886_v59, %v2885_v7  ;;  %v15617_v17 = vadd.f32 %v3074_v54, %v15288_v39  ;;  %v15648_v7 = vpop.permute.xlu0 %3208  ;;  %v15655_v10 = vpop.permute.xlu1 %3216 }
 0x485   :  { %11700 = vmatmul.msk.bf16.gmra.mxu3 %vm888_vm1, %v2216_v44  ;;  %11865 = vmatmul.msk.bf16.gmra.mxu1 %vm888_vm1, %v2922_v63  ;;  %v15667_v44 = vpop.permute.xlu2 %3224 }
 0x486   :  { %v2134_v48 = vpop.f32.mrf.mxu2  ;;  %v2804_v26 = vpop.f32.mrf.mxu0  ;;  %4398 = vrot.lane.b32.xlu2 %v15265_v16, %s13745_s26  ;;  %3812 = vrot.lane.b32.xlu1 %v15311_v18, %s13746_s14 }
 0x487   :  { %3808 = vrot.lane.b32.xlu0 %v15265_v16, %s13746_s14  ;;  %v2805_v3 = vadd.f32 %v15568_v27, %v2804_v26  ;;  %v2135_v6 = vadd.f32 %v15568_v27, %v2134_v48 }
 0x488   :  { %v2402_v40 = vpop.f32.mrf.mxu3 }
 0x489   :  { %11825 = vmatmul.msk.bf16.gmra.mxu0 %vm228_vm0, %v15379_v19  ;;  %v2887_v16 = vmax.f32 %v2805_v3, 0.0 }
 0x48a   :  { %v3076_v39 = vpop.f32.mrf.mxu1 }
 0x48b   :  { %v15635_v20 = vadd.f32 %v3076_v39, %v15299_v24  ;;  %v2190_v24 = vmax.f32 %v2135_v6, 0.0  ;;  %v15671_v63 = vpop.permute.xlu0 %3214  ;;  %v15679_v3 = vpop.permute.xlu1 %3222 }
 0x48e   :  { %v2136_v47 = vpop.f32.mrf.mxu2  ;;  %v2806_v36 = vpop.f32.mrf.mxu0  ;;  %3810 = vrot.lane.b32.xlu2 %v15285_v9, %s13746_s14  ;;  %4406 = vrot.lane.b32.xlu1 %v15385_v55, %s13745_s26 }
 0x48f   :  { %v2137_v34 = vadd.f32 %v15535_v28, %v2136_v47  ;;  %v2807_v45 = vadd.f32 %v15535_v28, %v2806_v36  ;;  %4402 = vrot.lane.b32.xlu0 %v15311_v18, %s13745_s26 }
 0x490   :  { %v2403_v13 = vpop.f32.mrf.mxu3 }
 0x491   :  { %v2191_v8 = vmax.f32 %v2137_v34, 0.0  ;;  %v2888_v51 = vmax.f32 %v2807_v45, 0.0 }
 0x492   :  { %v3079_v53 = vpop.f32.mrf.mxu1 }
 0x493   :  { %v2217_v1 = vpack.c.bf16 %v2191_v8, %v2190_v24  ;;  %11884 = vmatmul.msk.bf16.gmra.mxu2 %vm228_vm0, %v3205_v25  ;;  %v2923_v9 = vpack.c.bf16 %v2888_v51, %v2887_v16  ;;  %v15652_v32 = vadd.f32 %v3079_v53, %v15314_v57  ;;  %v15693_v24 = vpop.permute.xlu2 %3230 }
 0x495   :  { %11701 = vmatmul.msk.bf16.gmra.mxu3 %vm888_vm1, %v2217_v1  ;;  %11866 = vmatmul.msk.bf16.gmra.mxu1 %vm888_vm1, %v2923_v9  ;;  %v15705_v1 = vpop.permute.xlu0 %3220  ;;  %v19744_v9 = vld [vmem:[#allocation12_spill] sm:$0xff] }
 0x496   :  { %v2139_v59 = vpop.f32.mrf.mxu2  ;;  %v2809_v18 = vpop.f32.mrf.mxu0  ;;  %4404 = vrot.lane.b32.xlu2 %v15336_v11, %s13745_s26  ;;  %3818 = vrot.lane.b32.xlu1 %v15353_v2, %s13746_s14 }
 0x497   :  { %3814 = vrot.lane.b32.xlu0 %v15336_v11, %s13746_s14  ;;  %v2810_v48 = vadd.f32 %v15568_v27, %v2809_v18  ;;  %v2140_v40 = vadd.f32 %v15568_v27, %v2139_v59  ;;  %v15717_v18 = vpop.permute.xlu1 %3228 }
 0x498   :  { %v2405_v25 = vpop.f32.mrf.mxu3 }
 0x499   :  { %v15665_v57 = vadd.f32 %v2405_v25, %v15103_v12  ;;  %11826 = vmatmul.msk.bf16.gmra.mxu0 %vm228_vm0, %v15445_v41  ;;  %v2889_v6 = vmax.f32 %v2810_v48, 0.0  ;;  %v19745_v48 = vld [vmem:[#allocation4_spill] sm:$0xff] }
 0x49a   :  { %v3081_v54 = vpop.f32.mrf.mxu1 }
 0x49b   :  { %v15675_v26 = vadd.f32 %v3081_v54, %v15325_v35  ;;  %v2192_v35 = vmax.f32 %v2140_v40, 0.0 }
 0x49e   :  { %v2141_v39 = vpop.f32.mrf.mxu2  ;;  %v2811_v12 = vpop.f32.mrf.mxu0  ;;  %3816 = vrot.lane.b32.xlu2 %v15385_v55, %s13746_s14  ;;  %4412 = vrot.lane.b32.xlu1 %v15418_v56, %s13745_s26 }
 0x49f   :  { %v2142_v11 = vadd.f32 %v15535_v28, %v2141_v39  ;;  %v2812_v34 = vadd.f32 %v15535_v28, %v2811_v12  ;;  %4408 = vrot.lane.b32.xlu0 %v15353_v2, %s13745_s26  ;;  %v13495_v2 = vld [vmem:[%s19701_s2 + $0xf8] sm:$0xff] }
 0x4a0   :  { %v2407_v47 = vpop.f32.mrf.mxu3  ;;  %4816 = vmatpush.bf16.msrb.mxu3 %v13495_v2 }
 0x4a1   :  { %v2193_v36 = vmax.f32 %v2142_v11, 0.0  ;;  %v15689_v16 = vadd.f32 %v2407_v47, %v15122_v50  ;;  %v2890_v13 = vmax.f32 %v2812_v34, 0.0  ;;  %v13491_v50 = vld [vmem:[%s19701_s2 + $0xd8] sm:$0xff]  ;;  %v15729_v47 = vpop.permute.xlu0 %3226 }
 0x4a2   :  { %v3084_v55 = vpop.f32.mrf.mxu1  ;;  %4226 = vmatpush.bf16.msrb.mxu1 %v13491_v50 }
 0x4a3   :  { %v2218_v45 = vpack.c.bf16 %v2193_v36, %v2192_v35  ;;  %11885 = vmatmul.msk.bf16.gmra.mxu2 %vm228_vm0, %v15600_v5  ;;  %v2924_v8 = vpack.c.bf16 %v2890_v13, %v2889_v6  ;;  %v15696_v51 = vadd.f32 %v3084_v55, %v15339_v29  ;;  %v19746_v55 = vld [vmem:[#allocation2_spill] sm:$0xff] }
 0x4a5   :  { %11702 = vmatmul.msk.bf16.gmra.mxu3 %vm888_vm1, %v2218_v45  ;;  %11867 = vmatmul.msk.bf16.gmra.mxu1 %vm888_vm1, %v2924_v8 }
 0x4a6   :  { %v3324_v5 = vpop.f32.mrf.mxu2  ;;  %v2814_v53 = vpop.f32.mrf.mxu0  ;;  %4410 = vrot.lane.b32.xlu2 %v15413_v22, %s13745_s26  ;;  %3824 = vrot.lane.b32.xlu1 %v15379_v19, %s13746_s14 }
 0x4a7   :  { %3820 = vrot.lane.b32.xlu0 %v15413_v22, %s13746_s14  ;;  %v2815_v54 = vadd.f32 %v15568_v27, %v2814_v53  ;;  %v3325_v39 = vadd.f32 %v15568_v27, %v3324_v5  ;;  %v15726_v22 = vpop.permute.xlu2 %3236  ;;  %v15743_v5 = vpop.permute.xlu1 %3234 }
 0x4a8   :  { %v2410_v29 = vpop.f32.mrf.mxu3 }
 0x4a9   :  { %v15715_v59 = vadd.f32 %v2410_v29, %v19744_v9  ;;  %11827 = vmatmul.msk.bf16.gmra.mxu0 %vm228_vm0, %v15451_v52  ;;  %v2891_v34 = vmax.f32 %v2815_v54, 0.0  ;;  %v3449_v13 = vmax.f32 %v3325_v39, 0.0  ;;  %v19747_v29 = vld [vmem:[#allocation10_spill] sm:$0xff] }
 0x4aa   :  { %v3086_v25 = vpop.f32.mrf.mxu1 }
 0x4ab   :  { %v15723_v40 = vadd.f32 %v3086_v25, %v19745_v48 }
 0x4ae   :  { %v3326_v11 = vpop.f32.mrf.mxu2  ;;  %v2816_v6 = vpop.f32.mrf.mxu0  ;;  %3822 = vrot.lane.b32.xlu2 %v15418_v56, %s13746_s14  ;;  %4418 = vrot.lane.b32.xlu1 %v15451_v52, %s13745_s26 }
 0x4af   :  { %v3327_v12 = vadd.f32 %v15535_v28, %v3326_v11  ;;  %v2817_v36 = vadd.f32 %v15535_v28, %v2816_v6  ;;  %4414 = vrot.lane.b32.xlu0 %v15379_v19, %s13745_s26  ;;  %v3781_v54 = vpop.permute.xlu2 %3780  ;;  %v15757_v11 = vpop.permute.xlu0 %3232  ;;  %v19749_v6 = vld [vmem:[#allocation8_spill] sm:$0xff] }
 0x4b0   :  { %v2412_v35 = vpop.f32.mrf.mxu3 }
 0x4b1   :  { %v3450_v45 = vmax.f32 %v3327_v12, 0.0  ;;  %v15739_v8 = vadd.f32 %v2412_v35, %v19746_v55  ;;  %v2892_v2 = vmax.f32 %v2817_v36, 0.0 }
 0x4b2   :  { %v3089_v56 = vpop.f32.mrf.mxu1 }
 0x4b3   :  { %v3499_v50 = vpack.c.bf16 %v3450_v45, %v3449_v13  ;;  %11886 = vmatmul.msk.bf16.gmra.mxu2 %vm228_vm0, %v15648_v7  ;;  %v2925_v53 = vpack.c.bf16 %v2892_v2, %v2891_v34  ;;  %v15746_v9 = vadd.f32 %v3089_v56, %v19747_v29  ;;  %v19748_v7 = vld [vmem:[#allocation5_spill] sm:$0xff]  ;;  %v15766_v13 = vpop.permute.xlu1 %4370 }
 0x4b4   :  { %v19750_v2 = vld [vmem:[#allocation9_spill] sm:$0xff] }
 0x4b5   :  { %11926 = vmatmul.msk.bf16.vlgmr.msra.gmra.mxu3 %vm888_vm1, %v3499_v50  ;;  %11868 = vmatmul.msk.bf16.gmra.mxu1 %vm888_vm1, %v2925_v53 }
 0x4b6   :  { %v3329_v19 = vpop.f32.mrf.mxu2  ;;  %v2819_v25 = vpop.f32.mrf.mxu0  ;;  %4416 = vrot.lane.b32.xlu2 %v15445_v41, %s13745_s26 }
 0x4b7   :  { %3826 = vrot.lane.b32.xlu0 %v15445_v41, %s13746_s14  ;;  %v2820_v34 = vadd.f32 %v15568_v27, %v2819_v25  ;;  %v3330_v36 = vadd.f32 %v15568_v27, %v3329_v19  ;;  %v19751_v25 = vld [vmem:[#allocation6_spill] sm:$0xff] }
 0x4b8   :  { %v2415_v48 = vpop.f32.mrf.mxu3 }
 0x4b9   :  { %v15755_v39 = vadd.f32 %v2415_v48, %v19748_v7  ;;  %11951 = vmatmul.msk.bf16.vlgmr.msrb.gmra.mxu0 %vm228_vm0, %v3781_v54  ;;  %v2893_v50 = vmax.f32 %v2820_v34, 0.0  ;;  %v3451_v29 = vmax.f32 %v3330_v36, 0.0 }
 0x4ba   :  { %v3091_v12 = vpop.f32.mrf.mxu1  ;;  %6396 = vmatpush.bf16.msrb.mxu0 %v19749_v6 }
 0x4bb   :  { %v15763_v35 = vadd.f32 %v3091_v12, %v15429_v23  ;;  %v15778_v12 = vpop.permute.xlu0 %3238  ;;  %v3783_v36 = vpop.permute.xlu1 %3782 }
 0x4be   :  { %v3331_v41 = vpop.f32.mrf.mxu2  ;;  %v2821_v55 = vpop.f32.mrf.mxu0  ;;  %3828 = vrot.lane.b32.xlu2 %v15451_v52, %s13746_s14  ;;  %6397 = vmatpush.bf16.msrb.mxu0 %v19750_v2 }
 0x4bf   :  { %v3332_v45 = vadd.f32 %v15535_v28, %v3331_v41  ;;  %v2822_v53 = vadd.f32 %v15535_v28, %v2821_v55 }
 0x4c0   :  { %v2417_v56 = vpop.f32.mrf.mxu3 }
 0x4c1   :  { %v3452_v23 = vmax.f32 %v3332_v45, 0.0  ;;  %v15774_v54 = vadd.f32 %v2417_v56, %v19751_v25  ;;  %v2894_v19 = vmax.f32 %v2822_v53, 0.0  ;;  %v19752_v45 = vld [vmem:[#allocation3_spill] sm:$0xff] }
 0x4c2   :  { %v3094_v7 = vpop.f32.mrf.mxu1 }
 0x4c3   :  { %v3500_v48 = vpack.c.bf16 %v3452_v23, %v3451_v29  ;;  %11887 = vmatmul.msk.bf16.gmra.mxu2 %vm228_vm0, %v15631_v31  ;;  %v2926_v52 = vpack.c.bf16 %v2894_v19, %v2893_v50  ;;  %v15788_v53 = vpop.permute.xlu0 %4372 }
 0x4c4   :  { %19753 = vst [vmem:[#allocation12_spill] sm:$0xff] %v15788_v53 }
 0x4c5   :  { %11927 = vmatmul.msk.bf16.gmra.mxu3 %vm888_vm1, %v3500_v48  ;;  %11869 = vmatmul.msk.bf16.gmra.mxu1 %vm888_vm1, %v2926_v52 }
 0x4c6   :  { %v3334_v6 = vpop.f32.mrf.mxu2  ;;  %v2824_v34 = vpop.f32.mrf.mxu0 }
 0x4c7   :  { %v2825_v31 = vadd.f32 %v15568_v27, %v2824_v34  ;;  %v3335_v56 = vadd.f32 %v15568_v27, %v3334_v6 }
 0x4c8   :  { %v2420_v41 = vpop.f32.mrf.mxu3 }
 0x4c9   :  { %v15783_v55 = vadd.f32 %v2420_v41, %v19752_v45  ;;  %11952 = vmatmul.msk.bf16.gmra.mxu0 %vm228_vm0, %v3783_v36  ;;  %v2895_v25 = vmax.f32 %v2825_v31, 0.0  ;;  %v3453_v7 = vmax.f32 %v3335_v56, 0.0  ;;  %v19754_v41 = vld [vmem:[#allocation7_spill] sm:$0xff] }
 0x4ca   :  { %v3095_v2 = vpop.f32.mrf.mxu1 }
 0x4ce   :  { %v3336_v50 = vpop.f32.mrf.mxu2  ;;  %v2826_v23 = vpop.f32.mrf.mxu0 }
 0x4cf   :  { %v3337_v29 = vadd.f32 %v15535_v28, %v3336_v50  ;;  %v2827_v48 = vadd.f32 %v15535_v28, %v2826_v23  ;;  %v3785_v50 = vpop.permute.xlu0 %3784 }
 0x4d0   :  { %v2422_v19 = vpop.f32.mrf.mxu3 }
 0x4d1   :  { %v3454_v52 = vmax.f32 %v3337_v29, 0.0  ;;  %v15793_v45 = vadd.f32 %v2422_v19, %v19754_v41  ;;  %v2896_v36 = vmax.f32 %v2827_v48, 0.0 }
 0x4d2   :  { %v3097_v6 = vpop.f32.mrf.mxu1 }
 0x4d3   :  { %v3501_v2 = vpack.c.bf16 %v3454_v52, %v3453_v7  ;;  %11888 = vmatmul.msk.bf16.gmra.mxu2 %vm228_vm0, %v15620_v15  ;;  %v2927_v34 = vpack.c.bf16 %v2896_v36, %v2895_v25  ;;  %v15798_v53 = vadd.f32 %v3097_v6, %v15490_v33  ;;  %v15808_v33 = vpop.permute.xlu2 %4374 }
 0x4d5   :  { %11928 = vmatmul.msk.bf16.gmra.mxu3 %vm888_vm1, %v3501_v2  ;;  %11870 = vmatmul.msk.bf16.gmra.mxu1 %vm888_vm1, %v2927_v34 }
 0x4d6   :  { %v3339_v31 = vpop.f32.mrf.mxu2  ;;  %v2829_v56 = vpop.f32.mrf.mxu0 }
 0x4d7   :  { %v2830_v19 = vadd.f32 %v15568_v27, %v2829_v56  ;;  %v3340_v25 = vadd.f32 %v15568_v27, %v3339_v31 }
 0x4d8   :  { %v2425_v29 = vpop.f32.mrf.mxu3 }
 0x4d9   :  { %11953 = vmatmul.msk.bf16.gmra.mxu0 %vm228_vm0, %v3785_v50  ;;  %v2897_v41 = vmax.f32 %v2830_v19, 0.0  ;;  %v3455_v6 = vmax.f32 %v3340_v25, 0.0 }
 0x4da   :  { %v3099_v23 = vpop.f32.mrf.mxu1 }
 0x4db   :  { %v15805_v15 = vadd.f32 %v3099_v23, %v15508_v37 }
 0x4de   :  { %v3341_v48 = vpop.f32.mrf.mxu2  ;;  %v2831_v52 = vpop.f32.mrf.mxu0 }
 0x4df   :  { %v3342_v7 = vadd.f32 %v15535_v28, %v3341_v48  ;;  %v2832_v2 = vadd.f32 %v15535_v28, %v2831_v52  ;;  %v3787_v48 = vpop.permute.xlu2 %3786 }
 0x4e0   :  { %v2426_v36 = vpop.f32.mrf.mxu3 }
 0x4e1   :  { %v3456_v34 = vmax.f32 %v3342_v7, 0.0  ;;  %v2898_v50 = vmax.f32 %v2832_v2, 0.0 }
 0x4e2   :  { %v3102_v37 = vpop.f32.mrf.mxu1 }
 0x4e3   :  { %v3502_v29 = vpack.c.bf16 %v3456_v34, %v3455_v6  ;;  %11889 = vmatmul.msk.bf16.gmra.mxu2 %vm228_vm0, %v15671_v63  ;;  %v2928_v56 = vpack.c.bf16 %v2898_v50, %v2897_v41  ;;  %v15815_v31 = vadd.f32 %v3102_v37, %v15523_v42  ;;  %v15825_v42 = vpop.permute.xlu1 %4376 }
 0x4e5   :  { %11929 = vmatmul.msk.bf16.gmra.mxu3 %vm888_vm1, %v3502_v29  ;;  %11871 = vmatmul.msk.bf16.gmra.mxu1 %vm888_vm1, %v2928_v56 }
 0x4e6   :  { %v3344_v23 = vpop.f32.mrf.mxu2  ;;  %v2834_v19 = vpop.f32.mrf.mxu0 }
 0x4e7   :  { %v2835_v7 = vadd.f32 %v15568_v27, %v2834_v19  ;;  %v3345_v41 = vadd.f32 %v15568_v27, %v3344_v23 }
 0x4e8   :  { %v2428_v52 = vpop.f32.mrf.mxu3 }
 0x4e9   :  { %11954 = vmatmul.msk.bf16.gmra.mxu0 %vm228_vm0, %v3787_v48  ;;  %v2899_v34 = vmax.f32 %v2835_v7, 0.0  ;;  %v3457_v37 = vmax.f32 %v3345_v41, 0.0 }
 0x4ea   :  { %v3104_v25 = vpop.f32.mrf.mxu1 }
 0x4eb   :  { %v15822_v63 = vadd.f32 %v3104_v25, %v15546_v62 }
 0x4ee   :  { %v3346_v36 = vpop.f32.mrf.mxu2  ;;  %v2836_v6 = vpop.f32.mrf.mxu0 }
 0x4ef   :  { %v3347_v2 = vadd.f32 %v15535_v28, %v3346_v36  ;;  %v2837_v29 = vadd.f32 %v15535_v28, %v2836_v6  ;;  %v3789_v36 = vpop.permute.xlu1 %3788 }
 0x4f0   :  { %v2429_v50 = vpop.f32.mrf.mxu3 }
 0x4f1   :  { %v3458_v56 = vmax.f32 %v3347_v2, 0.0  ;;  %v2900_v48 = vmax.f32 %v2837_v29, 0.0 }
 0x4f2   :  { %v3107_v62 = vpop.f32.mrf.mxu1 }
 0x4f3   :  { %v3503_v52 = vpack.c.bf16 %v3458_v56, %v3457_v37  ;;  %11890 = vmatmul.msk.bf16.gmra.mxu2 %vm228_vm0, %v15655_v10  ;;  %v2929_v19 = vpack.c.bf16 %v2900_v48, %v2899_v34  ;;  %v15832_v23 = vadd.f32 %v3107_v62, %v15561_v43  ;;  %v15842_v43 = vpop.permute.xlu0 %4378 }
 0x4f5   :  { %11930 = vmatmul.msk.bf16.gmra.mxu3 %vm888_vm1, %v3503_v52  ;;  %11872 = vmatmul.msk.bf16.gmra.mxu1 %vm888_vm1, %v2929_v19 }
 0x4f6   :  { %v3349_v25 = vpop.f32.mrf.mxu2  ;;  %v2839_v7 = vpop.f32.mrf.mxu0 }
 0x4f7   :  { %v2840_v2 = vadd.f32 %v15568_v27, %v2839_v7  ;;  %v3350_v34 = vadd.f32 %v15568_v27, %v3349_v25 }
 0x4f8   :  { %v2431_v6 = vpop.f32.mrf.mxu3 }
 0x4f9   :  { %11955 = vmatmul.msk.bf16.gmra.mxu0 %vm228_vm0, %v3789_v36  ;;  %v2901_v56 = vmax.f32 %v2840_v2, 0.0  ;;  %v3459_v62 = vmax.f32 %v3350_v34, 0.0 }
 0x4fa   :  { %v3109_v41 = vpop.f32.mrf.mxu1 }
 0x4fb   :  { %v15839_v10 = vadd.f32 %v3109_v41, %v15584_v60  ;;  %v13494_v41 = vld [vmem:[%s19701_s2 + $0xf0] sm:$0xff] }
 0x4fc   :  { %4817 = vmatpush.bf16.msrb.mxu3 %v13494_v41 }
 0x4fe   :  { %v3351_v50 = vpop.f32.mrf.mxu2  ;;  %v2841_v37 = vpop.f32.mrf.mxu0 }
 0x4ff   :  { %v3352_v29 = vadd.f32 %v15535_v28, %v3351_v50  ;;  %v2842_v52 = vadd.f32 %v15535_v28, %v2841_v37  ;;  %v3791_v50 = vpop.permute.xlu0 %3790 }
 0x500   :  { %v2432_v48 = vpop.f32.mrf.mxu3 }
 0x501   :  { %v3460_v19 = vmax.f32 %v3352_v29, 0.0  ;;  %v2902_v36 = vmax.f32 %v2842_v52, 0.0  ;;  %v15865_v52 = vpop.permute.xlu2 %4380 }
 0x502   :  { %v3112_v60 = vpop.f32.mrf.mxu1 }
 0x503   :  { %v3504_v6 = vpack.c.bf16 %v3460_v19, %v3459_v62  ;;  %11891 = vmatmul.msk.bf16.gmra.mxu2 %vm228_vm0, %v15639_v49  ;;  %v2930_v7 = vpack.c.bf16 %v2902_v36, %v2901_v56  ;;  %v15849_v25 = vadd.f32 %v3112_v60, %v15596_v0  ;;  %v13490_v49 = vld [vmem:[%s19701_s2 + $0xd0] sm:$0xff] }
 0x504   :  { %4227 = vmatpush.bf16.msrb.mxu1 %v13490_v49 }
 0x505   :  { %11931 = vmatmul.msk.bf16.gmra.mxu3 %vm888_vm1, %v3504_v6  ;;  %11873 = vmatmul.msk.bf16.gmra.mxu1 %vm888_vm1, %v2930_v7 }
 0x506   :  { %v3354_v2 = vpop.f32.mrf.mxu2  ;;  %v2844_v34 = vpop.f32.mrf.mxu0 }
 0x507   :  { %v2845_v37 = vadd.f32 %v15568_v27, %v2844_v34  ;;  %v3355_v48 = vadd.f32 %v15568_v27, %v3354_v2 }
 0x508   :  { %v2434_v29 = vpop.f32.mrf.mxu3 }
 0x509   :  { %11956 = vmatmul.msk.bf16.gmra.mxu0 %vm228_vm0, %v3791_v50  ;;  %v2903_v6 = vmax.f32 %v2845_v37, 0.0  ;;  %v3461_v41 = vmax.f32 %v3355_v48, 0.0 }
 0x50a   :  { %v3114_v0 = vpop.f32.mrf.mxu1 }
 0x50b   :  { %v15862_v56 = vadd.f32 %v3114_v0, %v15613_v61 }
 0x50e   :  { %v3356_v62 = vpop.f32.mrf.mxu2  ;;  %v2846_v36 = vpop.f32.mrf.mxu0 }
 0x50f   :  { %v3357_v19 = vadd.f32 %v15535_v28, %v3356_v62  ;;  %v2847_v7 = vadd.f32 %v15535_v28, %v2846_v36  ;;  %v3793_v62 = vpop.permute.xlu2 %3792 }
 0x510   :  { %v2435_v60 = vpop.f32.mrf.mxu3 }
 0x511   :  { %v3462_v50 = vmax.f32 %v3357_v19, 0.0  ;;  %v2904_v29 = vmax.f32 %v2847_v7, 0.0  ;;  %v15876_v60 = vpop.permute.xlu1 %4382 }
 0x512   :  { %v3117_v61 = vpop.f32.mrf.mxu1 }
 0x513   :  { %v3505_v49 = vpack.c.bf16 %v3462_v50, %v3461_v41  ;;  %11892 = vmatmul.msk.bf16.gmra.mxu2 %vm228_vm0, %v15705_v1  ;;  %v2931_v34 = vpack.c.bf16 %v2904_v29, %v2903_v6  ;;  %v13489_v1 = vld [vmem:[%s19701_s2 + $0xc8] sm:$0xff] }
 0x514   :  { %4228 = vmatpush.bf16.msrb.mxu1 %v13489_v1 }
 0x515   :  { %11932 = vmatmul.msk.bf16.gmra.mxu3 %vm888_vm1, %v3505_v49  ;;  %11874 = vmatmul.msk.bf16.gmra.mxu1 %vm888_vm1, %v2931_v34 }
 0x516   :  { %v3359_v2 = vpop.f32.mrf.mxu2  ;;  %v2849_v0 = vpop.f32.mrf.mxu0 }
 0x517   :  { %v2850_v48 = vadd.f32 %v15568_v27, %v2849_v0  ;;  %v3360_v19 = vadd.f32 %v15568_v27, %v3359_v2  ;;  %v13488_v2 = vld [vmem:[%s19701_s2 + $0xc0] sm:$0xff] }
 0x518   :  { %v2437_v37 = vpop.f32.mrf.mxu3  ;;  %4229 = vmatpush.bf16.msrb.mxu1 %v13488_v2 }
 0x519   :  { %11957 = vmatmul.msk.bf16.gmra.mxu0 %vm228_vm0, %v3793_v62  ;;  %v2905_v50 = vmax.f32 %v2850_v48, 0.0  ;;  %v3463_v61 = vmax.f32 %v3360_v19, 0.0 }
 0x51a   :  { %v3118_v36 = vpop.f32.mrf.mxu1 }
 0x51e   :  { %v3361_v6 = vpop.f32.mrf.mxu2  ;;  %v2851_v41 = vpop.f32.mrf.mxu0 }
 0x51f   :  { %v3362_v7 = vadd.f32 %v15535_v28, %v3361_v6  ;;  %v2852_v49 = vadd.f32 %v15535_v28, %v2851_v41  ;;  %v3795_v6 = vpop.permute.xlu1 %3794 }
 0x520   :  { %v2438_v29 = vpop.f32.mrf.mxu3 }
 0x521   :  { %v3464_v34 = vmax.f32 %v3362_v7, 0.0  ;;  %v2906_v0 = vmax.f32 %v2852_v49, 0.0 }
 0x522   :  { %v3120_v37 = vpop.f32.mrf.mxu1 }
 0x523   :  { %v3506_v62 = vpack.c.bf16 %v3464_v34, %v3463_v61  ;;  %11893 = vmatmul.msk.bf16.gmra.mxu2 %vm228_vm0, %v15679_v3  ;;  %v2932_v36 = vpack.c.bf16 %v2906_v0, %v2905_v50  ;;  %v15889_v1 = vadd.f32 %v3120_v37, %v15665_v57  ;;  %v15899_v57 = vpop.permute.xlu0 %4384 }
 0x525   :  { %11933 = vmatmul.msk.bf16.gmra.mxu3 %vm888_vm1, %v3506_v62  ;;  %11875 = vmatmul.msk.bf16.gmra.mxu1 %vm888_vm1, %v2932_v36 }
 0x526   :  { %v3364_v48 = vpop.f32.mrf.mxu2  ;;  %v2854_v19 = vpop.f32.mrf.mxu0 }
 0x527   :  { %v2855_v29 = vadd.f32 %v15568_v27, %v2854_v19  ;;  %v3365_v50 = vadd.f32 %v15568_v27, %v3364_v48 }
 0x528   :  { %v2440_v7 = vpop.f32.mrf.mxu3 }
 0x529   :  { %11958 = vmatmul.msk.bf16.gmra.mxu0 %vm228_vm0, %v3795_v6  ;;  %v2907_v2 = vmax.f32 %v2855_v29, 0.0  ;;  %v3465_v37 = vmax.f32 %v3365_v50, 0.0 }
 0x52a   :  { %v3122_v41 = vpop.f32.mrf.mxu1 }
 0x52b   :  { %v15896_v3 = vadd.f32 %v3122_v41, %v15689_v16 }
 0x52e   :  { %v3366_v49 = vpop.f32.mrf.mxu2  ;;  %v2856_v34 = vpop.f32.mrf.mxu0 }
 0x52f   :  { %v3367_v61 = vadd.f32 %v15535_v28, %v3366_v49  ;;  %v2857_v62 = vadd.f32 %v15535_v28, %v2856_v34  ;;  %v3797_v49 = vpop.permute.xlu0 %3796 }
 0x530   :  { %v2441_v0 = vpop.f32.mrf.mxu3 }
 0x531   :  { %v3466_v36 = vmax.f32 %v3367_v61, 0.0  ;;  %v2908_v6 = vmax.f32 %v2857_v62, 0.0  ;;  %v15919_v0 = vpop.permute.xlu2 %4386 }
 0x532   :  { %v3125_v16 = vpop.f32.mrf.mxu1 }
 0x533   :  { %v3507_v7 = vpack.c.bf16 %v3466_v36, %v3465_v37  ;;  %11894 = vmatmul.msk.bf16.gmra.mxu2 %vm228_vm0, %v15667_v44  ;;  %v2933_v19 = vpack.c.bf16 %v2908_v6, %v2907_v2  ;;  %v15906_v48 = vadd.f32 %v3125_v16, %v15715_v59 }
 0x535   :  { %11934 = vmatmul.msk.bf16.gmra.mxu3 %vm888_vm1, %v3507_v7  ;;  %11876 = vmatmul.msk.bf16.gmra.mxu1 %vm888_vm1, %v2933_v19 }
 0x536   :  { %v3369_v41 = vpop.f32.mrf.mxu2  ;;  %v3914_v29 = vpop.f32.mrf.mxu0 }
 0x537   :  { %v3915_v44 = vadd.f32 %v15568_v27, %v3914_v29  ;;  %v3370_v59 = vadd.f32 %v15568_v27, %v3369_v41 }
 0x538   :  { %v3641_v34 = vpop.f32.mrf.mxu3 }
 0x539   :  { %v15911_v50 = vadd.f32 %v3641_v34, %v15433_v58  ;;  %11959 = vmatmul.msk.bf16.gmra.mxu0 %vm228_vm0, %v3797_v49  ;;  %v4039_v6 = vmax.f32 %v3915_v44, 0.0  ;;  %v3467_v16 = vmax.f32 %v3370_v59, 0.0  ;;  %v19756_v49 = vld [vmem:[#allocation11_spill] sm:$0xff] }
 0x53a   :  { %v3127_v61 = vpop.f32.mrf.mxu1 }
 0x53b   :  { %v15916_v2 = vadd.f32 %v3127_v61, %v15739_v8 }
 0x53d   :  { %19755 = vst [vmem:[#allocation4_spill] sm:$0xff] %v15916_v2 }
 0x53e   :  { %v3371_v62 = vpop.f32.mrf.mxu2  ;;  %v3916_v36 = vpop.f32.mrf.mxu0 }
 0x53f   :  { %v3372_v37 = vadd.f32 %v15535_v28, %v3371_v62  ;;  %v3917_v58 = vadd.f32 %v15535_v28, %v3916_v36  ;;  %v3799_v62 = vpop.permute.xlu2 %3798 }
 0x540   :  { %v3643_v7 = vpop.f32.mrf.mxu3 }
 0x541   :  { %v3468_v19 = vmax.f32 %v3372_v37, 0.0  ;;  %v15924_v34 = vadd.f32 %v3643_v7, %v19756_v49  ;;  %v4040_v29 = vmax.f32 %v3917_v58, 0.0  ;;  %v15942_v58 = vpop.permute.xlu1 %4388 }
 0x542   :  { %v3130_v41 = vpop.f32.mrf.mxu1 }
 0x543   :  { %v3508_v8 = vpack.c.bf16 %v3468_v19, %v3467_v16  ;;  %11895 = vmatmul.msk.bf16.gmra.mxu2 %vm228_vm0, %v15729_v47  ;;  %v4089_v61 = vpack.c.bf16 %v4040_v29, %v4039_v6  ;;  %v15929_v2 = vadd.f32 %v3130_v41, %v15755_v39 }
 0x545   :  { %11935 = vmatmul.msk.bf16.gmra.mxu3 %vm888_vm1, %v3508_v8  ;;  %12000 = vmatmul.msk.bf16.vlgmr.msrb.gmra.mxu1 %vm888_vm1, %v4089_v61 }
 0x546   :  { %v3374_v44 = vpop.f32.mrf.mxu2  ;;  %v3919_v59 = vpop.f32.mrf.mxu0 }
 0x547   :  { %v3920_v47 = vadd.f32 %v15568_v27, %v3919_v59  ;;  %v3375_v39 = vadd.f32 %v15568_v27, %v3374_v44 }
 0x548   :  { %v3646_v37 = vpop.f32.mrf.mxu3 }
 0x549   :  { %v15934_v36 = vadd.f32 %v3646_v37, %v15479_v30  ;;  %11960 = vmatmul.msk.bf16.gmra.mxu0 %vm228_vm0, %v3799_v62  ;;  %v4041_v29 = vmax.f32 %v3920_v47, 0.0  ;;  %v3469_v41 = vmax.f32 %v3375_v39, 0.0 }
 0x54a   :  { %v3132_v7 = vpop.f32.mrf.mxu1 }
 0x54b   :  { %v15939_v6 = vadd.f32 %v3132_v7, %v15774_v54 }
 0x54e   :  { %v3376_v16 = vpop.f32.mrf.mxu2  ;;  %v3921_v49 = vpop.f32.mrf.mxu0 }
 0x54f   :  { %v3377_v19 = vadd.f32 %v15535_v28, %v3376_v16  ;;  %v3922_v30 = vadd.f32 %v15535_v28, %v3921_v49  ;;  %v3801_v16 = vpop.permute.xlu1 %3800 }
 0x550   :  { %v3648_v8 = vpop.f32.mrf.mxu3 }
 0x551   :  { %v3470_v61 = vmax.f32 %v3377_v19, 0.0  ;;  %v15947_v62 = vadd.f32 %v3648_v8, %v15496_v21  ;;  %v4042_v59 = vmax.f32 %v3922_v30, 0.0  ;;  %v15965_v8 = vpop.permute.xlu0 %4390 }
 0x552   :  { %v3135_v44 = vpop.f32.mrf.mxu1 }
 0x553   :  { %v3509_v54 = vpack.c.bf16 %v3470_v61, %v3469_v41  ;;  %11896 = vmatmul.msk.bf16.gmra.mxu2 %vm228_vm0, %v15717_v18  ;;  %v4090_v37 = vpack.c.bf16 %v4042_v59, %v4041_v29  ;;  %v15952_v7 = vadd.f32 %v3135_v44, %v15783_v55 }
 0x555   :  { %11936 = vmatmul.msk.bf16.gmra.mxu3 %vm888_vm1, %v3509_v54  ;;  %12001 = vmatmul.msk.bf16.gmra.mxu1 %vm888_vm1, %v4090_v37 }
 0x556   :  { %v3379_v47 = vpop.f32.mrf.mxu2  ;;  %v3924_v39 = vpop.f32.mrf.mxu0 }
 0x557   :  { %v3925_v18 = vadd.f32 %v15568_v27, %v3924_v39  ;;  %v3380_v55 = vadd.f32 %v15568_v27, %v3379_v47 }
 0x558   :  { %v3651_v19 = vpop.f32.mrf.mxu3 }
 0x559   :  { %v15957_v21 = vadd.f32 %v3651_v19, %v15512_v14  ;;  %11961 = vmatmul.msk.bf16.gmra.mxu0 %vm228_vm0, %v3801_v16  ;;  %v4043_v59 = vmax.f32 %v3925_v18, 0.0  ;;  %v3471_v44 = vmax.f32 %v3380_v55, 0.0 }
 0x55a   :  { %v3137_v49 = vpop.f32.mrf.mxu1 }
 0x55b   :  { %v15962_v29 = vadd.f32 %v3137_v49, %v15793_v45 }
 0x55e   :  { %v3381_v30 = vpop.f32.mrf.mxu2  ;;  %v3926_v61 = vpop.f32.mrf.mxu0 }
 0x55f   :  { %v3382_v41 = vadd.f32 %v15535_v28, %v3381_v30  ;;  %v3927_v14 = vadd.f32 %v15535_v28, %v3926_v61  ;;  %v3803_v30 = vpop.permute.xlu0 %3802 }
 0x560   :  { %v3653_v54 = vpop.f32.mrf.mxu3 }
 0x561   :  { %v3472_v37 = vmax.f32 %v3382_v41, 0.0  ;;  %v15970_v16 = vadd.f32 %v3653_v54, %v15529_v4  ;;  %v4044_v39 = vmax.f32 %v3927_v14, 0.0  ;;  %v13493_v4 = vld [vmem:[%s19701_s2 + $0xe8] sm:$0xff] }
 0x562   :  { %v3140_v47 = vpop.f32.mrf.mxu1  ;;  %4818 = vmatpush.bf16.msrb.mxu3 %v13493_v4 }
 0x563   :  { %v3510_v45 = vpack.c.bf16 %v3472_v37, %v3471_v44  ;;  %11897 = vmatmul.msk.bf16.gmra.mxu2 %vm228_vm0, %v15693_v24  ;;  %v4091_v19 = vpack.c.bf16 %v4044_v39, %v4043_v59  ;;  %v15985_v59 = vpop.permute.xlu2 %4392 }
 0x565   :  { %11937 = vmatmul.msk.bf16.gmra.mxu3 %vm888_vm1, %v3510_v45  ;;  %12002 = vmatmul.msk.bf16.gmra.mxu1 %vm888_vm1, %v4091_v19 }
 0x566   :  { %v3384_v49 = vpop.f32.mrf.mxu2  ;;  %v3929_v18 = vpop.f32.mrf.mxu0 }
 0x567   :  { %v3930_v41 = vadd.f32 %v15568_v27, %v3929_v18  ;;  %v3385_v61 = vadd.f32 %v15568_v27, %v3384_v49 }
 0x568   :  { %v3656_v28 = vpop.f32.mrf.mxu3 }
 0x569   :  { %v15977_v55 = vadd.f32 %v3656_v28, %v15550_v38  ;;  %11962 = vmatmul.msk.bf16.gmra.mxu0 %vm228_vm0, %v3803_v30  ;;  %v15990_v38 = vld [vmem:[%s19702_s5 + $0x8] sm:$0xff]  ;;  %v4045_v37 = vmax.f32 %v3930_v41, 0.0  ;;  %v3473_v47 = vmax.f32 %v3385_v61, 0.0 }
 0x56a   :  { %v3141_v24 = vpop.f32.mrf.mxu1 }
 0x56e   :  { %v3386_v54 = vpop.f32.mrf.mxu2  ;;  %v3931_v44 = vpop.f32.mrf.mxu0 }
 0x56f   :  { %v3387_v14 = vadd.f32 %v15990_v38, %v3386_v54  ;;  %v3932_v45 = vadd.f32 %v15990_v38, %v3931_v44  ;;  %v3805_v54 = vpop.permute.xlu2 %3804 }
 0x570   :  { %v3658_v39 = vpop.f32.mrf.mxu3 }
 0x571   :  { %v3474_v19 = vmax.f32 %v3387_v14, 0.0  ;;  %v15995_v18 = vadd.f32 %v3658_v39, %v15572_v46  ;;  %v4046_v49 = vmax.f32 %v3932_v45, 0.0  ;;  %v16004_v39 = vpop.permute.xlu1 %4394 }
 0x572   :  { %v3143_v28 = vpop.f32.mrf.mxu1 }
 0x573   :  { %v3511_v30 = vpack.c.bf16 %v3474_v19, %v3473_v47  ;;  %11898 = vmatmul.msk.bf16.gmra.mxu2 %vm228_vm0, %v15757_v11  ;;  %v4092_v4 = vpack.c.bf16 %v4046_v49, %v4045_v37 }
 0x575   :  { %11938 = vmatmul.msk.bf16.gmra.mxu3 %vm888_vm1, %v3511_v30  ;;  %12003 = vmatmul.msk.bf16.gmra.mxu1 %vm888_vm1, %v4092_v4 }
 0x576   :  { %v3389_v24 = vpop.f32.mrf.mxu2  ;;  %v3934_v41 = vpop.f32.mrf.mxu0 }
 0x577   :  { %v3935_v46 = vadd.f32 %v15568_v27, %v3934_v41  ;;  %v3390_v14 = vadd.f32 %v15568_v27, %v3389_v24 }
 0x578   :  { %v3661_v44 = vpop.f32.mrf.mxu3 }
 0x579   :  { %11963 = vmatmul.msk.bf16.gmra.mxu0 %vm228_vm0, %v3805_v54  ;;  %v4047_v47 = vmax.f32 %v3935_v46, 0.0  ;;  %v3475_v30 = vmax.f32 %v3390_v14, 0.0 }
 0x57a   :  { %v3144_v61 = vpop.f32.mrf.mxu1 }
 0x57b   :  { %v3807_v61 = vpop.permute.xlu1 %3806 }
 0x57e   :  { %v3391_v11 = vpop.f32.mrf.mxu2  ;;  %v3936_v45 = vpop.f32.mrf.mxu0 }
 0x57f   :  { %v3392_v37 = vadd.f32 %v15990_v38, %v3391_v11  ;;  %v3937_v49 = vadd.f32 %v15990_v38, %v3936_v45 }
 0x580   :  { %v3662_v19 = vpop.f32.mrf.mxu3 }
 0x581   :  { %v3476_v28 = vmax.f32 %v3392_v37, 0.0  ;;  %v4048_v4 = vmax.f32 %v3937_v49, 0.0 }
 0x582   :  { %v3146_v41 = vpop.f32.mrf.mxu1 }
 0x583   :  { %v3512_v44 = vpack.c.bf16 %v3476_v28, %v3475_v30  ;;  %11899 = vmatmul.msk.bf16.gmra.mxu2 %vm228_vm0, %v15743_v5  ;;  %v4093_v54 = vpack.c.bf16 %v4048_v4, %v4047_v47  ;;  %v16019_v5 = vld [vmem:[%s19702_s5] sm:$0xff]  ;;  %v16023_v47 = vpop.permute.xlu0 %4396 }
 0x585   :  { %11939 = vmatmul.msk.bf16.gmra.mxu3 %vm888_vm1, %v3512_v44  ;;  %12004 = vmatmul.msk.bf16.gmra.mxu1 %vm888_vm1, %v4093_v54 }
 0x586   :  { %v3394_v27 = vpop.f32.mrf.mxu2  ;;  %v3939_v24 = vpop.f32.mrf.mxu0 }
 0x587   :  { %v3940_v37 = vadd.f32 %v16019_v5, %v3939_v24  ;;  %v3395_v45 = vadd.f32 %v16019_v5, %v3394_v27 }
 0x588   :  { %v3664_v46 = vpop.f32.mrf.mxu3 }
 0x589   :  { %v16013_v11 = vadd.f32 %v3664_v46, %v15617_v17  ;;  %11964 = vmatmul.msk.bf16.gmra.mxu0 %vm228_vm0, %v3807_v61  ;;  %v4049_v17 = vmax.f32 %v3940_v37, 0.0  ;;  %v3477_v44 = vmax.f32 %v3395_v45, 0.0 }
 0x58a   :  { %v3147_v14 = vpop.f32.mrf.mxu1 }
 0x58e   :  { %v3396_v19 = vpop.f32.mrf.mxu2  ;;  %v3941_v30 = vpop.f32.mrf.mxu0 }
 0x58f   :  { %v3397_v49 = vadd.f32 %v15990_v38, %v3396_v19  ;;  %v3942_v4 = vadd.f32 %v15990_v38, %v3941_v30  ;;  %v3809_v19 = vpop.permute.xlu0 %3808 }
 0x590   :  { %v3666_v28 = vpop.f32.mrf.mxu3 }
 0x591   :  { %v3478_v41 = vmax.f32 %v3397_v49, 0.0  ;;  %v16028_v54 = vadd.f32 %v3666_v28, %v15635_v20  ;;  %v4050_v61 = vmax.f32 %v3942_v4, 0.0  ;;  %v16040_v28 = vpop.permute.xlu2 %4398 }
 0x592   :  { %v3149_v27 = vpop.f32.mrf.mxu1  ;;  %19757 = vst [vmem:[#allocation2_spill] sm:$0xff] %v16040_v28 }
 0x593   :  { %v3513_v46 = vpack.c.bf16 %v3478_v41, %v3477_v44  ;;  %11900 = vmatmul.msk.bf16.gmra.mxu2 %vm228_vm0, %v15726_v22  ;;  %v4094_v24 = vpack.c.bf16 %v4050_v61, %v4049_v17 }
 0x595   :  { %11940 = vmatmul.msk.bf16.gmra.mxu3 %vm888_vm1, %v3513_v46  ;;  %12005 = vmatmul.msk.bf16.gmra.mxu1 %vm888_vm1, %v4094_v24 }
 0x596   :  { %v3399_v14 = vpop.f32.mrf.mxu2  ;;  %v3944_v37 = vpop.f32.mrf.mxu0 }
 0x597   :  { %v3945_v49 = vadd.f32 %v16019_v5, %v3944_v37  ;;  %v3400_v22 = vadd.f32 %v16019_v5, %v3399_v14 }
 0x598   :  { %v3669_v30 = vpop.f32.mrf.mxu3 }
 0x599   :  { %v16035_v45 = vadd.f32 %v3669_v30, %v15652_v32  ;;  %11965 = vmatmul.msk.bf16.gmra.mxu0 %vm228_vm0, %v3809_v19  ;;  %v4051_v41 = vmax.f32 %v3945_v49, 0.0  ;;  %v3479_v27 = vmax.f32 %v3400_v22, 0.0 }
 0x59a   :  { %v3150_v20 = vpop.f32.mrf.mxu1 }
 0x59e   :  { %v3401_v17 = vpop.f32.mrf.mxu2  ;;  %v3946_v44 = vpop.f32.mrf.mxu0 }
 0x59f   :  { %v3402_v4 = vadd.f32 %v15990_v38, %v3401_v17  ;;  %v3947_v46 = vadd.f32 %v15990_v38, %v3946_v44  ;;  %v3811_v17 = vpop.permute.xlu2 %3810 }
 0x5a0   :  { %v3671_v61 = vpop.f32.mrf.mxu3 }
 0x5a1   :  { %v3480_v32 = vmax.f32 %v3402_v4, 0.0  ;;  %v16045_v24 = vadd.f32 %v3671_v61, %v15675_v26  ;;  %v4052_v19 = vmax.f32 %v3947_v46, 0.0  ;;  %v16057_v61 = vpop.permute.xlu1 %4400 }
 0x5a2   :  { %v3152_v14 = vpop.f32.mrf.mxu1  ;;  %19758 = vst [vmem:[#allocation10_spill] sm:$0xff] %v16057_v61 }
 0x5a3   :  { %v3514_v30 = vpack.c.bf16 %v3480_v32, %v3479_v27  ;;  %11901 = vmatmul.msk.bf16.gmra.mxu2 %vm228_vm0, %v15778_v12  ;;  %v4095_v37 = vpack.c.bf16 %v4052_v19, %v4051_v41 }
 0x5a5   :  { %11941 = vmatmul.msk.bf16.gmra.mxu3 %vm888_vm1, %v3514_v30  ;;  %12006 = vmatmul.msk.bf16.gmra.mxu1 %vm888_vm1, %v4095_v37 }
 0x5a6   :  { %v3404_v20 = vpop.f32.mrf.mxu2  ;;  %v3949_v49 = vpop.f32.mrf.mxu0 }
 0x5a7   :  { %v3950_v4 = vadd.f32 %v16019_v5, %v3949_v49  ;;  %v3405_v12 = vadd.f32 %v16019_v5, %v3404_v20 }
 0x5a8   :  { %v3674_v44 = vpop.f32.mrf.mxu3 }
 0x5a9   :  { %v16052_v22 = vadd.f32 %v3674_v44, %v15696_v51  ;;  %11966 = vmatmul.msk.bf16.gmra.mxu0 %vm228_vm0, %v3811_v17  ;;  %v4053_v32 = vmax.f32 %v3950_v4, 0.0  ;;  %v3481_v14 = vmax.f32 %v3405_v12, 0.0  ;;  %v3813_v12 = vpop.permute.xlu1 %3812 }
 0x5aa   :  { %v3153_v26 = vpop.f32.mrf.mxu1 }
 0x5ab   :  { %v16069_v26 = vld [vmem:[%s19699_s1 + $0x8] sm:$0xff] }
 0x5ae   :  { %v3406_v41 = vpop.f32.mrf.mxu2  ;;  %v3951_v27 = vpop.f32.mrf.mxu0 }
 0x5af   :  { %v3407_v46 = vadd.f32 %v15990_v38, %v3406_v41  ;;  %v3952_v30 = vadd.f32 %v15990_v38, %v3951_v27 }
 0x5b0   :  { %v3676_v19 = vpop.f32.mrf.mxu3 }
 0x5b1   :  { %v3482_v51 = vmax.f32 %v3407_v46, 0.0  ;;  %v16062_v37 = vadd.f32 %v3676_v19, %v15723_v40  ;;  %v4054_v17 = vmax.f32 %v3952_v30, 0.0  ;;  %v16086_v30 = vpop.permute.xlu0 %4402 }
 0x5b2   :  { %v3155_v20 = vpop.f32.mrf.mxu1  ;;  %19759 = vst [vmem:[#allocation5_spill] sm:$0xff] %v16086_v30 }
 0x5b3   :  { %v3515_v44 = vpack.c.bf16 %v3482_v51, %v3481_v14  ;;  %12025 = vmatmul.msk.bf16.vlgmr.msrb.gmra.mxu2 %vm228_vm0, %v15766_v13  ;;  %v4096_v49 = vpack.c.bf16 %v4054_v17, %v4053_v32  ;;  %v16077_v13 = vld [vmem:[%s19699_s1] sm:$0xff] }
 0x5b4   :  { %6986 = vmatpush.bf16.msrb.mxu2 %v16069_v26 }
 0x5b5   :  { %11942 = vmatmul.msk.bf16.gmra.mxu3 %vm888_vm1, %v3515_v44  ;;  %12007 = vmatmul.msk.bf16.gmra.mxu1 %vm888_vm1, %v4096_v49 }
 0x5b6   :  { %v3409_v4 = vpop.f32.mrf.mxu2  ;;  %v3954_v40 = vpop.f32.mrf.mxu0 }
 0x5b7   :  { %v3955_v32 = vadd.f32 %v16019_v5, %v3954_v40  ;;  %v3410_v19 = vadd.f32 %v16019_v5, %v3409_v4  ;;  %v19760_v40 = vld [vmem:[#allocation12_spill] sm:$0xff] }
 0x5b8   :  { %v3679_v41 = vpop.f32.mrf.mxu3  ;;  %6987 = vmatpush.bf16.msrb.mxu2 %v16077_v13 }
 0x5b9   :  { %v16081_v46 = vadd.f32 %v3679_v41, %v15746_v9  ;;  %11967 = vmatmul.msk.bf16.gmra.mxu0 %vm228_vm0, %v3813_v12  ;;  %v4055_v44 = vmax.f32 %v3955_v32, 0.0  ;;  %v3483_v61 = vmax.f32 %v3410_v19, 0.0 }
 0x5ba   :  { %v3156_v27 = vpop.f32.mrf.mxu1 }
 0x5be   :  { %v3411_v14 = vpop.f32.mrf.mxu2  ;;  %v3956_v17 = vpop.f32.mrf.mxu0 }
 0x5bf   :  { %v3412_v51 = vadd.f32 %v15990_v38, %v3411_v14  ;;  %v3957_v49 = vadd.f32 %v15990_v38, %v3956_v17  ;;  %v3815_v14 = vpop.permute.xlu0 %3814 }
 0x5c0   :  { %v3681_v20 = vpop.f32.mrf.mxu3 }
 0x5c1   :  { %v3484_v9 = vmax.f32 %v3412_v51, 0.0  ;;  %v16091_v41 = vadd.f32 %v3681_v20, %v15763_v35  ;;  %v4056_v12 = vmax.f32 %v3957_v49, 0.0  ;;  %v16109_v20 = vpop.permute.xlu2 %4404 }
 0x5c2   :  { %v4231_v4 = vpop.f32.mrf.mxu1 }
 0x5c3   :  { %v3516_v27 = vpack.c.bf16 %v3484_v9, %v3483_v61  ;;  %12026 = vmatmul.msk.bf16.gmra.mxu2 %vm228_vm0, %v19760_v40  ;;  %v4097_v30 = vpack.c.bf16 %v4056_v12, %v4055_v44  ;;  %v16096_v28 = vadd.f32 %v4231_v4, %v15911_v50  ;;  %v13492_v50 = vld [vmem:[%s19701_s2 + $0xe0] sm:$0xff] }
 0x5c4   :  { %4819 = vmatpush.bf16.msrb.mxu3 %v13492_v50 }
 0x5c5   :  { %11943 = vmatmul.msk.bf16.gmra.mxu3 %vm888_vm1, %v3516_v27  ;;  %12008 = vmatmul.msk.bf16.gmra.mxu1 %vm888_vm1, %v4097_v30 }
 0x5c6   :  { %v3414_v32 = vpop.f32.mrf.mxu2  ;;  %v3959_v19 = vpop.f32.mrf.mxu0 }
 0x5c7   :  { %v3960_v61 = vadd.f32 %v16019_v5, %v3959_v19  ;;  %v3415_v44 = vadd.f32 %v16019_v5, %v3414_v32 }
 0x5c8   :  { %v3684_v51 = vpop.f32.mrf.mxu3 }
 0x5c9   :  { %11968 = vmatmul.msk.bf16.gmra.mxu0 %vm228_vm0, %v3815_v14  ;;  %v4057_v12 = vmax.f32 %v3960_v61, 0.0  ;;  %v3485_v4 = vmax.f32 %v3415_v44, 0.0 }
 0x5ca   :  { %v4233_v35 = vpop.f32.mrf.mxu1 }
 0x5cb   :  { %v16103_v17 = vadd.f32 %v4233_v35, %v15924_v34 }
 0x5ce   :  { %v3416_v30 = vpop.f32.mrf.mxu2  ;;  %v3961_v9 = vpop.f32.mrf.mxu0 }
 0x5cf   :  { %v3417_v49 = vadd.f32 %v15990_v38, %v3416_v30  ;;  %v3962_v40 = vadd.f32 %v15990_v38, %v3961_v9  ;;  %v3817_v30 = vpop.permute.xlu2 %3816 }
 0x5d0   :  { %v3685_v27 = vpop.f32.mrf.mxu3 }
 0x5d1   :  { %v3486_v34 = vmax.f32 %v3417_v49, 0.0  ;;  %v4058_v19 = vmax.f32 %v3962_v40, 0.0  ;;  %v16129_v27 = vpop.permute.xlu1 %4406 }
 0x5d2   :  { %v4236_v51 = vpop.f32.mrf.mxu1 }
 0x5d3   :  { %v3517_v14 = vpack.c.bf16 %v3486_v34, %v3485_v4  ;;  %12027 = vmatmul.msk.bf16.gmra.mxu2 %vm228_vm0, %v15808_v33  ;;  %v4098_v32 = vpack.c.bf16 %v4058_v19, %v4057_v12  ;;  %v16116_v35 = vadd.f32 %v4236_v51, %v15934_v36 }
 0x5d5   :  { %11944 = vmatmul.msk.bf16.gmra.mxu3 %vm888_vm1, %v3517_v14  ;;  %12009 = vmatmul.msk.bf16.gmra.mxu1 %vm888_vm1, %v4098_v32 }
 0x5d6   :  { %v3419_v50 = vpop.f32.mrf.mxu2  ;;  %v3964_v61 = vpop.f32.mrf.mxu0 }
 0x5d7   :  { %v3965_v33 = vadd.f32 %v16019_v5, %v3964_v61  ;;  %v3420_v36 = vadd.f32 %v16019_v5, %v3419_v50 }
 0x5d8   :  { %v3687_v9 = vpop.f32.mrf.mxu3 }
 0x5d9   :  { %v16121_v44 = vadd.f32 %v3687_v9, %v15798_v53  ;;  %11969 = vmatmul.msk.bf16.gmra.mxu0 %vm228_vm0, %v3817_v30  ;;  %v4059_v19 = vmax.f32 %v3965_v33, 0.0  ;;  %v3487_v51 = vmax.f32 %v3420_v36, 0.0 }
 0x5da   :  { %v4238_v49 = vpop.f32.mrf.mxu1 }
 0x5db   :  { %v16126_v12 = vadd.f32 %v4238_v49, %v15947_v62 }
 0x5de   :  { %v3421_v40 = vpop.f32.mrf.mxu2  ;;  %v3966_v34 = vpop.f32.mrf.mxu0 }
 0x5df   :  { %v3422_v4 = vadd.f32 %v15990_v38, %v3421_v40  ;;  %v3967_v53 = vadd.f32 %v15990_v38, %v3966_v34  ;;  %v3819_v40 = vpop.permute.xlu1 %3818 }
 0x5e0   :  { %v3689_v14 = vpop.f32.mrf.mxu3 }
 0x5e1   :  { %v3488_v32 = vmax.f32 %v3422_v4, 0.0  ;;  %v16134_v30 = vadd.f32 %v3689_v14, %v15805_v15  ;;  %v4060_v61 = vmax.f32 %v3967_v53, 0.0  ;;  %v16152_v14 = vpop.permute.xlu0 %4408 }
 0x5e2   :  { %v4241_v50 = vpop.f32.mrf.mxu1 }
 0x5e3   :  { %v3518_v62 = vpack.c.bf16 %v3488_v32, %v3487_v51  ;;  %12028 = vmatmul.msk.bf16.gmra.mxu2 %vm228_vm0, %v15825_v42  ;;  %v4099_v9 = vpack.c.bf16 %v4060_v61, %v4059_v19  ;;  %v16139_v49 = vadd.f32 %v4241_v50, %v15957_v21 }
 0x5e5   :  { %11945 = vmatmul.msk.bf16.gmra.mxu3 %vm888_vm1, %v3518_v62  ;;  %12010 = vmatmul.msk.bf16.gmra.mxu1 %vm888_vm1, %v4099_v9 }
 0x5e6   :  { %v3424_v33 = vpop.f32.mrf.mxu2  ;;  %v3969_v36 = vpop.f32.mrf.mxu0 }
 0x5e7   :  { %v3970_v42 = vadd.f32 %v16019_v5, %v3969_v36  ;;  %v3425_v21 = vadd.f32 %v16019_v5, %v3424_v33 }
 0x5e8   :  { %v3692_v4 = vpop.f32.mrf.mxu3 }
 0x5e9   :  { %v16144_v15 = vadd.f32 %v3692_v4, %v15815_v31  ;;  %11970 = vmatmul.msk.bf16.gmra.mxu0 %vm228_vm0, %v3819_v40  ;;  %v4061_v61 = vmax.f32 %v3970_v42, 0.0  ;;  %v3489_v50 = vmax.f32 %v3425_v21, 0.0 }
 0x5ea   :  { %v4243_v34 = vpop.f32.mrf.mxu1 }
 0x5eb   :  { %v16149_v19 = vadd.f32 %v4243_v34, %v15970_v16 }
 0x5ee   :  { %v3426_v53 = vpop.f32.mrf.mxu2  ;;  %v3971_v32 = vpop.f32.mrf.mxu0 }
 0x5ef   :  { %v3427_v51 = vadd.f32 %v15990_v38, %v3426_v53  ;;  %v3972_v31 = vadd.f32 %v15990_v38, %v3971_v32  ;;  %v3821_v53 = vpop.permute.xlu0 %3820 }
 0x5f0   :  { %v3694_v62 = vpop.f32.mrf.mxu3 }
 0x5f1   :  { %v3490_v9 = vmax.f32 %v3427_v51, 0.0  ;;  %v16157_v40 = vadd.f32 %v3694_v62, %v15822_v63  ;;  %v4062_v36 = vmax.f32 %v3972_v31, 0.0  ;;  %v16175_v62 = vpop.permute.xlu2 %4410 }
 0x5f2   :  { %v4246_v33 = vpop.f32.mrf.mxu1 }
 0x5f3   :  { %v3519_v16 = vpack.c.bf16 %v3490_v9, %v3489_v50  ;;  %12029 = vmatmul.msk.bf16.gmra.mxu2 %vm228_vm0, %v15842_v43  ;;  %v4100_v4 = vpack.c.bf16 %v4062_v36, %v4061_v61  ;;  %v16162_v34 = vadd.f32 %v4246_v33, %v15977_v55 }
 0x5f5   :  { %11946 = vmatmul.msk.bf16.gmra.mxu3 %vm888_vm1, %v3519_v16  ;;  %12011 = vmatmul.msk.bf16.gmra.mxu1 %vm888_vm1, %v4100_v4 }
 0x5f6   :  { %v3429_v42 = vpop.f32.mrf.mxu2  ;;  %v3974_v21 = vpop.f32.mrf.mxu0 }
 0x5f7   :  { %v3975_v43 = vadd.f32 %v16019_v5, %v3974_v21  ;;  %v3430_v55 = vadd.f32 %v16019_v5, %v3429_v42 }
 0x5f8   :  { %v3697_v51 = vpop.f32.mrf.mxu3 }
 0x5f9   :  { %v16167_v63 = vadd.f32 %v3697_v51, %v15832_v23  ;;  %11971 = vmatmul.msk.bf16.gmra.mxu0 %vm228_vm0, %v3821_v53  ;;  %v4063_v36 = vmax.f32 %v3975_v43, 0.0  ;;  %v3491_v33 = vmax.f32 %v3430_v55, 0.0 }
 0x5fa   :  { %v4248_v32 = vpop.f32.mrf.mxu1 }
 0x5fb   :  { %v16172_v61 = vadd.f32 %v4248_v32, %v15995_v18 }
 0x5fe   :  { %v3431_v31 = vpop.f32.mrf.mxu2  ;;  %v3976_v9 = vpop.f32.mrf.mxu0 }
 0x5ff   :  { %v3432_v50 = vadd.f32 %v15990_v38, %v3431_v31  ;;  %v3977_v23 = vadd.f32 %v15990_v38, %v3976_v9  ;;  %v3823_v31 = vpop.permute.xlu2 %3822 }
 0x600   :  { %v3699_v16 = vpop.f32.mrf.mxu3 }
 0x601   :  { %v3492_v4 = vmax.f32 %v3432_v50, 0.0  ;;  %v16180_v53 = vadd.f32 %v3699_v16, %v15839_v10  ;;  %v4064_v21 = vmax.f32 %v3977_v23, 0.0  ;;  %v16192_v16 = vpop.permute.xlu1 %4412 }
 0x602   :  { %v4251_v42 = vpop.f32.mrf.mxu1 }
 0x603   :  { %v3520_v18 = vpack.c.bf16 %v3492_v4, %v3491_v33  ;;  %12030 = vmatmul.msk.bf16.gmra.mxu2 %vm228_vm0, %v15865_v52  ;;  %v4101_v51 = vpack.c.bf16 %v4064_v21, %v4063_v36 }
 0x605   :  { %11947 = vmatmul.msk.bf16.gmra.mxu3 %vm888_vm1, %v3520_v18  ;;  %12012 = vmatmul.msk.bf16.gmra.mxu1 %vm888_vm1, %v4101_v51 }
 0x606   :  { %v3434_v32 = vpop.f32.mrf.mxu2  ;;  %v3979_v43 = vpop.f32.mrf.mxu0 }
 0x607   :  { %v3980_v50 = vadd.f32 %v16019_v5, %v3979_v43  ;;  %v3435_v52 = vadd.f32 %v16019_v5, %v3434_v32 }
 0x608   :  { %v3702_v9 = vpop.f32.mrf.mxu3 }
 0x609   :  { %v16187_v55 = vadd.f32 %v3702_v9, %v15849_v25  ;;  %11972 = vmatmul.msk.bf16.gmra.mxu0 %vm228_vm0, %v3823_v31  ;;  %v4065_v4 = vmax.f32 %v3980_v50, 0.0  ;;  %v3493_v42 = vmax.f32 %v3435_v52, 0.0 }
 0x60a   :  { %v4252_v10 = vpop.f32.mrf.mxu1 }
 0x60e   :  { %v3436_v36 = vpop.f32.mrf.mxu2  ;;  %v3981_v33 = vpop.f32.mrf.mxu0 }
 0x60f   :  { %v3437_v23 = vadd.f32 %v15990_v38, %v3436_v36  ;;  %v3982_v18 = vadd.f32 %v15990_v38, %v3981_v33  ;;  %v3825_v36 = vpop.permute.xlu1 %3824 }
 0x610   :  { %v3704_v21 = vpop.f32.mrf.mxu3 }
 0x611   :  { %v3494_v25 = vmax.f32 %v3437_v23, 0.0  ;;  %v16197_v51 = vadd.f32 %v3704_v21, %v15862_v56  ;;  %v4066_v31 = vmax.f32 %v3982_v18, 0.0 }
 0x612   :  { %v4254_v32 = vpop.f32.mrf.mxu1 }
 0x613   :  { %v3521_v9 = vpack.c.bf16 %v3494_v25, %v3493_v42  ;;  %12031 = vmatmul.msk.bf16.gmra.mxu2 %vm228_vm0, %v15876_v60  ;;  %v4102_v43 = vpack.c.bf16 %v4066_v31, %v4065_v4  ;;  %v16202_v10 = vadd.f32 %v4254_v32, %v16013_v11  ;;  %v16212_v11 = vpop.permute.xlu0 %4414 }
 0x615   :  { %11948 = vmatmul.msk.bf16.gmra.mxu3 %vm888_vm1, %v3521_v9  ;;  %12013 = vmatmul.msk.bf16.gmra.mxu1 %vm888_vm1, %v4102_v43 }
 0x616   :  { %v3439_v50 = vpop.f32.mrf.mxu2  ;;  %v3984_v52 = vpop.f32.mrf.mxu0 }
 0x617   :  { %v3985_v33 = vadd.f32 %v16019_v5, %v3984_v52  ;;  %v3440_v4 = vadd.f32 %v16019_v5, %v3439_v50 }
 0x618   :  { %v3707_v23 = vpop.f32.mrf.mxu3 }
 0x619   :  { %11973 = vmatmul.msk.bf16.gmra.mxu0 %vm228_vm0, %v3825_v36  ;;  %v4067_v25 = vmax.f32 %v3985_v33, 0.0  ;;  %v3495_v32 = vmax.f32 %v3440_v4, 0.0  ;;  %v12101_v4 = vld [vmem:[%s19700_s0 + $0x8] sm:$0xf] }
 0x61a   :  { %v4256_v56 = vpop.f32.mrf.mxu1 }
 0x61b   :  { %v16209_v60 = vadd.f32 %v4256_v56, %v16028_v54 }
 0x61e   :  { %v3441_v21 = vpop.f32.mrf.mxu2  ;;  %v3986_v42 = vpop.f32.mrf.mxu0 }
 0x61f   :  { %v3442_v18 = vadd.f32 %v15990_v38, %v3441_v21  ;;  %v3987_v9 = vadd.f32 %v15990_v38, %v3986_v42  ;;  %v3827_v21 = vpop.permute.xlu0 %3826 }
 0x620   :  { %v3708_v31 = vpop.f32.mrf.mxu3 }
 0x621   :  { %v3496_v43 = vmax.f32 %v3442_v18, 0.0  ;;  %v4068_v36 = vmax.f32 %v3987_v9, 0.0 }
 0x622   :  { %v4259_v54 = vpop.f32.mrf.mxu1 }
 0x623   :  { %v3522_v23 = vpack.c.bf16 %v3496_v43, %v3495_v32  ;;  %12032 = vmatmul.msk.bf16.gmra.mxu2 %vm228_vm0, %v15899_v57  ;;  %v4103_v52 = vpack.c.bf16 %v4068_v36, %v4067_v25  ;;  %v16219_v50 = vadd.f32 %v4259_v54, %v16035_v45  ;;  %v13496_v57 = vld [vmem:[%s19700_s0 + $0x14] sm:$0xf0]  ;;  %v16242_v43 = vpop.permute.xlu2 %4416 }
 0x624   :  { %v16229_v42 = vor.u32 %v13496_v57, %v12101_v4 }
 0x625   :  { %11949 = vmatmul.msk.bf16.gmra.mxu3 %vm888_vm1, %v3522_v23  ;;  %12014 = vmatmul.msk.bf16.gmra.mxu1 %vm888_vm1, %v4103_v52 }
 0x626   :  { %v3444_v56 = vpop.f32.mrf.mxu2  ;;  %v3989_v33 = vpop.f32.mrf.mxu0  ;;  %5675 = vrot.lane.b32.xlu0 %v16229_v42, %s13744_s21 }
 0x627   :  { %v3990_v31 = vadd.f32 %v16019_v5, %v3989_v33  ;;  %v3445_v32 = vadd.f32 %v16019_v5, %v3444_v56 }
 0x628   :  { %v3710_v18 = vpop.f32.mrf.mxu3 }
 0x629   :  { %v16232_v45 = vadd.f32 %v3710_v18, %v15889_v1  ;;  %11974 = vmatmul.msk.bf16.gmra.mxu0 %vm228_vm0, %v3827_v21  ;;  %v4069_v54 = vmax.f32 %v3990_v31, 0.0  ;;  %v3497_v4 = vmax.f32 %v3445_v32, 0.0  ;;  %v13528_v31 = vld [vmem:[%s19701_s2 + $0x138] sm:$0xff] }
 0x62a   :  { %v4261_v25 = vpop.f32.mrf.mxu1  ;;  %v13524_v32 = vld [vmem:[%s19701_s2 + $0x118] sm:$0xff]  ;;  %6121 = vmatpush.bf16.msra.mxu3 %v13528_v31 }
 0x62b   :  { %v16239_v9 = vadd.f32 %v4261_v25, %v16045_v24  ;;  %5531 = vmatpush.bf16.msra.mxu1 %v13524_v32 }
 0x62d   :  { %19761 = vst [vmem:[#allocation8_spill] sm:$0xff] %v16239_v9 }
 0x62e   :  { %v3446_v36 = vpop.f32.mrf.mxu2  ;;  %v3991_v1 = vpop.f32.mrf.mxu0 }
 0x62f   :  { %v3447_v23 = vadd.f32 %v15990_v38, %v3446_v36  ;;  %v3992_v21 = vadd.f32 %v15990_v38, %v3991_v1  ;;  %v3829_v36 = vpop.permute.xlu2 %3828 }
 0x630   :  { %v3712_v52 = vpop.f32.mrf.mxu3 }
 0x631   :  { %v3498_v57 = vmax.f32 %v3447_v23, 0.0  ;;  %v16247_v18 = vadd.f32 %v3712_v52, %v15896_v3  ;;  %v4070_v33 = vmax.f32 %v3992_v21, 0.0  ;;  %v13497_v23 = vld [vmem:[%s19700_s0 + $0x34] sm:$0xf0] }
 0x632   :  { %v4264_v56 = vpop.f32.mrf.mxu1 }
 0x633   :  { %v3523_v24 = vpack.c.bf16 %v3498_v57, %v3497_v4  ;;  %12033 = vmatmul.msk.bf16.gmra.mxu2 %vm228_vm0, %v15919_v0  ;;  %v4104_v25 = vpack.c.bf16 %v4070_v33, %v4069_v54  ;;  %v16252_v9 = vadd.f32 %v4264_v56, %v16052_v22  ;;  %v12105_v22 = vld [vmem:[%s19700_s0 + $0x28] sm:$0xf] }
 0x634   :  { %v16268_v54 = vor.u32 %v13497_v23, %v12105_v22  ;;  %v19763_v23 = vld [vmem:[#allocation4_spill] sm:$0xff] }
 0x635   :  { %19762 = vst [vmem:[#allocation9_spill] sm:$0xff] %v16252_v9  ;;  %11950 = vmatmul.msk.bf16.gmra.mxu3 %vm888_vm1, %v3523_v24  ;;  %12015 = vmatmul.msk.bf16.gmra.mxu1 %vm888_vm1, %v4104_v25 }
 0x636   :  { %v4504_v3 = vpop.f32.mrf.mxu2  ;;  %v3994_v0 = vpop.f32.mrf.mxu0  ;;  %5677 = vrot.lane.b32.xlu1 %v16268_v54, %s13744_s21 }
 0x637   :  { %v3995_v4 = vadd.f32 %v16019_v5, %v3994_v0  ;;  %v4505_v33 = vadd.f32 %v16019_v5, %v4504_v3 }
 0x638   :  { %v3715_v1 = vpop.f32.mrf.mxu3 }
 0x639   :  { %v16271_v52 = vadd.f32 %v3715_v1, %v15906_v48  ;;  %11975 = vmatmul.msk.bf16.gmra.mxu0 %vm228_vm0, %v3829_v36  ;;  %v4071_v31 = vmax.f32 %v3995_v4, 0.0  ;;  %v4629_v36 = vmax.f32 %v4505_v33, 0.0 }
 0x63a   :  { %v4266_v21 = vpop.f32.mrf.mxu1 }
 0x63b   :  { %v16278_v57 = vadd.f32 %v4266_v21, %v16062_v37 }
 0x63e   :  { %v4506_v24 = vpop.f32.mrf.mxu2  ;;  %v3996_v25 = vpop.f32.mrf.mxu0 }
 0x63f   :  { %v4507_v56 = vadd.f32 %v15990_v38, %v4506_v24  ;;  %v3997_v32 = vadd.f32 %v15990_v38, %v3996_v25  ;;  %v12109_v24 = vld [vmem:[%s19700_s0 + $0x48] sm:$0xf] }
 0x640   :  { %v3717_v48 = vpop.f32.mrf.mxu3 }
 0x641   :  { %v4630_v22 = vmax.f32 %v4507_v56, 0.0  ;;  %v16284_v1 = vadd.f32 %v3717_v48, %v19763_v23  ;;  %v4072_v9 = vmax.f32 %v3997_v32, 0.0  ;;  %v13498_v56 = vld [vmem:[%s19700_s0 + $0x54] sm:$0xf0] }
 0x642   :  { %v4269_v37 = vpop.f32.mrf.mxu1  ;;  %v16299_v25 = vor.u32 %v13498_v56, %v12109_v24 }
 0x643   :  { %v4679_v0 = vpack.c.bf16 %v4630_v22, %v4629_v36  ;;  %12034 = vmatmul.msk.bf16.gmra.mxu2 %vm228_vm0, %v15942_v58  ;;  %v4105_v3 = vpack.c.bf16 %v4072_v9, %v4071_v31  ;;  %v16289_v21 = vadd.f32 %v4269_v37, %v16081_v46 }
 0x644   :  { %5679 = vrot.lane.b32.xlu2 %v16299_v25, %s13744_s21 }
 0x645   :  { %12074 = vmatmul.msk.bf16.vlgmr.msrb.gmra.mxu3 %vm888_vm1, %v4679_v0  ;;  %12016 = vmatmul.msk.bf16.gmra.mxu1 %vm888_vm1, %v4105_v3 }
 0x646   :  { %v4509_v4 = vpop.f32.mrf.mxu2  ;;  %v3999_v33 = vpop.f32.mrf.mxu0 }
 0x647   :  { %v4000_v31 = vadd.f32 %v16019_v5, %v3999_v33  ;;  %v4510_v32 = vadd.f32 %v16019_v5, %v4509_v4 }
 0x648   :  { %v3720_v58 = vpop.f32.mrf.mxu3 }
 0x649   :  { %v16302_v46 = vadd.f32 %v3720_v58, %v15929_v2  ;;  %12199 = vmatmul.msk.bf16.vlgmr.msra.gmra.mxu0 %vm228_vm0, %v16229_v42  ;;  %v4073_v23 = vmax.f32 %v4000_v31, 0.0  ;;  %v4631_v3 = vmax.f32 %v4510_v32, 0.0 }
 0x64a   :  { %v4271_v9 = vpop.f32.mrf.mxu1  ;;  %7701 = vmatpush.bf16.msra.mxu0 %v16069_v26 }
 0x64b   :  { %v16311_v48 = vadd.f32 %v4271_v9, %v16091_v41  ;;  %v12113_v9 = vld [vmem:[%s19700_s0 + $0x68] sm:$0xf] }
 0x64e   :  { %v4511_v36 = vpop.f32.mrf.mxu2  ;;  %v4001_v22 = vpop.f32.mrf.mxu0  ;;  %7702 = vmatpush.bf16.msra.mxu0 %v16077_v13 }
 0x64f   :  { %v4512_v2 = vadd.f32 %v15990_v38, %v4511_v36  ;;  %v4002_v37 = vadd.f32 %v15990_v38, %v4001_v22 }
 0x650   :  { %v3722_v0 = vpop.f32.mrf.mxu3 }
 0x651   :  { %v4632_v24 = vmax.f32 %v4512_v2, 0.0  ;;  %v16318_v26 = vadd.f32 %v3722_v0, %v15939_v6  ;;  %v4074_v33 = vmax.f32 %v4002_v37, 0.0  ;;  %v13499_v6 = vld [vmem:[%s19700_s0 + $0x74] sm:$0xf0] }
 0x652   :  { %v4274_v4 = vpop.f32.mrf.mxu1  ;;  %v16330_v32 = vor.u32 %v13499_v6, %v12113_v9 }
 0x653   :  { %v4680_v41 = vpack.c.bf16 %v4632_v24, %v4631_v3  ;;  %12035 = vmatmul.msk.bf16.gmra.mxu2 %vm228_vm0, %v15965_v8  ;;  %v4106_v56 = vpack.c.bf16 %v4074_v33, %v4073_v23 }
 0x654   :  { %5681 = vrot.lane.b32.xlu0 %v16330_v32, %s13744_s21 }
 0x655   :  { %12075 = vmatmul.msk.bf16.gmra.mxu3 %vm888_vm1, %v4680_v41  ;;  %12017 = vmatmul.msk.bf16.gmra.mxu1 %vm888_vm1, %v4106_v56 }
 0x656   :  { %v4514_v58 = vpop.f32.mrf.mxu2  ;;  %v4004_v13 = vpop.f32.mrf.mxu0 }
 0x657   :  { %v4005_v2 = vadd.f32 %v16019_v5, %v4004_v13  ;;  %v4515_v22 = vadd.f32 %v16019_v5, %v4514_v58 }
 0x658   :  { %v3725_v31 = vpop.f32.mrf.mxu3 }
 0x659   :  { %v16333_v8 = vadd.f32 %v3725_v31, %v15952_v7  ;;  %12200 = vmatmul.msk.bf16.gmra.mxu0 %vm228_vm0, %v16268_v54  ;;  %v4075_v3 = vmax.f32 %v4005_v2, 0.0  ;;  %v4633_v33 = vmax.f32 %v4515_v22, 0.0  ;;  %v13500_v2 = vld [vmem:[%s19700_s0 + $0x94] sm:$0xf0] }
 0x65a   :  { %v4275_v36 = vpop.f32.mrf.mxu1 }
 0x65e   :  { %v4516_v23 = vpop.f32.mrf.mxu2  ;;  %v4006_v37 = vpop.f32.mrf.mxu0 }
 0x65f   :  { %v4517_v0 = vadd.f32 %v15990_v38, %v4516_v23  ;;  %v4007_v7 = vadd.f32 %v15990_v38, %v4006_v37 }
 0x660   :  { %v3727_v24 = vpop.f32.mrf.mxu3 }
 0x661   :  { %v4634_v41 = vmax.f32 %v4517_v0, 0.0  ;;  %v16344_v4 = vadd.f32 %v3727_v24, %v15962_v29  ;;  %v4076_v56 = vmax.f32 %v4007_v7, 0.0  ;;  %v12117_v29 = vld [vmem:[%s19700_s0 + $0x88] sm:$0xf] }
 0x662   :  { %v4277_v13 = vpop.f32.mrf.mxu1  ;;  %v16359_v22 = vor.u32 %v13500_v2, %v12117_v29 }
 0x663   :  { %v4681_v9 = vpack.c.bf16 %v4634_v41, %v4633_v33  ;;  %12036 = vmatmul.msk.bf16.gmra.mxu2 %vm228_vm0, %v15985_v59  ;;  %v4107_v58 = vpack.c.bf16 %v4076_v56, %v4075_v3  ;;  %v16349_v6 = vadd.f32 %v4277_v13, %v16121_v44 }
 0x664   :  { %5683 = vrot.lane.b32.xlu1 %v16359_v22, %s13744_s21 }
 0x665   :  { %12076 = vmatmul.msk.bf16.gmra.mxu3 %vm888_vm1, %v4681_v9  ;;  %12018 = vmatmul.msk.bf16.gmra.mxu1 %vm888_vm1, %v4107_v58 }
 0x666   :  { %v4519_v31 = vpop.f32.mrf.mxu2  ;;  %v4009_v36 = vpop.f32.mrf.mxu0 }
 0x667   :  { %v4010_v23 = vadd.f32 %v16019_v5, %v4009_v36  ;;  %v4520_v37 = vadd.f32 %v16019_v5, %v4519_v31 }
 0x668   :  { %v3730_v59 = vpop.f32.mrf.mxu3 }
 0x669   :  { %12201 = vmatmul.msk.bf16.gmra.mxu0 %vm228_vm0, %v16299_v25  ;;  %v4077_v33 = vmax.f32 %v4010_v23, 0.0  ;;  %v4635_v9 = vmax.f32 %v4520_v37, 0.0  ;;  %v13501_v23 = vld [vmem:[%s19700_s0 + $0xb4] sm:$0xf0] }
 0x66a   :  { %v4279_v44 = vpop.f32.mrf.mxu1 }
 0x66b   :  { %v16367_v0 = vadd.f32 %v4279_v44, %v16134_v30  ;;  %v12121_v44 = vld [vmem:[%s19700_s0 + $0xa8] sm:$0xf] }
 0x66c   :  { %v16385_v37 = vor.u32 %v13501_v23, %v12121_v44 }
 0x66e   :  { %v4521_v3 = vpop.f32.mrf.mxu2  ;;  %v4011_v7 = vpop.f32.mrf.mxu0  ;;  %5685 = vrot.lane.b32.xlu2 %v16385_v37, %s13744_s21 }
 0x66f   :  { %v4522_v24 = vadd.f32 %v15990_v38, %v4521_v3  ;;  %v4012_v56 = vadd.f32 %v15990_v38, %v4011_v7 }
 0x670   :  { %v3731_v41 = vpop.f32.mrf.mxu3 }
 0x671   :  { %v4636_v13 = vmax.f32 %v4522_v24, 0.0  ;;  %v4078_v58 = vmax.f32 %v4012_v56, 0.0 }
 0x672   :  { %v4282_v36 = vpop.f32.mrf.mxu1 }
 0x673   :  { %v4682_v29 = vpack.c.bf16 %v4636_v13, %v4635_v9  ;;  %12037 = vmatmul.msk.bf16.gmra.mxu2 %vm228_vm0, %v16004_v39  ;;  %v4108_v30 = vpack.c.bf16 %v4078_v58, %v4077_v33  ;;  %v16375_v2 = vadd.f32 %v4282_v36, %v16144_v15 }
 0x675   :  { %12077 = vmatmul.msk.bf16.gmra.mxu3 %vm888_vm1, %v4682_v29  ;;  %12019 = vmatmul.msk.bf16.gmra.mxu1 %vm888_vm1, %v4108_v30 }
 0x676   :  { %v4524_v31 = vpop.f32.mrf.mxu2  ;;  %v4014_v59 = vpop.f32.mrf.mxu0 }
 0x677   :  { %v4015_v3 = vadd.f32 %v16019_v5, %v4014_v59  ;;  %v4525_v7 = vadd.f32 %v16019_v5, %v4524_v31 }
 0x678   :  { %v3733_v39 = vpop.f32.mrf.mxu3 }
 0x679   :  { %12202 = vmatmul.msk.bf16.gmra.mxu0 %vm228_vm0, %v16330_v32  ;;  %v4079_v9 = vmax.f32 %v4015_v3, 0.0  ;;  %v4637_v29 = vmax.f32 %v4525_v7, 0.0  ;;  %v13502_v3 = vld [vmem:[%s19700_s0 + $0xd4] sm:$0xf0] }
 0x67a   :  { %v4284_v15 = vpop.f32.mrf.mxu1 }
 0x67b   :  { %v16393_v24 = vadd.f32 %v4284_v15, %v16157_v40  ;;  %v12125_v15 = vld [vmem:[%s19700_s0 + $0xc8] sm:$0xf] }
 0x67c   :  { %v16411_v7 = vor.u32 %v13502_v3, %v12125_v15  ;;  %v19764_v3 = vld [vmem:[#allocation2_spill] sm:$0xff] }
 0x67e   :  { %v4526_v33 = vpop.f32.mrf.mxu2  ;;  %v4016_v56 = vpop.f32.mrf.mxu0  ;;  %5687 = vrot.lane.b32.xlu0 %v16411_v7, %s13744_s21 }
 0x67f   :  { %v4527_v41 = vadd.f32 %v15990_v38, %v4526_v33  ;;  %v4017_v58 = vadd.f32 %v15990_v38, %v4016_v56 }
 0x680   :  { %v3734_v13 = vpop.f32.mrf.mxu3 }
 0x681   :  { %v4638_v36 = vmax.f32 %v4527_v41, 0.0  ;;  %v4080_v30 = vmax.f32 %v4017_v58, 0.0 }
 0x682   :  { %v4287_v59 = vpop.f32.mrf.mxu1 }
 0x683   :  { %v4683_v44 = vpack.c.bf16 %v4638_v36, %v4637_v29  ;;  %12038 = vmatmul.msk.bf16.gmra.mxu2 %vm228_vm0, %v16023_v47  ;;  %v4109_v40 = vpack.c.bf16 %v4080_v30, %v4079_v9  ;;  %v16401_v23 = vadd.f32 %v4287_v59, %v16167_v63 }
 0x685   :  { %12078 = vmatmul.msk.bf16.gmra.mxu3 %vm888_vm1, %v4683_v44  ;;  %12020 = vmatmul.msk.bf16.gmra.mxu1 %vm888_vm1, %v4109_v40 }
 0x686   :  { %v4529_v31 = vpop.f32.mrf.mxu2  ;;  %v4019_v39 = vpop.f32.mrf.mxu0 }
 0x687   :  { %v4020_v33 = vadd.f32 %v16019_v5, %v4019_v39  ;;  %v4530_v56 = vadd.f32 %v16019_v5, %v4529_v31  ;;  %v13527_v31 = vld [vmem:[%s19701_s2 + $0x130] sm:$0xff] }
 0x688   :  { %v3736_v47 = vpop.f32.mrf.mxu3  ;;  %6122 = vmatpush.bf16.msra.mxu3 %v13527_v31 }
 0x689   :  { %12203 = vmatmul.msk.bf16.gmra.mxu0 %vm228_vm0, %v16359_v22  ;;  %v4081_v29 = vmax.f32 %v4020_v33, 0.0  ;;  %v4639_v44 = vmax.f32 %v4530_v56, 0.0  ;;  %v12129_v33 = vld [vmem:[%s19700_s0 + $0xe8] sm:$0xf] }
 0x68a   :  { %v4289_v63 = vpop.f32.mrf.mxu1 }
 0x68b   :  { %v16419_v41 = vadd.f32 %v4289_v63, %v16180_v53 }
 0x68e   :  { %v4531_v9 = vpop.f32.mrf.mxu2  ;;  %v4021_v58 = vpop.f32.mrf.mxu0 }
 0x68f   :  { %v4532_v13 = vadd.f32 %v15990_v38, %v4531_v9  ;;  %v4022_v30 = vadd.f32 %v15990_v38, %v4021_v58 }
 0x690   :  { %v3737_v36 = vpop.f32.mrf.mxu3 }
 0x691   :  { %v4640_v59 = vmax.f32 %v4532_v13, 0.0  ;;  %v4082_v40 = vmax.f32 %v4022_v30, 0.0  ;;  %v13523_v13 = vld [vmem:[%s19701_s2 + $0x110] sm:$0xff] }
 0x692   :  { %v4292_v39 = vpop.f32.mrf.mxu1  ;;  %5532 = vmatpush.bf16.msra.mxu1 %v13523_v13 }
 0x693   :  { %v4684_v15 = vpack.c.bf16 %v4640_v59, %v4639_v44  ;;  %12039 = vmatmul.msk.bf16.gmra.mxu2 %vm228_vm0, %v19764_v3  ;;  %v4110_v53 = vpack.c.bf16 %v4082_v40, %v4081_v29  ;;  %v16427_v47 = vadd.f32 %v4292_v39, %v16187_v55  ;;  %v13503_v55 = vld [vmem:[%s19700_s0 + $0xf4] sm:$0xf0]  ;;  %v16457_v59 = vld [vmem:[%s19702_s5 + $0x8] sm:$0xff] }
 0x694   :  { %v16440_v9 = vor.u32 %v13503_v55, %v12129_v33  ;;  %v19765_v55 = vld [vmem:[#allocation10_spill] sm:$0xff] }
 0x695   :  { %12079 = vmatmul.msk.bf16.gmra.mxu3 %vm888_vm1, %v4684_v15  ;;  %12021 = vmatmul.msk.bf16.gmra.mxu1 %vm888_vm1, %v4110_v53 }
 0x696   :  { %v4534_v63 = vpop.f32.mrf.mxu2  ;;  %v4024_v38 = vpop.f32.mrf.mxu0  ;;  %5689 = vrot.lane.b32.xlu1 %v16440_v9, %s13744_s21 }
 0x697   :  { %v4025_v29 = vadd.f32 %v16019_v5, %v4024_v38  ;;  %v4535_v30 = vadd.f32 %v16019_v5, %v4534_v63 }
 0x698   :  { %v3739_v56 = vpop.f32.mrf.mxu3 }
 0x699   :  { %12204 = vmatmul.msk.bf16.gmra.mxu0 %vm228_vm0, %v16385_v37  ;;  %v4083_v3 = vmax.f32 %v4025_v29, 0.0  ;;  %v4641_v31 = vmax.f32 %v4535_v30, 0.0  ;;  %v13504_v29 = vld [vmem:[%s19700_s0 + $0x114] sm:$0xf0] }
 0x69a   :  { %v4294_v58 = vpop.f32.mrf.mxu1 }
 0x69b   :  { %v16451_v36 = vadd.f32 %v4294_v58, %v16197_v51  ;;  %v12133_v58 = vld [vmem:[%s19700_s0 + $0x108] sm:$0xf] }
 0x69e   :  { %v4536_v44 = vpop.f32.mrf.mxu2  ;;  %v4026_v15 = vpop.f32.mrf.mxu0 }
 0x69f   :  { %v4537_v40 = vadd.f32 %v16457_v59, %v4536_v44  ;;  %v4027_v53 = vadd.f32 %v16457_v59, %v4026_v15  ;;  %v16471_v44 = vor.u32 %v13504_v29, %v12133_v58  ;;  %v16480_v15 = vld [vmem:[%s19702_s5] sm:$0xff] }
 0x6a0   :  { %v3740_v39 = vpop.f32.mrf.mxu3 }
 0x6a1   :  { %v4642_v38 = vmax.f32 %v4537_v40, 0.0  ;;  %v4084_v33 = vmax.f32 %v4027_v53, 0.0  ;;  %5691 = vrot.lane.b32.xlu2 %v16471_v44, %s13744_s21  ;;  %v13522_v53 = vld [vmem:[%s19701_s2 + $0x108] sm:$0xff] }
 0x6a2   :  { %v4297_v5 = vpop.f32.mrf.mxu1  ;;  %5533 = vmatpush.bf16.msra.mxu1 %v13522_v53 }
 0x6a3   :  { %v4685_v51 = vpack.c.bf16 %v4642_v38, %v4641_v31  ;;  %12040 = vmatmul.msk.bf16.gmra.mxu2 %vm228_vm0, %v19765_v55  ;;  %v4111_v63 = vpack.c.bf16 %v4084_v33, %v4083_v3 }
 0x6a5   :  { %12080 = vmatmul.msk.bf16.gmra.mxu3 %vm888_vm1, %v4685_v51  ;;  %12022 = vmatmul.msk.bf16.gmra.mxu1 %vm888_vm1, %v4111_v63 }
 0x6a6   :  { %v4539_v56 = vpop.f32.mrf.mxu2  ;;  %v4029_v13 = vpop.f32.mrf.mxu0 }
 0x6a7   :  { %v4030_v3 = vadd.f32 %v16480_v15, %v4029_v13  ;;  %v4540_v39 = vadd.f32 %v16480_v15, %v4539_v56  ;;  %v13521_v13 = vld [vmem:[%s19701_s2 + $0x100] sm:$0xff] }
 0x6a8   :  { %v3742_v30 = vpop.f32.mrf.mxu3  ;;  %5534 = vmatpush.bf16.msra.mxu1 %v13521_v13 }
 0x6a9   :  { %12205 = vmatmul.msk.bf16.gmra.mxu0 %vm228_vm0, %v16411_v7  ;;  %v4085_v51 = vmax.f32 %v4030_v3, 0.0  ;;  %v4643_v63 = vmax.f32 %v4540_v39, 0.0  ;;  %v19766_v30 = vld [vmem:[#allocation5_spill] sm:$0xff] }
 0x6aa   :  { %v4298_v40 = vpop.f32.mrf.mxu1 }
 0x6ae   :  { %v4541_v31 = vpop.f32.mrf.mxu2  ;;  %v4031_v33 = vpop.f32.mrf.mxu0 }
 0x6af   :  { %v4542_v38 = vadd.f32 %v16457_v59, %v4541_v31  ;;  %v4032_v5 = vadd.f32 %v16457_v59, %v4031_v33  ;;  %v13505_v33 = vld [vmem:[%s19700_s0 + $0x134] sm:$0xf0] }
 0x6b0   :  { %v3743_v55 = vpop.f32.mrf.mxu3 }
 0x6b1   :  { %v4644_v58 = vmax.f32 %v4542_v38, 0.0  ;;  %v4086_v56 = vmax.f32 %v4032_v5, 0.0  ;;  %v12137_v38 = vld [vmem:[%s19700_s0 + $0x128] sm:$0xf] }
 0x6b2   :  { %v4300_v40 = vpop.f32.mrf.mxu1  ;;  %v16505_v5 = vor.u32 %v13505_v33, %v12137_v38 }
 0x6b3   :  { %v4686_v29 = vpack.c.bf16 %v4644_v58, %v4643_v63  ;;  %12041 = vmatmul.msk.bf16.gmra.mxu2 %vm228_vm0, %v19766_v30  ;;  %v4112_v31 = vpack.c.bf16 %v4086_v56, %v4085_v51  ;;  %v16495_v53 = vadd.f32 %v4300_v40, %v16232_v45 }
 0x6b4   :  { %5693 = vrot.lane.b32.xlu0 %v16505_v5, %s13744_s21 }
 0x6b5   :  { %19767 = vst [vmem:[#allocation6_spill] sm:$0xff] %v16495_v53  ;;  %12081 = vmatmul.msk.bf16.gmra.mxu3 %vm888_vm1, %v4686_v29  ;;  %12023 = vmatmul.msk.bf16.gmra.mxu1 %vm888_vm1, %v4112_v31 }
 0x6b6   :  { %v4544_v3 = vpop.f32.mrf.mxu2  ;;  %v4034_v39 = vpop.f32.mrf.mxu0 }
 0x6b7   :  { %v4035_v51 = vadd.f32 %v16480_v15, %v4034_v39  ;;  %v4545_v58 = vadd.f32 %v16480_v15, %v4544_v3 }
 0x6b8   :  { %v3745_v55 = vpop.f32.mrf.mxu3 }
 0x6b9   :  { %12206 = vmatmul.msk.bf16.gmra.mxu0 %vm228_vm0, %v16440_v9  ;;  %v4087_v30 = vmax.f32 %v4035_v51, 0.0  ;;  %v4645_v38 = vmax.f32 %v4545_v58, 0.0  ;;  %v12141_v58 = vld [vmem:[%s19700_s0 + $0x148] sm:$0xf] }
 0x6ba   :  { %v4302_v45 = vpop.f32.mrf.mxu1 }
 0x6bb   :  { %v16513_v63 = vadd.f32 %v4302_v45, %v16247_v18 }
 0x6be   :  { %v4546_v13 = vpop.f32.mrf.mxu2  ;;  %v4036_v29 = vpop.f32.mrf.mxu0 }
 0x6bf   :  { %v4547_v56 = vadd.f32 %v16457_v59, %v4546_v13  ;;  %v4037_v31 = vadd.f32 %v16457_v59, %v4036_v29  ;;  %v13506_v13 = vld [vmem:[%s19700_s0 + $0x154] sm:$0xf0] }
 0x6c0   :  { %v3746_v40 = vpop.f32.mrf.mxu3 }
 0x6c1   :  { %v4646_v33 = vmax.f32 %v4547_v56, 0.0  ;;  %v4088_v55 = vmax.f32 %v4037_v31, 0.0  ;;  %v16531_v56 = vor.u32 %v13506_v13, %v12141_v58 }
 0x6c2   :  { %v4305_v39 = vpop.f32.mrf.mxu1 }
 0x6c3   :  { %v4687_v53 = vpack.c.bf16 %v4646_v33, %v4645_v38  ;;  %12042 = vmatmul.msk.bf16.gmra.mxu2 %vm228_vm0, %v16109_v20  ;;  %v4113_v18 = vpack.c.bf16 %v4088_v55, %v4087_v30  ;;  %v16521_v45 = vadd.f32 %v4305_v39, %v16271_v52  ;;  %5695 = vrot.lane.b32.xlu1 %v16531_v56, %s13744_s21 }
 0x6c5   :  { %12082 = vmatmul.msk.bf16.gmra.mxu3 %vm888_vm1, %v4687_v53  ;;  %12024 = vmatmul.msk.bf16.gmra.mxu1 %vm888_vm1, %v4113_v18 }
 0x6c6   :  { %v4549_v3 = vpop.f32.mrf.mxu2  ;;  %v5219_v51 = vpop.f32.mrf.mxu0 }
 0x6c7   :  { %v5220_v29 = vadd.f32 %v16480_v15, %v5219_v51  ;;  %v4550_v40 = vadd.f32 %v16480_v15, %v4549_v3 }
 0x6c8   :  { %v4821_v20 = vpop.f32.mrf.mxu3 }
 0x6c9   :  { %v16534_v52 = vadd.f32 %v4821_v20, %v16096_v28  ;;  %12207 = vmatmul.msk.bf16.gmra.mxu0 %vm228_vm0, %v16471_v44  ;;  %v5344_v28 = vmax.f32 %v5220_v29, 0.0  ;;  %v4647_v18 = vmax.f32 %v4550_v40, 0.0 }
 0x6ca   :  { %v4307_v53 = vpop.f32.mrf.mxu1 }
 0x6cb   :  { %v16542_v30 = vadd.f32 %v4307_v53, %v16284_v1 }
 0x6cd   :  { %19768 = vst [vmem:[#allocation3_spill] sm:$0xff] %v16542_v30 }
 0x6ce   :  { %v4551_v31 = vpop.f32.mrf.mxu2  ;;  %v5221_v33 = vpop.f32.mrf.mxu0 }
 0x6cf   :  { %v4552_v38 = vadd.f32 %v16457_v59, %v4551_v31  ;;  %v5222_v39 = vadd.f32 %v16457_v59, %v5221_v33  ;;  %v13507_v31 = vld [vmem:[%s19700_s0 + $0x174] sm:$0xf0] }
 0x6d0   :  { %v4823_v55 = vpop.f32.mrf.mxu3 }
 0x6d1   :  { %v4648_v58 = vmax.f32 %v4552_v38, 0.0  ;;  %v16548_v13 = vadd.f32 %v4823_v55, %v16103_v17  ;;  %v5345_v20 = vmax.f32 %v5222_v39, 0.0  ;;  %v12145_v17 = vld [vmem:[%s19700_s0 + $0x168] sm:$0xf] }
 0x6d2   :  { %v4310_v1 = vpop.f32.mrf.mxu1  ;;  %v16563_v38 = vor.u32 %v13507_v31, %v12145_v17 }
 0x6d3   :  { %v4688_v51 = vpack.c.bf16 %v4648_v58, %v4647_v18  ;;  %12043 = vmatmul.msk.bf16.gmra.mxu2 %vm228_vm0, %v16129_v27  ;;  %v5394_v3 = vpack.c.bf16 %v5345_v20, %v5344_v28  ;;  %v16553_v53 = vadd.f32 %v4310_v1, %v16302_v46 }
 0x6d4   :  { %5697 = vrot.lane.b32.xlu2 %v16563_v38, %s13744_s21 }
 0x6d5   :  { %19769 = vst [vmem:[#allocation7_spill] sm:$0xff] %v16553_v53  ;;  %12083 = vmatmul.msk.bf16.gmra.mxu3 %vm888_vm1, %v4688_v51  ;;  %12248 = vmatmul.msk.bf16.vlgmr.msra.gmra.mxu1 %vm888_vm1, %v5394_v3  ;;  %v12189_v53 = vld [vmem:[%s19700_s0 + $0x2c8] sm:$0xf] }
 0x6d6   :  { %v4554_v29 = vpop.f32.mrf.mxu2  ;;  %v5224_v40 = vpop.f32.mrf.mxu0 }
 0x6d7   :  { %v5225_v28 = vadd.f32 %v16480_v15, %v5224_v40  ;;  %v4555_v39 = vadd.f32 %v16480_v15, %v4554_v29 }
 0x6d8   :  { %v4826_v27 = vpop.f32.mrf.mxu3 }
 0x6d9   :  { %v16566_v46 = vadd.f32 %v4826_v27, %v16116_v35  ;;  %12208 = vmatmul.msk.bf16.gmra.mxu0 %vm228_vm0, %v16505_v5  ;;  %v5346_v35 = vmax.f32 %v5225_v28, 0.0  ;;  %v4649_v3 = vmax.f32 %v4555_v39, 0.0 }
 0x6da   :  { %v4312_v33 = vpop.f32.mrf.mxu1 }
 0x6db   :  { %v16574_v55 = vadd.f32 %v4312_v33, %v16318_v26 }
 0x6dd   :  { %19770 = vst [vmem:[#allocation11_spill] sm:$0xff] %v16574_v55 }
 0x6de   :  { %v4556_v18 = vpop.f32.mrf.mxu2  ;;  %v5226_v20 = vpop.f32.mrf.mxu0 }
 0x6df   :  { %v4557_v58 = vadd.f32 %v16457_v59, %v4556_v18  ;;  %v5227_v1 = vadd.f32 %v16457_v59, %v5226_v20  ;;  %v13508_v18 = vld [vmem:[%s19700_s0 + $0x194] sm:$0xf0] }
 0x6e0   :  { %v4828_v51 = vpop.f32.mrf.mxu3 }
 0x6e1   :  { %v4650_v17 = vmax.f32 %v4557_v58, 0.0  ;;  %v16580_v31 = vadd.f32 %v4828_v51, %v16126_v12  ;;  %v5347_v27 = vmax.f32 %v5227_v1, 0.0  ;;  %v12149_v12 = vld [vmem:[%s19700_s0 + $0x188] sm:$0xf] }
 0x6e2   :  { %v4315_v26 = vpop.f32.mrf.mxu1  ;;  %v16595_v58 = vor.u32 %v13508_v18, %v12149_v12 }
 0x6e3   :  { %v4689_v40 = vpack.c.bf16 %v4650_v17, %v4649_v3  ;;  %12044 = vmatmul.msk.bf16.gmra.mxu2 %vm228_vm0, %v16152_v14  ;;  %v5395_v29 = vpack.c.bf16 %v5347_v27, %v5346_v35  ;;  %v16585_v33 = vadd.f32 %v4315_v26, %v16333_v8 }
 0x6e4   :  { %5699 = vrot.lane.b32.xlu0 %v16595_v58, %s13744_s21 }
 0x6e5   :  { %19771 = vst [vmem:[#allocation12_spill] sm:$0xff] %v16585_v33  ;;  %12084 = vmatmul.msk.bf16.gmra.mxu3 %vm888_vm1, %v4689_v40  ;;  %12249 = vmatmul.msk.bf16.gmra.mxu1 %vm888_vm1, %v5395_v29 }
 0x6e6   :  { %v4559_v28 = vpop.f32.mrf.mxu2  ;;  %v5229_v39 = vpop.f32.mrf.mxu0 }
 0x6e7   :  { %v5230_v35 = vadd.f32 %v16480_v15, %v5229_v39  ;;  %v4560_v1 = vadd.f32 %v16480_v15, %v4559_v28 }
 0x6e8   :  { %v4831_v14 = vpop.f32.mrf.mxu3 }
 0x6e9   :  { %v16598_v8 = vadd.f32 %v4831_v14, %v16139_v49  ;;  %12209 = vmatmul.msk.bf16.gmra.mxu0 %vm228_vm0, %v16531_v56  ;;  %v5348_v49 = vmax.f32 %v5230_v35, 0.0  ;;  %v4651_v29 = vmax.f32 %v4560_v1, 0.0  ;;  %v12153_v1 = vld [vmem:[%s19700_s0 + $0x1a8] sm:$0xf] }
 0x6ea   :  { %v4317_v20 = vpop.f32.mrf.mxu1 }
 0x6eb   :  { %v16606_v51 = vadd.f32 %v4317_v20, %v16344_v4 }
 0x6ed   :  { %19772 = vst [vmem:[#allocation4_spill] sm:$0xff] %v16606_v51 }
 0x6ee   :  { %v4561_v3 = vpop.f32.mrf.mxu2  ;;  %v5231_v27 = vpop.f32.mrf.mxu0 }
 0x6ef   :  { %v4562_v17 = vadd.f32 %v16457_v59, %v4561_v3  ;;  %v5232_v26 = vadd.f32 %v16457_v59, %v5231_v27  ;;  %v13526_v27 = vld [vmem:[%s19701_s2 + $0x128] sm:$0xff] }
 0x6f0   :  { %v4833_v40 = vpop.f32.mrf.mxu3  ;;  %6123 = vmatpush.bf16.msra.mxu3 %v13526_v27 }
 0x6f1   :  { %v4652_v12 = vmax.f32 %v4562_v17, 0.0  ;;  %v16612_v18 = vadd.f32 %v4833_v40, %v16149_v19  ;;  %v5349_v14 = vmax.f32 %v5232_v26, 0.0  ;;  %v13509_v19 = vld [vmem:[%s19700_s0 + $0x1b4] sm:$0xf0] }
 0x6f2   :  { %v4320_v4 = vpop.f32.mrf.mxu1  ;;  %v16624_v17 = vor.u32 %v13509_v19, %v12153_v1 }
 0x6f3   :  { %v4690_v39 = vpack.c.bf16 %v4652_v12, %v4651_v29  ;;  %12045 = vmatmul.msk.bf16.gmra.mxu2 %vm228_vm0, %v16175_v62  ;;  %v5396_v28 = vpack.c.bf16 %v5349_v14, %v5348_v49 }
 0x6f4   :  { %5701 = vrot.lane.b32.xlu1 %v16624_v17, %s13744_s21 }
 0x6f5   :  { %12085 = vmatmul.msk.bf16.gmra.mxu3 %vm888_vm1, %v4690_v39  ;;  %12250 = vmatmul.msk.bf16.gmra.mxu1 %vm888_vm1, %v5396_v28 }
 0x6f6   :  { %v4564_v20 = vpop.f32.mrf.mxu2  ;;  %v5234_v35 = vpop.f32.mrf.mxu0 }
 0x6f7   :  { %v5235_v40 = vadd.f32 %v16480_v15, %v5234_v35  ;;  %v4565_v26 = vadd.f32 %v16480_v15, %v4564_v20 }
 0x6f8   :  { %v4836_v3 = vpop.f32.mrf.mxu3 }
 0x6f9   :  { %v16627_v62 = vadd.f32 %v4836_v3, %v16162_v34  ;;  %12210 = vmatmul.msk.bf16.gmra.mxu0 %vm228_vm0, %v16563_v38  ;;  %v5350_v14 = vmax.f32 %v5235_v40, 0.0  ;;  %v4653_v28 = vmax.f32 %v4565_v26, 0.0  ;;  %v12157_v26 = vld [vmem:[%s19700_s0 + $0x1c8] sm:$0xf] }
 0x6fa   :  { %v4321_v49 = vpop.f32.mrf.mxu1 }
 0x6fe   :  { %v4566_v29 = vpop.f32.mrf.mxu2  ;;  %v5236_v12 = vpop.f32.mrf.mxu0 }
 0x6ff   :  { %v4567_v34 = vadd.f32 %v16457_v59, %v4566_v29  ;;  %v5237_v4 = vadd.f32 %v16457_v59, %v5236_v12 }
 0x700   :  { %v4838_v39 = vpop.f32.mrf.mxu3 }
 0x701   :  { %v4654_v1 = vmax.f32 %v4567_v34, 0.0  ;;  %v16641_v19 = vadd.f32 %v4838_v39, %v16172_v61  ;;  %v5351_v3 = vmax.f32 %v5237_v4, 0.0  ;;  %v13510_v61 = vld [vmem:[%s19700_s0 + $0x1d4] sm:$0xf0] }
 0x702   :  { %v4323_v35 = vpop.f32.mrf.mxu1  ;;  %v16653_v34 = vor.u32 %v13510_v61, %v12157_v26 }
 0x703   :  { %v4691_v49 = vpack.c.bf16 %v4654_v1, %v4653_v28  ;;  %12046 = vmatmul.msk.bf16.gmra.mxu2 %vm228_vm0, %v16192_v16  ;;  %v5397_v20 = vpack.c.bf16 %v5351_v3, %v5350_v14 }
 0x704   :  { %5703 = vrot.lane.b32.xlu2 %v16653_v34, %s13744_s21 }
 0x705   :  { %12086 = vmatmul.msk.bf16.gmra.mxu3 %vm888_vm1, %v4691_v49  ;;  %12251 = vmatmul.msk.bf16.gmra.mxu1 %vm888_vm1, %v5397_v20 }
 0x706   :  { %v4569_v27 = vpop.f32.mrf.mxu2  ;;  %v5239_v40 = vpop.f32.mrf.mxu0 }
 0x707   :  { %v5240_v12 = vadd.f32 %v16480_v15, %v5239_v40  ;;  %v4570_v14 = vadd.f32 %v16480_v15, %v4569_v27 }
 0x708   :  { %v4841_v29 = vpop.f32.mrf.mxu3 }
 0x709   :  { %12211 = vmatmul.msk.bf16.gmra.mxu0 %vm228_vm0, %v16595_v58  ;;  %v5352_v1 = vmax.f32 %v5240_v12, 0.0  ;;  %v4655_v35 = vmax.f32 %v4570_v14, 0.0  ;;  %v12161_v12 = vld [vmem:[%s19700_s0 + $0x1e8] sm:$0xf]  ;;  %v13511_v14 = vld [vmem:[%s19700_s0 + $0x1f4] sm:$0xf0] }
 0x70a   :  { %v4324_v16 = vpop.f32.mrf.mxu1 }
 0x70e   :  { %v4571_v39 = vpop.f32.mrf.mxu2  ;;  %v5241_v28 = vpop.f32.mrf.mxu0 }
 0x70f   :  { %v4572_v4 = vadd.f32 %v16457_v59, %v4571_v39  ;;  %v5242_v49 = vadd.f32 %v16457_v59, %v5241_v28 }
 0x710   :  { %v4842_v3 = vpop.f32.mrf.mxu3 }
 0x711   :  { %v4656_v20 = vmax.f32 %v4572_v4, 0.0  ;;  %v5353_v26 = vmax.f32 %v5242_v49, 0.0  ;;  %v16673_v4 = vor.u32 %v13511_v14, %v12161_v12 }
 0x712   :  { %v4326_v29 = vpop.f32.mrf.mxu1 }
 0x713   :  { %v4692_v61 = vpack.c.bf16 %v4656_v20, %v4655_v35  ;;  %12047 = vmatmul.msk.bf16.gmra.mxu2 %vm228_vm0, %v16212_v11  ;;  %v5398_v16 = vpack.c.bf16 %v5353_v26, %v5352_v1  ;;  %5705 = vrot.lane.b32.xlu0 %v16673_v4, %s13744_s21 }
 0x715   :  { %12087 = vmatmul.msk.bf16.gmra.mxu3 %vm888_vm1, %v4692_v61  ;;  %12252 = vmatmul.msk.bf16.gmra.mxu1 %vm888_vm1, %v5398_v16 }
 0x716   :  { %v4574_v27 = vpop.f32.mrf.mxu2  ;;  %v5244_v40 = vpop.f32.mrf.mxu0 }
 0x717   :  { %v5245_v1 = vadd.f32 %v16480_v15, %v5244_v40  ;;  %v4575_v3 = vadd.f32 %v16480_v15, %v4574_v27 }
 0x718   :  { %v4844_v39 = vpop.f32.mrf.mxu3 }
 0x719   :  { %v16676_v11 = vadd.f32 %v4844_v39, %v16202_v10  ;;  %12212 = vmatmul.msk.bf16.gmra.mxu0 %vm228_vm0, %v16624_v17  ;;  %v5354_v26 = vmax.f32 %v5245_v1, 0.0  ;;  %v4657_v29 = vmax.f32 %v4575_v3, 0.0  ;;  %v12165_v3 = vld [vmem:[%s19700_s0 + $0x208] sm:$0xf] }
 0x71a   :  { %v4327_v28 = vpop.f32.mrf.mxu1 }
 0x71e   :  { %v4576_v49 = vpop.f32.mrf.mxu2  ;;  %v5246_v20 = vpop.f32.mrf.mxu0 }
 0x71f   :  { %v4577_v35 = vadd.f32 %v16457_v59, %v4576_v49  ;;  %v5247_v10 = vadd.f32 %v16457_v59, %v5246_v20 }
 0x720   :  { %v4846_v61 = vpop.f32.mrf.mxu3 }
 0x721   :  { %v4658_v16 = vmax.f32 %v4577_v35, 0.0  ;;  %v16687_v12 = vadd.f32 %v4846_v61, %v16209_v60  ;;  %v5355_v14 = vmax.f32 %v5247_v10, 0.0  ;;  %v13512_v60 = vld [vmem:[%s19700_s0 + $0x214] sm:$0xf0] }
 0x722   :  { %v4329_v40 = vpop.f32.mrf.mxu1  ;;  %v16699_v35 = vor.u32 %v13512_v60, %v12165_v3  ;;  %v19773_v60 = vld [vmem:[#allocation8_spill] sm:$0xff] }
 0x723   :  { %v4693_v39 = vpack.c.bf16 %v4658_v16, %v4657_v29  ;;  %12048 = vmatmul.msk.bf16.gmra.mxu2 %vm228_vm0, %v16242_v43  ;;  %v5399_v27 = vpack.c.bf16 %v5355_v14, %v5354_v26  ;;  %v4419_v40 = vpop.permute.xlu1 %4418 }
 0x724   :  { %5707 = vrot.lane.b32.xlu1 %v16699_v35, %s13744_s21 }
 0x725   :  { %12088 = vmatmul.msk.bf16.gmra.mxu3 %vm888_vm1, %v4693_v39  ;;  %12253 = vmatmul.msk.bf16.gmra.mxu1 %vm888_vm1, %v5399_v27 }
 0x726   :  { %v4579_v28 = vpop.f32.mrf.mxu2  ;;  %v5249_v1 = vpop.f32.mrf.mxu0 }
 0x727   :  { %v5250_v26 = vadd.f32 %v16480_v15, %v5249_v1  ;;  %v4580_v61 = vadd.f32 %v16480_v15, %v4579_v28 }
 0x728   :  { %v4849_v49 = vpop.f32.mrf.mxu3 }
 0x729   :  { %v16702_v43 = vadd.f32 %v4849_v49, %v16219_v50  ;;  %12213 = vmatmul.msk.bf16.gmra.mxu0 %vm228_vm0, %v16653_v34  ;;  %v5356_v14 = vmax.f32 %v5250_v26, 0.0  ;;  %v4659_v27 = vmax.f32 %v4580_v61, 0.0  ;;  %v12169_v61 = vld [vmem:[%s19700_s0 + $0x228] sm:$0xf] }
 0x72a   :  { %v4330_v20 = vpop.f32.mrf.mxu1 }
 0x72e   :  { %v4581_v10 = vpop.f32.mrf.mxu2  ;;  %v5251_v16 = vpop.f32.mrf.mxu0 }
 0x72f   :  { %v4582_v29 = vadd.f32 %v16457_v59, %v4581_v10  ;;  %v5252_v50 = vadd.f32 %v16457_v59, %v5251_v16 }
 0x730   :  { %v4851_v39 = vpop.f32.mrf.mxu3 }
 0x731   :  { %v4660_v3 = vmax.f32 %v4582_v29, 0.0  ;;  %v16713_v49 = vadd.f32 %v4851_v39, %v19773_v60  ;;  %v5357_v51 = vmax.f32 %v5252_v50, 0.0  ;;  %v13513_v29 = vld [vmem:[%s19700_s0 + $0x234] sm:$0xf0] }
 0x732   :  { %v4332_v1 = vpop.f32.mrf.mxu1  ;;  %v16724_v39 = vor.u32 %v13513_v29, %v12169_v61  ;;  %v19774_v50 = vld [vmem:[#allocation9_spill] sm:$0xff] }
 0x733   :  { %v4694_v20 = vpack.c.bf16 %v4660_v3, %v4659_v27  ;;  %12049 = vmatmul.msk.bf16.gmra.mxu2 %vm228_vm0, %v4419_v40  ;;  %v5400_v28 = vpack.c.bf16 %v5357_v51, %v5356_v14  ;;  %v12177_v27 = vld [vmem:[%s19700_s0 + $0x268] sm:$0xf]  ;;  %v13515_v3 = vld [vmem:[%s19700_s0 + $0x274] sm:$0xf0] }
 0x734   :  { %5709 = vrot.lane.b32.xlu2 %v16724_v39, %s13744_s21 }
 0x735   :  { %12089 = vmatmul.msk.bf16.gmra.mxu3 %vm888_vm1, %v4694_v20  ;;  %12254 = vmatmul.msk.bf16.gmra.mxu1 %vm888_vm1, %v5400_v28  ;;  %v16741_v20 = vor.u32 %v13515_v3, %v12177_v27 }
 0x736   :  { %v4584_v10 = vpop.f32.mrf.mxu2  ;;  %v5254_v26 = vpop.f32.mrf.mxu0 }
 0x737   :  { %v5255_v14 = vadd.f32 %v16480_v15, %v5254_v26  ;;  %v4585_v60 = vadd.f32 %v16480_v15, %v4584_v10  ;;  %5713 = vrot.lane.b32.xlu1 %v16741_v20, %s13744_s21 }
 0x738   :  { %v4854_v16 = vpop.f32.mrf.mxu3 }
 0x739   :  { %v16727_v40 = vadd.f32 %v4854_v16, %v19774_v50  ;;  %12214 = vmatmul.msk.bf16.gmra.mxu0 %vm228_vm0, %v16673_v4  ;;  %v5358_v26 = vmax.f32 %v5255_v14, 0.0  ;;  %v5676_v50 = vpop.permute.xlu0 %5675  ;;  %v13518_v14 = vld [vmem:[%s19700_s0 + $0x2d4] sm:$0xf0] }
 0x73a   :  { %v4333_v51 = vpop.f32.mrf.mxu1 }
 0x73b   :  { %v4661_v51 = vmax.f32 %v4585_v60, 0.0  ;;  %v12173_v60 = vld [vmem:[%s19700_s0 + $0x248] sm:$0xf] }
 0x73e   :  { %v4586_v1 = vpop.f32.mrf.mxu2  ;;  %v5256_v61 = vpop.f32.mrf.mxu0 }
 0x73f   :  { %v4587_v28 = vadd.f32 %v16457_v59, %v4586_v1  ;;  %v5257_v16 = vadd.f32 %v16457_v59, %v5256_v61 }
 0x740   :  { %v4856_v29 = vpop.f32.mrf.mxu3 }
 0x741   :  { %v4662_v33 = vmax.f32 %v4587_v28, 0.0  ;;  %v16748_v55 = vadd.f32 %v4856_v29, %v16278_v57  ;;  %v5359_v10 = vmax.f32 %v5257_v16, 0.0  ;;  %v16763_v57 = vld [vmem:[%s19699_s1 + $0x8] sm:$0xff]  ;;  %v13514_v28 = vld [vmem:[%s19700_s0 + $0x254] sm:$0xf0] }
 0x742   :  { %v4335_v3 = vpop.f32.mrf.mxu1  ;;  %19776 = vst [vmem:[#allocation10_spill] sm:$0xff] %v16763_v57 }
 0x743   :  { %19775 = vst [vmem:[#allocation2_spill] sm:$0xff] %v16748_v55  ;;  %v4695_v27 = vpack.c.bf16 %v4662_v33, %v4661_v51  ;;  %12273 = vmatmul.msk.bf16.vlgmr.msra.gmra.mxu2 %vm228_vm0, %v5676_v50  ;;  %v5401_v1 = vpack.c.bf16 %v5359_v10, %v5358_v26  ;;  %v16767_v33 = vor.u32 %v13518_v14, %v12189_v53  ;;  %v16782_v53 = vld [vmem:[%s19699_s1] sm:$0xff]  ;;  %v13516_v3 = vld [vmem:[%s19700_s0 + $0x294] sm:$0xf0] }
 0x744   :  { %8291 = vmatpush.bf16.msra.mxu2 %v16763_v57  ;;  %v16773_v26 = vor.u32 %v13514_v28, %v12173_v60  ;;  %19777 = vst [vmem:[#allocation5_spill] sm:$0xff] %v16782_v53  ;;  %v13517_v60 = vld [vmem:[%s19700_s0 + $0x2b4] sm:$0xf0] }
 0x745   :  { %12090 = vmatmul.msk.bf16.gmra.mxu3 %vm888_vm1, %v4695_v27  ;;  %12255 = vmatmul.msk.bf16.gmra.mxu1 %vm888_vm1, %v5401_v1  ;;  %v12181_v27 = vld [vmem:[%s19700_s0 + $0x288] sm:$0xf] }
 0x746   :  { %v4589_v61 = vpop.f32.mrf.mxu2  ;;  %v5259_v29 = vpop.f32.mrf.mxu0  ;;  %5719 = vrot.lane.b32.xlu1 %v16767_v33, %s13744_s21  ;;  %5711 = vrot.lane.b32.xlu0 %v16773_v26, %s13744_s21  ;;  %v12185_v1 = vld [vmem:[%s19700_s0 + $0x2a8] sm:$0xf]  ;;  %v16801_v14 = vor.u32 %v13516_v3, %v12181_v27 }
 0x747   :  { %v5260_v10 = vadd.f32 %v16480_v15, %v5259_v29  ;;  %v16806_v29 = vor.u32 %v13517_v60, %v12185_v1  ;;  %v5678_v3 = vpop.permute.xlu1 %5677 }
 0x748   :  { %v4859_v16 = vpop.f32.mrf.mxu3  ;;  %8292 = vmatpush.bf16.msra.mxu2 %v16782_v53  ;;  %5715 = vrot.lane.b32.xlu2 %v16801_v14, %s13744_s21 }
 0x749   :  { %v16786_v50 = vadd.f32 %v4859_v16, %v16289_v21  ;;  %12215 = vmatmul.msk.bf16.gmra.mxu0 %vm228_vm0, %v16699_v35  ;;  %v4590_v21 = vadd.f32 %v16480_v15, %v4589_v61  ;;  %v5360_v53 = vmax.f32 %v5260_v10, 0.0 }
 0x74a   :  { %v4336_v51 = vpop.f32.mrf.mxu1 }
 0x74b   :  { %19778 = vst [vmem:[#allocation8_spill] sm:$0xff] %v16786_v50  ;;  %v4663_v57 = vmax.f32 %v4590_v21, 0.0  ;;  %v13519_v21 = vld [vmem:[%s19700_s0 + $0x2f4] sm:$0xf0] }
 0x74e   :  { %v4591_v28 = vpop.f32.mrf.mxu2  ;;  %v5261_v51 = vpop.f32.mrf.mxu0  ;;  %6855 = vrot.lane.b32.xlu1 %v16229_v42, %s13745_s26  ;;  %5717 = vrot.lane.b32.xlu0 %v16806_v29, %s13744_s21 }
 0x74f   :  { %v4592_v16 = vadd.f32 %v16457_v59, %v4591_v28  ;;  %v5262_v27 = vadd.f32 %v16457_v59, %v5261_v51  ;;  %v12193_v51 = vld [vmem:[%s19700_s0 + $0x2e8] sm:$0xf] }
 0x750   :  { %v4861_v61 = vpop.f32.mrf.mxu3 }
 0x751   :  { %v4664_v1 = vmax.f32 %v4592_v16, 0.0  ;;  %v16817_v60 = vadd.f32 %v4861_v61, %v16311_v48  ;;  %v5361_v28 = vmax.f32 %v5262_v27, 0.0  ;;  %v12197_v48 = vld [vmem:[%s19700_s0 + $0x308] sm:$0xf] }
 0x752   :  { %v5536_v30 = vpop.f32.mrf.mxu1 }
 0x753   :  { %v4696_v50 = vpack.c.bf16 %v4664_v1, %v4663_v57  ;;  %12274 = vmatmul.msk.bf16.gmra.mxu2 %vm228_vm0, %v5678_v3  ;;  %v5402_v55 = vpack.c.bf16 %v5361_v28, %v5360_v53  ;;  %v16821_v10 = vadd.f32 %v5536_v30, %v16534_v52  ;;  %v16833_v57 = vor.u32 %v13519_v21, %v12193_v51  ;;  %v13520_v52 = vld [vmem:[%s19700_s0 + $0x314] sm:$0xf0]  ;;  %v13525_v3 = vld [vmem:[%s19701_s2 + $0x120] sm:$0xff] }
 0x754   :  { %v16839_v53 = vor.u32 %v13520_v52, %v12197_v48  ;;  %6124 = vmatpush.bf16.msra.mxu3 %v13525_v3 }
 0x755   :  { %12091 = vmatmul.msk.bf16.gmra.mxu3 %vm888_vm1, %v4696_v50  ;;  %12256 = vmatmul.msk.bf16.gmra.mxu1 %vm888_vm1, %v5402_v55 }
 0x756   :  { %v4594_v30 = vpop.f32.mrf.mxu2  ;;  %v5264_v16 = vpop.f32.mrf.mxu0  ;;  %5721 = vrot.lane.b32.xlu2 %v16833_v57, %s13744_s21  ;;  %6267 = vrot.lane.b32.xlu1 %v16268_v54, %s13746_s14 }
 0x757   :  { %5723 = vrot.lane.b32.xlu0 %v16839_v53, %s13744_s21  ;;  %v5265_v27 = vadd.f32 %v16480_v15, %v5264_v16  ;;  %v4595_v1 = vadd.f32 %v16480_v15, %v4594_v30  ;;  %v5680_v16 = vpop.permute.xlu2 %5679 }
 0x758   :  { %v4864_v61 = vpop.f32.mrf.mxu3 }
 0x759   :  { %12216 = vmatmul.msk.bf16.gmra.mxu0 %vm228_vm0, %v16724_v39  ;;  %v5362_v48 = vmax.f32 %v5265_v27, 0.0  ;;  %v4665_v30 = vmax.f32 %v4595_v1, 0.0 }
 0x75a   :  { %v5538_v50 = vpop.f32.mrf.mxu1 }
 0x75b   :  { %v16851_v55 = vadd.f32 %v5538_v50, %v16548_v13 }
 0x75d   :  { %19779 = vst [vmem:[#allocation9_spill] sm:$0xff] %v16851_v55 }
 0x75e   :  { %v4596_v28 = vpop.f32.mrf.mxu2  ;;  %v5266_v21 = vpop.f32.mrf.mxu0  ;;  %6265 = vrot.lane.b32.xlu2 %v16229_v42, %s13746_s14  ;;  %6861 = vrot.lane.b32.xlu1 %v16330_v32, %s13745_s26 }
 0x75f   :  { %v4597_v51 = vadd.f32 %v16457_v59, %v4596_v28  ;;  %v5267_v52 = vadd.f32 %v16457_v59, %v5266_v21  ;;  %6857 = vrot.lane.b32.xlu0 %v16268_v54, %s13745_s26 }
 0x760   :  { %v4865_v13 = vpop.f32.mrf.mxu3 }
 0x761   :  { %v4666_v61 = vmax.f32 %v4597_v51, 0.0  ;;  %v5363_v50 = vmax.f32 %v5267_v52, 0.0 }
 0x762   :  { %v5541_v28 = vpop.f32.mrf.mxu1 }
 0x763   :  { %v4697_v3 = vpack.c.bf16 %v4666_v61, %v4665_v30  ;;  %12275 = vmatmul.msk.bf16.gmra.mxu2 %vm228_vm0, %v5680_v16  ;;  %v5403_v55 = vpack.c.bf16 %v5363_v50, %v5362_v48  ;;  %v16867_v42 = vadd.f32 %v5541_v28, %v16566_v46  ;;  %v5682_v61 = vpop.permute.xlu0 %5681 }
 0x765   :  { %12092 = vmatmul.msk.bf16.gmra.mxu3 %vm888_vm1, %v4697_v3  ;;  %12257 = vmatmul.msk.bf16.gmra.mxu1 %vm888_vm1, %v5403_v55 }
 0x766   :  { %v4599_v27 = vpop.f32.mrf.mxu2  ;;  %v5269_v21 = vpop.f32.mrf.mxu0  ;;  %6859 = vrot.lane.b32.xlu2 %v16299_v25, %s13745_s26  ;;  %6273 = vrot.lane.b32.xlu1 %v16359_v22, %s13746_s14 }
 0x767   :  { %6269 = vrot.lane.b32.xlu0 %v16299_v25, %s13746_s14  ;;  %v5270_v55 = vadd.f32 %v16480_v15, %v5269_v21  ;;  %v4600_v48 = vadd.f32 %v16480_v15, %v4599_v27 }
 0x768   :  { %v4867_v54 = vpop.f32.mrf.mxu3 }
 0x769   :  { %v16878_v1 = vadd.f32 %v4867_v54, %v16349_v6  ;;  %12217 = vmatmul.msk.bf16.gmra.mxu0 %vm228_vm0, %v16773_v26  ;;  %v5364_v25 = vmax.f32 %v5270_v55, 0.0 }
 0x76a   :  { %v5543_v46 = vpop.f32.mrf.mxu1 }
 0x76b   :  { %v16884_v51 = vadd.f32 %v5543_v46, %v16580_v31  ;;  %v4667_v31 = vmax.f32 %v4600_v48, 0.0 }
 0x76e   :  { %v4601_v13 = vpop.f32.mrf.mxu2  ;;  %v5271_v16 = vpop.f32.mrf.mxu0  ;;  %6271 = vrot.lane.b32.xlu2 %v16330_v32, %s13746_s14  ;;  %6867 = vrot.lane.b32.xlu1 %v16411_v7, %s13745_s26 }
 0x76f   :  { %v4602_v52 = vadd.f32 %v16457_v59, %v4601_v13  ;;  %v5272_v30 = vadd.f32 %v16457_v59, %v5271_v16  ;;  %6863 = vrot.lane.b32.xlu0 %v16359_v22, %s13745_s26 }
 0x770   :  { %v4869_v6 = vpop.f32.mrf.mxu3 }
 0x771   :  { %v4668_v50 = vmax.f32 %v4602_v52, 0.0  ;;  %v16896_v3 = vadd.f32 %v4869_v6, %v16367_v0  ;;  %v5365_v28 = vmax.f32 %v5272_v30, 0.0 }
 0x772   :  { %v5546_v32 = vpop.f32.mrf.mxu1 }
 0x773   :  { %v4698_v27 = vpack.c.bf16 %v4668_v50, %v4667_v31  ;;  %12276 = vmatmul.msk.bf16.gmra.mxu2 %vm228_vm0, %v5682_v61  ;;  %v5404_v21 = vpack.c.bf16 %v5365_v28, %v5364_v25  ;;  %v16900_v54 = vadd.f32 %v5546_v32, %v16598_v8  ;;  %v5684_v61 = vpop.permute.xlu1 %5683 }
 0x775   :  { %12093 = vmatmul.msk.bf16.gmra.mxu3 %vm888_vm1, %v4698_v27  ;;  %12258 = vmatmul.msk.bf16.gmra.mxu1 %vm888_vm1, %v5404_v21 }
 0x776   :  { %v4604_v46 = vpop.f32.mrf.mxu2  ;;  %v5274_v22 = vpop.f32.mrf.mxu0  ;;  %6865 = vrot.lane.b32.xlu2 %v16385_v37, %s13745_s26  ;;  %6279 = vrot.lane.b32.xlu1 %v16440_v9, %s13746_s14 }
 0x777   :  { %6275 = vrot.lane.b32.xlu0 %v16385_v37, %s13746_s14  ;;  %v5275_v48 = vadd.f32 %v16480_v15, %v5274_v22  ;;  %v4605_v52 = vadd.f32 %v16480_v15, %v4604_v46 }
 0x778   :  { %v4872_v0 = vpop.f32.mrf.mxu3 }
 0x779   :  { %v16911_v55 = vadd.f32 %v4872_v0, %v16375_v2  ;;  %12218 = vmatmul.msk.bf16.gmra.mxu0 %vm228_vm0, %v16741_v20  ;;  %v5366_v2 = vmax.f32 %v5275_v48, 0.0 }
 0x77a   :  { %v5548_v8 = vpop.f32.mrf.mxu1 }
 0x77b   :  { %v16917_v13 = vadd.f32 %v5548_v8, %v16612_v18  ;;  %v4669_v18 = vmax.f32 %v4605_v52, 0.0 }
 0x77e   :  { %v4606_v16 = vpop.f32.mrf.mxu2  ;;  %v5276_v6 = vpop.f32.mrf.mxu0  ;;  %6277 = vrot.lane.b32.xlu2 %v16411_v7, %s13746_s14  ;;  %6873 = vrot.lane.b32.xlu1 %v16505_v5, %s13745_s26 }
 0x77f   :  { %v4607_v25 = vadd.f32 %v16457_v59, %v4606_v16  ;;  %v5277_v30 = vadd.f32 %v16457_v59, %v5276_v6  ;;  %6869 = vrot.lane.b32.xlu0 %v16440_v9, %s13745_s26 }
 0x780   :  { %v4874_v37 = vpop.f32.mrf.mxu3 }
 0x781   :  { %v4670_v31 = vmax.f32 %v4607_v25, 0.0  ;;  %v16929_v50 = vadd.f32 %v4874_v37, %v16393_v24  ;;  %v5367_v28 = vmax.f32 %v5277_v30, 0.0 }
 0x782   :  { %v5551_v7 = vpop.f32.mrf.mxu1 }
 0x783   :  { %v4699_v27 = vpack.c.bf16 %v4670_v31, %v4669_v18  ;;  %12277 = vmatmul.msk.bf16.gmra.mxu2 %vm228_vm0, %v5684_v61  ;;  %v5405_v32 = vpack.c.bf16 %v5367_v28, %v5366_v2  ;;  %v16933_v21 = vadd.f32 %v5551_v7, %v16627_v62  ;;  %v5686_v2 = vpop.permute.xlu2 %5685 }
 0x785   :  { %12094 = vmatmul.msk.bf16.gmra.mxu3 %vm888_vm1, %v4699_v27  ;;  %12259 = vmatmul.msk.bf16.gmra.mxu1 %vm888_vm1, %v5405_v32 }
 0x786   :  { %v4609_v46 = vpop.f32.mrf.mxu2  ;;  %v5279_v9 = vpop.f32.mrf.mxu0  ;;  %6871 = vrot.lane.b32.xlu2 %v16471_v44, %s13745_s26  ;;  %6285 = vrot.lane.b32.xlu1 %v16531_v56, %s13746_s14 }
 0x787   :  { %6281 = vrot.lane.b32.xlu0 %v16471_v44, %s13746_s14  ;;  %v5280_v0 = vadd.f32 %v16480_v15, %v5279_v9  ;;  %v4610_v48 = vadd.f32 %v16480_v15, %v4609_v46 }
 0x788   :  { %v4877_v24 = vpop.f32.mrf.mxu3 }
 0x789   :  { %v16944_v22 = vadd.f32 %v4877_v24, %v16401_v23  ;;  %12219 = vmatmul.msk.bf16.gmra.mxu0 %vm228_vm0, %v16801_v14  ;;  %v5368_v23 = vmax.f32 %v5280_v0, 0.0 }
 0x78a   :  { %v5553_v62 = vpop.f32.mrf.mxu1 }
 0x78b   :  { %v16950_v8 = vadd.f32 %v5553_v62, %v16641_v19  ;;  %v4671_v19 = vmax.f32 %v4610_v48, 0.0  ;;  %v16978_v32 = vpop.permute.xlu2 %5691 }
 0x78e   :  { %v4611_v52 = vpop.f32.mrf.mxu2  ;;  %v5281_v25 = vpop.f32.mrf.mxu0  ;;  %6283 = vrot.lane.b32.xlu2 %v16505_v5, %s13746_s14  ;;  %6879 = vrot.lane.b32.xlu1 %v16595_v58, %s13745_s26 }
 0x78f   :  { %v4612_v16 = vadd.f32 %v16457_v59, %v4611_v52  ;;  %v5282_v6 = vadd.f32 %v16457_v59, %v5281_v25  ;;  %6875 = vrot.lane.b32.xlu0 %v16531_v56, %s13745_s26  ;;  %v5688_v52 = vpop.permute.xlu0 %5687 }
 0x790   :  { %v4879_v44 = vpop.f32.mrf.mxu3 }
 0x791   :  { %v4672_v37 = vmax.f32 %v4612_v16, 0.0  ;;  %v16962_v30 = vadd.f32 %v4879_v44, %v16419_v41  ;;  %v5369_v61 = vmax.f32 %v5282_v6, 0.0  ;;  %v5690_v44 = vpop.permute.xlu1 %5689 }
 0x792   :  { %v5556_v5 = vpop.f32.mrf.mxu1 }
 0x793   :  { %v4700_v18 = vpack.c.bf16 %v4672_v37, %v4671_v19  ;;  %12278 = vmatmul.msk.bf16.gmra.mxu2 %vm228_vm0, %v5686_v2  ;;  %v5406_v31 = vpack.c.bf16 %v5369_v61, %v5368_v23 }
 0x795   :  { %12095 = vmatmul.msk.bf16.gmra.mxu3 %vm888_vm1, %v4700_v18  ;;  %12260 = vmatmul.msk.bf16.gmra.mxu1 %vm888_vm1, %v5406_v31 }
 0x796   :  { %v4614_v28 = vpop.f32.mrf.mxu2  ;;  %v5284_v27 = vpop.f32.mrf.mxu0  ;;  %6877 = vrot.lane.b32.xlu2 %v16563_v38, %s13745_s26  ;;  %6291 = vrot.lane.b32.xlu1 %v16624_v17, %s13746_s14 }
 0x797   :  { %6287 = vrot.lane.b32.xlu0 %v16563_v38, %s13746_s14  ;;  %v5285_v46 = vadd.f32 %v16480_v15, %v5284_v27  ;;  %v4615_v9 = vadd.f32 %v16480_v15, %v4614_v28  ;;  %v17018_v28 = vld [vmem:[%s19702_s5] sm:$0xff] }
 0x798   :  { %v4882_v41 = vpop.f32.mrf.mxu3 }
 0x799   :  { %v16974_v56 = vadd.f32 %v4882_v41, %v16427_v47  ;;  %12220 = vmatmul.msk.bf16.gmra.mxu0 %vm228_vm0, %v16806_v29  ;;  %v5370_v47 = vmax.f32 %v5285_v46, 0.0  ;;  %v4673_v16 = vmax.f32 %v4615_v9, 0.0  ;;  %v17009_v18 = vpop.permute.xlu1 %5695 }
 0x79a   :  { %v5557_v7 = vpop.f32.mrf.mxu1 }
 0x79e   :  { %v4616_v24 = vpop.f32.mrf.mxu2  ;;  %v5286_v0 = vpop.f32.mrf.mxu0  ;;  %6289 = vrot.lane.b32.xlu2 %v16595_v58, %s13746_s14  ;;  %6885 = vrot.lane.b32.xlu1 %v16673_v4, %s13745_s26 }
 0x79f   :  { %v4617_v62 = vadd.f32 %v16457_v59, %v4616_v24  ;;  %v5287_v48 = vadd.f32 %v16457_v59, %v5286_v0  ;;  %6881 = vrot.lane.b32.xlu0 %v16624_v17, %s13745_s26  ;;  %v16998_v59 = vpop.permute.xlu2 %5697 }
 0x7a0   :  { %v4884_v38 = vpop.f32.mrf.mxu3 }
 0x7a1   :  { %v4674_v25 = vmax.f32 %v4617_v62, 0.0  ;;  %v16991_v23 = vadd.f32 %v4884_v38, %v16451_v36  ;;  %v5371_v6 = vmax.f32 %v5287_v48, 0.0 }
 0x7a2   :  { %v5559_v58 = vpop.f32.mrf.mxu1 }
 0x7a3   :  { %v4701_v2 = vpack.c.bf16 %v4674_v25, %v4673_v16  ;;  %12279 = vmatmul.msk.bf16.gmra.mxu2 %vm228_vm0, %v5688_v52  ;;  %v5407_v19 = vpack.c.bf16 %v5371_v6, %v5370_v47  ;;  %v16995_v37 = vadd.f32 %v5559_v58, %v16676_v11  ;;  %v17036_v47 = vpop.permute.xlu0 %5693  ;;  %v17043_v25 = vpop.permute.xlu1 %5701 }
 0x7a5   :  { %12096 = vmatmul.msk.bf16.gmra.mxu3 %vm888_vm1, %v4701_v2  ;;  %12261 = vmatmul.msk.bf16.gmra.mxu1 %vm888_vm1, %v5407_v19 }
 0x7a6   :  { %v4619_v17 = vpop.f32.mrf.mxu2  ;;  %v5289_v61 = vpop.f32.mrf.mxu0  ;;  %6883 = vrot.lane.b32.xlu2 %v16653_v34, %s13745_s26  ;;  %6297 = vrot.lane.b32.xlu1 %v16699_v35, %s13746_s14 }
 0x7a7   :  { %6293 = vrot.lane.b32.xlu0 %v16653_v34, %s13746_s14  ;;  %v5290_v5 = vadd.f32 %v16480_v15, %v5289_v61  ;;  %v4620_v27 = vadd.f32 %v17018_v28, %v4619_v17  ;;  %v17024_v34 = vld [vmem:[%s19702_s5 + $0x8] sm:$0xff]  ;;  %v17027_v15 = vpop.permute.xlu2 %5703 }
 0x7a8   :  { %v4887_v36 = vpop.f32.mrf.mxu3 }
 0x7a9   :  { %12221 = vmatmul.msk.bf16.gmra.mxu0 %vm228_vm0, %v16767_v33  ;;  %v4675_v62 = vmax.f32 %v4620_v27, 0.0 }
 0x7aa   :  { %v5561_v11 = vpop.f32.mrf.mxu1 }
 0x7ab   :  { %v17013_v31 = vadd.f32 %v5561_v11, %v16687_v12  ;;  %v5372_v12 = vmax.f32 %v5290_v5, 0.0  ;;  %v17059_v17 = vpop.permute.xlu0 %5699 }
 0x7ae   :  { %v4621_v41 = vpop.f32.mrf.mxu2  ;;  %v5291_v46 = vpop.f32.mrf.mxu0  ;;  %6295 = vrot.lane.b32.xlu2 %v16673_v4, %s13746_s14  ;;  %6891 = vrot.lane.b32.xlu1 %v16773_v26, %s13745_s26 }
 0x7af   :  { %v4622_v7 = vadd.f32 %v17024_v34, %v4621_v41  ;;  %v5292_v24 = vadd.f32 %v17024_v34, %v5291_v46  ;;  %6887 = vrot.lane.b32.xlu0 %v16699_v35, %s13745_s26  ;;  %v17055_v58 = vpop.permute.xlu2 %5709  ;;  %v17067_v41 = vpop.permute.xlu1 %5707 }
 0x7b0   :  { %v4888_v9 = vpop.f32.mrf.mxu3 }
 0x7b1   :  { %v4676_v0 = vmax.f32 %v4622_v7, 0.0  ;;  %v5373_v38 = vmax.f32 %v5292_v24, 0.0 }
 0x7b2   :  { %v5564_v52 = vpop.f32.mrf.mxu1 }
 0x7b3   :  { %v4702_v48 = vpack.c.bf16 %v4676_v0, %v4675_v62  ;;  %12280 = vmatmul.msk.bf16.gmra.mxu2 %vm228_vm0, %v5690_v44  ;;  %v5408_v4 = vpack.c.bf16 %v5373_v38, %v5372_v12  ;;  %v17040_v16 = vadd.f32 %v5564_v52, %v16702_v43  ;;  %v19780_v43 = vld [vmem:[#allocation6_spill] sm:$0xff] }
 0x7b5   :  { %12097 = vmatmul.msk.bf16.gmra.mxu3 %vm888_vm1, %v4702_v48  ;;  %12262 = vmatmul.msk.bf16.gmra.mxu1 %vm888_vm1, %v5408_v4  ;;  %v17093_v4 = vpop.permute.xlu0 %5705 }
 0x7b6   :  { %v4624_v6 = vpop.f32.mrf.mxu2  ;;  %v5294_v35 = vpop.f32.mrf.mxu0  ;;  %6889 = vrot.lane.b32.xlu2 %v16724_v39, %s13745_s26  ;;  %6303 = vrot.lane.b32.xlu1 %v16741_v20, %s13746_s14 }
 0x7b7   :  { %6299 = vrot.lane.b32.xlu0 %v16724_v39, %s13746_s14  ;;  %v5295_v61 = vadd.f32 %v17018_v28, %v5294_v35  ;;  %v4625_v11 = vadd.f32 %v17018_v28, %v4624_v6  ;;  %v17081_v38 = vpop.permute.xlu2 %5715 }
 0x7b8   :  { %v4890_v44 = vpop.f32.mrf.mxu3 }
 0x7b9   :  { %v17053_v2 = vadd.f32 %v4890_v44, %v19780_v43  ;;  %12222 = vmatmul.msk.bf16.gmra.mxu0 %vm228_vm0, %v16833_v57  ;;  %v5374_v7 = vmax.f32 %v5295_v61, 0.0  ;;  %v17105_v44 = vpop.permute.xlu1 %5713  ;;  %v19781_v61 = vld [vmem:[#allocation2_spill] sm:$0xff] }
 0x7ba   :  { %v5566_v19 = vpop.f32.mrf.mxu1 }
 0x7bb   :  { %v17063_v36 = vadd.f32 %v5566_v19, %v16713_v49  ;;  %v4677_v49 = vmax.f32 %v4625_v11, 0.0 }
 0x7be   :  { %v4626_v5 = vpop.f32.mrf.mxu2  ;;  %v5296_v27 = vpop.f32.mrf.mxu0  ;;  %6301 = vrot.lane.b32.xlu2 %v16773_v26, %s13746_s14  ;;  %6897 = vrot.lane.b32.xlu1 %v16806_v29, %s13745_s26 }
 0x7bf   :  { %v4627_v39 = vadd.f32 %v17024_v34, %v4626_v5  ;;  %v5297_v12 = vadd.f32 %v17024_v34, %v5296_v27  ;;  %6893 = vrot.lane.b32.xlu0 %v16741_v20, %s13745_s26  ;;  %v13536_v20 = vld [vmem:[%s19701_s2 + $0x178] sm:$0xff] }
 0x7c0   :  { %v4892_v46 = vpop.f32.mrf.mxu3  ;;  %7301 = vmatpush.bf16.msrb.mxu3 %v13536_v20 }
 0x7c1   :  { %v4678_v9 = vmax.f32 %v4627_v39, 0.0  ;;  %v17077_v24 = vadd.f32 %v4892_v46, %v16513_v63  ;;  %v5375_v62 = vmax.f32 %v5297_v12, 0.0  ;;  %v13532_v63 = vld [vmem:[%s19701_s2 + $0x158] sm:$0xff] }
 0x7c2   :  { %v5569_v26 = vpop.f32.mrf.mxu1  ;;  %6711 = vmatpush.bf16.msrb.mxu1 %v13532_v63  ;;  %v17131_v63 = vpop.permute.xlu1 %5719 }
 0x7c3   :  { %v4703_v0 = vpack.c.bf16 %v4678_v9, %v4677_v49  ;;  %12281 = vmatmul.msk.bf16.gmra.mxu2 %vm228_vm0, %v16978_v32  ;;  %v5409_v48 = vpack.c.bf16 %v5375_v62, %v5374_v7  ;;  %v17084_v52 = vadd.f32 %v5569_v26, %v16727_v40  ;;  %v17117_v7 = vpop.permute.xlu0 %5711 }
 0x7c5   :  { %12098 = vmatmul.msk.bf16.gmra.mxu3 %vm888_vm1, %v4703_v0  ;;  %12263 = vmatmul.msk.bf16.gmra.mxu1 %vm888_vm1, %v5409_v48  ;;  %v19782_v0 = vld [vmem:[#allocation3_spill] sm:$0xff] }
 0x7c6   :  { %v5809_v32 = vpop.f32.mrf.mxu2  ;;  %v5299_v6 = vpop.f32.mrf.mxu0  ;;  %6895 = vrot.lane.b32.xlu2 %v16801_v14, %s13745_s26  ;;  %6309 = vrot.lane.b32.xlu1 %v16767_v33, %s13746_s14 }
 0x7c7   :  { %6305 = vrot.lane.b32.xlu0 %v16801_v14, %s13746_s14  ;;  %v5300_v19 = vadd.f32 %v17018_v28, %v5299_v6  ;;  %v5810_v5 = vadd.f32 %v17018_v28, %v5809_v32  ;;  %v17114_v14 = vpop.permute.xlu2 %5721  ;;  %v19783_v6 = vld [vmem:[#allocation8_spill] sm:$0xff] }
 0x7c8   :  { %v4895_v40 = vpop.f32.mrf.mxu3 }
 0x7c9   :  { %v17103_v35 = vadd.f32 %v4895_v40, %v16521_v45  ;;  %12223 = vmatmul.msk.bf16.gmra.mxu0 %vm228_vm0, %v16839_v53  ;;  %v5376_v46 = vmax.f32 %v5300_v19, 0.0  ;;  %v5934_v9 = vmax.f32 %v5810_v5, 0.0 }
 0x7ca   :  { %v5571_v43 = vpop.f32.mrf.mxu1 }
 0x7cb   :  { %v17111_v11 = vadd.f32 %v5571_v43, %v19781_v61 }
 0x7ce   :  { %v5811_v39 = vpop.f32.mrf.mxu2  ;;  %v5301_v45 = vpop.f32.mrf.mxu0  ;;  %6307 = vrot.lane.b32.xlu2 %v16806_v29, %s13746_s14  ;;  %6903 = vrot.lane.b32.xlu1 %v16839_v53, %s13745_s26 }
 0x7cf   :  { %v5812_v27 = vadd.f32 %v17024_v34, %v5811_v39  ;;  %v5302_v49 = vadd.f32 %v17024_v34, %v5301_v45  ;;  %6899 = vrot.lane.b32.xlu0 %v16767_v33, %s13745_s26  ;;  %v6266_v19 = vpop.permute.xlu2 %6265  ;;  %v17145_v39 = vpop.permute.xlu0 %5717  ;;  %v19785_v45 = vld [vmem:[#allocation10_spill] sm:$0xff] }
 0x7d0   :  { %v4897_v12 = vpop.f32.mrf.mxu3 }
 0x7d1   :  { %v5935_v62 = vmax.f32 %v5812_v27, 0.0  ;;  %v17127_v26 = vadd.f32 %v4897_v12, %v19782_v0  ;;  %v5377_v48 = vmax.f32 %v5302_v49, 0.0 }
 0x7d2   :  { %v5574_v29 = vpop.f32.mrf.mxu1 }
 0x7d3   :  { %v5984_v20 = vpack.c.bf16 %v5935_v62, %v5934_v9  ;;  %12282 = vmatmul.msk.bf16.gmra.mxu2 %vm228_vm0, %v17036_v47  ;;  %v5410_v32 = vpack.c.bf16 %v5377_v48, %v5376_v46  ;;  %v17134_v40 = vadd.f32 %v5574_v29, %v19783_v6  ;;  %v19784_v47 = vld [vmem:[#allocation7_spill] sm:$0xff]  ;;  %v17154_v9 = vpop.permute.xlu1 %6855  ;;  %v19786_v48 = vld [vmem:[#allocation5_spill] sm:$0xff] }
 0x7d5   :  { %12322 = vmatmul.msk.bf16.vlgmr.msra.gmra.mxu3 %vm888_vm1, %v5984_v20  ;;  %12264 = vmatmul.msk.bf16.gmra.mxu1 %vm888_vm1, %v5410_v32 }
 0x7d6   :  { %v5814_v33 = vpop.f32.mrf.mxu2  ;;  %v5304_v43 = vpop.f32.mrf.mxu0  ;;  %6901 = vrot.lane.b32.xlu2 %v16833_v57, %s13745_s26 }
 0x7d7   :  { %6311 = vrot.lane.b32.xlu0 %v16833_v57, %s13746_s14  ;;  %v5305_v46 = vadd.f32 %v17018_v28, %v5304_v43  ;;  %v5815_v49 = vadd.f32 %v17018_v28, %v5814_v33  ;;  %v19787_v43 = vld [vmem:[#allocation11_spill] sm:$0xff] }
 0x7d8   :  { %v4900_v61 = vpop.f32.mrf.mxu3 }
 0x7d9   :  { %v17143_v5 = vadd.f32 %v4900_v61, %v19784_v47  ;;  %12347 = vmatmul.msk.bf16.vlgmr.msrb.gmra.mxu0 %vm228_vm0, %v6266_v19  ;;  %v5378_v20 = vmax.f32 %v5305_v46, 0.0  ;;  %v5936_v6 = vmax.f32 %v5815_v49, 0.0 }
 0x7da   :  { %v5576_v27 = vpop.f32.mrf.mxu1  ;;  %8881 = vmatpush.bf16.msrb.mxu0 %v19785_v45 }
 0x7db   :  { %v17151_v12 = vadd.f32 %v5576_v27, %v16817_v60  ;;  %v17166_v27 = vpop.permute.xlu0 %5723  ;;  %v6268_v49 = vpop.permute.xlu1 %6267 }
 0x7de   :  { %v5816_v57 = vpop.f32.mrf.mxu2  ;;  %v5306_v0 = vpop.f32.mrf.mxu0  ;;  %6313 = vrot.lane.b32.xlu2 %v16839_v53, %s13746_s14  ;;  %8882 = vmatpush.bf16.msrb.mxu0 %v19786_v48 }
 0x7df   :  { %v5817_v62 = vadd.f32 %v17024_v34, %v5816_v57  ;;  %v5307_v32 = vadd.f32 %v17024_v34, %v5306_v0 }
 0x7e0   :  { %v4902_v29 = vpop.f32.mrf.mxu3 }
 0x7e1   :  { %v5937_v60 = vmax.f32 %v5817_v62, 0.0  ;;  %v17162_v19 = vadd.f32 %v4902_v29, %v19787_v43  ;;  %v5379_v33 = vmax.f32 %v5307_v32, 0.0  ;;  %v19788_v62 = vld [vmem:[#allocation12_spill] sm:$0xff] }
 0x7e2   :  { %v5579_v47 = vpop.f32.mrf.mxu1 }
 0x7e3   :  { %v5985_v61 = vpack.c.bf16 %v5937_v60, %v5936_v6  ;;  %12283 = vmatmul.msk.bf16.gmra.mxu2 %vm228_vm0, %v17009_v18  ;;  %v5411_v53 = vpack.c.bf16 %v5379_v33, %v5378_v20  ;;  %v17176_v32 = vpop.permute.xlu0 %6857 }
 0x7e4   :  { %19789 = vst [vmem:[#allocation6_spill] sm:$0xff] %v17176_v32 }
 0x7e5   :  { %12323 = vmatmul.msk.bf16.gmra.mxu3 %vm888_vm1, %v5985_v61  ;;  %12265 = vmatmul.msk.bf16.gmra.mxu1 %vm888_vm1, %v5411_v53 }
 0x7e6   :  { %v5819_v45 = vpop.f32.mrf.mxu2  ;;  %v5309_v46 = vpop.f32.mrf.mxu0 }
 0x7e7   :  { %v5310_v18 = vadd.f32 %v17018_v28, %v5309_v46  ;;  %v5820_v29 = vadd.f32 %v17018_v28, %v5819_v45 }
 0x7e8   :  { %v4905_v57 = vpop.f32.mrf.mxu3 }
 0x7e9   :  { %v17171_v0 = vadd.f32 %v4905_v57, %v19788_v62  ;;  %12348 = vmatmul.msk.bf16.gmra.mxu0 %vm228_vm0, %v6268_v49  ;;  %v5380_v43 = vmax.f32 %v5310_v18, 0.0  ;;  %v5938_v47 = vmax.f32 %v5820_v29, 0.0  ;;  %v19790_v57 = vld [vmem:[#allocation4_spill] sm:$0xff] }
 0x7ea   :  { %v5580_v48 = vpop.f32.mrf.mxu1 }
 0x7ee   :  { %v5821_v20 = vpop.f32.mrf.mxu2  ;;  %v5311_v60 = vpop.f32.mrf.mxu0 }
 0x7ef   :  { %v5822_v6 = vadd.f32 %v17024_v34, %v5821_v20  ;;  %v5312_v61 = vadd.f32 %v17024_v34, %v5311_v60  ;;  %v6270_v20 = vpop.permute.xlu0 %6269 }
 0x7f0   :  { %v4907_v33 = vpop.f32.mrf.mxu3 }
 0x7f1   :  { %v5939_v53 = vmax.f32 %v5822_v6, 0.0  ;;  %v17181_v62 = vadd.f32 %v4907_v33, %v19790_v57  ;;  %v5381_v49 = vmax.f32 %v5312_v61, 0.0 }
 0x7f2   :  { %v5582_v45 = vpop.f32.mrf.mxu1 }
 0x7f3   :  { %v5986_v48 = vpack.c.bf16 %v5939_v53, %v5938_v47  ;;  %12284 = vmatmul.msk.bf16.gmra.mxu2 %vm228_vm0, %v16998_v59  ;;  %v5412_v46 = vpack.c.bf16 %v5381_v49, %v5380_v43  ;;  %v17186_v32 = vadd.f32 %v5582_v45, %v16878_v1  ;;  %v17196_v1 = vpop.permute.xlu2 %6859 }
 0x7f5   :  { %12324 = vmatmul.msk.bf16.gmra.mxu3 %vm888_vm1, %v5986_v48  ;;  %12266 = vmatmul.msk.bf16.gmra.mxu1 %vm888_vm1, %v5412_v46 }
 0x7f6   :  { %v5824_v18 = vpop.f32.mrf.mxu2  ;;  %v5314_v29 = vpop.f32.mrf.mxu0 }
 0x7f7   :  { %v5315_v33 = vadd.f32 %v17018_v28, %v5314_v29  ;;  %v5825_v43 = vadd.f32 %v17018_v28, %v5824_v18 }
 0x7f8   :  { %v4910_v6 = vpop.f32.mrf.mxu3 }
 0x7f9   :  { %12349 = vmatmul.msk.bf16.gmra.mxu0 %vm228_vm0, %v6270_v20  ;;  %v5382_v57 = vmax.f32 %v5315_v33, 0.0  ;;  %v5940_v45 = vmax.f32 %v5825_v43, 0.0 }
 0x7fa   :  { %v5584_v60 = vpop.f32.mrf.mxu1 }
 0x7fb   :  { %v17193_v59 = vadd.f32 %v5584_v60, %v16896_v3 }
 0x7fe   :  { %v5826_v61 = vpop.f32.mrf.mxu2  ;;  %v5316_v53 = vpop.f32.mrf.mxu0 }
 0x7ff   :  { %v5827_v47 = vadd.f32 %v17024_v34, %v5826_v61  ;;  %v5317_v48 = vadd.f32 %v17024_v34, %v5316_v53  ;;  %v6272_v61 = vpop.permute.xlu2 %6271 }
 0x800   :  { %v4911_v49 = vpop.f32.mrf.mxu3 }
 0x801   :  { %v5941_v46 = vmax.f32 %v5827_v47, 0.0  ;;  %v5383_v20 = vmax.f32 %v5317_v48, 0.0 }
 0x802   :  { %v5587_v3 = vpop.f32.mrf.mxu1 }
 0x803   :  { %v5987_v6 = vpack.c.bf16 %v5941_v46, %v5940_v45  ;;  %12285 = vmatmul.msk.bf16.gmra.mxu2 %vm228_vm0, %v17059_v17  ;;  %v5413_v29 = vpack.c.bf16 %v5383_v20, %v5382_v57  ;;  %v17203_v18 = vadd.f32 %v5587_v3, %v16911_v55  ;;  %v17213_v55 = vpop.permute.xlu1 %6861 }
 0x805   :  { %12325 = vmatmul.msk.bf16.gmra.mxu3 %vm888_vm1, %v5987_v6  ;;  %12267 = vmatmul.msk.bf16.gmra.mxu1 %vm888_vm1, %v5413_v29 }
 0x806   :  { %v5829_v60 = vpop.f32.mrf.mxu2  ;;  %v5319_v33 = vpop.f32.mrf.mxu0 }
 0x807   :  { %v5320_v47 = vadd.f32 %v17018_v28, %v5319_v33  ;;  %v5830_v57 = vadd.f32 %v17018_v28, %v5829_v60 }
 0x808   :  { %v4913_v53 = vpop.f32.mrf.mxu3 }
 0x809   :  { %12350 = vmatmul.msk.bf16.gmra.mxu0 %vm228_vm0, %v6272_v61  ;;  %v5384_v46 = vmax.f32 %v5320_v47, 0.0  ;;  %v5942_v3 = vmax.f32 %v5830_v57, 0.0 }
 0x80a   :  { %v5589_v43 = vpop.f32.mrf.mxu1 }
 0x80b   :  { %v17210_v17 = vadd.f32 %v5589_v43, %v16929_v50 }
 0x80e   :  { %v5831_v49 = vpop.f32.mrf.mxu2  ;;  %v5321_v45 = vpop.f32.mrf.mxu0 }
 0x80f   :  { %v5832_v48 = vadd.f32 %v17024_v34, %v5831_v49  ;;  %v5322_v6 = vadd.f32 %v17024_v34, %v5321_v45  ;;  %v6274_v49 = vpop.permute.xlu1 %6273 }
 0x810   :  { %v4914_v20 = vpop.f32.mrf.mxu3 }
 0x811   :  { %v5943_v29 = vmax.f32 %v5832_v48, 0.0  ;;  %v5385_v61 = vmax.f32 %v5322_v6, 0.0 }
 0x812   :  { %v5592_v50 = vpop.f32.mrf.mxu1 }
 0x813   :  { %v5988_v53 = vpack.c.bf16 %v5943_v29, %v5942_v3  ;;  %12286 = vmatmul.msk.bf16.gmra.mxu2 %vm228_vm0, %v17043_v25  ;;  %v5414_v33 = vpack.c.bf16 %v5385_v61, %v5384_v46  ;;  %v17220_v60 = vadd.f32 %v5592_v50, %v16944_v22  ;;  %v17230_v22 = vpop.permute.xlu0 %6863 }
 0x815   :  { %12326 = vmatmul.msk.bf16.gmra.mxu3 %vm888_vm1, %v5988_v53  ;;  %12268 = vmatmul.msk.bf16.gmra.mxu1 %vm888_vm1, %v5414_v33 }
 0x816   :  { %v5834_v43 = vpop.f32.mrf.mxu2  ;;  %v5324_v47 = vpop.f32.mrf.mxu0 }
 0x817   :  { %v5325_v48 = vadd.f32 %v17018_v28, %v5324_v47  ;;  %v5835_v46 = vadd.f32 %v17018_v28, %v5834_v43 }
 0x818   :  { %v4916_v45 = vpop.f32.mrf.mxu3 }
 0x819   :  { %12351 = vmatmul.msk.bf16.gmra.mxu0 %vm228_vm0, %v6274_v49  ;;  %v5386_v29 = vmax.f32 %v5325_v48, 0.0  ;;  %v5944_v50 = vmax.f32 %v5835_v46, 0.0 }
 0x81a   :  { %v5594_v57 = vpop.f32.mrf.mxu1 }
 0x81b   :  { %v17227_v25 = vadd.f32 %v5594_v57, %v16962_v30  ;;  %v13535_v57 = vld [vmem:[%s19701_s2 + $0x170] sm:$0xff] }
 0x81c   :  { %7302 = vmatpush.bf16.msrb.mxu3 %v13535_v57 }
 0x81e   :  { %v5836_v20 = vpop.f32.mrf.mxu2  ;;  %v5326_v3 = vpop.f32.mrf.mxu0 }
 0x81f   :  { %v5837_v6 = vadd.f32 %v17024_v34, %v5836_v20  ;;  %v5327_v53 = vadd.f32 %v17024_v34, %v5326_v3  ;;  %v6276_v20 = vpop.permute.xlu0 %6275 }
 0x820   :  { %v4917_v61 = vpop.f32.mrf.mxu3 }
 0x821   :  { %v5945_v33 = vmax.f32 %v5837_v6, 0.0  ;;  %v5387_v49 = vmax.f32 %v5327_v53, 0.0  ;;  %v17253_v53 = vpop.permute.xlu2 %6865 }
 0x822   :  { %v5597_v30 = vpop.f32.mrf.mxu1 }
 0x823   :  { %v5989_v45 = vpack.c.bf16 %v5945_v33, %v5944_v50  ;;  %12287 = vmatmul.msk.bf16.gmra.mxu2 %vm228_vm0, %v17027_v15  ;;  %v5415_v47 = vpack.c.bf16 %v5387_v49, %v5386_v29  ;;  %v17237_v43 = vadd.f32 %v5597_v30, %v16974_v56  ;;  %v13531_v15 = vld [vmem:[%s19701_s2 + $0x150] sm:$0xff] }
 0x824   :  { %6712 = vmatpush.bf16.msrb.mxu1 %v13531_v15 }
 0x825   :  { %12327 = vmatmul.msk.bf16.gmra.mxu3 %vm888_vm1, %v5989_v45  ;;  %12269 = vmatmul.msk.bf16.gmra.mxu1 %vm888_vm1, %v5415_v47 }
 0x826   :  { %v5839_v48 = vpop.f32.mrf.mxu2  ;;  %v5329_v46 = vpop.f32.mrf.mxu0 }
 0x827   :  { %v5330_v3 = vadd.f32 %v17018_v28, %v5329_v46  ;;  %v5840_v61 = vadd.f32 %v17018_v28, %v5839_v48 }
 0x828   :  { %v4919_v6 = vpop.f32.mrf.mxu3 }
 0x829   :  { %12352 = vmatmul.msk.bf16.gmra.mxu0 %vm228_vm0, %v6276_v20  ;;  %v5388_v45 = vmax.f32 %v5330_v3, 0.0  ;;  %v5946_v57 = vmax.f32 %v5840_v61, 0.0 }
 0x82a   :  { %v5599_v56 = vpop.f32.mrf.mxu1 }
 0x82b   :  { %v17250_v29 = vadd.f32 %v5599_v56, %v16991_v23 }
 0x82e   :  { %v5841_v50 = vpop.f32.mrf.mxu2  ;;  %v5331_v49 = vpop.f32.mrf.mxu0 }
 0x82f   :  { %v5842_v33 = vadd.f32 %v17024_v34, %v5841_v50  ;;  %v5332_v47 = vadd.f32 %v17024_v34, %v5331_v49  ;;  %v6278_v50 = vpop.permute.xlu2 %6277 }
 0x830   :  { %v4920_v30 = vpop.f32.mrf.mxu3 }
 0x831   :  { %v5947_v20 = vmax.f32 %v5842_v33, 0.0  ;;  %v5389_v6 = vmax.f32 %v5332_v47, 0.0  ;;  %v17264_v30 = vpop.permute.xlu1 %6867 }
 0x832   :  { %v5602_v23 = vpop.f32.mrf.mxu1 }
 0x833   :  { %v5990_v15 = vpack.c.bf16 %v5947_v20, %v5946_v57  ;;  %12288 = vmatmul.msk.bf16.gmra.mxu2 %vm228_vm0, %v17093_v4  ;;  %v5416_v46 = vpack.c.bf16 %v5389_v6, %v5388_v45  ;;  %v13530_v4 = vld [vmem:[%s19701_s2 + $0x148] sm:$0xff] }
 0x834   :  { %6713 = vmatpush.bf16.msrb.mxu1 %v13530_v4 }
 0x835   :  { %12328 = vmatmul.msk.bf16.gmra.mxu3 %vm888_vm1, %v5990_v15  ;;  %12270 = vmatmul.msk.bf16.gmra.mxu1 %vm888_vm1, %v5416_v46 }
 0x836   :  { %v5844_v48 = vpop.f32.mrf.mxu2  ;;  %v5334_v56 = vpop.f32.mrf.mxu0 }
 0x837   :  { %v5335_v61 = vadd.f32 %v17018_v28, %v5334_v56  ;;  %v5845_v33 = vadd.f32 %v17018_v28, %v5844_v48  ;;  %v13529_v48 = vld [vmem:[%s19701_s2 + $0x140] sm:$0xff] }
 0x838   :  { %v4922_v3 = vpop.f32.mrf.mxu3  ;;  %6714 = vmatpush.bf16.msrb.mxu1 %v13529_v48 }
 0x839   :  { %12353 = vmatmul.msk.bf16.gmra.mxu0 %vm228_vm0, %v6278_v50  ;;  %v5390_v20 = vmax.f32 %v5335_v61, 0.0  ;;  %v5948_v23 = vmax.f32 %v5845_v33, 0.0 }
 0x83a   :  { %v5603_v49 = vpop.f32.mrf.mxu1 }
 0x83e   :  { %v5846_v45 = vpop.f32.mrf.mxu2  ;;  %v5336_v57 = vpop.f32.mrf.mxu0 }
 0x83f   :  { %v5847_v47 = vadd.f32 %v17024_v34, %v5846_v45  ;;  %v5337_v15 = vadd.f32 %v17024_v34, %v5336_v57  ;;  %v6280_v45 = vpop.permute.xlu1 %6279 }
 0x840   :  { %v4923_v6 = vpop.f32.mrf.mxu3 }
 0x841   :  { %v5949_v46 = vmax.f32 %v5847_v47, 0.0  ;;  %v5391_v56 = vmax.f32 %v5337_v15, 0.0 }
 0x842   :  { %v5605_v3 = vpop.f32.mrf.mxu1 }
 0x843   :  { %v5991_v50 = vpack.c.bf16 %v5949_v46, %v5948_v23  ;;  %12289 = vmatmul.msk.bf16.gmra.mxu2 %vm228_vm0, %v17067_v41  ;;  %v5417_v49 = vpack.c.bf16 %v5391_v56, %v5390_v20  ;;  %v17277_v4 = vadd.f32 %v5605_v3, %v17053_v2  ;;  %v17287_v2 = vpop.permute.xlu0 %6869 }
 0x845   :  { %12329 = vmatmul.msk.bf16.gmra.mxu3 %vm888_vm1, %v5991_v50  ;;  %12271 = vmatmul.msk.bf16.gmra.mxu1 %vm888_vm1, %v5417_v49 }
 0x846   :  { %v5849_v61 = vpop.f32.mrf.mxu2  ;;  %v5339_v33 = vpop.f32.mrf.mxu0 }
 0x847   :  { %v5340_v6 = vadd.f32 %v17018_v28, %v5339_v33  ;;  %v5850_v20 = vadd.f32 %v17018_v28, %v5849_v61 }
 0x848   :  { %v4925_v47 = vpop.f32.mrf.mxu3 }
 0x849   :  { %12354 = vmatmul.msk.bf16.gmra.mxu0 %vm228_vm0, %v6280_v45  ;;  %v5392_v48 = vmax.f32 %v5340_v6, 0.0  ;;  %v5950_v3 = vmax.f32 %v5850_v20, 0.0 }
 0x84a   :  { %v5607_v57 = vpop.f32.mrf.mxu1 }
 0x84b   :  { %v17284_v41 = vadd.f32 %v5607_v57, %v17077_v24 }
 0x84e   :  { %v5851_v15 = vpop.f32.mrf.mxu2  ;;  %v5341_v46 = vpop.f32.mrf.mxu0 }
 0x84f   :  { %v5852_v23 = vadd.f32 %v17024_v34, %v5851_v15  ;;  %v5342_v50 = vadd.f32 %v17024_v34, %v5341_v46  ;;  %v6282_v15 = vpop.permute.xlu0 %6281 }
 0x850   :  { %v4926_v56 = vpop.f32.mrf.mxu3 }
 0x851   :  { %v5951_v49 = vmax.f32 %v5852_v23, 0.0  ;;  %v5393_v45 = vmax.f32 %v5342_v50, 0.0  ;;  %v17307_v56 = vpop.permute.xlu2 %6871 }
 0x852   :  { %v5610_v24 = vpop.f32.mrf.mxu1 }
 0x853   :  { %v5992_v47 = vpack.c.bf16 %v5951_v49, %v5950_v3  ;;  %12290 = vmatmul.msk.bf16.gmra.mxu2 %vm228_vm0, %v17055_v58  ;;  %v5418_v33 = vpack.c.bf16 %v5393_v45, %v5392_v48  ;;  %v17294_v61 = vadd.f32 %v5610_v24, %v17103_v35 }
 0x855   :  { %12330 = vmatmul.msk.bf16.gmra.mxu3 %vm888_vm1, %v5992_v47  ;;  %12272 = vmatmul.msk.bf16.gmra.mxu1 %vm888_vm1, %v5418_v33 }
 0x856   :  { %v5854_v57 = vpop.f32.mrf.mxu2  ;;  %v6399_v6 = vpop.f32.mrf.mxu0 }
 0x857   :  { %v6400_v58 = vadd.f32 %v17018_v28, %v6399_v6  ;;  %v5855_v35 = vadd.f32 %v17018_v28, %v5854_v57 }
 0x858   :  { %v6126_v46 = vpop.f32.mrf.mxu3 }
 0x859   :  { %v17299_v20 = vadd.f32 %v6126_v46, %v16821_v10  ;;  %12355 = vmatmul.msk.bf16.gmra.mxu0 %vm228_vm0, %v6282_v15  ;;  %v6524_v45 = vmax.f32 %v6400_v58, 0.0  ;;  %v5952_v24 = vmax.f32 %v5855_v35, 0.0  ;;  %v19792_v15 = vld [vmem:[#allocation9_spill] sm:$0xff] }
 0x85a   :  { %v5612_v23 = vpop.f32.mrf.mxu1 }
 0x85b   :  { %v17304_v48 = vadd.f32 %v5612_v23, %v17127_v26 }
 0x85d   :  { %19791 = vst [vmem:[#allocation2_spill] sm:$0xff] %v17304_v48 }
 0x85e   :  { %v5856_v50 = vpop.f32.mrf.mxu2  ;;  %v6401_v49 = vpop.f32.mrf.mxu0 }
 0x85f   :  { %v5857_v3 = vadd.f32 %v17024_v34, %v5856_v50  ;;  %v6402_v10 = vadd.f32 %v17024_v34, %v6401_v49  ;;  %v6284_v50 = vpop.permute.xlu2 %6283 }
 0x860   :  { %v6128_v47 = vpop.f32.mrf.mxu3 }
 0x861   :  { %v5953_v33 = vmax.f32 %v5857_v3, 0.0  ;;  %v17312_v46 = vadd.f32 %v6128_v47, %v19792_v15  ;;  %v6525_v6 = vmax.f32 %v6402_v10, 0.0  ;;  %v17330_v10 = vpop.permute.xlu1 %6873 }
 0x862   :  { %v5615_v57 = vpop.f32.mrf.mxu1 }
 0x863   :  { %v5993_v26 = vpack.c.bf16 %v5953_v33, %v5952_v24  ;;  %12291 = vmatmul.msk.bf16.gmra.mxu2 %vm228_vm0, %v17117_v7  ;;  %v6574_v23 = vpack.c.bf16 %v6525_v6, %v6524_v45  ;;  %v17317_v48 = vadd.f32 %v5615_v57, %v17143_v5 }
 0x865   :  { %12331 = vmatmul.msk.bf16.gmra.mxu3 %vm888_vm1, %v5993_v26  ;;  %12396 = vmatmul.msk.bf16.vlgmr.msrb.gmra.mxu1 %vm888_vm1, %v6574_v23 }
 0x866   :  { %v5859_v58 = vpop.f32.mrf.mxu2  ;;  %v6404_v35 = vpop.f32.mrf.mxu0 }
 0x867   :  { %v6405_v7 = vadd.f32 %v17018_v28, %v6404_v35  ;;  %v5860_v5 = vadd.f32 %v17018_v28, %v5859_v58 }
 0x868   :  { %v6131_v3 = vpop.f32.mrf.mxu3 }
 0x869   :  { %v17322_v49 = vadd.f32 %v6131_v3, %v16867_v42  ;;  %12356 = vmatmul.msk.bf16.gmra.mxu0 %vm228_vm0, %v6284_v50  ;;  %v6526_v6 = vmax.f32 %v6405_v7, 0.0  ;;  %v5954_v57 = vmax.f32 %v5860_v5, 0.0 }
 0x86a   :  { %v5617_v47 = vpop.f32.mrf.mxu1 }
 0x86b   :  { %v17327_v45 = vadd.f32 %v5617_v47, %v17162_v19 }
 0x86e   :  { %v5861_v24 = vpop.f32.mrf.mxu2  ;;  %v6406_v15 = vpop.f32.mrf.mxu0 }
 0x86f   :  { %v5862_v33 = vadd.f32 %v17024_v34, %v5861_v24  ;;  %v6407_v42 = vadd.f32 %v17024_v34, %v6406_v15  ;;  %v6286_v24 = vpop.permute.xlu1 %6285 }
 0x870   :  { %v6133_v26 = vpop.f32.mrf.mxu3 }
 0x871   :  { %v5955_v23 = vmax.f32 %v5862_v33, 0.0  ;;  %v17335_v50 = vadd.f32 %v6133_v26, %v16884_v51  ;;  %v6527_v35 = vmax.f32 %v6407_v42, 0.0  ;;  %v17353_v26 = vpop.permute.xlu0 %6875 }
 0x872   :  { %v5620_v58 = vpop.f32.mrf.mxu1 }
 0x873   :  { %v5994_v19 = vpack.c.bf16 %v5955_v23, %v5954_v57  ;;  %12292 = vmatmul.msk.bf16.gmra.mxu2 %vm228_vm0, %v17105_v44  ;;  %v6575_v3 = vpack.c.bf16 %v6527_v35, %v6526_v6  ;;  %v17340_v47 = vadd.f32 %v5620_v58, %v17171_v0 }
 0x875   :  { %12332 = vmatmul.msk.bf16.gmra.mxu3 %vm888_vm1, %v5994_v19  ;;  %12397 = vmatmul.msk.bf16.gmra.mxu1 %vm888_vm1, %v6575_v3 }
 0x876   :  { %v5864_v7 = vpop.f32.mrf.mxu2  ;;  %v6409_v5 = vpop.f32.mrf.mxu0 }
 0x877   :  { %v6410_v44 = vadd.f32 %v17018_v28, %v6409_v5  ;;  %v5865_v0 = vadd.f32 %v17018_v28, %v5864_v7 }
 0x878   :  { %v6136_v33 = vpop.f32.mrf.mxu3 }
 0x879   :  { %v17345_v51 = vadd.f32 %v6136_v33, %v16900_v54  ;;  %12357 = vmatmul.msk.bf16.gmra.mxu0 %vm228_vm0, %v6286_v24  ;;  %v6528_v35 = vmax.f32 %v6410_v44, 0.0  ;;  %v5956_v58 = vmax.f32 %v5865_v0, 0.0 }
 0x87a   :  { %v5622_v15 = vpop.f32.mrf.mxu1 }
 0x87b   :  { %v17350_v6 = vadd.f32 %v5622_v15, %v17181_v62 }
 0x87e   :  { %v5866_v42 = vpop.f32.mrf.mxu2  ;;  %v6411_v23 = vpop.f32.mrf.mxu0 }
 0x87f   :  { %v5867_v57 = vadd.f32 %v17024_v34, %v5866_v42  ;;  %v6412_v54 = vadd.f32 %v17024_v34, %v6411_v23  ;;  %v6288_v42 = vpop.permute.xlu0 %6287 }
 0x880   :  { %v6138_v19 = vpop.f32.mrf.mxu3 }
 0x881   :  { %v5957_v3 = vmax.f32 %v5867_v57, 0.0  ;;  %v17358_v24 = vadd.f32 %v6138_v19, %v16917_v13  ;;  %v6529_v5 = vmax.f32 %v6412_v54, 0.0  ;;  %v13534_v13 = vld [vmem:[%s19701_s2 + $0x168] sm:$0xff]  ;;  %v17373_v19 = vpop.permute.xlu2 %6877 }
 0x882   :  { %v5625_v7 = vpop.f32.mrf.mxu1  ;;  %7303 = vmatpush.bf16.msrb.mxu3 %v13534_v13 }
 0x883   :  { %v5995_v62 = vpack.c.bf16 %v5957_v3, %v5956_v58  ;;  %12293 = vmatmul.msk.bf16.gmra.mxu2 %vm228_vm0, %v17081_v38  ;;  %v6576_v33 = vpack.c.bf16 %v6529_v5, %v6528_v35 }
 0x885   :  { %12333 = vmatmul.msk.bf16.gmra.mxu3 %vm888_vm1, %v5995_v62  ;;  %12398 = vmatmul.msk.bf16.gmra.mxu1 %vm888_vm1, %v6576_v33 }
 0x886   :  { %v5869_v15 = vpop.f32.mrf.mxu2  ;;  %v6414_v44 = vpop.f32.mrf.mxu0 }
 0x887   :  { %v6415_v57 = vadd.f32 %v17018_v28, %v6414_v44  ;;  %v5870_v35 = vadd.f32 %v17018_v28, %v5869_v15 }
 0x888   :  { %v6141_v23 = vpop.f32.mrf.mxu3 }
 0x889   :  { %v17365_v0 = vadd.f32 %v6141_v23, %v16933_v21  ;;  %12358 = vmatmul.msk.bf16.gmra.mxu0 %vm228_vm0, %v6288_v42  ;;  %v6530_v21 = vmax.f32 %v6415_v57, 0.0  ;;  %v5958_v7 = vmax.f32 %v5870_v35, 0.0 }
 0x88a   :  { %v5626_v38 = vpop.f32.mrf.mxu1 }
 0x88e   :  { %v5871_v54 = vpop.f32.mrf.mxu2  ;;  %v6416_v3 = vpop.f32.mrf.mxu0 }
 0x88f   :  { %v5872_v58 = vadd.f32 %v17024_v34, %v5871_v54  ;;  %v6417_v62 = vadd.f32 %v17024_v34, %v6416_v3  ;;  %v6290_v54 = vpop.permute.xlu2 %6289 }
 0x890   :  { %v6143_v5 = vpop.f32.mrf.mxu3 }
 0x891   :  { %v5959_v33 = vmax.f32 %v5872_v58, 0.0  ;;  %v17378_v42 = vadd.f32 %v6143_v5, %v16950_v8  ;;  %v6531_v23 = vmax.f32 %v6417_v62, 0.0  ;;  %v17387_v5 = vpop.permute.xlu1 %6879 }
 0x892   :  { %v5628_v15 = vpop.f32.mrf.mxu1 }
 0x893   :  { %v5996_v44 = vpack.c.bf16 %v5959_v33, %v5958_v7  ;;  %12294 = vmatmul.msk.bf16.gmra.mxu2 %vm228_vm0, %v17145_v39  ;;  %v6577_v13 = vpack.c.bf16 %v6531_v23, %v6530_v21 }
 0x895   :  { %12334 = vmatmul.msk.bf16.gmra.mxu3 %vm888_vm1, %v5996_v44  ;;  %12399 = vmatmul.msk.bf16.gmra.mxu1 %vm888_vm1, %v6577_v13 }
 0x896   :  { %v5874_v38 = vpop.f32.mrf.mxu2  ;;  %v6419_v57 = vpop.f32.mrf.mxu0 }
 0x897   :  { %v6420_v8 = vadd.f32 %v17018_v28, %v6419_v57  ;;  %v5875_v58 = vadd.f32 %v17018_v28, %v5874_v38 }
 0x898   :  { %v6146_v3 = vpop.f32.mrf.mxu3 }
 0x899   :  { %12359 = vmatmul.msk.bf16.gmra.mxu0 %vm228_vm0, %v6290_v54  ;;  %v6532_v7 = vmax.f32 %v6420_v8, 0.0  ;;  %v5960_v44 = vmax.f32 %v5875_v58, 0.0 }
 0x89a   :  { %v5629_v35 = vpop.f32.mrf.mxu1 }
 0x89e   :  { %v5876_v39 = vpop.f32.mrf.mxu2  ;;  %v6421_v62 = vpop.f32.mrf.mxu0 }
 0x89f   :  { %v5877_v21 = vadd.f32 %v17024_v34, %v5876_v39  ;;  %v6422_v23 = vadd.f32 %v17024_v34, %v6421_v62  ;;  %v6292_v39 = vpop.permute.xlu1 %6291  ;;  %v17401_v62 = vpop.permute.xlu0 %6881 }
 0x8a0   :  { %v6147_v33 = vpop.f32.mrf.mxu3 }
 0x8a1   :  { %v5961_v15 = vmax.f32 %v5877_v21, 0.0  ;;  %v6533_v13 = vmax.f32 %v6422_v23, 0.0 }
 0x8a2   :  { %v5631_v57 = vpop.f32.mrf.mxu1 }
 0x8a3   :  { %v5997_v3 = vpack.c.bf16 %v5961_v15, %v5960_v44  ;;  %12295 = vmatmul.msk.bf16.gmra.mxu2 %vm228_vm0, %v17131_v63  ;;  %v6578_v54 = vpack.c.bf16 %v6533_v13, %v6532_v7 }
 0x8a5   :  { %12335 = vmatmul.msk.bf16.gmra.mxu3 %vm888_vm1, %v5997_v3  ;;  %12400 = vmatmul.msk.bf16.gmra.mxu1 %vm888_vm1, %v6578_v54 }
 0x8a6   :  { %v5879_v38 = vpop.f32.mrf.mxu2  ;;  %v6424_v35 = vpop.f32.mrf.mxu0 }
 0x8a7   :  { %v6425_v21 = vadd.f32 %v17018_v28, %v6424_v35  ;;  %v5880_v63 = vadd.f32 %v17018_v28, %v5879_v38 }
 0x8a8   :  { %v6149_v8 = vpop.f32.mrf.mxu3 }
 0x8a9   :  { %v17396_v33 = vadd.f32 %v6149_v8, %v16995_v37  ;;  %12360 = vmatmul.msk.bf16.gmra.mxu0 %vm228_vm0, %v6292_v39  ;;  %v6534_v15 = vmax.f32 %v6425_v21, 0.0  ;;  %v5962_v57 = vmax.f32 %v5880_v63, 0.0 }
 0x8aa   :  { %v5632_v58 = vpop.f32.mrf.mxu1 }
 0x8ae   :  { %v5881_v7 = vpop.f32.mrf.mxu2  ;;  %v6426_v44 = vpop.f32.mrf.mxu0 }
 0x8af   :  { %v5882_v23 = vadd.f32 %v17024_v34, %v5881_v7  ;;  %v6427_v3 = vadd.f32 %v17024_v34, %v6426_v44  ;;  %v6294_v7 = vpop.permute.xlu0 %6293 }
 0x8b0   :  { %v6151_v13 = vpop.f32.mrf.mxu3 }
 0x8b1   :  { %v5963_v37 = vmax.f32 %v5882_v23, 0.0  ;;  %v17406_v54 = vadd.f32 %v6151_v13, %v17013_v31  ;;  %v6535_v39 = vmax.f32 %v6427_v3, 0.0  ;;  %v17418_v13 = vpop.permute.xlu2 %6883 }
 0x8b2   :  { %v5634_v38 = vpop.f32.mrf.mxu1 }
 0x8b3   :  { %v5998_v8 = vpack.c.bf16 %v5963_v37, %v5962_v57  ;;  %12296 = vmatmul.msk.bf16.gmra.mxu2 %vm228_vm0, %v17114_v14  ;;  %v6579_v35 = vpack.c.bf16 %v6535_v39, %v6534_v15 }
 0x8b5   :  { %12336 = vmatmul.msk.bf16.gmra.mxu3 %vm888_vm1, %v5998_v8  ;;  %12401 = vmatmul.msk.bf16.gmra.mxu1 %vm888_vm1, %v6579_v35 }
 0x8b6   :  { %v5884_v58 = vpop.f32.mrf.mxu2  ;;  %v6429_v21 = vpop.f32.mrf.mxu0 }
 0x8b7   :  { %v6430_v23 = vadd.f32 %v17018_v28, %v6429_v21  ;;  %v5885_v14 = vadd.f32 %v17018_v28, %v5884_v58 }
 0x8b8   :  { %v6154_v44 = vpop.f32.mrf.mxu3 }
 0x8b9   :  { %v17413_v63 = vadd.f32 %v6154_v44, %v17040_v16  ;;  %12361 = vmatmul.msk.bf16.gmra.mxu0 %vm228_vm0, %v6294_v7  ;;  %v6536_v37 = vmax.f32 %v6430_v23, 0.0  ;;  %v5964_v38 = vmax.f32 %v5885_v14, 0.0  ;;  %v6296_v23 = vpop.permute.xlu2 %6295 }
 0x8ba   :  { %v5635_v31 = vpop.f32.mrf.mxu1 }
 0x8be   :  { %v5886_v15 = vpop.f32.mrf.mxu2  ;;  %v6431_v57 = vpop.f32.mrf.mxu0 }
 0x8bf   :  { %v5887_v3 = vadd.f32 %v17024_v34, %v5886_v15  ;;  %v6432_v8 = vadd.f32 %v17024_v34, %v6431_v57  ;;  %v17440_v57 = vpop.permute.xlu1 %6885 }
 0x8c0   :  { %v6156_v39 = vpop.f32.mrf.mxu3 }
 0x8c1   :  { %v5965_v16 = vmax.f32 %v5887_v3, 0.0  ;;  %v17423_v35 = vadd.f32 %v6156_v39, %v17063_v36  ;;  %v6537_v7 = vmax.f32 %v6432_v8, 0.0 }
 0x8c2   :  { %v5637_v28 = vpop.f32.mrf.mxu1 }
 0x8c3   :  { %v5999_v44 = vpack.c.bf16 %v5965_v16, %v5964_v38  ;;  %12297 = vmatmul.msk.bf16.gmra.mxu2 %vm228_vm0, %v17166_v27  ;;  %v6580_v58 = vpack.c.bf16 %v6537_v7, %v6536_v37  ;;  %v17436_v27 = vld [vmem:[%s19702_s5] sm:$0xff] }
 0x8c5   :  { %12337 = vmatmul.msk.bf16.gmra.mxu3 %vm888_vm1, %v5999_v44  ;;  %12402 = vmatmul.msk.bf16.gmra.mxu1 %vm888_vm1, %v6580_v58 }
 0x8c6   :  { %v5889_v21 = vpop.f32.mrf.mxu2  ;;  %v6434_v31 = vpop.f32.mrf.mxu0 }
 0x8c7   :  { %v6435_v15 = vadd.f32 %v17436_v27, %v6434_v31  ;;  %v5890_v3 = vadd.f32 %v17436_v27, %v5889_v21 }
 0x8c8   :  { %v6159_v34 = vpop.f32.mrf.mxu3 }
 0x8c9   :  { %v17430_v14 = vadd.f32 %v6159_v34, %v17084_v52  ;;  %12362 = vmatmul.msk.bf16.gmra.mxu0 %vm228_vm0, %v6296_v23  ;;  %v17445_v52 = vld [vmem:[%s19702_s5 + $0x8] sm:$0xff]  ;;  %v6538_v38 = vmax.f32 %v6435_v15, 0.0  ;;  %v5966_v44 = vmax.f32 %v5890_v3, 0.0 }
 0x8ca   :  { %v5638_v36 = vpop.f32.mrf.mxu1 }
 0x8cb   :  { %v13734_v36 = vld [vmem:[%s19699_s1 + $0x8] sm:$0xff] }
 0x8ce   :  { %v5891_v37 = vpop.f32.mrf.mxu2  ;;  %v6436_v8 = vpop.f32.mrf.mxu0 }
 0x8cf   :  { %v5892_v39 = vadd.f32 %v17445_v52, %v5891_v37  ;;  %v6437_v7 = vadd.f32 %v17445_v52, %v6436_v8 }
 0x8d0   :  { %v6161_v16 = vpop.f32.mrf.mxu3 }
 0x8d1   :  { %v5967_v28 = vmax.f32 %v5892_v39, 0.0  ;;  %v17450_v58 = vadd.f32 %v6161_v16, %v17111_v11  ;;  %v6539_v21 = vmax.f32 %v6437_v7, 0.0  ;;  %v6298_v11 = vpop.permute.xlu1 %6297  ;;  %v13735_v39 = vld [vmem:[%s19699_s1] sm:$0xff]  ;;  %v17468_v7 = vpop.permute.xlu0 %6887 }
 0x8d2   :  { %v5640_v23 = vpop.f32.mrf.mxu1  ;;  %19793 = vst [vmem:[#allocation3_spill] sm:$0xff] %v17468_v7 }
 0x8d3   :  { %v6000_v31 = vpack.c.bf16 %v5967_v28, %v5966_v44  ;;  %12421 = vmatmul.msk.bf16.vlgmr.msrb.gmra.mxu2 %vm228_vm0, %v17154_v9  ;;  %v6581_v34 = vpack.c.bf16 %v6539_v21, %v6538_v38 }
 0x8d4   :  { %9471 = vmatpush.bf16.msrb.mxu2 %v13734_v36 }
 0x8d5   :  { %12338 = vmatmul.msk.bf16.gmra.mxu3 %vm888_vm1, %v6000_v31  ;;  %12403 = vmatmul.msk.bf16.gmra.mxu1 %vm888_vm1, %v6581_v34 }
 0x8d6   :  { %v5894_v15 = vpop.f32.mrf.mxu2  ;;  %v6439_v3 = vpop.f32.mrf.mxu0 }
 0x8d7   :  { %v6440_v38 = vadd.f32 %v17436_v27, %v6439_v3  ;;  %v5895_v16 = vadd.f32 %v17436_v27, %v5894_v15  ;;  %v19794_v3 = vld [vmem:[#allocation6_spill] sm:$0xff] }
 0x8d8   :  { %v6164_v37 = vpop.f32.mrf.mxu3  ;;  %9472 = vmatpush.bf16.msrb.mxu2 %v13735_v39 }
 0x8d9   :  { %v17463_v9 = vadd.f32 %v6164_v37, %v17134_v40  ;;  %12363 = vmatmul.msk.bf16.gmra.mxu0 %vm228_vm0, %v6298_v11  ;;  %v6540_v31 = vmax.f32 %v6440_v38, 0.0  ;;  %v5968_v36 = vmax.f32 %v5895_v16, 0.0 }
 0x8da   :  { %v5641_v8 = vpop.f32.mrf.mxu1 }
 0x8de   :  { %v5896_v44 = vpop.f32.mrf.mxu2  ;;  %v6441_v21 = vpop.f32.mrf.mxu0 }
 0x8df   :  { %v5897_v28 = vadd.f32 %v17445_v52, %v5896_v44  ;;  %v6442_v34 = vadd.f32 %v17445_v52, %v6441_v21  ;;  %v6300_v44 = vpop.permute.xlu0 %6299 }
 0x8e0   :  { %v6166_v23 = vpop.f32.mrf.mxu3 }
 0x8e1   :  { %v5969_v40 = vmax.f32 %v5897_v28, 0.0  ;;  %v17473_v37 = vadd.f32 %v6166_v23, %v17151_v12  ;;  %v6541_v11 = vmax.f32 %v6442_v34, 0.0  ;;  %v17491_v34 = vpop.permute.xlu2 %6889 }
 0x8e2   :  { %v6716_v15 = vpop.f32.mrf.mxu1 }
 0x8e3   :  { %v6001_v39 = vpack.c.bf16 %v5969_v40, %v5968_v36  ;;  %12422 = vmatmul.msk.bf16.gmra.mxu2 %vm228_vm0, %v19794_v3  ;;  %v6582_v8 = vpack.c.bf16 %v6541_v11, %v6540_v31  ;;  %v17478_v7 = vadd.f32 %v6716_v15, %v17299_v20  ;;  %v13533_v20 = vld [vmem:[%s19701_s2 + $0x160] sm:$0xff] }
 0x8e4   :  { %7304 = vmatpush.bf16.msrb.mxu3 %v13533_v20 }
 0x8e5   :  { %12339 = vmatmul.msk.bf16.gmra.mxu3 %vm888_vm1, %v6001_v39  ;;  %12404 = vmatmul.msk.bf16.gmra.mxu1 %vm888_vm1, %v6582_v8 }
 0x8e6   :  { %v5899_v38 = vpop.f32.mrf.mxu2  ;;  %v6444_v16 = vpop.f32.mrf.mxu0 }
 0x8e7   :  { %v6445_v21 = vadd.f32 %v17436_v27, %v6444_v16  ;;  %v5900_v31 = vadd.f32 %v17436_v27, %v5899_v38 }
 0x8e8   :  { %v6169_v28 = vpop.f32.mrf.mxu3 }
 0x8e9   :  { %12364 = vmatmul.msk.bf16.gmra.mxu0 %vm228_vm0, %v6300_v44  ;;  %v6542_v39 = vmax.f32 %v6445_v21, 0.0  ;;  %v5970_v8 = vmax.f32 %v5900_v31, 0.0 }
 0x8ea   :  { %v6718_v12 = vpop.f32.mrf.mxu1 }
 0x8eb   :  { %v17485_v23 = vadd.f32 %v6718_v12, %v17312_v46 }
 0x8ee   :  { %v5901_v36 = vpop.f32.mrf.mxu2  ;;  %v6446_v11 = vpop.f32.mrf.mxu0 }
 0x8ef   :  { %v5902_v40 = vadd.f32 %v17445_v52, %v5901_v36  ;;  %v6447_v15 = vadd.f32 %v17445_v52, %v6446_v11  ;;  %v6302_v36 = vpop.permute.xlu2 %6301 }
 0x8f0   :  { %v6170_v3 = vpop.f32.mrf.mxu3 }
 0x8f1   :  { %v5971_v46 = vmax.f32 %v5902_v40, 0.0  ;;  %v6543_v16 = vmax.f32 %v6447_v15, 0.0  ;;  %v17511_v3 = vpop.permute.xlu1 %6891 }
 0x8f2   :  { %v6721_v28 = vpop.f32.mrf.mxu1 }
 0x8f3   :  { %v6002_v44 = vpack.c.bf16 %v5971_v46, %v5970_v8  ;;  %12423 = vmatmul.msk.bf16.gmra.mxu2 %vm228_vm0, %v17196_v1  ;;  %v6583_v38 = vpack.c.bf16 %v6543_v16, %v6542_v39  ;;  %v17498_v12 = vadd.f32 %v6721_v28, %v17322_v49 }
 0x8f5   :  { %12340 = vmatmul.msk.bf16.gmra.mxu3 %vm888_vm1, %v6002_v44  ;;  %12405 = vmatmul.msk.bf16.gmra.mxu1 %vm888_vm1, %v6583_v38 }
 0x8f6   :  { %v5904_v20 = vpop.f32.mrf.mxu2  ;;  %v6449_v21 = vpop.f32.mrf.mxu0 }
 0x8f7   :  { %v6450_v1 = vadd.f32 %v17436_v27, %v6449_v21  ;;  %v5905_v49 = vadd.f32 %v17436_v27, %v5904_v20 }
 0x8f8   :  { %v6172_v11 = vpop.f32.mrf.mxu3 }
 0x8f9   :  { %v17503_v31 = vadd.f32 %v6172_v11, %v17186_v32  ;;  %12365 = vmatmul.msk.bf16.gmra.mxu0 %vm228_vm0, %v6302_v36  ;;  %v6544_v16 = vmax.f32 %v6450_v1, 0.0  ;;  %v5972_v28 = vmax.f32 %v5905_v49, 0.0 }
 0x8fa   :  { %v6723_v40 = vpop.f32.mrf.mxu1 }
 0x8fb   :  { %v17508_v39 = vadd.f32 %v6723_v40, %v17335_v50 }
 0x8fe   :  { %v5906_v15 = vpop.f32.mrf.mxu2  ;;  %v6451_v46 = vpop.f32.mrf.mxu0 }
 0x8ff   :  { %v5907_v8 = vadd.f32 %v17445_v52, %v5906_v15  ;;  %v6452_v32 = vadd.f32 %v17445_v52, %v6451_v46  ;;  %v6304_v15 = vpop.permute.xlu1 %6303 }
 0x900   :  { %v6174_v44 = vpop.f32.mrf.mxu3 }
 0x901   :  { %v5973_v38 = vmax.f32 %v5907_v8, 0.0  ;;  %v17516_v36 = vadd.f32 %v6174_v44, %v17193_v59  ;;  %v6545_v21 = vmax.f32 %v6452_v32, 0.0  ;;  %v17534_v44 = vpop.permute.xlu0 %6893 }
 0x902   :  { %v6726_v20 = vpop.f32.mrf.mxu1 }
 0x903   :  { %v6003_v50 = vpack.c.bf16 %v5973_v38, %v5972_v28  ;;  %12424 = vmatmul.msk.bf16.gmra.mxu2 %vm228_vm0, %v17213_v55  ;;  %v6584_v11 = vpack.c.bf16 %v6545_v21, %v6544_v16  ;;  %v17521_v40 = vadd.f32 %v6726_v20, %v17345_v51 }
 0x905   :  { %12341 = vmatmul.msk.bf16.gmra.mxu3 %vm888_vm1, %v6003_v50  ;;  %12406 = vmatmul.msk.bf16.gmra.mxu1 %vm888_vm1, %v6584_v11 }
 0x906   :  { %v5909_v1 = vpop.f32.mrf.mxu2  ;;  %v6454_v49 = vpop.f32.mrf.mxu0 }
 0x907   :  { %v6455_v55 = vadd.f32 %v17436_v27, %v6454_v49  ;;  %v5910_v51 = vadd.f32 %v17436_v27, %v5909_v1 }
 0x908   :  { %v6177_v8 = vpop.f32.mrf.mxu3 }
 0x909   :  { %v17526_v59 = vadd.f32 %v6177_v8, %v17203_v18  ;;  %12366 = vmatmul.msk.bf16.gmra.mxu0 %vm228_vm0, %v6304_v15  ;;  %v6546_v21 = vmax.f32 %v6455_v55, 0.0  ;;  %v5974_v20 = vmax.f32 %v5910_v51, 0.0 }
 0x90a   :  { %v6728_v46 = vpop.f32.mrf.mxu1 }
 0x90b   :  { %v17531_v16 = vadd.f32 %v6728_v46, %v17358_v24 }
 0x90e   :  { %v5911_v32 = vpop.f32.mrf.mxu2  ;;  %v6456_v38 = vpop.f32.mrf.mxu0 }
 0x90f   :  { %v5912_v28 = vadd.f32 %v17445_v52, %v5911_v32  ;;  %v6457_v18 = vadd.f32 %v17445_v52, %v6456_v38  ;;  %v6306_v32 = vpop.permute.xlu0 %6305 }
 0x910   :  { %v6179_v50 = vpop.f32.mrf.mxu3 }
 0x911   :  { %v5975_v11 = vmax.f32 %v5912_v28, 0.0  ;;  %v17539_v15 = vadd.f32 %v6179_v50, %v17210_v17  ;;  %v6547_v49 = vmax.f32 %v6457_v18, 0.0  ;;  %v17557_v50 = vpop.permute.xlu2 %6895 }
 0x912   :  { %v6731_v1 = vpop.f32.mrf.mxu1 }
 0x913   :  { %v6004_v24 = vpack.c.bf16 %v5975_v11, %v5974_v20  ;;  %12425 = vmatmul.msk.bf16.gmra.mxu2 %vm228_vm0, %v17230_v22  ;;  %v6585_v8 = vpack.c.bf16 %v6547_v49, %v6546_v21  ;;  %v17544_v46 = vadd.f32 %v6731_v1, %v17365_v0 }
 0x915   :  { %12342 = vmatmul.msk.bf16.gmra.mxu3 %vm888_vm1, %v6004_v24  ;;  %12407 = vmatmul.msk.bf16.gmra.mxu1 %vm888_vm1, %v6585_v8 }
 0x916   :  { %v5914_v55 = vpop.f32.mrf.mxu2  ;;  %v6459_v51 = vpop.f32.mrf.mxu0 }
 0x917   :  { %v6460_v22 = vadd.f32 %v17436_v27, %v6459_v51  ;;  %v5915_v0 = vadd.f32 %v17436_v27, %v5914_v55 }
 0x918   :  { %v6182_v28 = vpop.f32.mrf.mxu3 }
 0x919   :  { %v17549_v17 = vadd.f32 %v6182_v28, %v17220_v60  ;;  %12367 = vmatmul.msk.bf16.gmra.mxu0 %vm228_vm0, %v6306_v32  ;;  %v6548_v49 = vmax.f32 %v6460_v22, 0.0  ;;  %v5976_v1 = vmax.f32 %v5915_v0, 0.0 }
 0x91a   :  { %v6733_v38 = vpop.f32.mrf.mxu1 }
 0x91b   :  { %v17554_v21 = vadd.f32 %v6733_v38, %v17378_v42 }
 0x91e   :  { %v5916_v18 = vpop.f32.mrf.mxu2  ;;  %v6461_v11 = vpop.f32.mrf.mxu0 }
 0x91f   :  { %v5917_v20 = vadd.f32 %v17445_v52, %v5916_v18  ;;  %v6462_v60 = vadd.f32 %v17445_v52, %v6461_v11  ;;  %v6308_v18 = vpop.permute.xlu2 %6307 }
 0x920   :  { %v6184_v24 = vpop.f32.mrf.mxu3 }
 0x921   :  { %v5977_v8 = vmax.f32 %v5917_v20, 0.0  ;;  %v17562_v32 = vadd.f32 %v6184_v24, %v17227_v25  ;;  %v6549_v51 = vmax.f32 %v6462_v60, 0.0  ;;  %v17574_v24 = vpop.permute.xlu1 %6897 }
 0x922   :  { %v6736_v55 = vpop.f32.mrf.mxu1 }
 0x923   :  { %v6005_v42 = vpack.c.bf16 %v5977_v8, %v5976_v1  ;;  %12426 = vmatmul.msk.bf16.gmra.mxu2 %vm228_vm0, %v17253_v53  ;;  %v6586_v28 = vpack.c.bf16 %v6549_v51, %v6548_v49 }
 0x925   :  { %12343 = vmatmul.msk.bf16.gmra.mxu3 %vm888_vm1, %v6005_v42  ;;  %12408 = vmatmul.msk.bf16.gmra.mxu1 %vm888_vm1, %v6586_v28 }
 0x926   :  { %v5919_v38 = vpop.f32.mrf.mxu2  ;;  %v6464_v22 = vpop.f32.mrf.mxu0 }
 0x927   :  { %v6465_v20 = vadd.f32 %v17436_v27, %v6464_v22  ;;  %v5920_v53 = vadd.f32 %v17436_v27, %v5919_v38 }
 0x928   :  { %v6187_v11 = vpop.f32.mrf.mxu3 }
 0x929   :  { %v17569_v0 = vadd.f32 %v6187_v11, %v17237_v43  ;;  %12368 = vmatmul.msk.bf16.gmra.mxu0 %vm228_vm0, %v6308_v18  ;;  %v6550_v8 = vmax.f32 %v6465_v20, 0.0  ;;  %v5978_v55 = vmax.f32 %v5920_v53, 0.0 }
 0x92a   :  { %v6737_v25 = vpop.f32.mrf.mxu1 }
 0x92e   :  { %v5921_v49 = vpop.f32.mrf.mxu2  ;;  %v6466_v1 = vpop.f32.mrf.mxu0 }
 0x92f   :  { %v5922_v60 = vadd.f32 %v17445_v52, %v5921_v49  ;;  %v6467_v42 = vadd.f32 %v17445_v52, %v6466_v1  ;;  %v6310_v49 = vpop.permute.xlu1 %6309 }
 0x930   :  { %v6189_v51 = vpop.f32.mrf.mxu3 }
 0x931   :  { %v5979_v43 = vmax.f32 %v5922_v60, 0.0  ;;  %v17579_v28 = vadd.f32 %v6189_v51, %v17250_v29  ;;  %v6551_v18 = vmax.f32 %v6467_v42, 0.0 }
 0x932   :  { %v6739_v38 = vpop.f32.mrf.mxu1 }
 0x933   :  { %v6006_v11 = vpack.c.bf16 %v5979_v43, %v5978_v55  ;;  %12427 = vmatmul.msk.bf16.gmra.mxu2 %vm228_vm0, %v17264_v30  ;;  %v6587_v22 = vpack.c.bf16 %v6551_v18, %v6550_v8  ;;  %v17584_v25 = vadd.f32 %v6739_v38, %v17396_v33  ;;  %v17594_v33 = vpop.permute.xlu0 %6899 }
 0x935   :  { %12344 = vmatmul.msk.bf16.gmra.mxu3 %vm888_vm1, %v6006_v11  ;;  %12409 = vmatmul.msk.bf16.gmra.mxu1 %vm888_vm1, %v6587_v22 }
 0x936   :  { %v5924_v20 = vpop.f32.mrf.mxu2  ;;  %v6469_v53 = vpop.f32.mrf.mxu0 }
 0x937   :  { %v6470_v1 = vadd.f32 %v17436_v27, %v6469_v53  ;;  %v5925_v8 = vadd.f32 %v17436_v27, %v5924_v20 }
 0x938   :  { %v6192_v60 = vpop.f32.mrf.mxu3 }
 0x939   :  { %12369 = vmatmul.msk.bf16.gmra.mxu0 %vm228_vm0, %v6310_v49  ;;  %v6552_v43 = vmax.f32 %v6470_v1, 0.0  ;;  %v5980_v38 = vmax.f32 %v5925_v8, 0.0  ;;  %v12497_v8 = vld [vmem:[%s19700_s0 + $0xc] sm:$0xf] }
 0x93a   :  { %v6741_v29 = vpop.f32.mrf.mxu1 }
 0x93b   :  { %v17591_v30 = vadd.f32 %v6741_v29, %v17406_v54 }
 0x93e   :  { %v5926_v51 = vpop.f32.mrf.mxu2  ;;  %v6471_v55 = vpop.f32.mrf.mxu0 }
 0x93f   :  { %v5927_v42 = vadd.f32 %v17445_v52, %v5926_v51  ;;  %v6472_v11 = vadd.f32 %v17445_v52, %v6471_v55  ;;  %v6312_v51 = vpop.permute.xlu0 %6311 }
 0x940   :  { %v6193_v18 = vpop.f32.mrf.mxu3 }
 0x941   :  { %v5981_v22 = vmax.f32 %v5927_v42, 0.0  ;;  %v6553_v49 = vmax.f32 %v6472_v11, 0.0 }
 0x942   :  { %v6744_v54 = vpop.f32.mrf.mxu1 }
 0x943   :  { %v6007_v60 = vpack.c.bf16 %v5981_v22, %v5980_v38  ;;  %12428 = vmatmul.msk.bf16.gmra.mxu2 %vm228_vm0, %v17287_v2  ;;  %v6588_v53 = vpack.c.bf16 %v6553_v49, %v6552_v43  ;;  %v17601_v20 = vadd.f32 %v6744_v54, %v17413_v63  ;;  %v13537_v2 = vld [vmem:[%s19700_s0 + $0x18] sm:$0xf0]  ;;  %v17624_v22 = vpop.permute.xlu2 %6901 }
 0x944   :  { %v17611_v55 = vor.u32 %v13537_v2, %v12497_v8 }
 0x945   :  { %12345 = vmatmul.msk.bf16.gmra.mxu3 %vm888_vm1, %v6007_v60  ;;  %12410 = vmatmul.msk.bf16.gmra.mxu1 %vm888_vm1, %v6588_v53 }
 0x946   :  { %v5929_v29 = vpop.f32.mrf.mxu2  ;;  %v6474_v1 = vpop.f32.mrf.mxu0  ;;  %8160 = vrot.lane.b32.xlu0 %v17611_v55, %s13744_s21 }
 0x947   :  { %v6475_v18 = vadd.f32 %v17436_v27, %v6474_v1  ;;  %v5930_v38 = vadd.f32 %v17436_v27, %v5929_v29 }
 0x948   :  { %v6195_v42 = vpop.f32.mrf.mxu3 }
 0x949   :  { %v17614_v63 = vadd.f32 %v6195_v42, %v17277_v4  ;;  %12370 = vmatmul.msk.bf16.gmra.mxu0 %vm228_vm0, %v6312_v51  ;;  %v6554_v54 = vmax.f32 %v6475_v18, 0.0  ;;  %v5982_v8 = vmax.f32 %v5930_v38, 0.0  ;;  %v13569_v18 = vld [vmem:[%s19701_s2 + $0x1b8] sm:$0xff] }
 0x94a   :  { %v6746_v43 = vpop.f32.mrf.mxu1  ;;  %v13565_v38 = vld [vmem:[%s19701_s2 + $0x198] sm:$0xff]  ;;  %8606 = vmatpush.bf16.msra.mxu3 %v13569_v18 }
 0x94b   :  { %v17621_v11 = vadd.f32 %v6746_v43, %v17423_v35  ;;  %8016 = vmatpush.bf16.msra.mxu1 %v13565_v38 }
 0x94d   :  { %19795 = vst [vmem:[#allocation8_spill] sm:$0xff] %v17621_v11 }
 0x94e   :  { %v5931_v49 = vpop.f32.mrf.mxu2  ;;  %v6476_v4 = vpop.f32.mrf.mxu0 }
 0x94f   :  { %v5932_v60 = vadd.f32 %v17445_v52, %v5931_v49  ;;  %v6477_v51 = vadd.f32 %v17445_v52, %v6476_v4  ;;  %v6314_v49 = vpop.permute.xlu2 %6313 }
 0x950   :  { %v6197_v53 = vpop.f32.mrf.mxu3 }
 0x951   :  { %v5983_v2 = vmax.f32 %v5932_v60, 0.0  ;;  %v17629_v42 = vadd.f32 %v6197_v53, %v17284_v41  ;;  %v6555_v1 = vmax.f32 %v6477_v51, 0.0  ;;  %v13538_v60 = vld [vmem:[%s19700_s0 + $0x38] sm:$0xf0] }
 0x952   :  { %v6749_v29 = vpop.f32.mrf.mxu1 }
 0x953   :  { %v6008_v35 = vpack.c.bf16 %v5983_v2, %v5982_v8  ;;  %12429 = vmatmul.msk.bf16.gmra.mxu2 %vm228_vm0, %v17307_v56  ;;  %v6589_v43 = vpack.c.bf16 %v6555_v1, %v6554_v54  ;;  %v17634_v11 = vadd.f32 %v6749_v29, %v17430_v14  ;;  %v12501_v14 = vld [vmem:[%s19700_s0 + $0x2c] sm:$0xf] }
 0x954   :  { %v17650_v54 = vor.u32 %v13538_v60, %v12501_v14  ;;  %v19797_v60 = vld [vmem:[#allocation2_spill] sm:$0xff] }
 0x955   :  { %19796 = vst [vmem:[#allocation7_spill] sm:$0xff] %v17634_v11  ;;  %12346 = vmatmul.msk.bf16.gmra.mxu3 %vm888_vm1, %v6008_v35  ;;  %12411 = vmatmul.msk.bf16.gmra.mxu1 %vm888_vm1, %v6589_v43 }
 0x956   :  { %v6989_v41 = vpop.f32.mrf.mxu2  ;;  %v6479_v56 = vpop.f32.mrf.mxu0  ;;  %8162 = vrot.lane.b32.xlu1 %v17650_v54, %s13744_s21 }
 0x957   :  { %v6480_v8 = vadd.f32 %v17436_v27, %v6479_v56  ;;  %v6990_v1 = vadd.f32 %v17436_v27, %v6989_v41 }
 0x958   :  { %v6200_v4 = vpop.f32.mrf.mxu3 }
 0x959   :  { %v17653_v53 = vadd.f32 %v6200_v4, %v17294_v61  ;;  %12371 = vmatmul.msk.bf16.gmra.mxu0 %vm228_vm0, %v6314_v49  ;;  %v6556_v18 = vmax.f32 %v6480_v8, 0.0  ;;  %v7114_v49 = vmax.f32 %v6990_v1, 0.0 }
 0x95a   :  { %v6751_v51 = vpop.f32.mrf.mxu1 }
 0x95b   :  { %v17660_v2 = vadd.f32 %v6751_v51, %v17450_v58 }
 0x95e   :  { %v6991_v35 = vpop.f32.mrf.mxu2  ;;  %v6481_v43 = vpop.f32.mrf.mxu0 }
 0x95f   :  { %v6992_v29 = vadd.f32 %v17445_v52, %v6991_v35  ;;  %v6482_v38 = vadd.f32 %v17445_v52, %v6481_v43  ;;  %v12505_v35 = vld [vmem:[%s19700_s0 + $0x4c] sm:$0xf] }
 0x960   :  { %v6202_v61 = vpop.f32.mrf.mxu3 }
 0x961   :  { %v7115_v14 = vmax.f32 %v6992_v29, 0.0  ;;  %v17666_v4 = vadd.f32 %v6202_v61, %v19797_v60  ;;  %v6557_v11 = vmax.f32 %v6482_v38, 0.0  ;;  %v13539_v29 = vld [vmem:[%s19700_s0 + $0x58] sm:$0xf0] }
 0x962   :  { %v6754_v58 = vpop.f32.mrf.mxu1  ;;  %v17681_v43 = vor.u32 %v13539_v29, %v12505_v35 }
 0x963   :  { %v7164_v56 = vpack.c.bf16 %v7115_v14, %v7114_v49  ;;  %12430 = vmatmul.msk.bf16.gmra.mxu2 %vm228_vm0, %v17330_v10  ;;  %v6590_v41 = vpack.c.bf16 %v6557_v11, %v6556_v18  ;;  %v17671_v51 = vadd.f32 %v6754_v58, %v17463_v9 }
 0x964   :  { %8164 = vrot.lane.b32.xlu2 %v17681_v43, %s13744_s21 }
 0x965   :  { %12470 = vmatmul.msk.bf16.vlgmr.msrb.gmra.mxu3 %vm888_vm1, %v7164_v56  ;;  %12412 = vmatmul.msk.bf16.gmra.mxu1 %vm888_vm1, %v6590_v41 }
 0x966   :  { %v6994_v8 = vpop.f32.mrf.mxu2  ;;  %v6484_v1 = vpop.f32.mrf.mxu0 }
 0x967   :  { %v6485_v18 = vadd.f32 %v17436_v27, %v6484_v1  ;;  %v6995_v38 = vadd.f32 %v17436_v27, %v6994_v8 }
 0x968   :  { %v6205_v10 = vpop.f32.mrf.mxu3 }
 0x969   :  { %v17684_v9 = vadd.f32 %v6205_v10, %v17317_v48  ;;  %12595 = vmatmul.msk.bf16.vlgmr.msra.gmra.mxu0 %vm228_vm0, %v17611_v55  ;;  %v6558_v48 = vmax.f32 %v6485_v18, 0.0  ;;  %v7116_v41 = vmax.f32 %v6995_v38, 0.0  ;;  %v12509_v38 = vld [vmem:[%s19700_s0 + $0x6c] sm:$0xf] }
 0x96a   :  { %v6756_v11 = vpop.f32.mrf.mxu1 }
 0x96b   :  { %v17692_v61 = vadd.f32 %v6756_v11, %v17473_v37 }
 0x96e   :  { %v6996_v49 = vpop.f32.mrf.mxu2  ;;  %v6486_v60 = vpop.f32.mrf.mxu0 }
 0x96f   :  { %v6997_v14 = vadd.f32 %v17445_v52, %v6996_v49  ;;  %v6487_v58 = vadd.f32 %v17445_v52, %v6486_v60 }
 0x970   :  { %v6207_v56 = vpop.f32.mrf.mxu3 }
 0x971   :  { %v7117_v35 = vmax.f32 %v6997_v14, 0.0  ;;  %v17698_v29 = vadd.f32 %v6207_v56, %v17327_v45  ;;  %v6559_v10 = vmax.f32 %v6487_v58, 0.0  ;;  %v13540_v45 = vld [vmem:[%s19700_s0 + $0x78] sm:$0xf0] }
 0x972   :  { %v6759_v37 = vpop.f32.mrf.mxu1  ;;  %v17710_v14 = vor.u32 %v13540_v45, %v12509_v38 }
 0x973   :  { %v7165_v1 = vpack.c.bf16 %v7117_v35, %v7116_v41  ;;  %12431 = vmatmul.msk.bf16.gmra.mxu2 %vm228_vm0, %v17353_v26  ;;  %v6591_v8 = vpack.c.bf16 %v6559_v10, %v6558_v48 }
 0x974   :  { %8166 = vrot.lane.b32.xlu0 %v17710_v14, %s13744_s21 }
 0x975   :  { %12471 = vmatmul.msk.bf16.gmra.mxu3 %vm888_vm1, %v7165_v1  ;;  %12413 = vmatmul.msk.bf16.gmra.mxu1 %vm888_vm1, %v6591_v8 }
 0x976   :  { %v6999_v11 = vpop.f32.mrf.mxu2  ;;  %v6489_v18 = vpop.f32.mrf.mxu0 }
 0x977   :  { %v6490_v48 = vadd.f32 %v17436_v27, %v6489_v18  ;;  %v7000_v56 = vadd.f32 %v17436_v27, %v6999_v11 }
 0x978   :  { %v6210_v49 = vpop.f32.mrf.mxu3 }
 0x979   :  { %v17713_v26 = vadd.f32 %v6210_v49, %v17340_v47  ;;  %12596 = vmatmul.msk.bf16.gmra.mxu0 %vm228_vm0, %v17650_v54  ;;  %v6560_v10 = vmax.f32 %v6490_v48, 0.0  ;;  %v7118_v37 = vmax.f32 %v7000_v56, 0.0 }
 0x97a   :  { %v6760_v60 = vpop.f32.mrf.mxu1 }
 0x97e   :  { %v7001_v58 = vpop.f32.mrf.mxu2  ;;  %v6491_v35 = vpop.f32.mrf.mxu0 }
 0x97f   :  { %v7002_v41 = vadd.f32 %v17445_v52, %v7001_v58  ;;  %v6492_v47 = vadd.f32 %v17445_v52, %v6491_v35  ;;  %v13541_v58 = vld [vmem:[%s19700_s0 + $0x98] sm:$0xf0] }
 0x980   :  { %v6212_v1 = vpop.f32.mrf.mxu3 }
 0x981   :  { %v7119_v8 = vmax.f32 %v7002_v41, 0.0  ;;  %v17724_v38 = vadd.f32 %v6212_v1, %v17350_v6  ;;  %v6561_v45 = vmax.f32 %v6492_v47, 0.0  ;;  %v12513_v6 = vld [vmem:[%s19700_s0 + $0x8c] sm:$0xf] }
 0x982   :  { %v6762_v18 = vpop.f32.mrf.mxu1  ;;  %v17739_v41 = vor.u32 %v13541_v58, %v12513_v6 }
 0x983   :  { %v7166_v49 = vpack.c.bf16 %v7119_v8, %v7118_v37  ;;  %12432 = vmatmul.msk.bf16.gmra.mxu2 %vm228_vm0, %v17373_v19  ;;  %v6592_v11 = vpack.c.bf16 %v6561_v45, %v6560_v10  ;;  %v17729_v60 = vadd.f32 %v6762_v18, %v17503_v31 }
 0x984   :  { %8168 = vrot.lane.b32.xlu1 %v17739_v41, %s13744_s21 }
 0x985   :  { %12472 = vmatmul.msk.bf16.gmra.mxu3 %vm888_vm1, %v7166_v49  ;;  %12414 = vmatmul.msk.bf16.gmra.mxu1 %vm888_vm1, %v6592_v11 }
 0x986   :  { %v7004_v48 = vpop.f32.mrf.mxu2  ;;  %v6494_v56 = vpop.f32.mrf.mxu0 }
 0x987   :  { %v6495_v35 = vadd.f32 %v17436_v27, %v6494_v56  ;;  %v7005_v1 = vadd.f32 %v17436_v27, %v7004_v48 }
 0x988   :  { %v6215_v19 = vpop.f32.mrf.mxu3 }
 0x989   :  { %12597 = vmatmul.msk.bf16.gmra.mxu0 %vm228_vm0, %v17681_v43  ;;  %v6562_v45 = vmax.f32 %v6495_v35, 0.0  ;;  %v7120_v11 = vmax.f32 %v7005_v1, 0.0  ;;  %v12517_v1 = vld [vmem:[%s19700_s0 + $0xac] sm:$0xf] }
 0x98a   :  { %v6764_v31 = vpop.f32.mrf.mxu1 }
 0x98b   :  { %v17747_v10 = vadd.f32 %v6764_v31, %v17516_v36 }
 0x98e   :  { %v7006_v47 = vpop.f32.mrf.mxu2  ;;  %v6496_v8 = vpop.f32.mrf.mxu0 }
 0x98f   :  { %v7007_v37 = vadd.f32 %v17445_v52, %v7006_v47  ;;  %v6497_v18 = vadd.f32 %v17445_v52, %v6496_v8  ;;  %v13542_v47 = vld [vmem:[%s19700_s0 + $0xb8] sm:$0xf0] }
 0x990   :  { %v6216_v49 = vpop.f32.mrf.mxu3 }
 0x991   :  { %v7121_v6 = vmax.f32 %v7007_v37, 0.0  ;;  %v6563_v58 = vmax.f32 %v6497_v18, 0.0  ;;  %v17765_v37 = vor.u32 %v13542_v47, %v12517_v1 }
 0x992   :  { %v6767_v56 = vpop.f32.mrf.mxu1 }
 0x993   :  { %v7167_v19 = vpack.c.bf16 %v7121_v6, %v7120_v11  ;;  %12433 = vmatmul.msk.bf16.gmra.mxu2 %vm228_vm0, %v17387_v5  ;;  %v6593_v36 = vpack.c.bf16 %v6563_v58, %v6562_v45  ;;  %v17755_v31 = vadd.f32 %v6767_v56, %v17526_v59  ;;  %8170 = vrot.lane.b32.xlu2 %v17765_v37, %s13744_s21 }
 0x995   :  { %12473 = vmatmul.msk.bf16.gmra.mxu3 %vm888_vm1, %v7167_v19  ;;  %12415 = vmatmul.msk.bf16.gmra.mxu1 %vm888_vm1, %v6593_v36 }
 0x996   :  { %v7009_v48 = vpop.f32.mrf.mxu2  ;;  %v6499_v35 = vpop.f32.mrf.mxu0 }
 0x997   :  { %v6500_v8 = vadd.f32 %v17436_v27, %v6499_v35  ;;  %v7010_v49 = vadd.f32 %v17436_v27, %v7009_v48 }
 0x998   :  { %v6218_v5 = vpop.f32.mrf.mxu3 }
 0x999   :  { %12598 = vmatmul.msk.bf16.gmra.mxu0 %vm228_vm0, %v17710_v14  ;;  %v6564_v58 = vmax.f32 %v6500_v8, 0.0  ;;  %v7122_v36 = vmax.f32 %v7010_v49, 0.0  ;;  %v12521_v49 = vld [vmem:[%s19700_s0 + $0xcc] sm:$0xf] }
 0x99a   :  { %v6769_v59 = vpop.f32.mrf.mxu1 }
 0x99b   :  { %v17773_v45 = vadd.f32 %v6769_v59, %v17539_v15 }
 0x99e   :  { %v7011_v18 = vpop.f32.mrf.mxu2  ;;  %v6501_v6 = vpop.f32.mrf.mxu0 }
 0x99f   :  { %v7012_v11 = vadd.f32 %v17445_v52, %v7011_v18  ;;  %v6502_v56 = vadd.f32 %v17445_v52, %v6501_v6  ;;  %v13543_v18 = vld [vmem:[%s19700_s0 + $0xd8] sm:$0xf0] }
 0x9a0   :  { %v6219_v19 = vpop.f32.mrf.mxu3 }
 0x9a1   :  { %v7123_v1 = vmax.f32 %v7012_v11, 0.0  ;;  %v6565_v47 = vmax.f32 %v6502_v56, 0.0  ;;  %v17791_v11 = vor.u32 %v13543_v18, %v12521_v49 }
 0x9a2   :  { %v6772_v35 = vpop.f32.mrf.mxu1 }
 0x9a3   :  { %v7168_v5 = vpack.c.bf16 %v7123_v1, %v7122_v36  ;;  %12434 = vmatmul.msk.bf16.gmra.mxu2 %vm228_vm0, %v17401_v62  ;;  %v6594_v15 = vpack.c.bf16 %v6565_v47, %v6564_v58  ;;  %v17781_v59 = vadd.f32 %v6772_v35, %v17549_v17  ;;  %8172 = vrot.lane.b32.xlu0 %v17791_v11, %s13744_s21 }
 0x9a5   :  { %12474 = vmatmul.msk.bf16.gmra.mxu3 %vm888_vm1, %v7168_v5  ;;  %12416 = vmatmul.msk.bf16.gmra.mxu1 %vm888_vm1, %v6594_v15 }
 0x9a6   :  { %v7014_v48 = vpop.f32.mrf.mxu2  ;;  %v6504_v8 = vpop.f32.mrf.mxu0 }
 0x9a7   :  { %v6505_v6 = vadd.f32 %v17436_v27, %v6504_v8  ;;  %v7015_v19 = vadd.f32 %v17436_v27, %v7014_v48  ;;  %v13568_v48 = vld [vmem:[%s19701_s2 + $0x1b0] sm:$0xff] }
 0x9a8   :  { %v6221_v62 = vpop.f32.mrf.mxu3  ;;  %8607 = vmatpush.bf16.msra.mxu3 %v13568_v48 }
 0x9a9   :  { %12599 = vmatmul.msk.bf16.gmra.mxu0 %vm228_vm0, %v17739_v41  ;;  %v6566_v47 = vmax.f32 %v6505_v6, 0.0  ;;  %v7124_v15 = vmax.f32 %v7015_v19, 0.0 }
 0x9aa   :  { %v6774_v17 = vpop.f32.mrf.mxu1 }
 0x9ab   :  { %v17799_v58 = vadd.f32 %v6774_v17, %v17562_v32 }
 0x9ae   :  { %v7016_v56 = vpop.f32.mrf.mxu2  ;;  %v6506_v1 = vpop.f32.mrf.mxu0 }
 0x9af   :  { %v7017_v36 = vadd.f32 %v17445_v52, %v7016_v56  ;;  %v6507_v35 = vadd.f32 %v17445_v52, %v6506_v1  ;;  %v13564_v1 = vld [vmem:[%s19701_s2 + $0x190] sm:$0xff] }
 0x9b0   :  { %v6222_v5 = vpop.f32.mrf.mxu3  ;;  %8017 = vmatpush.bf16.msra.mxu1 %v13564_v1 }
 0x9b1   :  { %v7125_v49 = vmax.f32 %v7017_v36, 0.0  ;;  %v6567_v18 = vmax.f32 %v6507_v35, 0.0 }
 0x9b2   :  { %v6777_v8 = vpop.f32.mrf.mxu1 }
 0x9b3   :  { %v7169_v62 = vpack.c.bf16 %v7125_v49, %v7124_v15  ;;  %12435 = vmatmul.msk.bf16.gmra.mxu2 %vm228_vm0, %v17418_v13  ;;  %v6595_v32 = vpack.c.bf16 %v6567_v18, %v6566_v47  ;;  %v17807_v17 = vadd.f32 %v6777_v8, %v17569_v0  ;;  %v12525_v13 = vld [vmem:[%s19700_s0 + $0xec] sm:$0xf]  ;;  %v13544_v0 = vld [vmem:[%s19700_s0 + $0xf8] sm:$0xf0] }
 0x9b4   :  { %v17820_v36 = vor.u32 %v13544_v0, %v12525_v13 }
 0x9b5   :  { %19798 = vst [vmem:[#allocation10_spill] sm:$0xff] %v17807_v17  ;;  %12475 = vmatmul.msk.bf16.gmra.mxu3 %vm888_vm1, %v7169_v62  ;;  %12417 = vmatmul.msk.bf16.gmra.mxu1 %vm888_vm1, %v6595_v32 }
 0x9b6   :  { %v7019_v6 = vpop.f32.mrf.mxu2  ;;  %v6509_v19 = vpop.f32.mrf.mxu0  ;;  %8174 = vrot.lane.b32.xlu1 %v17820_v36, %s13744_s21 }
 0x9b7   :  { %v6510_v5 = vadd.f32 %v17436_v27, %v6509_v19  ;;  %v7020_v15 = vadd.f32 %v17436_v27, %v7019_v6 }
 0x9b8   :  { %v6224_v56 = vpop.f32.mrf.mxu3 }
 0x9b9   :  { %12600 = vmatmul.msk.bf16.gmra.mxu0 %vm228_vm0, %v17765_v37  ;;  %v6568_v8 = vmax.f32 %v6510_v5, 0.0  ;;  %v7126_v13 = vmax.f32 %v7020_v15, 0.0  ;;  %v13545_v5 = vld [vmem:[%s19700_s0 + $0x118] sm:$0xf0] }
 0x9ba   :  { %v6779_v47 = vpop.f32.mrf.mxu1 }
 0x9bb   :  { %v17831_v35 = vadd.f32 %v6779_v47, %v17579_v28  ;;  %v12529_v47 = vld [vmem:[%s19700_s0 + $0x10c] sm:$0xf] }
 0x9be   :  { %v7021_v49 = vpop.f32.mrf.mxu2  ;;  %v6511_v62 = vpop.f32.mrf.mxu0 }
 0x9bf   :  { %v7022_v18 = vadd.f32 %v17445_v52, %v7021_v49  ;;  %v6512_v48 = vadd.f32 %v17445_v52, %v6511_v62  ;;  %v17846_v49 = vor.u32 %v13545_v5, %v12529_v47  ;;  %v13563_v62 = vld [vmem:[%s19701_s2 + $0x188] sm:$0xff] }
 0x9c0   :  { %v6225_v32 = vpop.f32.mrf.mxu3  ;;  %8018 = vmatpush.bf16.msra.mxu1 %v13563_v62  ;;  %v19799_v5 = vld [vmem:[#allocation3_spill] sm:$0xff] }
 0x9c1   :  { %v7127_v0 = vmax.f32 %v7022_v18, 0.0  ;;  %v6569_v56 = vmax.f32 %v6512_v48, 0.0  ;;  %8176 = vrot.lane.b32.xlu2 %v17846_v49, %s13744_s21 }
 0x9c2   :  { %v6782_v19 = vpop.f32.mrf.mxu1 }
 0x9c3   :  { %v7170_v17 = vpack.c.bf16 %v7127_v0, %v7126_v13  ;;  %12436 = vmatmul.msk.bf16.gmra.mxu2 %vm228_vm0, %v17440_v57  ;;  %v6596_v28 = vpack.c.bf16 %v6569_v56, %v6568_v8 }
 0x9c5   :  { %12476 = vmatmul.msk.bf16.gmra.mxu3 %vm888_vm1, %v7170_v17  ;;  %12418 = vmatmul.msk.bf16.gmra.mxu1 %vm888_vm1, %v6596_v28 }
 0x9c6   :  { %v7024_v6 = vpop.f32.mrf.mxu2  ;;  %v6514_v1 = vpop.f32.mrf.mxu0 }
 0x9c7   :  { %v6515_v17 = vadd.f32 %v17436_v27, %v6514_v1  ;;  %v7025_v18 = vadd.f32 %v17436_v27, %v7024_v6  ;;  %v13562_v1 = vld [vmem:[%s19701_s2 + $0x180] sm:$0xff] }
 0x9c8   :  { %v6227_v15 = vpop.f32.mrf.mxu3  ;;  %8019 = vmatpush.bf16.msra.mxu1 %v13562_v1 }
 0x9c9   :  { %12601 = vmatmul.msk.bf16.gmra.mxu0 %vm228_vm0, %v17791_v11  ;;  %v6570_v13 = vmax.f32 %v6515_v17, 0.0  ;;  %v7128_v19 = vmax.f32 %v7025_v18, 0.0 }
 0x9ca   :  { %v6783_v57 = vpop.f32.mrf.mxu1 }
 0x9ce   :  { %v7026_v8 = vpop.f32.mrf.mxu2  ;;  %v6516_v48 = vpop.f32.mrf.mxu0 }
 0x9cf   :  { %v7027_v32 = vadd.f32 %v17445_v52, %v7026_v8  ;;  %v6517_v56 = vadd.f32 %v17445_v52, %v6516_v48  ;;  %v12533_v8 = vld [vmem:[%s19700_s0 + $0x12c] sm:$0xf] }
 0x9d0   :  { %v6228_v0 = vpop.f32.mrf.mxu3 }
 0x9d1   :  { %v7129_v28 = vmax.f32 %v7027_v32, 0.0  ;;  %v6571_v6 = vmax.f32 %v6517_v56, 0.0  ;;  %v13546_v32 = vld [vmem:[%s19700_s0 + $0x138] sm:$0xf0] }
 0x9d2   :  { %v6785_v15 = vpop.f32.mrf.mxu1  ;;  %v17875_v0 = vor.u32 %v13546_v32, %v12533_v8 }
 0x9d3   :  { %v7171_v47 = vpack.c.bf16 %v7129_v28, %v7128_v19  ;;  %12437 = vmatmul.msk.bf16.gmra.mxu2 %vm228_vm0, %v19799_v5  ;;  %v6597_v57 = vpack.c.bf16 %v6571_v6, %v6570_v13  ;;  %v17865_v62 = vadd.f32 %v6785_v15, %v17614_v63 }
 0x9d4   :  { %8178 = vrot.lane.b32.xlu0 %v17875_v0, %s13744_s21 }
 0x9d5   :  { %12477 = vmatmul.msk.bf16.gmra.mxu3 %vm888_vm1, %v7171_v47  ;;  %12419 = vmatmul.msk.bf16.gmra.mxu1 %vm888_vm1, %v6597_v57 }
 0x9d6   :  { %v7029_v17 = vpop.f32.mrf.mxu2  ;;  %v6519_v18 = vpop.f32.mrf.mxu0 }
 0x9d7   :  { %v6520_v13 = vadd.f32 %v17436_v27, %v6519_v18  ;;  %v7030_v19 = vadd.f32 %v17436_v27, %v7029_v17 }
 0x9d8   :  { %v6230_v48 = vpop.f32.mrf.mxu3 }
 0x9d9   :  { %12602 = vmatmul.msk.bf16.gmra.mxu0 %vm228_vm0, %v17820_v36  ;;  %v6572_v47 = vmax.f32 %v6520_v13, 0.0  ;;  %v7130_v57 = vmax.f32 %v7030_v19, 0.0  ;;  %v13547_v13 = vld [vmem:[%s19700_s0 + $0x158] sm:$0xf0] }
 0x9da   :  { %v6787_v63 = vpop.f32.mrf.mxu1 }
 0x9db   :  { %v17883_v56 = vadd.f32 %v6787_v63, %v17629_v42 }
 0x9de   :  { %v7031_v28 = vpop.f32.mrf.mxu2  ;;  %v6521_v6 = vpop.f32.mrf.mxu0 }
 0x9df   :  { %v7032_v1 = vadd.f32 %v17445_v52, %v7031_v28  ;;  %v6522_v15 = vadd.f32 %v17445_v52, %v6521_v6  ;;  %v12537_v52 = vld [vmem:[%s19700_s0 + $0x14c] sm:$0xf] }
 0x9e0   :  { %v6231_v5 = vpop.f32.mrf.mxu3  ;;  %v17901_v19 = vor.u32 %v13547_v13, %v12537_v52 }
 0x9e1   :  { %v7131_v8 = vmax.f32 %v7032_v1, 0.0  ;;  %v6573_v32 = vmax.f32 %v6522_v15, 0.0  ;;  %v17913_v1 = vld [vmem:[%s19702_s5] sm:$0xff]  ;;  %v17923_v15 = vld [vmem:[%s19702_s5 + $0x8] sm:$0xff] }
 0x9e2   :  { %v6790_v18 = vpop.f32.mrf.mxu1  ;;  %8180 = vrot.lane.b32.xlu1 %v17901_v19, %s13744_s21 }
 0x9e3   :  { %v7172_v48 = vpack.c.bf16 %v7131_v8, %v7130_v57  ;;  %12438 = vmatmul.msk.bf16.gmra.mxu2 %vm228_vm0, %v17491_v34  ;;  %v6598_v42 = vpack.c.bf16 %v6573_v32, %v6572_v47  ;;  %v17891_v63 = vadd.f32 %v6790_v18, %v17653_v53 }
 0x9e5   :  { %12478 = vmatmul.msk.bf16.gmra.mxu3 %vm888_vm1, %v7172_v48  ;;  %12420 = vmatmul.msk.bf16.gmra.mxu1 %vm888_vm1, %v6598_v42 }
 0x9e6   :  { %v7034_v27 = vpop.f32.mrf.mxu2  ;;  %v7704_v17 = vpop.f32.mrf.mxu0 }
 0x9e7   :  { %v7705_v6 = vadd.f32 %v17913_v1, %v7704_v17 }
 0x9e8   :  { %v7306_v34 = vpop.f32.mrf.mxu3 }
 0x9e9   :  { %v17904_v53 = vadd.f32 %v7306_v34, %v17478_v7  ;;  %12603 = vmatmul.msk.bf16.gmra.mxu0 %vm228_vm0, %v17846_v49  ;;  %v7035_v7 = vadd.f32 %v17913_v1, %v7034_v27  ;;  %v7829_v32 = vmax.f32 %v7705_v6, 0.0 }
 0x9ea   :  { %v6792_v28 = vpop.f32.mrf.mxu1 }
 0x9eb   :  { %v17917_v47 = vadd.f32 %v6792_v28, %v17666_v4  ;;  %v7132_v42 = vmax.f32 %v7035_v7, 0.0 }
 0x9ed   :  { %19800 = vst [vmem:[#allocation5_spill] sm:$0xff] %v17917_v47 }
 0x9ee   :  { %v7036_v5 = vpop.f32.mrf.mxu2  ;;  %v7706_v8 = vpop.f32.mrf.mxu0 }
 0x9ef   :  { %v7037_v57 = vadd.f32 %v17923_v15, %v7036_v5  ;;  %v7707_v18 = vadd.f32 %v17923_v15, %v7706_v8  ;;  %v13548_v5 = vld [vmem:[%s19700_s0 + $0x178] sm:$0xf0] }
 0x9f0   :  { %v7308_v48 = vpop.f32.mrf.mxu3 }
 0x9f1   :  { %v7133_v17 = vmax.f32 %v7037_v57, 0.0  ;;  %v17928_v4 = vadd.f32 %v7308_v48, %v17485_v23  ;;  %v7830_v52 = vmax.f32 %v7707_v18, 0.0  ;;  %v12541_v23 = vld [vmem:[%s19700_s0 + $0x16c] sm:$0xf] }
 0x9f2   :  { %v6795_v13 = vpop.f32.mrf.mxu1  ;;  %v17943_v57 = vor.u32 %v13548_v5, %v12541_v23 }
 0x9f3   :  { %v7173_v27 = vpack.c.bf16 %v7133_v17, %v7132_v42  ;;  %12439 = vmatmul.msk.bf16.gmra.mxu2 %vm228_vm0, %v17511_v3  ;;  %v7879_v34 = vpack.c.bf16 %v7830_v52, %v7829_v32  ;;  %v17933_v28 = vadd.f32 %v6795_v13, %v17684_v9 }
 0x9f4   :  { %8182 = vrot.lane.b32.xlu2 %v17943_v57, %s13744_s21 }
 0x9f5   :  { %19801 = vst [vmem:[#allocation11_spill] sm:$0xff] %v17933_v28  ;;  %12479 = vmatmul.msk.bf16.gmra.mxu3 %vm888_vm1, %v7173_v27  ;;  %12644 = vmatmul.msk.bf16.vlgmr.msra.gmra.mxu1 %vm888_vm1, %v7879_v34  ;;  %v12585_v28 = vld [vmem:[%s19700_s0 + $0x2cc] sm:$0xf] }
 0x9f6   :  { %v7039_v6 = vpop.f32.mrf.mxu2  ;;  %v7709_v7 = vpop.f32.mrf.mxu0 }
 0x9f7   :  { %v7710_v32 = vadd.f32 %v17913_v1, %v7709_v7  ;;  %v7040_v18 = vadd.f32 %v17913_v1, %v7039_v6 }
 0x9f8   :  { %v7311_v3 = vpop.f32.mrf.mxu3 }
 0x9f9   :  { %v17946_v9 = vadd.f32 %v7311_v3, %v17498_v12  ;;  %12604 = vmatmul.msk.bf16.gmra.mxu0 %vm228_vm0, %v17875_v0  ;;  %v7831_v12 = vmax.f32 %v7710_v32, 0.0  ;;  %v7134_v34 = vmax.f32 %v7040_v18, 0.0 }
 0x9fa   :  { %v6797_v8 = vpop.f32.mrf.mxu1 }
 0x9fb   :  { %v17954_v48 = vadd.f32 %v6797_v8, %v17698_v29 }
 0x9fd   :  { %19802 = vst [vmem:[#allocation12_spill] sm:$0xff] %v17954_v48 }
 0x9fe   :  { %v7041_v42 = vpop.f32.mrf.mxu2  ;;  %v7711_v52 = vpop.f32.mrf.mxu0 }
 0x9ff   :  { %v7042_v17 = vadd.f32 %v17923_v15, %v7041_v42  ;;  %v7712_v13 = vadd.f32 %v17923_v15, %v7711_v52  ;;  %v13549_v42 = vld [vmem:[%s19700_s0 + $0x198] sm:$0xf0] }
 0xa00   :  { %v7313_v27 = vpop.f32.mrf.mxu3 }
 0xa01   :  { %v7135_v23 = vmax.f32 %v7042_v17, 0.0  ;;  %v17960_v5 = vadd.f32 %v7313_v27, %v17508_v39  ;;  %v7832_v3 = vmax.f32 %v7712_v13, 0.0  ;;  %v12545_v39 = vld [vmem:[%s19700_s0 + $0x18c] sm:$0xf] }
 0xa02   :  { %v6800_v29 = vpop.f32.mrf.mxu1  ;;  %v17975_v17 = vor.u32 %v13549_v42, %v12545_v39 }
 0xa03   :  { %v7174_v7 = vpack.c.bf16 %v7135_v23, %v7134_v34  ;;  %12440 = vmatmul.msk.bf16.gmra.mxu2 %vm228_vm0, %v17534_v44  ;;  %v7880_v6 = vpack.c.bf16 %v7832_v3, %v7831_v12  ;;  %v17965_v8 = vadd.f32 %v6800_v29, %v17713_v26 }
 0xa04   :  { %8184 = vrot.lane.b32.xlu0 %v17975_v17, %s13744_s21 }
 0xa05   :  { %19803 = vst [vmem:[#allocation4_spill] sm:$0xff] %v17965_v8  ;;  %12480 = vmatmul.msk.bf16.gmra.mxu3 %vm888_vm1, %v7174_v7  ;;  %12645 = vmatmul.msk.bf16.gmra.mxu1 %vm888_vm1, %v7880_v6 }
 0xa06   :  { %v7044_v32 = vpop.f32.mrf.mxu2  ;;  %v7714_v18 = vpop.f32.mrf.mxu0 }
 0xa07   :  { %v7715_v12 = vadd.f32 %v17913_v1, %v7714_v18  ;;  %v7045_v13 = vadd.f32 %v17913_v1, %v7044_v32 }
 0xa08   :  { %v7316_v44 = vpop.f32.mrf.mxu3 }
 0xa09   :  { %v17978_v26 = vadd.f32 %v7316_v44, %v17521_v40  ;;  %12605 = vmatmul.msk.bf16.gmra.mxu0 %vm228_vm0, %v17901_v19  ;;  %v7833_v40 = vmax.f32 %v7715_v12, 0.0  ;;  %v7136_v6 = vmax.f32 %v7045_v13, 0.0  ;;  %v12549_v13 = vld [vmem:[%s19700_s0 + $0x1ac] sm:$0xf] }
 0xa0a   :  { %v6802_v52 = vpop.f32.mrf.mxu1 }
 0xa0b   :  { %v17986_v27 = vadd.f32 %v6802_v52, %v17724_v38 }
 0xa0d   :  { %19804 = vst [vmem:[#allocation9_spill] sm:$0xff] %v17986_v27 }
 0xa0e   :  { %v7046_v34 = vpop.f32.mrf.mxu2  ;;  %v7716_v3 = vpop.f32.mrf.mxu0 }
 0xa0f   :  { %v7047_v23 = vadd.f32 %v17923_v15, %v7046_v34  ;;  %v7717_v29 = vadd.f32 %v17923_v15, %v7716_v3  ;;  %v13567_v3 = vld [vmem:[%s19701_s2 + $0x1a8] sm:$0xff] }
 0xa10   :  { %v7318_v7 = vpop.f32.mrf.mxu3  ;;  %8608 = vmatpush.bf16.msra.mxu3 %v13567_v3 }
 0xa11   :  { %v7137_v39 = vmax.f32 %v7047_v23, 0.0  ;;  %v17992_v42 = vadd.f32 %v7318_v7, %v17531_v16  ;;  %v7834_v44 = vmax.f32 %v7717_v29, 0.0  ;;  %v13550_v16 = vld [vmem:[%s19700_s0 + $0x1b8] sm:$0xf0] }
 0xa12   :  { %v6805_v38 = vpop.f32.mrf.mxu1  ;;  %v18004_v23 = vor.u32 %v13550_v16, %v12549_v13 }
 0xa13   :  { %v7175_v18 = vpack.c.bf16 %v7137_v39, %v7136_v6  ;;  %12441 = vmatmul.msk.bf16.gmra.mxu2 %vm228_vm0, %v17557_v50  ;;  %v7881_v32 = vpack.c.bf16 %v7834_v44, %v7833_v40 }
 0xa14   :  { %8186 = vrot.lane.b32.xlu1 %v18004_v23, %s13744_s21 }
 0xa15   :  { %12481 = vmatmul.msk.bf16.gmra.mxu3 %vm888_vm1, %v7175_v18  ;;  %12646 = vmatmul.msk.bf16.gmra.mxu1 %vm888_vm1, %v7881_v32 }
 0xa16   :  { %v7049_v52 = vpop.f32.mrf.mxu2  ;;  %v7719_v12 = vpop.f32.mrf.mxu0 }
 0xa17   :  { %v7720_v7 = vadd.f32 %v17913_v1, %v7719_v12  ;;  %v7050_v29 = vadd.f32 %v17913_v1, %v7049_v52 }
 0xa18   :  { %v7321_v34 = vpop.f32.mrf.mxu3 }
 0xa19   :  { %v18007_v50 = vadd.f32 %v7321_v34, %v17544_v46  ;;  %12606 = vmatmul.msk.bf16.gmra.mxu0 %vm228_vm0, %v17943_v57  ;;  %v7835_v44 = vmax.f32 %v7720_v7, 0.0  ;;  %v7138_v32 = vmax.f32 %v7050_v29, 0.0  ;;  %v12553_v29 = vld [vmem:[%s19700_s0 + $0x1cc] sm:$0xf] }
 0xa1a   :  { %v6806_v40 = vpop.f32.mrf.mxu1 }
 0xa1e   :  { %v7051_v6 = vpop.f32.mrf.mxu2  ;;  %v7721_v39 = vpop.f32.mrf.mxu0 }
 0xa1f   :  { %v7052_v46 = vadd.f32 %v17923_v15, %v7051_v6  ;;  %v7722_v38 = vadd.f32 %v17923_v15, %v7721_v39 }
 0xa20   :  { %v7323_v18 = vpop.f32.mrf.mxu3 }
 0xa21   :  { %v7139_v13 = vmax.f32 %v7052_v46, 0.0  ;;  %v18021_v16 = vadd.f32 %v7323_v18, %v17554_v21  ;;  %v7836_v34 = vmax.f32 %v7722_v38, 0.0  ;;  %v13551_v21 = vld [vmem:[%s19700_s0 + $0x1d8] sm:$0xf0] }
 0xa22   :  { %v6808_v12 = vpop.f32.mrf.mxu1  ;;  %v18033_v46 = vor.u32 %v13551_v21, %v12553_v29 }
 0xa23   :  { %v7176_v40 = vpack.c.bf16 %v7139_v13, %v7138_v32  ;;  %12442 = vmatmul.msk.bf16.gmra.mxu2 %vm228_vm0, %v17574_v24  ;;  %v7882_v52 = vpack.c.bf16 %v7836_v34, %v7835_v44 }
 0xa24   :  { %8188 = vrot.lane.b32.xlu2 %v18033_v46, %s13744_s21 }
 0xa25   :  { %12482 = vmatmul.msk.bf16.gmra.mxu3 %vm888_vm1, %v7176_v40  ;;  %12647 = vmatmul.msk.bf16.gmra.mxu1 %vm888_vm1, %v7882_v52 }
 0xa26   :  { %v7054_v3 = vpop.f32.mrf.mxu2  ;;  %v7724_v7 = vpop.f32.mrf.mxu0 }
 0xa27   :  { %v7725_v39 = vadd.f32 %v17913_v1, %v7724_v7  ;;  %v7055_v44 = vadd.f32 %v17913_v1, %v7054_v3 }
 0xa28   :  { %v7326_v6 = vpop.f32.mrf.mxu3 }
 0xa29   :  { %12607 = vmatmul.msk.bf16.gmra.mxu0 %vm228_vm0, %v17975_v17  ;;  %v7837_v13 = vmax.f32 %v7725_v39, 0.0  ;;  %v7140_v12 = vmax.f32 %v7055_v44, 0.0  ;;  %v12557_v39 = vld [vmem:[%s19700_s0 + $0x1ec] sm:$0xf]  ;;  %v13552_v44 = vld [vmem:[%s19700_s0 + $0x1f8] sm:$0xf0] }
 0xa2a   :  { %v6809_v24 = vpop.f32.mrf.mxu1 }
 0xa2e   :  { %v7056_v18 = vpop.f32.mrf.mxu2  ;;  %v7726_v32 = vpop.f32.mrf.mxu0 }
 0xa2f   :  { %v7057_v38 = vadd.f32 %v17923_v15, %v7056_v18  ;;  %v7727_v40 = vadd.f32 %v17923_v15, %v7726_v32 }
 0xa30   :  { %v7327_v34 = vpop.f32.mrf.mxu3 }
 0xa31   :  { %v7141_v52 = vmax.f32 %v7057_v38, 0.0  ;;  %v7838_v29 = vmax.f32 %v7727_v40, 0.0  ;;  %v18053_v38 = vor.u32 %v13552_v44, %v12557_v39 }
 0xa32   :  { %v6811_v6 = vpop.f32.mrf.mxu1 }
 0xa33   :  { %v7177_v21 = vpack.c.bf16 %v7141_v52, %v7140_v12  ;;  %12443 = vmatmul.msk.bf16.gmra.mxu2 %vm228_vm0, %v17594_v33  ;;  %v7883_v24 = vpack.c.bf16 %v7838_v29, %v7837_v13  ;;  %8190 = vrot.lane.b32.xlu0 %v18053_v38, %s13744_s21 }
 0xa35   :  { %12483 = vmatmul.msk.bf16.gmra.mxu3 %vm888_vm1, %v7177_v21  ;;  %12648 = vmatmul.msk.bf16.gmra.mxu1 %vm888_vm1, %v7883_v24 }
 0xa36   :  { %v7059_v3 = vpop.f32.mrf.mxu2  ;;  %v7729_v7 = vpop.f32.mrf.mxu0 }
 0xa37   :  { %v7730_v13 = vadd.f32 %v17913_v1, %v7729_v7  ;;  %v7060_v34 = vadd.f32 %v17913_v1, %v7059_v3 }
 0xa38   :  { %v7329_v18 = vpop.f32.mrf.mxu3 }
 0xa39   :  { %v18056_v33 = vadd.f32 %v7329_v18, %v17584_v25  ;;  %12608 = vmatmul.msk.bf16.gmra.mxu0 %vm228_vm0, %v18004_v23  ;;  %v7839_v29 = vmax.f32 %v7730_v13, 0.0  ;;  %v7142_v6 = vmax.f32 %v7060_v34, 0.0  ;;  %v12561_v34 = vld [vmem:[%s19700_s0 + $0x20c] sm:$0xf] }
 0xa3a   :  { %v6812_v32 = vpop.f32.mrf.mxu1 }
 0xa3e   :  { %v7061_v40 = vpop.f32.mrf.mxu2  ;;  %v7731_v52 = vpop.f32.mrf.mxu0 }
 0xa3f   :  { %v7062_v12 = vadd.f32 %v17923_v15, %v7061_v40  ;;  %v7732_v25 = vadd.f32 %v17923_v15, %v7731_v52 }
 0xa40   :  { %v7331_v21 = vpop.f32.mrf.mxu3 }
 0xa41   :  { %v7143_v24 = vmax.f32 %v7062_v12, 0.0  ;;  %v18067_v39 = vadd.f32 %v7331_v21, %v17591_v30  ;;  %v7840_v44 = vmax.f32 %v7732_v25, 0.0  ;;  %v13553_v30 = vld [vmem:[%s19700_s0 + $0x218] sm:$0xf0] }
 0xa42   :  { %v6814_v7 = vpop.f32.mrf.mxu1  ;;  %v18079_v12 = vor.u32 %v13553_v30, %v12561_v34  ;;  %v19805_v30 = vld [vmem:[#allocation8_spill] sm:$0xff] }
 0xa43   :  { %v7178_v18 = vpack.c.bf16 %v7143_v24, %v7142_v6  ;;  %12444 = vmatmul.msk.bf16.gmra.mxu2 %vm228_vm0, %v17624_v22  ;;  %v7884_v3 = vpack.c.bf16 %v7840_v44, %v7839_v29  ;;  %v6904_v7 = vpop.permute.xlu1 %6903 }
 0xa44   :  { %8192 = vrot.lane.b32.xlu1 %v18079_v12, %s13744_s21 }
 0xa45   :  { %12484 = vmatmul.msk.bf16.gmra.mxu3 %vm888_vm1, %v7178_v18  ;;  %12649 = vmatmul.msk.bf16.gmra.mxu1 %vm888_vm1, %v7884_v3 }
 0xa46   :  { %v7064_v32 = vpop.f32.mrf.mxu2  ;;  %v7734_v13 = vpop.f32.mrf.mxu0 }
 0xa47   :  { %v7735_v29 = vadd.f32 %v17913_v1, %v7734_v13  ;;  %v7065_v21 = vadd.f32 %v17913_v1, %v7064_v32 }
 0xa48   :  { %v7334_v40 = vpop.f32.mrf.mxu3 }
 0xa49   :  { %v18082_v22 = vadd.f32 %v7334_v40, %v17601_v20  ;;  %12609 = vmatmul.msk.bf16.gmra.mxu0 %vm228_vm0, %v18033_v46  ;;  %v7841_v44 = vmax.f32 %v7735_v29, 0.0  ;;  %v7144_v3 = vmax.f32 %v7065_v21, 0.0  ;;  %v12565_v21 = vld [vmem:[%s19700_s0 + $0x22c] sm:$0xf] }
 0xa4a   :  { %v6815_v52 = vpop.f32.mrf.mxu1 }
 0xa4e   :  { %v7066_v25 = vpop.f32.mrf.mxu2  ;;  %v7736_v24 = vpop.f32.mrf.mxu0 }
 0xa4f   :  { %v7067_v6 = vadd.f32 %v17923_v15, %v7066_v25  ;;  %v7737_v20 = vadd.f32 %v17923_v15, %v7736_v24 }
 0xa50   :  { %v7336_v18 = vpop.f32.mrf.mxu3 }
 0xa51   :  { %v7145_v34 = vmax.f32 %v7067_v6, 0.0  ;;  %v18093_v40 = vadd.f32 %v7336_v18, %v19805_v30  ;;  %v7842_v27 = vmax.f32 %v7737_v20, 0.0  ;;  %v13554_v6 = vld [vmem:[%s19700_s0 + $0x238] sm:$0xf0]  ;;  %v19806_v20 = vld [vmem:[#allocation7_spill] sm:$0xff] }
 0xa52   :  { %v6817_v13 = vpop.f32.mrf.mxu1  ;;  %v18104_v18 = vor.u32 %v13554_v6, %v12565_v21 }
 0xa53   :  { %v7179_v52 = vpack.c.bf16 %v7145_v34, %v7144_v3  ;;  %12445 = vmatmul.msk.bf16.gmra.mxu2 %vm228_vm0, %v6904_v7  ;;  %v7885_v32 = vpack.c.bf16 %v7842_v27, %v7841_v44  ;;  %v12573_v3 = vld [vmem:[%s19700_s0 + $0x26c] sm:$0xf]  ;;  %v13556_v34 = vld [vmem:[%s19700_s0 + $0x278] sm:$0xf0] }
 0xa54   :  { %8194 = vrot.lane.b32.xlu2 %v18104_v18, %s13744_s21 }
 0xa55   :  { %12485 = vmatmul.msk.bf16.gmra.mxu3 %vm888_vm1, %v7179_v52  ;;  %12650 = vmatmul.msk.bf16.gmra.mxu1 %vm888_vm1, %v7885_v32  ;;  %v18121_v52 = vor.u32 %v13556_v34, %v12573_v3 }
 0xa56   :  { %v7069_v25 = vpop.f32.mrf.mxu2  ;;  %v7739_v29 = vpop.f32.mrf.mxu0 }
 0xa57   :  { %v7740_v44 = vadd.f32 %v17913_v1, %v7739_v29  ;;  %v7070_v30 = vadd.f32 %v17913_v1, %v7069_v25  ;;  %8198 = vrot.lane.b32.xlu1 %v18121_v52, %s13744_s21 }
 0xa58   :  { %v7339_v24 = vpop.f32.mrf.mxu3 }
 0xa59   :  { %v18107_v7 = vadd.f32 %v7339_v24, %v19806_v20  ;;  %12610 = vmatmul.msk.bf16.gmra.mxu0 %vm228_vm0, %v18053_v38  ;;  %v7843_v29 = vmax.f32 %v7740_v44, 0.0  ;;  %v8161_v20 = vpop.permute.xlu0 %8160  ;;  %v13559_v44 = vld [vmem:[%s19700_s0 + $0x2d8] sm:$0xf0] }
 0xa5a   :  { %v6818_v27 = vpop.f32.mrf.mxu1 }
 0xa5b   :  { %v7146_v27 = vmax.f32 %v7070_v30, 0.0  ;;  %v12569_v30 = vld [vmem:[%s19700_s0 + $0x24c] sm:$0xf] }
 0xa5e   :  { %v7071_v13 = vpop.f32.mrf.mxu2  ;;  %v7741_v21 = vpop.f32.mrf.mxu0 }
 0xa5f   :  { %v7072_v32 = vadd.f32 %v17923_v15, %v7071_v13  ;;  %v7742_v24 = vadd.f32 %v17923_v15, %v7741_v21 }
 0xa60   :  { %v7341_v6 = vpop.f32.mrf.mxu3 }
 0xa61   :  { %v7147_v8 = vmax.f32 %v7072_v32, 0.0  ;;  %v18128_v48 = vadd.f32 %v7341_v6, %v17660_v2  ;;  %v7844_v25 = vmax.f32 %v7742_v24, 0.0  ;;  %v18141_v2 = vor.u32 %v13559_v44, %v12585_v28 }
 0xa62   :  { %v6820_v34 = vpop.f32.mrf.mxu1 }
 0xa63   :  { %19807 = vst [vmem:[#allocation6_spill] sm:$0xff] %v18128_v48  ;;  %v7180_v3 = vpack.c.bf16 %v7147_v8, %v7146_v27  ;;  %12669 = vmatmul.msk.bf16.vlgmr.msra.gmra.mxu2 %vm228_vm0, %v8161_v20  ;;  %v7886_v13 = vpack.c.bf16 %v7844_v25, %v7843_v29  ;;  %v13555_v8 = vld [vmem:[%s19700_s0 + $0x258] sm:$0xf0]  ;;  %8204 = vrot.lane.b32.xlu1 %v18141_v2, %s13744_s21  ;;  %v12577_v27 = vld [vmem:[%s19700_s0 + $0x28c] sm:$0xf] }
 0xa64   :  { %v18147_v21 = vor.u32 %v13555_v8, %v12569_v30  ;;  %v13557_v25 = vld [vmem:[%s19700_s0 + $0x298] sm:$0xf0] }
 0xa65   :  { %12486 = vmatmul.msk.bf16.gmra.mxu3 %vm888_vm1, %v7180_v3  ;;  %12651 = vmatmul.msk.bf16.gmra.mxu1 %vm888_vm1, %v7886_v13  ;;  %v12581_v3 = vld [vmem:[%s19700_s0 + $0x2ac] sm:$0xf]  ;;  %v18169_v34 = vor.u32 %v13557_v25, %v12577_v27  ;;  %v13558_v13 = vld [vmem:[%s19700_s0 + $0x2b8] sm:$0xf0]  ;;  %v8163_v27 = vpop.permute.xlu1 %8162 }
 0xa66   :  { %v7074_v32 = vpop.f32.mrf.mxu2  ;;  %v7744_v29 = vpop.f32.mrf.mxu0  ;;  %8196 = vrot.lane.b32.xlu0 %v18147_v21, %s13744_s21  ;;  %v18174_v30 = vor.u32 %v13558_v13, %v12581_v3 }
 0xa67   :  { %v7745_v20 = vadd.f32 %v17913_v1, %v7744_v29  ;;  %8200 = vrot.lane.b32.xlu2 %v18169_v34, %s13744_s21 }
 0xa68   :  { %v7344_v6 = vpop.f32.mrf.mxu3 }
 0xa69   :  { %v18154_v28 = vadd.f32 %v7344_v6, %v17671_v51  ;;  %12611 = vmatmul.msk.bf16.gmra.mxu0 %vm228_vm0, %v18079_v12  ;;  %v7075_v51 = vadd.f32 %v17913_v1, %v7074_v32  ;;  %v7845_v6 = vmax.f32 %v7745_v20, 0.0 }
 0xa6a   :  { %v6821_v24 = vpop.f32.mrf.mxu1 }
 0xa6b   :  { %19808 = vst [vmem:[#allocation2_spill] sm:$0xff] %v18154_v28  ;;  %9340 = vrot.lane.b32.xlu1 %v17611_v55, %s13745_s26  ;;  %v7148_v25 = vmax.f32 %v7075_v51, 0.0  ;;  %v13560_v51 = vld [vmem:[%s19700_s0 + $0x2f8] sm:$0xf0] }
 0xa6e   :  { %v7076_v44 = vpop.f32.mrf.mxu2  ;;  %v7746_v29 = vpop.f32.mrf.mxu0  ;;  %8202 = vrot.lane.b32.xlu0 %v18174_v30, %s13744_s21 }
 0xa6f   :  { %v7077_v8 = vadd.f32 %v17923_v15, %v7076_v44  ;;  %v7747_v24 = vadd.f32 %v17923_v15, %v7746_v29  ;;  %v12589_v29 = vld [vmem:[%s19700_s0 + $0x2ec] sm:$0xf] }
 0xa70   :  { %v7346_v32 = vpop.f32.mrf.mxu3 }
 0xa71   :  { %v7149_v3 = vmax.f32 %v7077_v8, 0.0  ;;  %v18185_v13 = vadd.f32 %v7346_v32, %v17692_v61  ;;  %v7846_v44 = vmax.f32 %v7747_v24, 0.0  ;;  %v12593_v61 = vld [vmem:[%s19700_s0 + $0x30c] sm:$0xf]  ;;  %v18201_v8 = vor.u32 %v13560_v51, %v12589_v29 }
 0xa72   :  { %v8021_v47 = vpop.f32.mrf.mxu1 }
 0xa73   :  { %v7181_v28 = vpack.c.bf16 %v7149_v3, %v7148_v25  ;;  %12670 = vmatmul.msk.bf16.gmra.mxu2 %vm228_vm0, %v8163_v27  ;;  %v7887_v48 = vpack.c.bf16 %v7846_v44, %v7845_v6  ;;  %v18189_v20 = vadd.f32 %v8021_v47, %v17904_v53  ;;  %v13561_v53 = vld [vmem:[%s19700_s0 + $0x318] sm:$0xf0]  ;;  %8206 = vrot.lane.b32.xlu2 %v18201_v8, %s13744_s21  ;;  %v13566_v25 = vld [vmem:[%s19701_s2 + $0x1a0] sm:$0xff] }
 0xa74   :  { %v18207_v6 = vor.u32 %v13561_v53, %v12593_v61  ;;  %8752 = vrot.lane.b32.xlu1 %v17650_v54, %s13746_s14  ;;  %8609 = vmatpush.bf16.msra.mxu3 %v13566_v25 }
 0xa75   :  { %12487 = vmatmul.msk.bf16.gmra.mxu3 %vm888_vm1, %v7181_v28  ;;  %12652 = vmatmul.msk.bf16.gmra.mxu1 %vm888_vm1, %v7887_v48 }
 0xa76   :  { %v7079_v47 = vpop.f32.mrf.mxu2  ;;  %v7749_v32 = vpop.f32.mrf.mxu0  ;;  %8208 = vrot.lane.b32.xlu0 %v18207_v6, %s13744_s21 }
 0xa77   :  { %v7750_v27 = vadd.f32 %v17913_v1, %v7749_v32  ;;  %v7080_v3 = vadd.f32 %v17913_v1, %v7079_v47  ;;  %v8165_v32 = vpop.permute.xlu2 %8164 }
 0xa78   :  { %v7349_v24 = vpop.f32.mrf.mxu3 }
 0xa79   :  { %12612 = vmatmul.msk.bf16.gmra.mxu0 %vm228_vm0, %v18104_v18  ;;  %v7847_v61 = vmax.f32 %v7750_v27, 0.0  ;;  %v7150_v47 = vmax.f32 %v7080_v3, 0.0 }
 0xa7a   :  { %v8023_v28 = vpop.f32.mrf.mxu1 }
 0xa7b   :  { %v18219_v48 = vadd.f32 %v8023_v28, %v17928_v4  ;;  %8750 = vrot.lane.b32.xlu2 %v17611_v55, %s13746_s14 }
 0xa7c   :  { %9346 = vrot.lane.b32.xlu1 %v17710_v14, %s13745_s26 }
 0xa7d   :  { %19809 = vst [vmem:[#allocation3_spill] sm:$0xff] %v18219_v48 }
 0xa7e   :  { %v7081_v44 = vpop.f32.mrf.mxu2  ;;  %v7751_v51 = vpop.f32.mrf.mxu0  ;;  %9342 = vrot.lane.b32.xlu0 %v17650_v54, %s13745_s26 }
 0xa7f   :  { %v7082_v29 = vadd.f32 %v17923_v15, %v7081_v44  ;;  %v7752_v53 = vadd.f32 %v17923_v15, %v7751_v51 }
 0xa80   :  { %v7350_v4 = vpop.f32.mrf.mxu3 }
 0xa81   :  { %v7151_v24 = vmax.f32 %v7082_v29, 0.0  ;;  %v7848_v28 = vmax.f32 %v7752_v53, 0.0 }
 0xa82   :  { %v8026_v44 = vpop.f32.mrf.mxu1 }
 0xa83   :  { %v7182_v25 = vpack.c.bf16 %v7151_v24, %v7150_v47  ;;  %12671 = vmatmul.msk.bf16.gmra.mxu2 %vm228_vm0, %v8165_v32  ;;  %v7888_v48 = vpack.c.bf16 %v7848_v28, %v7847_v61  ;;  %v18235_v55 = vadd.f32 %v8026_v44, %v17946_v9  ;;  %9344 = vrot.lane.b32.xlu2 %v17681_v43, %s13745_s26  ;;  %v8167_v24 = vpop.permute.xlu0 %8166 }
 0xa84   :  { %8758 = vrot.lane.b32.xlu1 %v17739_v41, %s13746_s14 }
 0xa85   :  { %12488 = vmatmul.msk.bf16.gmra.mxu3 %vm888_vm1, %v7182_v25  ;;  %12653 = vmatmul.msk.bf16.gmra.mxu1 %vm888_vm1, %v7888_v48 }
 0xa86   :  { %v7084_v27 = vpop.f32.mrf.mxu2  ;;  %v7754_v51 = vpop.f32.mrf.mxu0  ;;  %8754 = vrot.lane.b32.xlu0 %v17681_v43, %s13746_s14 }
 0xa87   :  { %v7755_v48 = vadd.f32 %v17913_v1, %v7754_v51  ;;  %v7085_v61 = vadd.f32 %v17913_v1, %v7084_v27 }
 0xa88   :  { %v7352_v54 = vpop.f32.mrf.mxu3 }
 0xa89   :  { %v18246_v3 = vadd.f32 %v7352_v54, %v17729_v60  ;;  %12613 = vmatmul.msk.bf16.gmra.mxu0 %vm228_vm0, %v18147_v21  ;;  %v7849_v43 = vmax.f32 %v7755_v48, 0.0 }
 0xa8a   :  { %v8028_v9 = vpop.f32.mrf.mxu1 }
 0xa8b   :  { %v18252_v29 = vadd.f32 %v8028_v9, %v17960_v5  ;;  %8756 = vrot.lane.b32.xlu2 %v17710_v14, %s13746_s14  ;;  %v7152_v5 = vmax.f32 %v7085_v61, 0.0 }
 0xa8c   :  { %9352 = vrot.lane.b32.xlu1 %v17791_v11, %s13745_s26 }
 0xa8e   :  { %v7086_v4 = vpop.f32.mrf.mxu2  ;;  %v7756_v32 = vpop.f32.mrf.mxu0  ;;  %9348 = vrot.lane.b32.xlu0 %v17739_v41, %s13745_s26 }
 0xa8f   :  { %v7087_v53 = vadd.f32 %v17923_v15, %v7086_v4  ;;  %v7757_v47 = vadd.f32 %v17923_v15, %v7756_v32 }
 0xa90   :  { %v7354_v60 = vpop.f32.mrf.mxu3 }
 0xa91   :  { %v7153_v28 = vmax.f32 %v7087_v53, 0.0  ;;  %v18264_v25 = vadd.f32 %v7354_v60, %v17747_v10  ;;  %v7850_v44 = vmax.f32 %v7757_v47, 0.0 }
 0xa92   :  { %v8031_v14 = vpop.f32.mrf.mxu1 }
 0xa93   :  { %v7183_v27 = vpack.c.bf16 %v7153_v28, %v7152_v5  ;;  %12672 = vmatmul.msk.bf16.gmra.mxu2 %vm228_vm0, %v8167_v24  ;;  %v7889_v51 = vpack.c.bf16 %v7850_v44, %v7849_v43  ;;  %v18268_v54 = vadd.f32 %v8031_v14, %v17978_v26  ;;  %9350 = vrot.lane.b32.xlu2 %v17765_v37, %s13745_s26  ;;  %v8169_v24 = vpop.permute.xlu1 %8168 }
 0xa94   :  { %8764 = vrot.lane.b32.xlu1 %v17820_v36, %s13746_s14 }
 0xa95   :  { %12489 = vmatmul.msk.bf16.gmra.mxu3 %vm888_vm1, %v7183_v27  ;;  %12654 = vmatmul.msk.bf16.gmra.mxu1 %vm888_vm1, %v7889_v51 }
 0xa96   :  { %v7089_v9 = vpop.f32.mrf.mxu2  ;;  %v7759_v41 = vpop.f32.mrf.mxu0  ;;  %8760 = vrot.lane.b32.xlu0 %v17765_v37, %s13746_s14 }
 0xa97   :  { %v7760_v61 = vadd.f32 %v17913_v1, %v7759_v41  ;;  %v7090_v53 = vadd.f32 %v17913_v1, %v7089_v9 }
 0xa98   :  { %v7357_v10 = vpop.f32.mrf.mxu3 }
 0xa99   :  { %v18279_v48 = vadd.f32 %v7357_v10, %v17755_v31  ;;  %12614 = vmatmul.msk.bf16.gmra.mxu0 %vm228_vm0, %v18121_v52  ;;  %v7851_v31 = vmax.f32 %v7760_v61, 0.0 }
 0xa9a   :  { %v8033_v26 = vpop.f32.mrf.mxu1 }
 0xa9b   :  { %v18285_v4 = vadd.f32 %v8033_v26, %v17992_v42  ;;  %8762 = vrot.lane.b32.xlu2 %v17791_v11, %s13746_s14  ;;  %v7154_v42 = vmax.f32 %v7090_v53, 0.0 }
 0xa9c   :  { %9358 = vrot.lane.b32.xlu1 %v17875_v0, %s13745_s26 }
 0xa9e   :  { %v7091_v32 = vpop.f32.mrf.mxu2  ;;  %v7761_v60 = vpop.f32.mrf.mxu0  ;;  %9354 = vrot.lane.b32.xlu0 %v17820_v36, %s13745_s26 }
 0xa9f   :  { %v7092_v43 = vadd.f32 %v17923_v15, %v7091_v32  ;;  %v7762_v47 = vadd.f32 %v17923_v15, %v7761_v60 }
 0xaa0   :  { %v7359_v37 = vpop.f32.mrf.mxu3 }
 0xaa1   :  { %v7155_v5 = vmax.f32 %v7092_v43, 0.0  ;;  %v18297_v28 = vadd.f32 %v7359_v37, %v17773_v45  ;;  %v7852_v44 = vmax.f32 %v7762_v47, 0.0 }
 0xaa2   :  { %v8036_v11 = vpop.f32.mrf.mxu1 }
 0xaa3   :  { %v7184_v27 = vpack.c.bf16 %v7155_v5, %v7154_v42  ;;  %12673 = vmatmul.msk.bf16.gmra.mxu2 %vm228_vm0, %v8169_v24  ;;  %v7890_v14 = vpack.c.bf16 %v7852_v44, %v7851_v31  ;;  %v18301_v51 = vadd.f32 %v8036_v11, %v18007_v50  ;;  %9356 = vrot.lane.b32.xlu2 %v17846_v49, %s13745_s26  ;;  %v8171_v31 = vpop.permute.xlu2 %8170 }
 0xaa4   :  { %8770 = vrot.lane.b32.xlu1 %v17901_v19, %s13746_s14 }
 0xaa5   :  { %12490 = vmatmul.msk.bf16.gmra.mxu3 %vm888_vm1, %v7184_v27  ;;  %12655 = vmatmul.msk.bf16.gmra.mxu1 %vm888_vm1, %v7890_v14 }
 0xaa6   :  { %v7094_v9 = vpop.f32.mrf.mxu2  ;;  %v7764_v36 = vpop.f32.mrf.mxu0  ;;  %8766 = vrot.lane.b32.xlu0 %v17846_v49, %s13746_s14 }
 0xaa7   :  { %v7765_v10 = vadd.f32 %v17913_v1, %v7764_v36  ;;  %v7095_v61 = vadd.f32 %v17913_v1, %v7094_v9 }
 0xaa8   :  { %v7362_v45 = vpop.f32.mrf.mxu3 }
 0xaa9   :  { %v18312_v41 = vadd.f32 %v7362_v45, %v17781_v59  ;;  %12615 = vmatmul.msk.bf16.gmra.mxu0 %vm228_vm0, %v18169_v34  ;;  %v7853_v59 = vmax.f32 %v7765_v10, 0.0 }
 0xaaa   :  { %v8038_v50 = vpop.f32.mrf.mxu1 }
 0xaab   :  { %v18318_v26 = vadd.f32 %v8038_v50, %v18021_v16  ;;  %8768 = vrot.lane.b32.xlu2 %v17875_v0, %s13746_s14  ;;  %v7156_v16 = vmax.f32 %v7095_v61, 0.0  ;;  %v18346_v9 = vpop.permute.xlu2 %8176 }
 0xaac   :  { %9364 = vrot.lane.b32.xlu1 %v17975_v17, %s13745_s26 }
 0xaae   :  { %v7096_v53 = vpop.f32.mrf.mxu2  ;;  %v7766_v43 = vpop.f32.mrf.mxu0  ;;  %9360 = vrot.lane.b32.xlu0 %v17901_v19, %s13745_s26  ;;  %v19810_v19 = vld [vmem:[#allocation10_spill] sm:$0xff] }
 0xaaf   :  { %v7097_v32 = vadd.f32 %v17923_v15, %v7096_v53  ;;  %v7767_v60 = vadd.f32 %v17923_v15, %v7766_v43  ;;  %v8173_v43 = vpop.permute.xlu0 %8172 }
 0xab0   :  { %v7364_v49 = vpop.f32.mrf.mxu3 }
 0xab1   :  { %v7157_v37 = vmax.f32 %v7097_v32, 0.0  ;;  %v18330_v47 = vadd.f32 %v7364_v49, %v17799_v58  ;;  %v7854_v24 = vmax.f32 %v7767_v60, 0.0 }
 0xab2   :  { %v8041_v0 = vpop.f32.mrf.mxu1 }
 0xab3   :  { %v7185_v42 = vpack.c.bf16 %v7157_v37, %v7156_v16  ;;  %12674 = vmatmul.msk.bf16.gmra.mxu2 %vm228_vm0, %v8171_v31  ;;  %v7891_v5 = vpack.c.bf16 %v7854_v24, %v7853_v59  ;;  %9362 = vrot.lane.b32.xlu2 %v17943_v57, %s13745_s26  ;;  %v8175_v31 = vpop.permute.xlu1 %8174  ;;  %v18366_v0 = vpop.permute.xlu2 %8182 }
 0xab4   :  { %8776 = vrot.lane.b32.xlu1 %v18004_v23, %s13746_s14 }
 0xab5   :  { %12491 = vmatmul.msk.bf16.gmra.mxu3 %vm888_vm1, %v7185_v42  ;;  %12656 = vmatmul.msk.bf16.gmra.mxu1 %vm888_vm1, %v7891_v5 }
 0xab6   :  { %v7099_v44 = vpop.f32.mrf.mxu2  ;;  %v7769_v27 = vpop.f32.mrf.mxu0  ;;  %8772 = vrot.lane.b32.xlu0 %v17943_v57, %s13746_s14 }
 0xab7   :  { %v7770_v36 = vadd.f32 %v17913_v1, %v7769_v27  ;;  %v7100_v45 = vadd.f32 %v17913_v1, %v7099_v44 }
 0xab8   :  { %v7367_v58 = vpop.f32.mrf.mxu3 }
 0xab9   :  { %v18342_v11 = vadd.f32 %v7367_v58, %v19810_v19  ;;  %12616 = vmatmul.msk.bf16.gmra.mxu0 %vm228_vm0, %v18174_v30  ;;  %v7855_v57 = vmax.f32 %v7770_v36, 0.0  ;;  %v7158_v59 = vmax.f32 %v7100_v45, 0.0 }
 0xaba   :  { %v8042_v14 = vpop.f32.mrf.mxu1 }
 0xabb   :  { %8774 = vrot.lane.b32.xlu2 %v17975_v17, %s13746_s14  ;;  %v18377_v44 = vpop.permute.xlu1 %8180 }
 0xabc   :  { %9370 = vrot.lane.b32.xlu1 %v18053_v38, %s13745_s26 }
 0xabe   :  { %v7101_v50 = vpop.f32.mrf.mxu2  ;;  %v7771_v61 = vpop.f32.mrf.mxu0  ;;  %9366 = vrot.lane.b32.xlu0 %v18004_v23, %s13745_s26 }
 0xabf   :  { %v7102_v10 = vadd.f32 %v17923_v15, %v7101_v50  ;;  %v7772_v32 = vadd.f32 %v17923_v15, %v7771_v61  ;;  %v18385_v50 = vpop.permute.xlu2 %8188 }
 0xac0   :  { %v7369_v53 = vpop.f32.mrf.mxu3 }
 0xac1   :  { %v7159_v49 = vmax.f32 %v7102_v10, 0.0  ;;  %v18359_v60 = vadd.f32 %v7369_v53, %v17831_v35  ;;  %v7856_v16 = vmax.f32 %v7772_v32, 0.0  ;;  %v18394_v53 = vpop.permute.xlu0 %8178 }
 0xac2   :  { %v8044_v17 = vpop.f32.mrf.mxu1 }
 0xac3   :  { %v7186_v37 = vpack.c.bf16 %v7159_v49, %v7158_v59  ;;  %12675 = vmatmul.msk.bf16.gmra.mxu2 %vm228_vm0, %v8173_v43  ;;  %v7892_v24 = vpack.c.bf16 %v7856_v16, %v7855_v57  ;;  %v18363_v42 = vadd.f32 %v8044_v17, %v18056_v33  ;;  %9368 = vrot.lane.b32.xlu2 %v18033_v46, %s13745_s26  ;;  %v18401_v16 = vpop.permute.xlu1 %8186 }
 0xac4   :  { %8782 = vrot.lane.b32.xlu1 %v18079_v12, %s13746_s14 }
 0xac5   :  { %12492 = vmatmul.msk.bf16.gmra.mxu3 %vm888_vm1, %v7186_v37  ;;  %12657 = vmatmul.msk.bf16.gmra.mxu1 %vm888_vm1, %v7892_v24 }
 0xac6   :  { %v7104_v23 = vpop.f32.mrf.mxu2  ;;  %v7774_v5 = vpop.f32.mrf.mxu0  ;;  %8778 = vrot.lane.b32.xlu0 %v18033_v46, %s13746_s14 }
 0xac7   :  { %v7775_v27 = vadd.f32 %v17913_v1, %v7774_v5  ;;  %v7105_v19 = vadd.f32 %v17913_v1, %v7104_v23  ;;  %v18413_v17 = vpop.permute.xlu2 %8194 }
 0xac8   :  { %v7372_v35 = vpop.f32.mrf.mxu3 }
 0xac9   :  { %12617 = vmatmul.msk.bf16.gmra.mxu0 %vm228_vm0, %v18141_v2  ;;  %v7857_v46 = vmax.f32 %v7775_v27, 0.0  ;;  %v18417_v23 = vpop.permute.xlu0 %8184 }
 0xaca   :  { %v8046_v33 = vpop.f32.mrf.mxu1 }
 0xacb   :  { %v18381_v58 = vadd.f32 %v8046_v33, %v18067_v39  ;;  %8780 = vrot.lane.b32.xlu2 %v18053_v38, %s13746_s14  ;;  %v7160_v39 = vmax.f32 %v7105_v19, 0.0  ;;  %v18425_v19 = vpop.permute.xlu1 %8192 }
 0xacc   :  { %9376 = vrot.lane.b32.xlu1 %v18147_v21, %s13745_s26 }
 0xace   :  { %v7106_v14 = vpop.f32.mrf.mxu2  ;;  %v7776_v45 = vpop.f32.mrf.mxu0  ;;  %9372 = vrot.lane.b32.xlu0 %v18079_v12, %s13745_s26 }
 0xacf   :  { %v7107_v36 = vadd.f32 %v17923_v15, %v7106_v14  ;;  %v7777_v61 = vadd.f32 %v17923_v15, %v7776_v45 }
 0xad0   :  { %v7373_v10 = vpop.f32.mrf.mxu3 }
 0xad1   :  { %v7161_v57 = vmax.f32 %v7107_v36, 0.0  ;;  %v7858_v32 = vmax.f32 %v7777_v61, 0.0 }
 0xad2   :  { %v8049_v59 = vpop.f32.mrf.mxu1 }
 0xad3   :  { %v7187_v43 = vpack.c.bf16 %v7161_v57, %v7160_v39  ;;  %12676 = vmatmul.msk.bf16.gmra.mxu2 %vm228_vm0, %v8175_v31  ;;  %v7893_v38 = vpack.c.bf16 %v7858_v32, %v7857_v46  ;;  %v18398_v49 = vadd.f32 %v8049_v59, %v18082_v22  ;;  %9374 = vrot.lane.b32.xlu2 %v18104_v18, %s13745_s26  ;;  %v18439_v39 = vpop.permute.xlu2 %8200 }
 0xad4   :  { %8788 = vrot.lane.b32.xlu1 %v18121_v52, %s13746_s14 }
 0xad5   :  { %12493 = vmatmul.msk.bf16.gmra.mxu3 %vm888_vm1, %v7187_v43  ;;  %12658 = vmatmul.msk.bf16.gmra.mxu1 %vm888_vm1, %v7893_v38  ;;  %v18463_v38 = vpop.permute.xlu1 %8198 }
 0xad6   :  { %v7109_v37 = vpop.f32.mrf.mxu2  ;;  %v7779_v12 = vpop.f32.mrf.mxu0  ;;  %8784 = vrot.lane.b32.xlu0 %v18104_v18, %s13746_s14 }
 0xad7   :  { %v7780_v5 = vadd.f32 %v17913_v1, %v7779_v12  ;;  %v7110_v33 = vadd.f32 %v17913_v1, %v7109_v37  ;;  %v18470_v12 = vld [vmem:[%s19702_s5] sm:$0xff] }
 0xad8   :  { %v7375_v31 = vpop.f32.mrf.mxu3 }
 0xad9   :  { %v18411_v22 = vadd.f32 %v7375_v31, %v17865_v62  ;;  %12618 = vmatmul.msk.bf16.gmra.mxu0 %vm228_vm0, %v18201_v8  ;;  %v7859_v14 = vmax.f32 %v7780_v5, 0.0  ;;  %v7162_v1 = vmax.f32 %v7110_v33, 0.0 }
 0xada   :  { %v8051_v24 = vpop.f32.mrf.mxu1 }
 0xadb   :  { %v18421_v35 = vadd.f32 %v8051_v24, %v18093_v40  ;;  %8786 = vrot.lane.b32.xlu2 %v18147_v21, %s13746_s14 }
 0xadc   :  { %9382 = vrot.lane.b32.xlu1 %v18174_v30, %s13745_s26 }
 0xade   :  { %v7111_v27 = vpop.f32.mrf.mxu2  ;;  %v7781_v62 = vpop.f32.mrf.mxu0  ;;  %9378 = vrot.lane.b32.xlu0 %v18121_v52, %s13745_s26 }
 0xadf   :  { %v7112_v18 = vadd.f32 %v17923_v15, %v7111_v27  ;;  %v7782_v45 = vadd.f32 %v17923_v15, %v7781_v62  ;;  %v13577_v15 = vld [vmem:[%s19701_s2 + $0x1f8] sm:$0xff]  ;;  %v18451_v52 = vpop.permute.xlu0 %8190  ;;  %v18482_v27 = vld [vmem:[%s19702_s5 + $0x8] sm:$0xff] }
 0xae0   :  { %v7377_v36 = vpop.f32.mrf.mxu3  ;;  %9786 = vmatpush.bf16.msrb.mxu3 %v13577_v15 }
 0xae1   :  { %v7163_v40 = vmax.f32 %v7112_v18, 0.0  ;;  %v18435_v46 = vadd.f32 %v7377_v36, %v17883_v56  ;;  %v7860_v10 = vmax.f32 %v7782_v45, 0.0  ;;  %v13573_v56 = vld [vmem:[%s19701_s2 + $0x1d8] sm:$0xff] }
 0xae2   :  { %v8054_v21 = vpop.f32.mrf.mxu1  ;;  %9196 = vmatpush.bf16.msrb.mxu1 %v13573_v56  ;;  %v18499_v56 = vpop.permute.xlu1 %8204 }
 0xae3   :  { %v7188_v61 = vpack.c.bf16 %v7163_v40, %v7162_v1  ;;  %12677 = vmatmul.msk.bf16.gmra.mxu2 %vm228_vm0, %v18346_v9  ;;  %v7894_v57 = vpack.c.bf16 %v7860_v10, %v7859_v14  ;;  %v18442_v32 = vadd.f32 %v8054_v21, %v18107_v7  ;;  %9380 = vrot.lane.b32.xlu2 %v18169_v34, %s13745_s26 }
 0xae4   :  { %8794 = vrot.lane.b32.xlu1 %v18141_v2, %s13746_s14 }
 0xae5   :  { %12494 = vmatmul.msk.bf16.gmra.mxu3 %vm888_vm1, %v7188_v61  ;;  %12659 = vmatmul.msk.bf16.gmra.mxu1 %vm888_vm1, %v7894_v57  ;;  %v19812_v61 = vld [vmem:[#allocation5_spill] sm:$0xff] }
 0xae6   :  { %v8294_v9 = vpop.f32.mrf.mxu2  ;;  %v7784_v43 = vpop.f32.mrf.mxu0  ;;  %8790 = vrot.lane.b32.xlu0 %v18169_v34, %s13746_s14  ;;  %v19811_v34 = vld [vmem:[#allocation6_spill] sm:$0xff] }
 0xae7   :  { %v7785_v31 = vadd.f32 %v18470_v12, %v7784_v43  ;;  %v8295_v5 = vadd.f32 %v18470_v12, %v8294_v9  ;;  %v18485_v14 = vpop.permute.xlu0 %8196  ;;  %v19813_v43 = vld [vmem:[#allocation2_spill] sm:$0xff] }
 0xae8   :  { %v7380_v7 = vpop.f32.mrf.mxu3 }
 0xae9   :  { %v18461_v59 = vadd.f32 %v7380_v7, %v17891_v63  ;;  %12619 = vmatmul.msk.bf16.gmra.mxu0 %vm228_vm0, %v18207_v6  ;;  %v18477_v63 = vpop.permute.xlu2 %8206  ;;  %v7861_v36 = vmax.f32 %v7785_v31, 0.0  ;;  %v8419_v40 = vmax.f32 %v8295_v5, 0.0 }
 0xaea   :  { %v8056_v37 = vpop.f32.mrf.mxu1 }
 0xaeb   :  { %v18474_v24 = vadd.f32 %v8056_v37, %v19811_v34  ;;  %8792 = vrot.lane.b32.xlu2 %v18174_v30, %s13746_s14 }
 0xaec   :  { %9388 = vrot.lane.b32.xlu1 %v18207_v6, %s13745_s26 }
 0xaee   :  { %v8296_v33 = vpop.f32.mrf.mxu2  ;;  %v7786_v62 = vpop.f32.mrf.mxu0  ;;  %9384 = vrot.lane.b32.xlu0 %v18141_v2, %s13745_s26 }
 0xaef   :  { %v8297_v18 = vadd.f32 %v18482_v27, %v8296_v33  ;;  %v7787_v1 = vadd.f32 %v18482_v27, %v7786_v62  ;;  %v18513_v33 = vpop.permute.xlu0 %8202 }
 0xaf0   :  { %v7382_v45 = vpop.f32.mrf.mxu3 }
 0xaf1   :  { %v8420_v10 = vmax.f32 %v8297_v18, 0.0  ;;  %v18495_v21 = vadd.f32 %v7382_v45, %v19812_v61  ;;  %v7862_v57 = vmax.f32 %v7787_v1, 0.0  ;;  %v8751_v31 = vpop.permute.xlu2 %8750  ;;  %v18521_v1 = vpop.permute.xlu1 %9340 }
 0xaf2   :  { %v8059_v30 = vpop.f32.mrf.mxu1 }
 0xaf3   :  { %v8469_v15 = vpack.c.bf16 %v8420_v10, %v8419_v40  ;;  %12678 = vmatmul.msk.bf16.gmra.mxu2 %vm228_vm0, %v18394_v53  ;;  %v7895_v9 = vpack.c.bf16 %v7862_v57, %v7861_v36  ;;  %v18502_v7 = vadd.f32 %v8059_v30, %v19813_v43  ;;  %9386 = vrot.lane.b32.xlu2 %v18201_v8, %s13745_s26  ;;  %v19814_v53 = vld [vmem:[#allocation11_spill] sm:$0xff]  ;;  %v19815_v43 = vld [vmem:[#allocation12_spill] sm:$0xff] }
 0xaf5   :  { %12718 = vmatmul.msk.bf16.vlgmr.msra.gmra.mxu3 %vm888_vm1, %v8469_v15  ;;  %12660 = vmatmul.msk.bf16.gmra.mxu1 %vm888_vm1, %v7895_v9 }
 0xaf6   :  { %v8299_v2 = vpop.f32.mrf.mxu2  ;;  %v7789_v37 = vpop.f32.mrf.mxu0  ;;  %8796 = vrot.lane.b32.xlu0 %v18201_v8, %s13746_s14 }
 0xaf7   :  { %v7790_v62 = vadd.f32 %v18470_v12, %v7789_v37  ;;  %v8300_v45 = vadd.f32 %v18470_v12, %v8299_v2 }
 0xaf8   :  { %v7385_v34 = vpop.f32.mrf.mxu3 }
 0xaf9   :  { %v18511_v5 = vadd.f32 %v7385_v34, %v19814_v53  ;;  %12743 = vmatmul.msk.bf16.vlgmr.msrb.gmra.mxu0 %vm228_vm0, %v8751_v31  ;;  %v7863_v61 = vmax.f32 %v7790_v62, 0.0  ;;  %v8421_v30 = vmax.f32 %v8300_v45, 0.0  ;;  %v18532_v34 = vpop.permute.xlu0 %8208  ;;  %v8753_v62 = vpop.permute.xlu1 %8752 }
 0xafa   :  { %v8061_v18 = vpop.f32.mrf.mxu1 }
 0xafb   :  { %v18518_v36 = vadd.f32 %v8061_v18, %v18185_v13  ;;  %8798 = vrot.lane.b32.xlu2 %v18207_v6, %s13746_s14 }
 0xafe   :  { %v8301_v40 = vpop.f32.mrf.mxu2  ;;  %v7791_v10 = vpop.f32.mrf.mxu0 }
 0xaff   :  { %v8302_v8 = vadd.f32 %v18482_v27, %v8301_v40  ;;  %v7792_v15 = vadd.f32 %v18482_v27, %v7791_v10  ;;  %v19816_v40 = vld [vmem:[#allocation4_spill] sm:$0xff] }
 0xb00   :  { %v7387_v57 = vpop.f32.mrf.mxu3 }
 0xb01   :  { %v8422_v9 = vmax.f32 %v8302_v8, 0.0  ;;  %v18528_v13 = vadd.f32 %v7387_v57, %v19815_v43  ;;  %v7864_v37 = vmax.f32 %v7792_v15, 0.0  ;;  %v18542_v15 = vpop.permute.xlu0 %9342 }
 0xb02   :  { %v8064_v31 = vpop.f32.mrf.mxu1  ;;  %19817 = vst [vmem:[#allocation8_spill] sm:$0xff] %v18542_v15 }
 0xb03   :  { %v8470_v2 = vpack.c.bf16 %v8422_v9, %v8421_v30  ;;  %12679 = vmatmul.msk.bf16.gmra.mxu2 %vm228_vm0, %v18377_v44  ;;  %v7896_v53 = vpack.c.bf16 %v7864_v37, %v7863_v61 }
 0xb05   :  { %12719 = vmatmul.msk.bf16.gmra.mxu3 %vm888_vm1, %v8470_v2  ;;  %12661 = vmatmul.msk.bf16.gmra.mxu1 %vm888_vm1, %v7896_v53 }
 0xb06   :  { %v8304_v6 = vpop.f32.mrf.mxu2  ;;  %v7794_v18 = vpop.f32.mrf.mxu0 }
 0xb07   :  { %v7795_v44 = vadd.f32 %v18470_v12, %v7794_v18  ;;  %v8305_v57 = vadd.f32 %v18470_v12, %v8304_v6 }
 0xb08   :  { %v7390_v45 = vpop.f32.mrf.mxu3 }
 0xb09   :  { %v18537_v8 = vadd.f32 %v7390_v45, %v19816_v40  ;;  %12744 = vmatmul.msk.bf16.gmra.mxu0 %vm228_vm0, %v8753_v62  ;;  %v7865_v43 = vmax.f32 %v7795_v44, 0.0  ;;  %v8423_v31 = vmax.f32 %v8305_v57, 0.0  ;;  %v19818_v45 = vld [vmem:[#allocation9_spill] sm:$0xff] }
 0xb0a   :  { %v8065_v10 = vpop.f32.mrf.mxu1 }
 0xb0e   :  { %v8306_v61 = vpop.f32.mrf.mxu2  ;;  %v7796_v9 = vpop.f32.mrf.mxu0 }
 0xb0f   :  { %v8307_v30 = vadd.f32 %v18482_v27, %v8306_v61  ;;  %v7797_v2 = vadd.f32 %v18482_v27, %v7796_v9  ;;  %v8755_v61 = vpop.permute.xlu0 %8754 }
 0xb10   :  { %v7392_v37 = vpop.f32.mrf.mxu3 }
 0xb11   :  { %v8424_v53 = vmax.f32 %v8307_v30, 0.0  ;;  %v18547_v40 = vadd.f32 %v7392_v37, %v19818_v45  ;;  %v7866_v62 = vmax.f32 %v7797_v2, 0.0 }
 0xb12   :  { %v8067_v6 = vpop.f32.mrf.mxu1 }
 0xb13   :  { %v8471_v10 = vpack.c.bf16 %v8424_v53, %v8423_v31  ;;  %12680 = vmatmul.msk.bf16.gmra.mxu2 %vm228_vm0, %v18366_v0  ;;  %v7897_v18 = vpack.c.bf16 %v7866_v62, %v7865_v43  ;;  %v18552_v15 = vadd.f32 %v8067_v6, %v18246_v3  ;;  %v18562_v3 = vpop.permute.xlu2 %9344 }
 0xb15   :  { %12720 = vmatmul.msk.bf16.gmra.mxu3 %vm888_vm1, %v8471_v10  ;;  %12662 = vmatmul.msk.bf16.gmra.mxu1 %vm888_vm1, %v7897_v18 }
 0xb16   :  { %v8309_v44 = vpop.f32.mrf.mxu2  ;;  %v7799_v57 = vpop.f32.mrf.mxu0 }
 0xb17   :  { %v7800_v37 = vadd.f32 %v18470_v12, %v7799_v57  ;;  %v8310_v43 = vadd.f32 %v18470_v12, %v8309_v44 }
 0xb18   :  { %v7395_v30 = vpop.f32.mrf.mxu3 }
 0xb19   :  { %12745 = vmatmul.msk.bf16.gmra.mxu0 %vm228_vm0, %v8755_v61  ;;  %v7867_v45 = vmax.f32 %v7800_v37, 0.0  ;;  %v8425_v6 = vmax.f32 %v8310_v43, 0.0 }
 0xb1a   :  { %v8069_v9 = vpop.f32.mrf.mxu1 }
 0xb1b   :  { %v18559_v0 = vadd.f32 %v8069_v9, %v18264_v25 }
 0xb1e   :  { %v8311_v2 = vpop.f32.mrf.mxu2  ;;  %v7801_v53 = vpop.f32.mrf.mxu0 }
 0xb1f   :  { %v8312_v31 = vadd.f32 %v18482_v27, %v8311_v2  ;;  %v7802_v10 = vadd.f32 %v18482_v27, %v7801_v53  ;;  %v8757_v2 = vpop.permute.xlu2 %8756 }
 0xb20   :  { %v7396_v62 = vpop.f32.mrf.mxu3 }
 0xb21   :  { %v8426_v18 = vmax.f32 %v8312_v31, 0.0  ;;  %v7868_v61 = vmax.f32 %v7802_v10, 0.0 }
 0xb22   :  { %v8072_v25 = vpop.f32.mrf.mxu1 }
 0xb23   :  { %v8472_v30 = vpack.c.bf16 %v8426_v18, %v8425_v6  ;;  %12681 = vmatmul.msk.bf16.gmra.mxu2 %vm228_vm0, %v18417_v23  ;;  %v7898_v57 = vpack.c.bf16 %v7868_v61, %v7867_v45  ;;  %v18569_v44 = vadd.f32 %v8072_v25, %v18279_v48  ;;  %v18579_v48 = vpop.permute.xlu1 %9346 }
 0xb25   :  { %12721 = vmatmul.msk.bf16.gmra.mxu3 %vm888_vm1, %v8472_v30  ;;  %12663 = vmatmul.msk.bf16.gmra.mxu1 %vm888_vm1, %v7898_v57 }
 0xb26   :  { %v8314_v9 = vpop.f32.mrf.mxu2  ;;  %v7804_v37 = vpop.f32.mrf.mxu0 }
 0xb27   :  { %v7805_v31 = vadd.f32 %v18470_v12, %v7804_v37  ;;  %v8315_v45 = vadd.f32 %v18470_v12, %v8314_v9 }
 0xb28   :  { %v7398_v53 = vpop.f32.mrf.mxu3 }
 0xb29   :  { %12746 = vmatmul.msk.bf16.gmra.mxu0 %vm228_vm0, %v8757_v2  ;;  %v7869_v18 = vmax.f32 %v7805_v31, 0.0  ;;  %v8427_v25 = vmax.f32 %v8315_v45, 0.0 }
 0xb2a   :  { %v8074_v43 = vpop.f32.mrf.mxu1 }
 0xb2b   :  { %v18576_v23 = vadd.f32 %v8074_v43, %v18297_v28 }
 0xb2e   :  { %v8316_v62 = vpop.f32.mrf.mxu2  ;;  %v7806_v6 = vpop.f32.mrf.mxu0 }
 0xb2f   :  { %v8317_v10 = vadd.f32 %v18482_v27, %v8316_v62  ;;  %v7807_v30 = vadd.f32 %v18482_v27, %v7806_v6  ;;  %v8759_v62 = vpop.permute.xlu1 %8758 }
 0xb30   :  { %v7399_v61 = vpop.f32.mrf.mxu3 }
 0xb31   :  { %v8428_v57 = vmax.f32 %v8317_v10, 0.0  ;;  %v7870_v2 = vmax.f32 %v7807_v30, 0.0 }
 0xb32   :  { %v8077_v28 = vpop.f32.mrf.mxu1 }
 0xb33   :  { %v8473_v53 = vpack.c.bf16 %v8428_v57, %v8427_v25  ;;  %12682 = vmatmul.msk.bf16.gmra.mxu2 %vm228_vm0, %v18401_v16  ;;  %v7899_v37 = vpack.c.bf16 %v7870_v2, %v7869_v18  ;;  %v18586_v9 = vadd.f32 %v8077_v28, %v18312_v41  ;;  %v18596_v41 = vpop.permute.xlu0 %9348 }
 0xb35   :  { %12722 = vmatmul.msk.bf16.gmra.mxu3 %vm888_vm1, %v8473_v53  ;;  %12664 = vmatmul.msk.bf16.gmra.mxu1 %vm888_vm1, %v7899_v37 }
 0xb36   :  { %v8319_v43 = vpop.f32.mrf.mxu2  ;;  %v7809_v31 = vpop.f32.mrf.mxu0 }
 0xb37   :  { %v7810_v10 = vadd.f32 %v18470_v12, %v7809_v31  ;;  %v8320_v18 = vadd.f32 %v18470_v12, %v8319_v43 }
 0xb38   :  { %v7401_v6 = vpop.f32.mrf.mxu3 }
 0xb39   :  { %12747 = vmatmul.msk.bf16.gmra.mxu0 %vm228_vm0, %v8759_v62  ;;  %v7871_v57 = vmax.f32 %v7810_v10, 0.0  ;;  %v8429_v28 = vmax.f32 %v8320_v18, 0.0 }
 0xb3a   :  { %v8079_v45 = vpop.f32.mrf.mxu1 }
 0xb3b   :  { %v18593_v16 = vadd.f32 %v8079_v45, %v18330_v47  ;;  %v13576_v45 = vld [vmem:[%s19701_s2 + $0x1f0] sm:$0xff] }
 0xb3c   :  { %9787 = vmatpush.bf16.msrb.mxu3 %v13576_v45 }
 0xb3e   :  { %v8321_v61 = vpop.f32.mrf.mxu2  ;;  %v7811_v25 = vpop.f32.mrf.mxu0 }
 0xb3f   :  { %v8322_v30 = vadd.f32 %v18482_v27, %v8321_v61  ;;  %v7812_v53 = vadd.f32 %v18482_v27, %v7811_v25  ;;  %v8761_v61 = vpop.permute.xlu0 %8760 }
 0xb40   :  { %v7402_v2 = vpop.f32.mrf.mxu3 }
 0xb41   :  { %v8430_v37 = vmax.f32 %v8322_v30, 0.0  ;;  %v7872_v62 = vmax.f32 %v7812_v53, 0.0  ;;  %v18619_v53 = vpop.permute.xlu2 %9350 }
 0xb42   :  { %v8082_v47 = vpop.f32.mrf.mxu1 }
 0xb43   :  { %v8474_v6 = vpack.c.bf16 %v8430_v37, %v8429_v28  ;;  %12683 = vmatmul.msk.bf16.gmra.mxu2 %vm228_vm0, %v18385_v50  ;;  %v7900_v31 = vpack.c.bf16 %v7872_v62, %v7871_v57  ;;  %v18603_v43 = vadd.f32 %v8082_v47, %v18342_v11  ;;  %v13572_v50 = vld [vmem:[%s19701_s2 + $0x1d0] sm:$0xff] }
 0xb44   :  { %9197 = vmatpush.bf16.msrb.mxu1 %v13572_v50 }
 0xb45   :  { %12723 = vmatmul.msk.bf16.gmra.mxu3 %vm888_vm1, %v8474_v6  ;;  %12665 = vmatmul.msk.bf16.gmra.mxu1 %vm888_vm1, %v7900_v31 }
 0xb46   :  { %v8324_v10 = vpop.f32.mrf.mxu2  ;;  %v7814_v18 = vpop.f32.mrf.mxu0 }
 0xb47   :  { %v7815_v25 = vadd.f32 %v18470_v12, %v7814_v18  ;;  %v8325_v2 = vadd.f32 %v18470_v12, %v8324_v10 }
 0xb48   :  { %v7404_v30 = vpop.f32.mrf.mxu3 }
 0xb49   :  { %12748 = vmatmul.msk.bf16.gmra.mxu0 %vm228_vm0, %v8761_v61  ;;  %v7873_v6 = vmax.f32 %v7815_v25, 0.0  ;;  %v8431_v45 = vmax.f32 %v8325_v2, 0.0 }
 0xb4a   :  { %v8084_v11 = vpop.f32.mrf.mxu1 }
 0xb4b   :  { %v18616_v57 = vadd.f32 %v8084_v11, %v18359_v60 }
 0xb4e   :  { %v8326_v28 = vpop.f32.mrf.mxu2  ;;  %v7816_v62 = vpop.f32.mrf.mxu0 }
 0xb4f   :  { %v8327_v37 = vadd.f32 %v18482_v27, %v8326_v28  ;;  %v7817_v31 = vadd.f32 %v18482_v27, %v7816_v62  ;;  %v8763_v28 = vpop.permute.xlu2 %8762 }
 0xb50   :  { %v7405_v47 = vpop.f32.mrf.mxu3 }
 0xb51   :  { %v8432_v61 = vmax.f32 %v8327_v37, 0.0  ;;  %v7874_v30 = vmax.f32 %v7817_v31, 0.0  ;;  %v18630_v47 = vpop.permute.xlu1 %9352 }
 0xb52   :  { %v8087_v60 = vpop.f32.mrf.mxu1 }
 0xb53   :  { %v8475_v50 = vpack.c.bf16 %v8432_v61, %v8431_v45  ;;  %12684 = vmatmul.msk.bf16.gmra.mxu2 %vm228_vm0, %v18451_v52  ;;  %v7901_v18 = vpack.c.bf16 %v7874_v30, %v7873_v6  ;;  %v13571_v52 = vld [vmem:[%s19701_s2 + $0x1c8] sm:$0xff] }
 0xb54   :  { %9198 = vmatpush.bf16.msrb.mxu1 %v13571_v52 }
 0xb55   :  { %12724 = vmatmul.msk.bf16.gmra.mxu3 %vm888_vm1, %v8475_v50  ;;  %12666 = vmatmul.msk.bf16.gmra.mxu1 %vm888_vm1, %v7901_v18 }
 0xb56   :  { %v8329_v10 = vpop.f32.mrf.mxu2  ;;  %v7819_v11 = vpop.f32.mrf.mxu0 }
 0xb57   :  { %v7820_v2 = vadd.f32 %v18470_v12, %v7819_v11  ;;  %v8330_v37 = vadd.f32 %v18470_v12, %v8329_v10  ;;  %v13570_v10 = vld [vmem:[%s19701_s2 + $0x1c0] sm:$0xff] }
 0xb58   :  { %v7407_v25 = vpop.f32.mrf.mxu3  ;;  %9199 = vmatpush.bf16.msrb.mxu1 %v13570_v10 }
 0xb59   :  { %12749 = vmatmul.msk.bf16.gmra.mxu0 %vm228_vm0, %v8763_v28  ;;  %v7875_v61 = vmax.f32 %v7820_v2, 0.0  ;;  %v8433_v60 = vmax.f32 %v8330_v37, 0.0 }
 0xb5a   :  { %v8088_v62 = vpop.f32.mrf.mxu1 }
 0xb5e   :  { %v8331_v6 = vpop.f32.mrf.mxu2  ;;  %v7821_v45 = vpop.f32.mrf.mxu0 }
 0xb5f   :  { %v8332_v31 = vadd.f32 %v18482_v27, %v8331_v6  ;;  %v7822_v50 = vadd.f32 %v18482_v27, %v7821_v45  ;;  %v8765_v6 = vpop.permute.xlu1 %8764 }
 0xb60   :  { %v7408_v30 = vpop.f32.mrf.mxu3 }
 0xb61   :  { %v8434_v18 = vmax.f32 %v8332_v31, 0.0  ;;  %v7876_v11 = vmax.f32 %v7822_v50, 0.0 }
 0xb62   :  { %v8090_v25 = vpop.f32.mrf.mxu1 }
 0xb63   :  { %v8476_v28 = vpack.c.bf16 %v8434_v18, %v8433_v60  ;;  %12685 = vmatmul.msk.bf16.gmra.mxu2 %vm228_vm0, %v18425_v19  ;;  %v7902_v62 = vpack.c.bf16 %v7876_v11, %v7875_v61  ;;  %v18643_v52 = vadd.f32 %v8090_v25, %v18411_v22  ;;  %v18653_v22 = vpop.permute.xlu0 %9354 }
 0xb65   :  { %12725 = vmatmul.msk.bf16.gmra.mxu3 %vm888_vm1, %v8476_v28  ;;  %12667 = vmatmul.msk.bf16.gmra.mxu1 %vm888_vm1, %v7902_v62 }
 0xb66   :  { %v8334_v2 = vpop.f32.mrf.mxu2  ;;  %v7824_v37 = vpop.f32.mrf.mxu0 }
 0xb67   :  { %v7825_v30 = vadd.f32 %v18470_v12, %v7824_v37  ;;  %v8335_v61 = vadd.f32 %v18470_v12, %v8334_v2 }
 0xb68   :  { %v7410_v31 = vpop.f32.mrf.mxu3 }
 0xb69   :  { %12750 = vmatmul.msk.bf16.gmra.mxu0 %vm228_vm0, %v8765_v6  ;;  %v7877_v10 = vmax.f32 %v7825_v30, 0.0  ;;  %v8435_v25 = vmax.f32 %v8335_v61, 0.0 }
 0xb6a   :  { %v8092_v45 = vpop.f32.mrf.mxu1 }
 0xb6b   :  { %v18650_v19 = vadd.f32 %v8092_v45, %v18435_v46 }
 0xb6e   :  { %v8336_v50 = vpop.f32.mrf.mxu2  ;;  %v7826_v18 = vpop.f32.mrf.mxu0 }
 0xb6f   :  { %v8337_v60 = vadd.f32 %v18482_v27, %v8336_v50  ;;  %v7827_v28 = vadd.f32 %v18482_v27, %v7826_v18  ;;  %v8767_v50 = vpop.permute.xlu0 %8766 }
 0xb70   :  { %v7411_v11 = vpop.f32.mrf.mxu3 }
 0xb71   :  { %v8436_v62 = vmax.f32 %v8337_v60, 0.0  ;;  %v7878_v6 = vmax.f32 %v7827_v28, 0.0  ;;  %v18673_v11 = vpop.permute.xlu2 %9356 }
 0xb72   :  { %v8095_v46 = vpop.f32.mrf.mxu1 }
 0xb73   :  { %v8477_v31 = vpack.c.bf16 %v8436_v62, %v8435_v25  ;;  %12686 = vmatmul.msk.bf16.gmra.mxu2 %vm228_vm0, %v18413_v17  ;;  %v7903_v37 = vpack.c.bf16 %v7878_v6, %v7877_v10  ;;  %v18660_v2 = vadd.f32 %v8095_v46, %v18461_v59 }
 0xb75   :  { %12726 = vmatmul.msk.bf16.gmra.mxu3 %vm888_vm1, %v8477_v31  ;;  %12668 = vmatmul.msk.bf16.gmra.mxu1 %vm888_vm1, %v7903_v37 }
 0xb76   :  { %v8339_v45 = vpop.f32.mrf.mxu2  ;;  %v8884_v30 = vpop.f32.mrf.mxu0 }
 0xb77   :  { %v8885_v17 = vadd.f32 %v18470_v12, %v8884_v30  ;;  %v8340_v59 = vadd.f32 %v18470_v12, %v8339_v45 }
 0xb78   :  { %v8611_v18 = vpop.f32.mrf.mxu3 }
 0xb79   :  { %v18665_v61 = vadd.f32 %v8611_v18, %v18189_v20  ;;  %12751 = vmatmul.msk.bf16.gmra.mxu0 %vm228_vm0, %v8767_v50  ;;  %v9009_v6 = vmax.f32 %v8885_v17, 0.0  ;;  %v8437_v46 = vmax.f32 %v8340_v59, 0.0  ;;  %v19820_v50 = vld [vmem:[#allocation3_spill] sm:$0xff] }
 0xb7a   :  { %v8097_v60 = vpop.f32.mrf.mxu1 }
 0xb7b   :  { %v18670_v10 = vadd.f32 %v8097_v60, %v18495_v21 }
 0xb7d   :  { %19819 = vst [vmem:[#allocation7_spill] sm:$0xff] %v18670_v10 }
 0xb7e   :  { %v8341_v28 = vpop.f32.mrf.mxu2  ;;  %v8886_v62 = vpop.f32.mrf.mxu0 }
 0xb7f   :  { %v8342_v25 = vadd.f32 %v18482_v27, %v8341_v28  ;;  %v8887_v20 = vadd.f32 %v18482_v27, %v8886_v62  ;;  %v8769_v28 = vpop.permute.xlu2 %8768 }
 0xb80   :  { %v8613_v31 = vpop.f32.mrf.mxu3 }
 0xb81   :  { %v8438_v37 = vmax.f32 %v8342_v25, 0.0  ;;  %v18678_v18 = vadd.f32 %v8613_v31, %v19820_v50  ;;  %v9010_v30 = vmax.f32 %v8887_v20, 0.0  ;;  %v18696_v20 = vpop.permute.xlu1 %9358 }
 0xb82   :  { %v8100_v45 = vpop.f32.mrf.mxu1 }
 0xb83   :  { %v8478_v21 = vpack.c.bf16 %v8438_v37, %v8437_v46  ;;  %12687 = vmatmul.msk.bf16.gmra.mxu2 %vm228_vm0, %v18485_v14  ;;  %v9059_v60 = vpack.c.bf16 %v9010_v30, %v9009_v6  ;;  %v18683_v10 = vadd.f32 %v8100_v45, %v18511_v5 }
 0xb85   :  { %12727 = vmatmul.msk.bf16.gmra.mxu3 %vm888_vm1, %v8478_v21  ;;  %12792 = vmatmul.msk.bf16.vlgmr.msrb.gmra.mxu1 %vm888_vm1, %v9059_v60 }
 0xb86   :  { %v8344_v17 = vpop.f32.mrf.mxu2  ;;  %v8889_v59 = vpop.f32.mrf.mxu0 }
 0xb87   :  { %v8890_v14 = vadd.f32 %v18470_v12, %v8889_v59  ;;  %v8345_v5 = vadd.f32 %v18470_v12, %v8344_v17 }
 0xb88   :  { %v8616_v25 = vpop.f32.mrf.mxu3 }
 0xb89   :  { %v18688_v62 = vadd.f32 %v8616_v25, %v18235_v55  ;;  %12752 = vmatmul.msk.bf16.gmra.mxu0 %vm228_vm0, %v8769_v28  ;;  %v9011_v30 = vmax.f32 %v8890_v14, 0.0  ;;  %v8439_v45 = vmax.f32 %v8345_v5, 0.0 }
 0xb8a   :  { %v8102_v31 = vpop.f32.mrf.mxu1 }
 0xb8b   :  { %v18693_v6 = vadd.f32 %v8102_v31, %v18528_v13 }
 0xb8e   :  { %v8346_v46 = vpop.f32.mrf.mxu2  ;;  %v8891_v50 = vpop.f32.mrf.mxu0 }
 0xb8f   :  { %v8347_v37 = vadd.f32 %v18482_v27, %v8346_v46  ;;  %v8892_v55 = vadd.f32 %v18482_v27, %v8891_v50  ;;  %v8771_v46 = vpop.permute.xlu1 %8770 }
 0xb90   :  { %v8618_v21 = vpop.f32.mrf.mxu3 }
 0xb91   :  { %v8440_v60 = vmax.f32 %v8347_v37, 0.0  ;;  %v18701_v28 = vadd.f32 %v8618_v21, %v18252_v29  ;;  %v9012_v59 = vmax.f32 %v8892_v55, 0.0  ;;  %v18719_v21 = vpop.permute.xlu0 %9360 }
 0xb92   :  { %v8105_v17 = vpop.f32.mrf.mxu1 }
 0xb93   :  { %v8479_v13 = vpack.c.bf16 %v8440_v60, %v8439_v45  ;;  %12688 = vmatmul.msk.bf16.gmra.mxu2 %vm228_vm0, %v18463_v38  ;;  %v9060_v25 = vpack.c.bf16 %v9012_v59, %v9011_v30  ;;  %v18706_v31 = vadd.f32 %v8105_v17, %v18537_v8 }
 0xb95   :  { %12728 = vmatmul.msk.bf16.gmra.mxu3 %vm888_vm1, %v8479_v13  ;;  %12793 = vmatmul.msk.bf16.gmra.mxu1 %vm888_vm1, %v9060_v25 }
 0xb96   :  { %v8349_v14 = vpop.f32.mrf.mxu2  ;;  %v8894_v5 = vpop.f32.mrf.mxu0 }
 0xb97   :  { %v8895_v38 = vadd.f32 %v18470_v12, %v8894_v5  ;;  %v8350_v8 = vadd.f32 %v18470_v12, %v8349_v14 }
 0xb98   :  { %v8621_v37 = vpop.f32.mrf.mxu3 }
 0xb99   :  { %v18711_v29 = vadd.f32 %v8621_v37, %v18268_v54  ;;  %12753 = vmatmul.msk.bf16.gmra.mxu0 %vm228_vm0, %v8771_v46  ;;  %v9013_v59 = vmax.f32 %v8895_v38, 0.0  ;;  %v8441_v17 = vmax.f32 %v8350_v8, 0.0 }
 0xb9a   :  { %v8107_v50 = vpop.f32.mrf.mxu1 }
 0xb9b   :  { %v18716_v30 = vadd.f32 %v8107_v50, %v18547_v40 }
 0xb9e   :  { %v8351_v55 = vpop.f32.mrf.mxu2  ;;  %v8896_v60 = vpop.f32.mrf.mxu0 }
 0xb9f   :  { %v8352_v45 = vadd.f32 %v18482_v27, %v8351_v55  ;;  %v8897_v54 = vadd.f32 %v18482_v27, %v8896_v60  ;;  %v8773_v55 = vpop.permute.xlu0 %8772 }
 0xba0   :  { %v8623_v13 = vpop.f32.mrf.mxu3 }
 0xba1   :  { %v8442_v25 = vmax.f32 %v8352_v45, 0.0  ;;  %v18724_v46 = vadd.f32 %v8623_v13, %v18285_v4  ;;  %v9014_v5 = vmax.f32 %v8897_v54, 0.0  ;;  %v13575_v4 = vld [vmem:[%s19701_s2 + $0x1e8] sm:$0xff]  ;;  %v18739_v13 = vpop.permute.xlu2 %9362 }
 0xba2   :  { %v8110_v14 = vpop.f32.mrf.mxu1  ;;  %9788 = vmatpush.bf16.msrb.mxu3 %v13575_v4 }
 0xba3   :  { %v8480_v40 = vpack.c.bf16 %v8442_v25, %v8441_v17  ;;  %12689 = vmatmul.msk.bf16.gmra.mxu2 %vm228_vm0, %v18439_v39  ;;  %v9061_v37 = vpack.c.bf16 %v9014_v5, %v9013_v59 }
 0xba5   :  { %12729 = vmatmul.msk.bf16.gmra.mxu3 %vm888_vm1, %v8480_v40  ;;  %12794 = vmatmul.msk.bf16.gmra.mxu1 %vm888_vm1, %v9061_v37 }
 0xba6   :  { %v8354_v50 = vpop.f32.mrf.mxu2  ;;  %v8899_v38 = vpop.f32.mrf.mxu0 }
 0xba7   :  { %v8900_v45 = vadd.f32 %v18470_v12, %v8899_v38  ;;  %v8355_v59 = vadd.f32 %v18470_v12, %v8354_v50 }
 0xba8   :  { %v8626_v60 = vpop.f32.mrf.mxu3 }
 0xba9   :  { %v18731_v8 = vadd.f32 %v8626_v60, %v18301_v51  ;;  %12754 = vmatmul.msk.bf16.gmra.mxu0 %vm228_vm0, %v8773_v55  ;;  %v9015_v51 = vmax.f32 %v8900_v45, 0.0  ;;  %v8443_v14 = vmax.f32 %v8355_v59, 0.0 }
 0xbaa   :  { %v8111_v39 = vpop.f32.mrf.mxu1 }
 0xbae   :  { %v8356_v54 = vpop.f32.mrf.mxu2  ;;  %v8901_v25 = vpop.f32.mrf.mxu0 }
 0xbaf   :  { %v8357_v17 = vadd.f32 %v18482_v27, %v8356_v54  ;;  %v8902_v40 = vadd.f32 %v18482_v27, %v8901_v25  ;;  %v8775_v54 = vpop.permute.xlu2 %8774 }
 0xbb0   :  { %v8628_v5 = vpop.f32.mrf.mxu3 }
 0xbb1   :  { %v8444_v37 = vmax.f32 %v8357_v17, 0.0  ;;  %v18744_v55 = vadd.f32 %v8628_v5, %v18318_v26  ;;  %v9016_v60 = vmax.f32 %v8902_v40, 0.0  ;;  %v18753_v5 = vpop.permute.xlu1 %9364 }
 0xbb2   :  { %v8113_v50 = vpop.f32.mrf.mxu1 }
 0xbb3   :  { %v8481_v38 = vpack.c.bf16 %v8444_v37, %v8443_v14  ;;  %12690 = vmatmul.msk.bf16.gmra.mxu2 %vm228_vm0, %v18513_v33  ;;  %v9062_v4 = vpack.c.bf16 %v9016_v60, %v9015_v51 }
 0xbb5   :  { %12730 = vmatmul.msk.bf16.gmra.mxu3 %vm888_vm1, %v8481_v38  ;;  %12795 = vmatmul.msk.bf16.gmra.mxu1 %vm888_vm1, %v9062_v4 }
 0xbb6   :  { %v8359_v39 = vpop.f32.mrf.mxu2  ;;  %v8904_v45 = vpop.f32.mrf.mxu0 }
 0xbb7   :  { %v8905_v26 = vadd.f32 %v18470_v12, %v8904_v45  ;;  %v8360_v17 = vadd.f32 %v18470_v12, %v8359_v39 }
 0xbb8   :  { %v8631_v25 = vpop.f32.mrf.mxu3 }
 0xbb9   :  { %12755 = vmatmul.msk.bf16.gmra.mxu0 %vm228_vm0, %v8775_v54  ;;  %v9017_v14 = vmax.f32 %v8905_v26, 0.0  ;;  %v8445_v38 = vmax.f32 %v8360_v17, 0.0 }
 0xbba   :  { %v8114_v59 = vpop.f32.mrf.mxu1 }
 0xbbe   :  { %v8361_v33 = vpop.f32.mrf.mxu2  ;;  %v8906_v40 = vpop.f32.mrf.mxu0 }
 0xbbf   :  { %v8362_v51 = vadd.f32 %v18482_v27, %v8361_v33  ;;  %v8907_v60 = vadd.f32 %v18482_v27, %v8906_v40  ;;  %v8777_v33 = vpop.permute.xlu1 %8776  ;;  %v18767_v40 = vpop.permute.xlu0 %9366 }
 0xbc0   :  { %v8632_v37 = vpop.f32.mrf.mxu3 }
 0xbc1   :  { %v8446_v50 = vmax.f32 %v8362_v51, 0.0  ;;  %v9018_v4 = vmax.f32 %v8907_v60, 0.0 }
 0xbc2   :  { %v8116_v45 = vpop.f32.mrf.mxu1 }
 0xbc3   :  { %v8482_v25 = vpack.c.bf16 %v8446_v50, %v8445_v38  ;;  %12691 = vmatmul.msk.bf16.gmra.mxu2 %vm228_vm0, %v18499_v56  ;;  %v9063_v54 = vpack.c.bf16 %v9018_v4, %v9017_v14 }
 0xbc5   :  { %12731 = vmatmul.msk.bf16.gmra.mxu3 %vm888_vm1, %v8482_v25  ;;  %12796 = vmatmul.msk.bf16.gmra.mxu1 %vm888_vm1, %v9063_v54 }
 0xbc6   :  { %v8364_v39 = vpop.f32.mrf.mxu2  ;;  %v8909_v59 = vpop.f32.mrf.mxu0 }
 0xbc7   :  { %v8910_v51 = vadd.f32 %v18470_v12, %v8909_v59  ;;  %v8365_v56 = vadd.f32 %v18470_v12, %v8364_v39 }
 0xbc8   :  { %v8634_v26 = vpop.f32.mrf.mxu3 }
 0xbc9   :  { %v18762_v37 = vadd.f32 %v8634_v26, %v18363_v42  ;;  %12756 = vmatmul.msk.bf16.gmra.mxu0 %vm228_vm0, %v8777_v33  ;;  %v9019_v50 = vmax.f32 %v8910_v51, 0.0  ;;  %v8447_v45 = vmax.f32 %v8365_v56, 0.0 }
 0xbca   :  { %v8117_v17 = vpop.f32.mrf.mxu1 }
 0xbce   :  { %v8366_v14 = vpop.f32.mrf.mxu2  ;;  %v8911_v38 = vpop.f32.mrf.mxu0 }
 0xbcf   :  { %v8367_v60 = vadd.f32 %v18482_v27, %v8366_v14  ;;  %v8912_v25 = vadd.f32 %v18482_v27, %v8911_v38  ;;  %v8779_v14 = vpop.permute.xlu0 %8778 }
 0xbd0   :  { %v8636_v4 = vpop.f32.mrf.mxu3 }
 0xbd1   :  { %v8448_v42 = vmax.f32 %v8367_v60, 0.0  ;;  %v18772_v54 = vadd.f32 %v8636_v4, %v18381_v58  ;;  %v9020_v33 = vmax.f32 %v8912_v25, 0.0  ;;  %v18784_v4 = vpop.permute.xlu2 %9368 }
 0xbd2   :  { %v8119_v39 = vpop.f32.mrf.mxu1 }
 0xbd3   :  { %v8483_v26 = vpack.c.bf16 %v8448_v42, %v8447_v45  ;;  %12692 = vmatmul.msk.bf16.gmra.mxu2 %vm228_vm0, %v18477_v63  ;;  %v9064_v59 = vpack.c.bf16 %v9020_v33, %v9019_v50 }
 0xbd5   :  { %12732 = vmatmul.msk.bf16.gmra.mxu3 %vm888_vm1, %v8483_v26  ;;  %12797 = vmatmul.msk.bf16.gmra.mxu1 %vm888_vm1, %v9064_v59 }
 0xbd6   :  { %v8369_v17 = vpop.f32.mrf.mxu2  ;;  %v8914_v51 = vpop.f32.mrf.mxu0 }
 0xbd7   :  { %v8915_v60 = vadd.f32 %v18470_v12, %v8914_v51  ;;  %v8370_v63 = vadd.f32 %v18470_v12, %v8369_v17 }
 0xbd8   :  { %v8639_v38 = vpop.f32.mrf.mxu3 }
 0xbd9   :  { %v18779_v56 = vadd.f32 %v8639_v38, %v18398_v49  ;;  %12757 = vmatmul.msk.bf16.gmra.mxu0 %vm228_vm0, %v8779_v14  ;;  %v9021_v42 = vmax.f32 %v8915_v60, 0.0  ;;  %v8449_v39 = vmax.f32 %v8370_v63, 0.0 }
 0xbda   :  { %v8120_v58 = vpop.f32.mrf.mxu1 }
 0xbde   :  { %v8371_v50 = vpop.f32.mrf.mxu2  ;;  %v8916_v45 = vpop.f32.mrf.mxu0 }
 0xbdf   :  { %v8372_v25 = vadd.f32 %v18482_v27, %v8371_v50  ;;  %v8917_v26 = vadd.f32 %v18482_v27, %v8916_v45  ;;  %v8781_v50 = vpop.permute.xlu2 %8780 }
 0xbe0   :  { %v8641_v33 = vpop.f32.mrf.mxu3 }
 0xbe1   :  { %v8450_v49 = vmax.f32 %v8372_v25, 0.0  ;;  %v18789_v59 = vadd.f32 %v8641_v33, %v18421_v35  ;;  %v9022_v14 = vmax.f32 %v8917_v26, 0.0  ;;  %v18801_v33 = vpop.permute.xlu1 %9370 }
 0xbe2   :  { %v8122_v17 = vpop.f32.mrf.mxu1 }
 0xbe3   :  { %v8484_v38 = vpack.c.bf16 %v8450_v49, %v8449_v39  ;;  %12693 = vmatmul.msk.bf16.gmra.mxu2 %vm228_vm0, %v18532_v34  ;;  %v9065_v51 = vpack.c.bf16 %v9022_v14, %v9021_v42 }
 0xbe5   :  { %12733 = vmatmul.msk.bf16.gmra.mxu3 %vm888_vm1, %v8484_v38  ;;  %12798 = vmatmul.msk.bf16.gmra.mxu1 %vm888_vm1, %v9065_v51 }
 0xbe6   :  { %v8374_v58 = vpop.f32.mrf.mxu2  ;;  %v8919_v60 = vpop.f32.mrf.mxu0 }
 0xbe7   :  { %v8920_v25 = vadd.f32 %v18470_v12, %v8919_v60  ;;  %v8375_v34 = vadd.f32 %v18470_v12, %v8374_v58 }
 0xbe8   :  { %v8644_v45 = vpop.f32.mrf.mxu3 }
 0xbe9   :  { %v18796_v63 = vadd.f32 %v8644_v45, %v18442_v32  ;;  %12758 = vmatmul.msk.bf16.gmra.mxu0 %vm228_vm0, %v8781_v50  ;;  %v9023_v49 = vmax.f32 %v8920_v25, 0.0  ;;  %v8451_v17 = vmax.f32 %v8375_v34, 0.0 }
 0xbea   :  { %v8123_v35 = vpop.f32.mrf.mxu1 }
 0xbee   :  { %v8376_v42 = vpop.f32.mrf.mxu2  ;;  %v8921_v39 = vpop.f32.mrf.mxu0 }
 0xbef   :  { %v8377_v26 = vadd.f32 %v18482_v27, %v8376_v42  ;;  %v8922_v38 = vadd.f32 %v18482_v27, %v8921_v39  ;;  %v8783_v42 = vpop.permute.xlu1 %8782 }
 0xbf0   :  { %v8646_v14 = vpop.f32.mrf.mxu3 }
 0xbf1   :  { %v8452_v32 = vmax.f32 %v8377_v26, 0.0  ;;  %v18806_v51 = vadd.f32 %v8646_v14, %v18474_v24  ;;  %v9024_v50 = vmax.f32 %v8922_v38, 0.0  ;;  %v18818_v14 = vpop.permute.xlu0 %9372 }
 0xbf2   :  { %v8125_v58 = vpop.f32.mrf.mxu1  ;;  %19821 = vst [vmem:[#allocation10_spill] sm:$0xff] %v18818_v14 }
 0xbf3   :  { %v8485_v45 = vpack.c.bf16 %v8452_v32, %v8451_v17  ;;  %12817 = vmatmul.msk.bf16.vlgmr.msrb.gmra.mxu2 %vm228_vm0, %v18521_v1  ;;  %v9066_v60 = vpack.c.bf16 %v9024_v50, %v9023_v49 }
 0xbf5   :  { %12734 = vmatmul.msk.bf16.gmra.mxu3 %vm888_vm1, %v8485_v45  ;;  %12799 = vmatmul.msk.bf16.gmra.mxu1 %vm888_vm1, %v9066_v60 }
 0xbf6   :  { %v8379_v35 = vpop.f32.mrf.mxu2  ;;  %v8924_v25 = vpop.f32.mrf.mxu0 }
 0xbf7   :  { %v8925_v26 = vadd.f32 %v18470_v12, %v8924_v25  ;;  %v8380_v1 = vadd.f32 %v18470_v12, %v8379_v35  ;;  %v19822_v25 = vld [vmem:[#allocation8_spill] sm:$0xff] }
 0xbf8   :  { %v8649_v39 = vpop.f32.mrf.mxu3 }
 0xbf9   :  { %v18813_v34 = vadd.f32 %v8649_v39, %v18502_v7  ;;  %12759 = vmatmul.msk.bf16.gmra.mxu0 %vm228_vm0, %v8783_v42  ;;  %v9025_v32 = vmax.f32 %v8925_v26, 0.0  ;;  %v8453_v58 = vmax.f32 %v8380_v1, 0.0 }
 0xbfa   :  { %v8126_v24 = vpop.f32.mrf.mxu1 }
 0xbfe   :  { %v8381_v49 = vpop.f32.mrf.mxu2  ;;  %v8926_v17 = vpop.f32.mrf.mxu0 }
 0xbff   :  { %v8382_v38 = vadd.f32 %v18482_v27, %v8381_v49  ;;  %v8927_v45 = vadd.f32 %v18482_v27, %v8926_v17  ;;  %v8785_v49 = vpop.permute.xlu0 %8784 }
 0xc00   :  { %v8651_v50 = vpop.f32.mrf.mxu3 }
 0xc01   :  { %v8454_v7 = vmax.f32 %v8382_v38, 0.0  ;;  %v18823_v60 = vadd.f32 %v8651_v50, %v18518_v36  ;;  %v9026_v42 = vmax.f32 %v8927_v45, 0.0  ;;  %v18841_v45 = vpop.permute.xlu2 %9374 }
 0xc02   :  { %v9201_v35 = vpop.f32.mrf.mxu1 }
 0xc03   :  { %v8486_v39 = vpack.c.bf16 %v8454_v7, %v8453_v58  ;;  %12818 = vmatmul.msk.bf16.gmra.mxu2 %vm228_vm0, %v19822_v25  ;;  %v9067_v24 = vpack.c.bf16 %v9026_v42, %v9025_v32  ;;  %v18828_v14 = vadd.f32 %v9201_v35, %v18665_v61  ;;  %v13574_v61 = vld [vmem:[%s19701_s2 + $0x1e0] sm:$0xff] }
 0xc04   :  { %9789 = vmatpush.bf16.msrb.mxu3 %v13574_v61 }
 0xc05   :  { %12735 = vmatmul.msk.bf16.gmra.mxu3 %vm888_vm1, %v8486_v39  ;;  %12800 = vmatmul.msk.bf16.gmra.mxu1 %vm888_vm1, %v9067_v24 }
 0xc06   :  { %v8384_v26 = vpop.f32.mrf.mxu2  ;;  %v8929_v1 = vpop.f32.mrf.mxu0 }
 0xc07   :  { %v8930_v17 = vadd.f32 %v18470_v12, %v8929_v1  ;;  %v8385_v32 = vadd.f32 %v18470_v12, %v8384_v26 }
 0xc08   :  { %v8654_v38 = vpop.f32.mrf.mxu3 }
 0xc09   :  { %12760 = vmatmul.msk.bf16.gmra.mxu0 %vm228_vm0, %v8785_v49  ;;  %v9027_v39 = vmax.f32 %v8930_v17, 0.0  ;;  %v8455_v24 = vmax.f32 %v8385_v32, 0.0  ;;  %v8787_v61 = vpop.permute.xlu2 %8786 }
 0xc0a   :  { %v9203_v36 = vpop.f32.mrf.mxu1 }
 0xc0b   :  { %v18835_v50 = vadd.f32 %v9203_v36, %v18678_v18 }
 0xc0e   :  { %v8386_v58 = vpop.f32.mrf.mxu2  ;;  %v8931_v42 = vpop.f32.mrf.mxu0 }
 0xc0f   :  { %v8387_v7 = vadd.f32 %v18482_v27, %v8386_v58  ;;  %v8932_v35 = vadd.f32 %v18482_v27, %v8931_v42 }
 0xc10   :  { %v8655_v25 = vpop.f32.mrf.mxu3 }
 0xc11   :  { %v8456_v18 = vmax.f32 %v8387_v7, 0.0  ;;  %v9028_v1 = vmax.f32 %v8932_v35, 0.0 }
 0xc12   :  { %v9206_v38 = vpop.f32.mrf.mxu1 }
 0xc13   :  { %v8487_v49 = vpack.c.bf16 %v8456_v18, %v8455_v24  ;;  %12819 = vmatmul.msk.bf16.gmra.mxu2 %vm228_vm0, %v18562_v3  ;;  %v9068_v12 = vpack.c.bf16 %v9028_v1, %v9027_v39  ;;  %v18848_v26 = vadd.f32 %v9206_v38, %v18688_v62  ;;  %v18859_v3 = vld [vmem:[%s19702_s5] sm:$0xff]  ;;  %v18866_v39 = vpop.permute.xlu1 %9376 }
 0xc15   :  { %12736 = vmatmul.msk.bf16.gmra.mxu3 %vm888_vm1, %v8487_v49  ;;  %12801 = vmatmul.msk.bf16.gmra.mxu1 %vm888_vm1, %v9068_v12 }
 0xc16   :  { %v8389_v36 = vpop.f32.mrf.mxu2  ;;  %v8934_v17 = vpop.f32.mrf.mxu0 }
 0xc17   :  { %v8935_v62 = vadd.f32 %v18859_v3, %v8934_v17  ;;  %v8390_v42 = vadd.f32 %v18859_v3, %v8389_v36 }
 0xc18   :  { %v8657_v27 = vpop.f32.mrf.mxu3 }
 0xc19   :  { %v18853_v32 = vadd.f32 %v8657_v27, %v18552_v15  ;;  %12761 = vmatmul.msk.bf16.gmra.mxu0 %vm228_vm0, %v8787_v61  ;;  %v18871_v15 = vld [vmem:[%s19702_s5 + $0x8] sm:$0xff]  ;;  %v9029_v18 = vmax.f32 %v8935_v62, 0.0  ;;  %v8457_v38 = vmax.f32 %v8390_v42, 0.0 }
 0xc1a   :  { %v9208_v58 = vpop.f32.mrf.mxu1 }
 0xc1b   :  { %v18863_v7 = vadd.f32 %v9208_v58, %v18701_v28 }
 0xc1e   :  { %v8391_v25 = vpop.f32.mrf.mxu2  ;;  %v8936_v24 = vpop.f32.mrf.mxu0 }
 0xc1f   :  { %v8392_v35 = vadd.f32 %v18871_v15, %v8391_v25  ;;  %v8937_v49 = vadd.f32 %v18871_v15, %v8936_v24  ;;  %v8789_v25 = vpop.permute.xlu1 %8788 }
 0xc20   :  { %v8659_v1 = vpop.f32.mrf.mxu3 }
 0xc21   :  { %v8458_v28 = vmax.f32 %v8392_v35, 0.0  ;;  %v18876_v12 = vadd.f32 %v8659_v1, %v18559_v0  ;;  %v9030_v36 = vmax.f32 %v8937_v49, 0.0  ;;  %v18894_v1 = vpop.permute.xlu0 %9378 }
 0xc22   :  { %v9211_v61 = vpop.f32.mrf.mxu1 }
 0xc23   :  { %v8488_v17 = vpack.c.bf16 %v8458_v28, %v8457_v38  ;;  %12820 = vmatmul.msk.bf16.gmra.mxu2 %vm228_vm0, %v18579_v48  ;;  %v9069_v27 = vpack.c.bf16 %v9030_v36, %v9029_v18  ;;  %v18881_v58 = vadd.f32 %v9211_v61, %v18711_v29 }
 0xc25   :  { %12737 = vmatmul.msk.bf16.gmra.mxu3 %vm888_vm1, %v8488_v17  ;;  %12802 = vmatmul.msk.bf16.gmra.mxu1 %vm888_vm1, %v9069_v27 }
 0xc26   :  { %v8394_v62 = vpop.f32.mrf.mxu2  ;;  %v8939_v42 = vpop.f32.mrf.mxu0 }
 0xc27   :  { %v8940_v48 = vadd.f32 %v18859_v3, %v8939_v42  ;;  %v8395_v29 = vadd.f32 %v18859_v3, %v8394_v62 }
 0xc28   :  { %v8662_v35 = vpop.f32.mrf.mxu3 }
 0xc29   :  { %v18886_v0 = vadd.f32 %v8662_v35, %v18569_v44  ;;  %12762 = vmatmul.msk.bf16.gmra.mxu0 %vm228_vm0, %v8789_v25  ;;  %v9031_v36 = vmax.f32 %v8940_v48, 0.0  ;;  %v8459_v61 = vmax.f32 %v8395_v29, 0.0 }
 0xc2a   :  { %v9213_v24 = vpop.f32.mrf.mxu1 }
 0xc2b   :  { %v18891_v18 = vadd.f32 %v9213_v24, %v18724_v46 }
 0xc2e   :  { %v8396_v49 = vpop.f32.mrf.mxu2  ;;  %v8941_v28 = vpop.f32.mrf.mxu0 }
 0xc2f   :  { %v8397_v38 = vadd.f32 %v18871_v15, %v8396_v49  ;;  %v8942_v44 = vadd.f32 %v18871_v15, %v8941_v28  ;;  %v8791_v49 = vpop.permute.xlu0 %8790 }
 0xc30   :  { %v8664_v17 = vpop.f32.mrf.mxu3 }
 0xc31   :  { %v8460_v27 = vmax.f32 %v8397_v38, 0.0  ;;  %v18899_v25 = vadd.f32 %v8664_v17, %v18576_v23  ;;  %v9032_v42 = vmax.f32 %v8942_v44, 0.0  ;;  %v18917_v17 = vpop.permute.xlu2 %9380 }
 0xc32   :  { %v9216_v62 = vpop.f32.mrf.mxu1 }
 0xc33   :  { %v8489_v46 = vpack.c.bf16 %v8460_v27, %v8459_v61  ;;  %12821 = vmatmul.msk.bf16.gmra.mxu2 %vm228_vm0, %v18596_v41  ;;  %v9070_v35 = vpack.c.bf16 %v9032_v42, %v9031_v36  ;;  %v18904_v24 = vadd.f32 %v9216_v62, %v18731_v8 }
 0xc35   :  { %12738 = vmatmul.msk.bf16.gmra.mxu3 %vm888_vm1, %v8489_v46  ;;  %12803 = vmatmul.msk.bf16.gmra.mxu1 %vm888_vm1, %v9070_v35 }
 0xc36   :  { %v8399_v48 = vpop.f32.mrf.mxu2  ;;  %v8944_v29 = vpop.f32.mrf.mxu0 }
 0xc37   :  { %v8945_v41 = vadd.f32 %v18859_v3, %v8944_v29  ;;  %v8400_v8 = vadd.f32 %v18859_v3, %v8399_v48 }
 0xc38   :  { %v8667_v38 = vpop.f32.mrf.mxu3 }
 0xc39   :  { %v18909_v23 = vadd.f32 %v8667_v38, %v18586_v9  ;;  %12763 = vmatmul.msk.bf16.gmra.mxu0 %vm228_vm0, %v8791_v49  ;;  %v9033_v42 = vmax.f32 %v8945_v41, 0.0  ;;  %v8461_v62 = vmax.f32 %v8400_v8, 0.0 }
 0xc3a   :  { %v9218_v28 = vpop.f32.mrf.mxu1 }
 0xc3b   :  { %v18914_v36 = vadd.f32 %v9218_v28, %v18744_v55 }
 0xc3e   :  { %v8401_v44 = vpop.f32.mrf.mxu2  ;;  %v8946_v27 = vpop.f32.mrf.mxu0 }
 0xc3f   :  { %v8402_v61 = vadd.f32 %v18871_v15, %v8401_v44  ;;  %v8947_v9 = vadd.f32 %v18871_v15, %v8946_v27  ;;  %v8793_v44 = vpop.permute.xlu2 %8792 }
 0xc40   :  { %v8669_v46 = vpop.f32.mrf.mxu3 }
 0xc41   :  { %v8462_v35 = vmax.f32 %v8402_v61, 0.0  ;;  %v18922_v49 = vadd.f32 %v8669_v46, %v18593_v16  ;;  %v9034_v29 = vmax.f32 %v8947_v9, 0.0  ;;  %v18934_v46 = vpop.permute.xlu1 %9382 }
 0xc42   :  { %v9221_v48 = vpop.f32.mrf.mxu1 }
 0xc43   :  { %v8490_v55 = vpack.c.bf16 %v8462_v35, %v8461_v62  ;;  %12822 = vmatmul.msk.bf16.gmra.mxu2 %vm228_vm0, %v18619_v53  ;;  %v9071_v38 = vpack.c.bf16 %v9034_v29, %v9033_v42 }
 0xc45   :  { %12739 = vmatmul.msk.bf16.gmra.mxu3 %vm888_vm1, %v8490_v55  ;;  %12804 = vmatmul.msk.bf16.gmra.mxu1 %vm888_vm1, %v9071_v38 }
 0xc46   :  { %v8404_v28 = vpop.f32.mrf.mxu2  ;;  %v8949_v41 = vpop.f32.mrf.mxu0 }
 0xc47   :  { %v8950_v61 = vadd.f32 %v18859_v3, %v8949_v41  ;;  %v8405_v53 = vadd.f32 %v18859_v3, %v8404_v28 }
 0xc48   :  { %v8672_v27 = vpop.f32.mrf.mxu3 }
 0xc49   :  { %v18929_v8 = vadd.f32 %v8672_v27, %v18603_v43  ;;  %12764 = vmatmul.msk.bf16.gmra.mxu0 %vm228_vm0, %v8793_v44  ;;  %v9035_v35 = vmax.f32 %v8950_v61, 0.0  ;;  %v8463_v48 = vmax.f32 %v8405_v53, 0.0 }
 0xc4a   :  { %v9222_v16 = vpop.f32.mrf.mxu1 }
 0xc4e   :  { %v8406_v42 = vpop.f32.mrf.mxu2  ;;  %v8951_v62 = vpop.f32.mrf.mxu0 }
 0xc4f   :  { %v8407_v9 = vadd.f32 %v18871_v15, %v8406_v42  ;;  %v8952_v55 = vadd.f32 %v18871_v15, %v8951_v62  ;;  %v8795_v42 = vpop.permute.xlu1 %8794 }
 0xc50   :  { %v8674_v29 = vpop.f32.mrf.mxu3 }
 0xc51   :  { %v8464_v43 = vmax.f32 %v8407_v9, 0.0  ;;  %v18939_v38 = vadd.f32 %v8674_v29, %v18616_v57  ;;  %v9036_v44 = vmax.f32 %v8952_v55, 0.0 }
 0xc52   :  { %v9224_v28 = vpop.f32.mrf.mxu1 }
 0xc53   :  { %v8491_v27 = vpack.c.bf16 %v8464_v43, %v8463_v48  ;;  %12823 = vmatmul.msk.bf16.gmra.mxu2 %vm228_vm0, %v18630_v47  ;;  %v9072_v41 = vpack.c.bf16 %v9036_v44, %v9035_v35  ;;  %v18944_v16 = vadd.f32 %v9224_v28, %v18762_v37  ;;  %v18954_v37 = vpop.permute.xlu0 %9384 }
 0xc55   :  { %12740 = vmatmul.msk.bf16.gmra.mxu3 %vm888_vm1, %v8491_v27  ;;  %12805 = vmatmul.msk.bf16.gmra.mxu1 %vm888_vm1, %v9072_v41 }
 0xc56   :  { %v8409_v61 = vpop.f32.mrf.mxu2  ;;  %v8954_v53 = vpop.f32.mrf.mxu0 }
 0xc57   :  { %v8955_v62 = vadd.f32 %v18859_v3, %v8954_v53  ;;  %v8410_v35 = vadd.f32 %v18859_v3, %v8409_v61 }
 0xc58   :  { %v8677_v9 = vpop.f32.mrf.mxu3 }
 0xc59   :  { %12765 = vmatmul.msk.bf16.gmra.mxu0 %vm228_vm0, %v8795_v42  ;;  %v9037_v43 = vmax.f32 %v8955_v62, 0.0  ;;  %v8465_v28 = vmax.f32 %v8410_v35, 0.0 }
 0xc5a   :  { %v9226_v57 = vpop.f32.mrf.mxu1 }
 0xc5b   :  { %v18951_v47 = vadd.f32 %v9226_v57, %v18772_v54 }
 0xc5e   :  { %v8411_v29 = vpop.f32.mrf.mxu2  ;;  %v8956_v48 = vpop.f32.mrf.mxu0 }
 0xc5f   :  { %v8412_v55 = vadd.f32 %v18871_v15, %v8411_v29  ;;  %v8957_v27 = vadd.f32 %v18871_v15, %v8956_v48  ;;  %v8797_v29 = vpop.permute.xlu0 %8796 }
 0xc60   :  { %v8678_v44 = vpop.f32.mrf.mxu3 }
 0xc61   :  { %v8466_v41 = vmax.f32 %v8412_v55, 0.0  ;;  %v9038_v42 = vmax.f32 %v8957_v27, 0.0  ;;  %v18974_v44 = vpop.permute.xlu2 %9386 }
 0xc62   :  { %v9229_v54 = vpop.f32.mrf.mxu1 }
 0xc63   :  { %v8492_v9 = vpack.c.bf16 %v8466_v41, %v8465_v28  ;;  %12824 = vmatmul.msk.bf16.gmra.mxu2 %vm228_vm0, %v18653_v22  ;;  %v9073_v53 = vpack.c.bf16 %v9038_v42, %v9037_v43  ;;  %v18961_v61 = vadd.f32 %v9229_v54, %v18779_v56 }
 0xc65   :  { %12741 = vmatmul.msk.bf16.gmra.mxu3 %vm888_vm1, %v8492_v9  ;;  %12806 = vmatmul.msk.bf16.gmra.mxu1 %vm888_vm1, %v9073_v53 }
 0xc66   :  { %v8414_v57 = vpop.f32.mrf.mxu2  ;;  %v8959_v62 = vpop.f32.mrf.mxu0 }
 0xc67   :  { %v8960_v22 = vadd.f32 %v18859_v3, %v8959_v62  ;;  %v8415_v56 = vadd.f32 %v18859_v3, %v8414_v57 }
 0xc68   :  { %v8680_v48 = vpop.f32.mrf.mxu3 }
 0xc69   :  { %v18966_v35 = vadd.f32 %v8680_v48, %v18643_v52  ;;  %12766 = vmatmul.msk.bf16.gmra.mxu0 %vm228_vm0, %v8797_v29  ;;  %v9039_v42 = vmax.f32 %v8960_v22, 0.0  ;;  %v8467_v54 = vmax.f32 %v8415_v56, 0.0  ;;  %v13601_v48 = vld [vmem:[%s19703_s3 + $0xb8] sm:$0xff] }
 0xc6a   :  { %v9231_v55 = vpop.f32.mrf.mxu1  ;;  %v13585_v56 = vld [vmem:[%s19703_s3 + $0x38] sm:$0xff]  ;;  %11064 = vmatpush.bf16.msra.mxu2 %v13601_v48 }
 0xc6b   :  { %v18971_v43 = vadd.f32 %v9231_v55, %v18789_v59  ;;  %11036 = vmatpush.bf16.msra.mxu0 %v13585_v56 }
 0xc6e   :  { %v8416_v27 = vpop.f32.mrf.mxu2  ;;  %v8961_v41 = vpop.f32.mrf.mxu0 }
 0xc6f   :  { %v8417_v28 = vadd.f32 %v18871_v15, %v8416_v27  ;;  %v8962_v52 = vadd.f32 %v18871_v15, %v8961_v41 }
 0xc70   :  { %v8682_v9 = vpop.f32.mrf.mxu3 }
 0xc71   :  { %v8468_v53 = vmax.f32 %v8417_v28, 0.0  ;;  %v18979_v29 = vadd.f32 %v8682_v9, %v18650_v19  ;;  %v9040_v62 = vmax.f32 %v8962_v52, 0.0  ;;  %v13609_v19 = vld [vmem:[%s19703_s3 + $0xf8] sm:$0xff]  ;;  %v8799_v28 = vpop.permute.xlu2 %8798 }
 0xc72   :  { %v9234_v57 = vpop.f32.mrf.mxu1  ;;  %11078 = vmatpush.bf16.msra.mxu3 %v13609_v19 }
 0xc73   :  { %v8493_v59 = vpack.c.bf16 %v8468_v53, %v8467_v54  ;;  %12825 = vmatmul.msk.bf16.gmra.mxu2 %vm228_vm0, %v18673_v11  ;;  %v9074_v55 = vpack.c.bf16 %v9040_v62, %v9039_v42  ;;  %v18987_v22 = vadd.f32 %v9234_v57, %v18796_v63  ;;  %v13593_v11 = vld [vmem:[%s19703_s3 + $0x78] sm:$0xff] }
 0xc74   :  { %11050 = vmatpush.bf16.msra.mxu1 %v13593_v11  ;;  %v19823_v11 = vld [vmem:[#allocation7_spill] sm:$0xff] }
 0xc75   :  { %12742 = vmatmul.msk.bf16.gmra.mxu3 %vm888_vm1, %v8493_v59  ;;  %12807 = vmatmul.msk.bf16.gmra.mxu1 %vm888_vm1, %v9074_v55 }
 0xc76   :  { %v9474_v27 = vpop.f32.mrf.mxu2  ;;  %v8964_v63 = vpop.f32.mrf.mxu0 }
 0xc77   :  { %v8965_v52 = vadd.f32 %v18859_v3, %v8964_v63  ;;  %v9475_v53 = vadd.f32 %v18859_v3, %v9474_v27 }
 0xc78   :  { %v8685_v41 = vpop.f32.mrf.mxu3 }
 0xc79   :  { %v19001_v42 = vadd.f32 %v8685_v41, %v18660_v2  ;;  %12767 = vmatmul.msk.bf16.gmra.mxu0 %vm228_vm0, %v8799_v28  ;;  %v9041_v48 = vmax.f32 %v8965_v52, 0.0  ;;  %v9599_v2 = vmax.f32 %v9475_v53, 0.0 }
 0xc7a   :  { %v9236_v9 = vpop.f32.mrf.mxu1 }
 0xc7b   :  { %v19006_v54 = vadd.f32 %v9236_v9, %v18806_v51 }
 0xc7e   :  { %v9476_v62 = vpop.f32.mrf.mxu2  ;;  %v8966_v57 = vpop.f32.mrf.mxu0 }
 0xc7f   :  { %v9477_v59 = vadd.f32 %v18871_v15, %v9476_v62  ;;  %v8967_v56 = vadd.f32 %v18871_v15, %v8966_v57 }
 0xc80   :  { %v8687_v55 = vpop.f32.mrf.mxu3 }
 0xc81   :  { %v9600_v19 = vmax.f32 %v9477_v59, 0.0  ;;  %v19012_v28 = vadd.f32 %v8687_v55, %v19823_v11  ;;  %v9042_v41 = vmax.f32 %v8967_v56, 0.0 }
 0xc82   :  { %v9239_v51 = vpop.f32.mrf.mxu1 }
 0xc83   :  { %v9649_v63 = vpack.c.bf16 %v9600_v19, %v9599_v2  ;;  %12826 = vmatmul.msk.bf16.gmra.mxu2 %vm228_vm0, %v18696_v20  ;;  %v9075_v27 = vpack.c.bf16 %v9042_v41, %v9041_v48  ;;  %v19017_v9 = vadd.f32 %v9239_v51, %v18813_v34 }
 0xc85   :  { %12866 = vmatmul.msk.bf16.vlgmr.msrb.gmra.mxu3 %vm888_vm1, %v9649_v63  ;;  %12808 = vmatmul.msk.bf16.gmra.mxu1 %vm888_vm1, %v9075_v27 }
 0xc86   :  { %v9479_v52 = vpop.f32.mrf.mxu2  ;;  %v8969_v53 = vpop.f32.mrf.mxu0 }
 0xc87   :  { %v8970_v55 = vadd.f32 %v18859_v3, %v8969_v53  ;;  %v9480_v48 = vadd.f32 %v18859_v3, %v9479_v52 }
 0xc88   :  { %v8690_v62 = vpop.f32.mrf.mxu3 }
 0xc89   :  { %v19022_v59 = vadd.f32 %v8690_v62, %v18683_v10  ;;  %v9043_v19 = vmax.f32 %v8970_v55, 0.0  ;;  %v9601_v63 = vmax.f32 %v9480_v48, 0.0 }
 0xc8a   :  { %v9241_v57 = vpop.f32.mrf.mxu1 }
 0xc8b   :  { %v19026_v20 = vadd.f32 %v9241_v57, %v18823_v60 }
 0xc8e   :  { %v9481_v34 = vpop.f32.mrf.mxu2  ;;  %v8971_v2 = vpop.f32.mrf.mxu0 }
 0xc8f   :  { %v9482_v56 = vadd.f32 %v18871_v15, %v9481_v34  ;;  %v8972_v41 = vadd.f32 %v18871_v15, %v8971_v2 }
 0xc90   :  { %v8692_v11 = vpop.f32.mrf.mxu3 }
 0xc91   :  { %v9602_v51 = vmax.f32 %v9482_v56, 0.0  ;;  %v19032_v10 = vadd.f32 %v8692_v11, %v18693_v6  ;;  %v9044_v27 = vmax.f32 %v8972_v41, 0.0 }
 0xc92   :  { %v9244_v60 = vpop.f32.mrf.mxu1 }
 0xc93   :  { %v9650_v53 = vpack.c.bf16 %v9602_v51, %v9601_v63  ;;  %12827 = vmatmul.msk.bf16.gmra.mxu2 %vm228_vm0, %v18719_v21  ;;  %v9076_v52 = vpack.c.bf16 %v9044_v27, %v9043_v19 }
 0xc95   :  { %12867 = vmatmul.msk.bf16.gmra.mxu3 %vm888_vm1, %v9650_v53  ;;  %12809 = vmatmul.msk.bf16.gmra.mxu1 %vm888_vm1, %v9076_v52 }
 0xc96   :  { %v9484_v62 = vpop.f32.mrf.mxu2  ;;  %v8974_v57 = vpop.f32.mrf.mxu0 }
 0xc97   :  { %v8975_v6 = vadd.f32 %v18859_v3, %v8974_v57  ;;  %v9485_v56 = vadd.f32 %v18859_v3, %v9484_v62  ;;  %v13600_v62 = vld [vmem:[%s19703_s3 + $0xb0] sm:$0xff] }
 0xc98   :  { %v8695_v55 = vpop.f32.mrf.mxu3  ;;  %v13584_v57 = vld [vmem:[%s19703_s3 + $0x30] sm:$0xff]  ;;  %11065 = vmatpush.bf16.msra.mxu2 %v13600_v62 }
 0xc99   :  { %v19039_v48 = vadd.f32 %v8695_v55, %v18706_v31  ;;  %v9045_v19 = vmax.f32 %v8975_v6, 0.0  ;;  %v9603_v51 = vmax.f32 %v9485_v56, 0.0  ;;  %v13608_v55 = vld [vmem:[%s19703_s3 + $0xf0] sm:$0xff]  ;;  %11037 = vmatpush.bf16.msra.mxu0 %v13584_v57 }
 0xc9a   :  { %v9245_v34 = vpop.f32.mrf.mxu1  ;;  %11079 = vmatpush.bf16.msra.mxu3 %v13608_v55 }
 0xc9e   :  { %v9486_v2 = vpop.f32.mrf.mxu2  ;;  %v8976_v11 = vpop.f32.mrf.mxu0 }
 0xc9f   :  { %v9487_v21 = vadd.f32 %v18871_v15, %v9486_v2  ;;  %v8977_v63 = vadd.f32 %v18871_v15, %v8976_v11 }
 0xca0   :  { %v8697_v41 = vpop.f32.mrf.mxu3 }
 0xca1   :  { %v9604_v27 = vmax.f32 %v9487_v21, 0.0  ;;  %v19046_v53 = vadd.f32 %v8697_v41, %v18716_v30  ;;  %v9046_v31 = vmax.f32 %v8977_v63, 0.0 }
 0xca2   :  { %v9247_v52 = vpop.f32.mrf.mxu1 }
 0xca3   :  { %v9651_v60 = vpack.c.bf16 %v9604_v27, %v9603_v51  ;;  %12828 = vmatmul.msk.bf16.gmra.mxu2 %vm228_vm0, %v18739_v13  ;;  %v9077_v30 = vpack.c.bf16 %v9046_v31, %v9045_v19  ;;  %v19060_v34 = vadd.f32 %v9247_v52, %v18853_v32  ;;  %v13592_v13 = vld [vmem:[%s19703_s3 + $0x70] sm:$0xff] }
 0xca4   :  { %11051 = vmatpush.bf16.msra.mxu1 %v13592_v13 }
 0xca5   :  { %12868 = vmatmul.msk.bf16.gmra.mxu3 %vm888_vm1, %v9651_v60  ;;  %12810 = vmatmul.msk.bf16.gmra.mxu1 %vm888_vm1, %v9077_v30 }
 0xca6   :  { %v9489_v6 = vpop.f32.mrf.mxu2  ;;  %v8979_v56 = vpop.f32.mrf.mxu0 }
 0xca7   :  { %v8980_v32 = vadd.f32 %v18859_v3, %v8979_v56  ;;  %v9490_v19 = vadd.f32 %v18859_v3, %v9489_v6 }
 0xca8   :  { %v8700_v2 = vpop.f32.mrf.mxu3 }
 0xca9   :  { %v9047_v31 = vmax.f32 %v8980_v32, 0.0  ;;  %v9605_v52 = vmax.f32 %v9490_v19, 0.0 }
 0xcaa   :  { %v9249_v21 = vpop.f32.mrf.mxu1 }
 0xcab   :  { %v19068_v11 = vadd.f32 %v9249_v21, %v18876_v12 }
 0xcae   :  { %v9491_v41 = vpop.f32.mrf.mxu2  ;;  %v8981_v51 = vpop.f32.mrf.mxu0 }
 0xcaf   :  { %v9492_v63 = vadd.f32 %v18871_v15, %v9491_v41  ;;  %v8982_v60 = vadd.f32 %v18871_v15, %v8981_v51 }
 0xcb0   :  { %v8701_v27 = vpop.f32.mrf.mxu3 }
 0xcb1   :  { %v9606_v62 = vmax.f32 %v9492_v63, 0.0  ;;  %v9048_v57 = vmax.f32 %v8982_v60, 0.0 }
 0xcb2   :  { %v9252_v12 = vpop.f32.mrf.mxu1 }
 0xcb3   :  { %v9652_v55 = vpack.c.bf16 %v9606_v62, %v9605_v52  ;;  %12829 = vmatmul.msk.bf16.gmra.mxu2 %vm228_vm0, %v18753_v5  ;;  %v19077_v30 = vadd.f32 %v9252_v12, %v18886_v0  ;;  %v9078_v13 = vpack.c.bf16 %v9048_v57, %v9047_v31 }
 0xcb5   :  { %12869 = vmatmul.msk.bf16.gmra.mxu3 %vm888_vm1, %v9652_v55  ;;  %12811 = vmatmul.msk.bf16.gmra.mxu1 %vm888_vm1, %v9078_v13 }
 0xcb6   :  { %v9494_v6 = vpop.f32.mrf.mxu2  ;;  %v8984_v56 = vpop.f32.mrf.mxu0 }
 0xcb7   :  { %v8985_v19 = vadd.f32 %v18859_v3, %v8984_v56  ;;  %v9495_v5 = vadd.f32 %v18859_v3, %v9494_v6 }
 0xcb8   :  { %v8703_v2 = vpop.f32.mrf.mxu3 }
 0xcb9   :  { %v9049_v27 = vmax.f32 %v8985_v19, 0.0  ;;  %v9607_v60 = vmax.f32 %v9495_v5, 0.0 }
 0xcba   :  { %v9254_v21 = vpop.f32.mrf.mxu1 }
 0xcbb   :  { %v19082_v32 = vadd.f32 %v9254_v21, %v18899_v25 }
 0xcbe   :  { %v9496_v41 = vpop.f32.mrf.mxu2  ;;  %v8986_v63 = vpop.f32.mrf.mxu0 }
 0xcbf   :  { %v9497_v0 = vadd.f32 %v18871_v15, %v9496_v41  ;;  %v8987_v31 = vadd.f32 %v18871_v15, %v8986_v63 }
 0xcc0   :  { %v8704_v51 = vpop.f32.mrf.mxu3 }
 0xcc1   :  { %v9608_v52 = vmax.f32 %v9497_v0, 0.0  ;;  %v9050_v62 = vmax.f32 %v8987_v31, 0.0 }
 0xcc2   :  { %v9257_v25 = vpop.f32.mrf.mxu1 }
 0xcc3   :  { %v9653_v57 = vpack.c.bf16 %v9608_v52, %v9607_v60  ;;  %12830 = vmatmul.msk.bf16.gmra.mxu2 %vm228_vm0, %v18767_v40  ;;  %v19091_v55 = vadd.f32 %v9257_v25, %v18909_v23  ;;  %v9079_v12 = vpack.c.bf16 %v9050_v62, %v9049_v27  ;;  %v13599_v62 = vld [vmem:[%s19703_s3 + $0xa8] sm:$0xff] }
 0xcc4   :  { %11066 = vmatpush.bf16.msra.mxu2 %v13599_v62 }
 0xcc5   :  { %12870 = vmatmul.msk.bf16.gmra.mxu3 %vm888_vm1, %v9653_v57  ;;  %12812 = vmatmul.msk.bf16.gmra.mxu1 %vm888_vm1, %v9079_v12  ;;  %v13583_v12 = vld [vmem:[%s19703_s3 + $0x28] sm:$0xff] }
 0xcc6   :  { %v9499_v13 = vpop.f32.mrf.mxu2  ;;  %v8989_v6 = vpop.f32.mrf.mxu0  ;;  %11038 = vmatpush.bf16.msra.mxu0 %v13583_v12 }
 0xcc7   :  { %v8990_v19 = vadd.f32 %v18859_v3, %v8989_v6  ;;  %v9500_v40 = vadd.f32 %v18859_v3, %v9499_v13 }
 0xcc8   :  { %v8706_v56 = vpop.f32.mrf.mxu3 }
 0xcc9   :  { %v9051_v63 = vmax.f32 %v8990_v19, 0.0  ;;  %v9609_v27 = vmax.f32 %v9500_v40, 0.0  ;;  %v13591_v56 = vld [vmem:[%s19703_s3 + $0x68] sm:$0xff] }
 0xcca   :  { %v9259_v2 = vpop.f32.mrf.mxu1  ;;  %11052 = vmatpush.bf16.msra.mxu1 %v13591_v56  ;;  %v13580_v56 = vld [vmem:[%s19703_s3 + $0x10] sm:$0xff] }
 0xccb   :  { %v19096_v21 = vadd.f32 %v9259_v2, %v18922_v49 }
 0xcce   :  { %v9501_v5 = vpop.f32.mrf.mxu2  ;;  %v8991_v41 = vpop.f32.mrf.mxu0 }
 0xccf   :  { %v9502_v23 = vadd.f32 %v18871_v15, %v9501_v5  ;;  %v8992_v51 = vadd.f32 %v18871_v15, %v8991_v41 }
 0xcd0   :  { %v8707_v0 = vpop.f32.mrf.mxu3 }
 0xcd1   :  { %v9610_v31 = vmax.f32 %v9502_v23, 0.0  ;;  %v9052_v60 = vmax.f32 %v8992_v51, 0.0 }
 0xcd2   :  { %v9262_v49 = vpop.f32.mrf.mxu1 }
 0xcd3   :  { %v9654_v52 = vpack.c.bf16 %v9610_v31, %v9609_v27  ;;  %12831 = vmatmul.msk.bf16.gmra.mxu2 %vm228_vm0, %v18784_v4  ;;  %v19108_v57 = vadd.f32 %v9262_v49, %v18929_v8  ;;  %v9080_v25 = vpack.c.bf16 %v9052_v60, %v9051_v63  ;;  %v13607_v4 = vld [vmem:[%s19703_s3 + $0xe8] sm:$0xff] }
 0xcd4   :  { %11080 = vmatpush.bf16.msra.mxu3 %v13607_v4 }
 0xcd5   :  { %12871 = vmatmul.msk.bf16.gmra.mxu3 %vm888_vm1, %v9654_v52  ;;  %12813 = vmatmul.msk.bf16.gmra.mxu1 %vm888_vm1, %v9080_v25  ;;  %v13582_v25 = vld [vmem:[%s19703_s3 + $0x20] sm:$0xff] }
 0xcd6   :  { %v9504_v13 = vpop.f32.mrf.mxu2  ;;  %v8994_v6 = vpop.f32.mrf.mxu0  ;;  %11039 = vmatpush.bf16.msra.mxu0 %v13582_v25 }
 0xcd7   :  { %v8995_v19 = vadd.f32 %v18859_v3, %v8994_v6  ;;  %v9505_v40 = vadd.f32 %v18859_v3, %v9504_v13  ;;  %v13581_v6 = vld [vmem:[%s19703_s3 + $0x18] sm:$0xff] }
 0xcd8   :  { %v8709_v8 = vpop.f32.mrf.mxu3 }
 0xcd9   :  { %v9053_v63 = vmax.f32 %v8995_v19, 0.0  ;;  %v9611_v27 = vmax.f32 %v9505_v40, 0.0 }
 0xcda   :  { %v19121_v2 = vpop.f32.mrf.mxu1  ;;  %11040 = vmatpush.bf16.msra.mxu0 %v13581_v6 }
 0xcde   :  { %v9506_v5 = vpop.f32.mrf.mxu2  ;;  %v8996_v41 = vpop.f32.mrf.mxu0  ;;  %11041 = vmatpush.bf16.msra.mxu0 %v13580_v56 }
 0xcdf   :  { %v9507_v23 = vadd.f32 %v18871_v15, %v9506_v5  ;;  %v8997_v51 = vadd.f32 %v18871_v15, %v8996_v41 }
 0xce0   :  { %v8710_v0 = vpop.f32.mrf.mxu3 }
 0xce1   :  { %v9612_v31 = vmax.f32 %v9507_v23, 0.0  ;;  %v9054_v60 = vmax.f32 %v8997_v51, 0.0  ;;  %v13579_v51 = vld [vmem:[%s19703_s3 + $0x8] sm:$0xff] }
 0xce2   :  { %v9267_v49 = vpop.f32.mrf.mxu1  ;;  %11042 = vmatpush.bf16.msra.mxu0 %v13579_v51 }
 0xce3   :  { %v9655_v52 = vpack.c.bf16 %v9612_v31, %v9611_v27  ;;  %12832 = vmatmul.msk.bf16.gmra.mxu2 %vm228_vm0, %v18801_v33  ;;  %v9081_v62 = vpack.c.bf16 %v9054_v60, %v9053_v63  ;;  %v19824_v49 = vld [vmem:[#allocation10_spill] sm:$0xff] }
 0xce5   :  { %12872 = vmatmul.msk.bf16.gmra.mxu3 %vm888_vm1, %v9655_v52  ;;  %12814 = vmatmul.msk.bf16.gmra.mxu1 %vm888_vm1, %v9081_v62 }
 0xce6   :  { %v9509_v12 = vpop.f32.mrf.mxu2  ;;  %v8999_v4 = vpop.f32.mrf.mxu0 }
 0xce7   :  { %v9000_v8 = vadd.f32 %v18859_v3, %v8999_v4  ;;  %v9510_v19 = vadd.f32 %v18859_v3, %v9509_v12  ;;  %v13578_v4 = vld [vmem:[%s19703_s3] sm:$0xff] }
 0xce8   :  { %v8712_v13 = vpop.f32.mrf.mxu3  ;;  %11043 = vmatpush.bf16.msra.mxu0 %v13578_v4 }
 0xce9   :  { %v9055_v0 = vmax.f32 %v9000_v8, 0.0  ;;  %v9613_v27 = vmax.f32 %v9510_v19, 0.0  ;;  %v13590_v13 = vld [vmem:[%s19703_s3 + $0x60] sm:$0xff] }
 0xcea   :  { %v9268_v33 = vpop.f32.mrf.mxu1  ;;  %11053 = vmatpush.bf16.msra.mxu1 %v13590_v13 }
 0xcee   :  { %v9511_v40 = vpop.f32.mrf.mxu2  ;;  %v9001_v23 = vpop.f32.mrf.mxu0 }
 0xcef   :  { %v9512_v5 = vadd.f32 %v18871_v15, %v9511_v40  ;;  %v9002_v63 = vadd.f32 %v18871_v15, %v9001_v23  ;;  %v13588_v40 = vld [vmem:[%s19703_s3 + $0x50] sm:$0xff] }
 0xcf0   :  { %v8713_v41 = vpop.f32.mrf.mxu3 }
 0xcf1   :  { %v9614_v31 = vmax.f32 %v9512_v5, 0.0  ;;  %v9056_v60 = vmax.f32 %v9002_v63, 0.0 }
 0xcf2   :  { %v9270_v62 = vpop.f32.mrf.mxu1 }
 0xcf3   :  { %v9656_v52 = vpack.c.bf16 %v9614_v31, %v9613_v27  ;;  %12833 = vmatmul.msk.bf16.gmra.mxu2 %vm228_vm0, %v19824_v49  ;;  %v19150_v25 = vadd.f32 %v9270_v62, %v18966_v35  ;;  %v9082_v12 = vpack.c.bf16 %v9056_v60, %v9055_v0  ;;  %v13589_v35 = vld [vmem:[%s19703_s3 + $0x58] sm:$0xff]  ;;  %v13587_v31 = vld [vmem:[%s19703_s3 + $0x48] sm:$0xff] }
 0xcf4   :  { %11054 = vmatpush.bf16.msra.mxu1 %v13589_v35 }
 0xcf5   :  { %12873 = vmatmul.msk.bf16.gmra.mxu3 %vm888_vm1, %v9656_v52  ;;  %12815 = vmatmul.msk.bf16.gmra.mxu1 %vm888_vm1, %v9082_v12 }
 0xcf6   :  { %v9514_v6 = vpop.f32.mrf.mxu2  ;;  %v9004_v33 = vpop.f32.mrf.mxu0 }
 0xcf7   :  { %v9005_v19 = vadd.f32 %v18859_v3, %v9004_v33  ;;  %v9515_v5 = vadd.f32 %v18859_v3, %v9514_v6  ;;  %v13586_v6 = vld [vmem:[%s19703_s3 + $0x40] sm:$0xff] }
 0xcf8   :  { %v8715_v8 = vpop.f32.mrf.mxu3  ;;  %11055 = vmatpush.bf16.msra.mxu1 %v13588_v40 }
 0xcf9   :  { %v9057_v51 = vmax.f32 %v9005_v19, 0.0  ;;  %v9615_v60 = vmax.f32 %v9515_v5, 0.0  ;;  %v13598_v8 = vld [vmem:[%s19703_s3 + $0xa0] sm:$0xff] }
 0xcfa   :  { %v19163_v56 = vpop.f32.mrf.mxu1  ;;  %11067 = vmatpush.bf16.msra.mxu2 %v13598_v8  ;;  %v19198_v5 = vld [vmem:[%s19704_s6] sm:$0xff] }
 0xcfc   :  { %11056 = vmatpush.bf16.msra.mxu1 %v13587_v31 }
 0xcfe   :  { %v9516_v23 = vpop.f32.mrf.mxu2  ;;  %v9006_v0 = vpop.f32.mrf.mxu0 }
 0xcff   :  { %v9517_v41 = vadd.f32 %v18871_v15, %v9516_v23  ;;  %v9007_v27 = vadd.f32 %v18871_v15, %v9006_v0  ;;  %v19204_v0 = vld [vmem:[%s19704_s6 + $0x8] sm:$0xff] }
 0xd00   :  { %v8716_v63 = vpop.f32.mrf.mxu3  ;;  %11057 = vmatpush.bf16.msra.mxu1 %v13586_v6 }
 0xd01   :  { %v9616_v52 = vmax.f32 %v9517_v41, 0.0  ;;  %v9058_v49 = vmax.f32 %v9007_v27, 0.0 }
 0xd02   :  { %v9275_v12 = vpop.f32.mrf.mxu1 }
 0xd03   :  { %v9657_v62 = vpack.c.bf16 %v9616_v52, %v9615_v60  ;;  %12834 = vmatmul.msk.bf16.gmra.mxu2 %vm228_vm0, %v18841_v45  ;;  %v19178_v4 = vadd.f32 %v9275_v12, %v19001_v42  ;;  %v9083_v13 = vpack.c.bf16 %v9058_v49, %v9057_v51  ;;  %v13606_v42 = vld [vmem:[%s19703_s3 + $0xe0] sm:$0xff] }
 0xd04   :  { %11081 = vmatpush.bf16.msra.mxu3 %v13606_v42 }
 0xd05   :  { %12874 = vmatmul.msk.bf16.gmra.mxu3 %vm888_vm1, %v9657_v62  ;;  %12816 = vmatmul.msk.bf16.gmra.mxu1 %vm888_vm1, %v9083_v13 }
 0xd06   :  { %v9519_v33 = vpop.f32.mrf.mxu2 }
 0xd07   :  { %v9520_v19 = vadd.f32 %v18859_v3, %v9519_v33 }
 0xd08   :  { %v9791_v45 = vpop.f32.mrf.mxu3 }
 0xd09   :  { %v9898_v40 = vadd.f32 %v9791_v45, %v18828_v14  ;;  %v9617_v51 = vmax.f32 %v9520_v19, 0.0 }
 0xd0a   :  { %v19191_v35 = vpop.f32.mrf.mxu1 }
 0xd0b   :  { %v9930_v27 = vadd.f32 %v9898_v40, %v19198_v5 }
 0xd0d   :  { %v9962_v12 = vmax.f32 %v9930_v27, 0.0 }
 0xd0e   :  { %v9521_v23 = vpop.f32.mrf.mxu2 }
 0xd0f   :  { %v9522_v41 = vadd.f32 %v18871_v15, %v9521_v23 }
 0xd10   :  { %v9793_v63 = vpop.f32.mrf.mxu3 }
 0xd11   :  { %v9618_v31 = vmax.f32 %v9522_v41, 0.0  ;;  %v9899_v14 = vadd.f32 %v9793_v63, %v18835_v50 }
 0xd12   :  { %v9280_v49 = vpop.f32.mrf.mxu1 }
 0xd13   :  { %v9658_v60 = vpack.c.bf16 %v9618_v31, %v9617_v51  ;;  %v9931_v52 = vadd.f32 %v9899_v14, %v19204_v0  ;;  %12835 = vmatmul.msk.bf16.gmra.mxu2 %vm228_vm0, %v18866_v39  ;;  %v19212_v62 = vadd.f32 %v9280_v49, %v19022_v59 }
 0xd15   :  { %v9963_v13 = vmax.f32 %v9931_v52, 0.0  ;;  %12875 = vmatmul.msk.bf16.gmra.mxu3 %vm888_vm1, %v9658_v60 }
 0xd16   :  { %v9524_v6 = vpop.f32.mrf.mxu2 }
 0xd17   :  { %v9994_v33 = vpack.c.bf16 %v9963_v13, %v9962_v12  ;;  %v9525_v42 = vadd.f32 %v18859_v3, %v9524_v6 }
 0xd18   :  { %v9796_v8 = vpop.f32.mrf.mxu3 }
 0xd19   :  { %11044 = vmatmul.bf16.vlgmr.msra.gmra.mxu0 %v9994_v33  ;;  %v9900_v39 = vadd.f32 %v9796_v8, %v18848_v26  ;;  %v9619_v23 = vmax.f32 %v9525_v42, 0.0 }
 0xd1a   :  { %v9282_v45 = vpop.f32.mrf.mxu1 }
 0xd1b   :  { %v19216_v50 = vadd.f32 %v9282_v45, %v19032_v10  ;;  %v9932_v41 = vadd.f32 %v9900_v39, %v19198_v5 }
 0xd1d   :  { %v9964_v26 = vmax.f32 %v9932_v41, 0.0 }
 0xd1e   :  { %v9526_v19 = vpop.f32.mrf.mxu2 }
 0xd1f   :  { %v9527_v59 = vadd.f32 %v18871_v15, %v9526_v19 }
 0xd20   :  { %v9798_v40 = vpop.f32.mrf.mxu3 }
 0xd21   :  { %v9620_v63 = vmax.f32 %v9527_v59, 0.0  ;;  %v9901_v51 = vadd.f32 %v9798_v40, %v18863_v7  ;;  %v13617_v7 = vld [vmem:[%s19703_s3 + $0x138] sm:$0xff] }
 0xd22   :  { %v9285_v10 = vpop.f32.mrf.mxu1  ;;  %11092 = vmatpush.bf16.msrb.mxu0 %v13617_v7  ;;  %v13624_v7 = vld [vmem:[%s19703_s3 + $0x170] sm:$0xff] }
 0xd23   :  { %v9659_v27 = vpack.c.bf16 %v9620_v63, %v9619_v23  ;;  %v9933_v31 = vadd.f32 %v9901_v51, %v19204_v0  ;;  %12836 = vmatmul.msk.bf16.gmra.mxu2 %vm228_vm0, %v18894_v1  ;;  %v19227_v14 = vadd.f32 %v9285_v10, %v19039_v48  ;;  %v13616_v48 = vld [vmem:[%s19703_s3 + $0x130] sm:$0xff]  ;;  %v13614_v63 = vld [vmem:[%s19703_s3 + $0x120] sm:$0xff] }
 0xd25   :  { %v9965_v60 = vmax.f32 %v9933_v31, 0.0  ;;  %12876 = vmatmul.msk.bf16.gmra.mxu3 %vm888_vm1, %v9659_v27 }
 0xd26   :  { %v9529_v52 = vpop.f32.mrf.mxu2  ;;  %11093 = vmatpush.bf16.msrb.mxu0 %v13616_v48 }
 0xd27   :  { %v9995_v49 = vpack.c.bf16 %v9965_v60, %v9964_v26  ;;  %v9530_v33 = vadd.f32 %v18859_v3, %v9529_v52  ;;  %v13613_v26 = vld [vmem:[%s19703_s3 + $0x118] sm:$0xff] }
 0xd28   :  { %v9801_v12 = vpop.f32.mrf.mxu3  ;;  %v13597_v52 = vld [vmem:[%s19703_s3 + $0x98] sm:$0xff] }
 0xd29   :  { %v9902_v13 = vadd.f32 %v9801_v12, %v18881_v58  ;;  %11058 = vmatmul.bf16.vlgmr.msra.gmra.mxu1 %v9995_v49  ;;  %v13615_v58 = vld [vmem:[%s19703_s3 + $0x128] sm:$0xff]  ;;  %v9621_v39 = vmax.f32 %v9530_v33, 0.0  ;;  %11068 = vmatpush.bf16.msra.mxu2 %v13597_v52  ;;  %v13612_v12 = vld [vmem:[%s19703_s3 + $0x110] sm:$0xff] }
 0xd2a   :  { %v9287_v1 = vpop.f32.mrf.mxu1  ;;  %11094 = vmatpush.bf16.msrb.mxu0 %v13615_v58 }
 0xd2b   :  { %v19235_v6 = vadd.f32 %v9287_v1, %v19046_v53  ;;  %v9934_v19 = vadd.f32 %v9902_v13, %v19198_v5 }
 0xd2d   :  { %v9966_v51 = vmax.f32 %v9934_v19, 0.0 }
 0xd2e   :  { %v9531_v8 = vpop.f32.mrf.mxu2  ;;  %11095 = vmatpush.bf16.msrb.mxu0 %v13614_v63 }
 0xd2f   :  { %v9532_v45 = vadd.f32 %v18871_v15, %v9531_v8  ;;  %v13611_v8 = vld [vmem:[%s19703_s3 + $0x108] sm:$0xff] }
 0xd30   :  { %v9803_v42 = vpop.f32.mrf.mxu3 }
 0xd31   :  { %v9622_v53 = vmax.f32 %v9532_v45, 0.0  ;;  %v9903_v59 = vadd.f32 %v9803_v42, %v18891_v18  ;;  %v13623_v45 = vld [vmem:[%s19703_s3 + $0x168] sm:$0xff] }
 0xd32   :  { %v9290_v41 = vpop.f32.mrf.mxu1  ;;  %11096 = vmatpush.bf16.msrb.mxu0 %v13613_v26  ;;  %v19309_v26 = vld [vmem:[%s19702_s5] sm:$0xff] }
 0xd33   :  { %v9660_v40 = vpack.c.bf16 %v9622_v53, %v9621_v39  ;;  %v9935_v23 = vadd.f32 %v9903_v59, %v19204_v0  ;;  %12837 = vmatmul.msk.bf16.gmra.mxu2 %vm228_vm0, %v18917_v17  ;;  %v13625_v17 = vld [vmem:[%s19703_s3 + $0x178] sm:$0xff]  ;;  %v13610_v59 = vld [vmem:[%s19703_s3 + $0x100] sm:$0xff] }
 0xd34   :  { %11106 = vmatpush.bf16.msrb.mxu1 %v13625_v17 }
 0xd35   :  { %v9967_v27 = vmax.f32 %v9935_v23, 0.0  ;;  %12877 = vmatmul.msk.bf16.gmra.mxu3 %vm888_vm1, %v9660_v40  ;;  %v13622_v40 = vld [vmem:[%s19703_s3 + $0x160] sm:$0xff] }
 0xd36   :  { %v9534_v31 = vpop.f32.mrf.mxu2  ;;  %11097 = vmatpush.bf16.msrb.mxu0 %v13612_v12 }
 0xd37   :  { %v19254_v10 = vpack.c.bf16 %v9967_v27, %v9966_v51  ;;  %v9535_v13 = vadd.f32 %v18859_v3, %v9534_v31  ;;  %v13596_v27 = vld [vmem:[%s19703_s3 + $0x90] sm:$0xff] }
 0xd38   :  { %v9806_v18 = vpop.f32.mrf.mxu3  ;;  %11107 = vmatpush.bf16.msrb.mxu1 %v13624_v7  ;;  %11069 = vmatpush.bf16.msra.mxu2 %v13596_v27 }
 0xd39   :  { %v9904_v60 = vadd.f32 %v9806_v18, %v18904_v24  ;;  %v13605_v24 = vld [vmem:[%s19703_s3 + $0xd8] sm:$0xff]  ;;  %v9623_v3 = vmax.f32 %v9535_v13, 0.0  ;;  %v13620_v18 = vld [vmem:[%s19703_s3 + $0x150] sm:$0xff]  ;;  %v13619_v13 = vld [vmem:[%s19703_s3 + $0x148] sm:$0xff] }
 0xd3a   :  { %v9291_v49 = vpop.f32.mrf.mxu1  ;;  %11082 = vmatpush.bf16.msra.mxu3 %v13605_v24  ;;  %11098 = vmatpush.bf16.msrb.mxu0 %v13611_v8 }
 0xd3b   :  { %v9936_v42 = vadd.f32 %v9904_v60, %v19198_v5  ;;  %v13595_v60 = vld [vmem:[%s19703_s3 + $0x88] sm:$0xff] }
 0xd3c   :  { %11108 = vmatpush.bf16.msrb.mxu1 %v13623_v45  ;;  %v19318_v49 = vld [vmem:[%s19702_s5 + $0x8] sm:$0xff]  ;;  %11070 = vmatpush.bf16.msra.mxu2 %v13595_v60 }
 0xd3d   :  { %v9968_v23 = vmax.f32 %v9936_v42, 0.0 }
 0xd3e   :  { %v9536_v1 = vpop.f32.mrf.mxu2  ;;  %11099 = vmatpush.bf16.msrb.mxu0 %v13610_v59 }
 0xd3f   :  { %v9537_v48 = vadd.f32 %v18871_v15, %v9536_v1 }
 0xd40   :  { %v9808_v33 = vpop.f32.mrf.mxu3  ;;  %11109 = vmatpush.bf16.msrb.mxu1 %v13622_v40  ;;  %v13630_v40 = vld [vmem:[%s19703_s3 + $0x1a0] sm:$0xff] }
 0xd41   :  { %v9624_v58 = vmax.f32 %v9537_v48, 0.0  ;;  %v9905_v39 = vadd.f32 %v9808_v33, %v18914_v36  ;;  %v13594_v48 = vld [vmem:[%s19703_s3 + $0x80] sm:$0xff]  ;;  %v13633_v33 = vld [vmem:[%s19703_s3 + $0x1b8] sm:$0xff] }
 0xd42   :  { %v9293_v53 = vpop.f32.mrf.mxu1  ;;  %11071 = vmatpush.bf16.msra.mxu2 %v13594_v48 }
 0xd43   :  { %v9661_v19 = vpack.c.bf16 %v9624_v58, %v9623_v3  ;;  %v9937_v15 = vadd.f32 %v9905_v39, %v19204_v0  ;;  %12838 = vmatmul.msk.bf16.gmra.mxu2 %vm228_vm0, %v18934_v46  ;;  %v13621_v46 = vld [vmem:[%s19703_s3 + $0x158] sm:$0xff]  ;;  %v13618_v3 = vld [vmem:[%s19703_s3 + $0x140] sm:$0xff]  ;;  %v13632_v58 = vld [vmem:[%s19703_s3 + $0x1b0] sm:$0xff] }
 0xd44   :  { %11110 = vmatpush.bf16.msrb.mxu1 %v13621_v46 }
 0xd45   :  { %v9969_v41 = vmax.f32 %v9937_v15, 0.0  ;;  %12878 = vmatmul.msk.bf16.gmra.mxu3 %vm888_vm1, %v9661_v19 }
 0xd46   :  { %v9539_v36 = vpop.f32.mrf.mxu2  ;;  %11120 = vmatpush.bf16.msrb.mxu2 %v13633_v33  ;;  %v13604_v33 = vld [vmem:[%s19703_s3 + $0xd0] sm:$0xff] }
 0xd47   :  { %v19295_v63 = vpack.c.bf16 %v9969_v41, %v9968_v23  ;;  %v9540_v17 = vadd.f32 %v19309_v26, %v9539_v36  ;;  %11083 = vmatpush.bf16.msra.mxu3 %v13604_v33 }
 0xd48   :  { %v9811_v51 = vpop.f32.mrf.mxu3  ;;  %11111 = vmatpush.bf16.msrb.mxu1 %v13620_v18 }
 0xd49   :  { %v9625_v24 = vmax.f32 %v9540_v17, 0.0 }
 0xd4a   :  { %v9294_v31 = vpop.f32.mrf.mxu1  ;;  %11121 = vmatpush.bf16.msrb.mxu2 %v13632_v58  ;;  %v9389_v58 = vpop.permute.xlu1 %9388 }
 0xd4c   :  { %11112 = vmatpush.bf16.msrb.mxu1 %v13619_v13 }
 0xd4e   :  { %v9541_v52 = vpop.f32.mrf.mxu2 }
 0xd4f   :  { %v9542_v12 = vadd.f32 %v19318_v49, %v9541_v52 }
 0xd50   :  { %v9812_v7 = vpop.f32.mrf.mxu3  ;;  %11113 = vmatpush.bf16.msrb.mxu1 %v13618_v3 }
 0xd51   :  { %v9626_v1 = vmax.f32 %v9542_v12, 0.0 }
 0xd52   :  { %v9296_v45 = vpop.f32.mrf.mxu1 }
 0xd53   :  { %v9662_v8 = vpack.c.bf16 %v9626_v1, %v9625_v24  ;;  %12839 = vmatmul.msk.bf16.gmra.mxu2 %vm228_vm0, %v18954_v37  ;;  %v13631_v37 = vld [vmem:[%s19703_s3 + $0x1a8] sm:$0xff]  ;;  %v13626_v45 = vld [vmem:[%s19703_s3 + $0x180] sm:$0xff] }
 0xd54   :  { %11122 = vmatpush.bf16.msrb.mxu2 %v13631_v37  ;;  %v13627_v24 = vld [vmem:[%s19703_s3 + $0x188] sm:$0xff] }
 0xd55   :  { %12879 = vmatmul.msk.bf16.gmra.mxu3 %vm888_vm1, %v9662_v8 }
 0xd56   :  { %v9544_v42 = vpop.f32.mrf.mxu2 }
 0xd57   :  { %v9545_v15 = vadd.f32 %v19309_v26, %v9544_v42 }
 0xd58   :  { %v9814_v39 = vpop.f32.mrf.mxu3  ;;  %11123 = vmatpush.bf16.msrb.mxu2 %v13630_v40 }
 0xd59   :  { %v9906_v53 = vadd.f32 %v9814_v39, %v18944_v16  ;;  %v9627_v36 = vmax.f32 %v9545_v15, 0.0  ;;  %v13629_v16 = vld [vmem:[%s19703_s3 + $0x198] sm:$0xff] }
 0xd5a   :  { %v9297_v19 = vpop.f32.mrf.mxu1 }
 0xd5b   :  { %v9938_v51 = vadd.f32 %v9906_v53, %v19198_v5 }
 0xd5c   :  { %11124 = vmatpush.bf16.msrb.mxu2 %v13629_v16 }
 0xd5d   :  { %v9970_v60 = vmax.f32 %v9938_v51, 0.0 }
 0xd5e   :  { %v9546_v59 = vpop.f32.mrf.mxu2 }
 0xd5f   :  { %v9547_v23 = vadd.f32 %v19318_v49, %v9546_v59 }
 0xd60   :  { %v9816_v41 = vpop.f32.mrf.mxu3 }
 0xd61   :  { %v9628_v46 = vmax.f32 %v9547_v23, 0.0  ;;  %v9907_v27 = vadd.f32 %v9816_v41, %v18951_v47  ;;  %v13628_v47 = vld [vmem:[%s19703_s3 + $0x190] sm:$0xff] }
 0xd62   :  { %v9299_v17 = vpop.f32.mrf.mxu1  ;;  %11125 = vmatpush.bf16.msrb.mxu2 %v13628_v47 }
 0xd63   :  { %v9663_v31 = vpack.c.bf16 %v9628_v46, %v9627_v36  ;;  %v9939_v18 = vadd.f32 %v9907_v27, %v19204_v0  ;;  %12840 = vmatmul.msk.bf16.gmra.mxu2 %vm228_vm0, %v18974_v44  ;;  %v13649_v46 = vld [vmem:[%s19703_s3 + $0x238] sm:$0xff]  ;;  %v13648_v27 = vld [vmem:[%s19703_s3 + $0x230] sm:$0xff] }
 0xd64   :  { %11148 = vmatpush.bf16.msra.mxu0 %v13649_v46 }
 0xd65   :  { %v9971_v52 = vmax.f32 %v9939_v18, 0.0  ;;  %12880 = vmatmul.msk.bf16.gmra.mxu3 %vm888_vm1, %v9663_v31 }
 0xd66   :  { %v9549_v12 = vpop.f32.mrf.mxu2  ;;  %11126 = vmatpush.bf16.msrb.mxu2 %v13627_v24 }
 0xd67   :  { %v9998_v7 = vpack.c.bf16 %v9971_v52, %v9970_v60  ;;  %v9550_v1 = vadd.f32 %v19309_v26, %v9549_v12  ;;  %v13647_v52 = vld [vmem:[%s19703_s3 + $0x228] sm:$0xff] }
 0xd68   :  { %v9819_v13 = vpop.f32.mrf.mxu3  ;;  %11149 = vmatpush.bf16.msra.mxu0 %v13648_v27  ;;  %v13654_v27 = vld [vmem:[%s19703_s3 + $0x260] sm:$0xff] }
 0xd69   :  { %11100 = vmatmul.bf16.vlgmr.msrb.gmra.mxu0 %v9998_v7  ;;  %v9908_v48 = vadd.f32 %v9819_v13, %v18961_v61  ;;  %v9629_v39 = vmax.f32 %v9550_v1, 0.0  ;;  %v13646_v1 = vld [vmem:[%s19703_s3 + $0x220] sm:$0xff] }
 0xd6a   :  { %v9300_v44 = vpop.f32.mrf.mxu1  ;;  %11127 = vmatpush.bf16.msrb.mxu2 %v13626_v45 }
 0xd6b   :  { %v9940_v37 = vadd.f32 %v9908_v48, %v19198_v5 }
 0xd6c   :  { %11150 = vmatpush.bf16.msra.mxu0 %v13647_v52  ;;  %v13665_v52 = vld [vmem:[%s19703_s3 + $0x2b8] sm:$0xff] }
 0xd6d   :  { %v9972_v40 = vmax.f32 %v9940_v37, 0.0  ;;  %v13656_v37 = vld [vmem:[%s19703_s3 + $0x270] sm:$0xff] }
 0xd6e   :  { %v9551_v8 = vpop.f32.mrf.mxu2 }
 0xd6f   :  { %v9552_v3 = vadd.f32 %v19318_v49, %v9551_v8 }
 0xd70   :  { %v9821_v42 = vpop.f32.mrf.mxu3  ;;  %11151 = vmatpush.bf16.msra.mxu0 %v13646_v1  ;;  %v13651_v1 = vld [vmem:[%s19703_s3 + $0x248] sm:$0xff] }
 0xd71   :  { %v9630_v19 = vmax.f32 %v9552_v3, 0.0  ;;  %v9909_v61 = vadd.f32 %v9821_v42, %v18971_v43 }
 0xd72   :  { %v9302_v59 = vpop.f32.mrf.mxu1 }
 0xd73   :  { %v9664_v15 = vpack.c.bf16 %v9630_v19, %v9629_v39  ;;  %v9941_v53 = vadd.f32 %v9909_v61, %v19204_v0  ;;  %12841 = vmatmul.msk.bf16.gmra.mxu2 %vm228_vm0, %v9389_v58  ;;  %v13644_v39 = vld [vmem:[%s19703_s3 + $0x210] sm:$0xff]  ;;  %v13655_v59 = vld [vmem:[%s19703_s3 + $0x268] sm:$0xff] }
 0xd75   :  { %v9973_v23 = vmax.f32 %v9941_v53, 0.0  ;;  %12881 = vmatmul.msk.bf16.gmra.mxu3 %vm888_vm1, %v9664_v15 }
 0xd76   :  { %v9554_v41 = vpop.f32.mrf.mxu2 }
 0xd77   :  { %v9999_v36 = vpack.c.bf16 %v9973_v23, %v9972_v40  ;;  %v9555_v16 = vadd.f32 %v19309_v26, %v9554_v41 }
 0xd78   :  { %v9824_v51 = vpop.f32.mrf.mxu3 }
 0xd79   :  { %11114 = vmatmul.bf16.vlgmr.msrb.gmra.mxu1 %v9999_v36  ;;  %v9910_v31 = vadd.f32 %v9824_v51, %v18987_v22  ;;  %v9631_v12 = vmax.f32 %v9555_v16, 0.0 }
 0xd7a   :  { %v9303_v43 = vpop.f32.mrf.mxu1 }
 0xd7b   :  { %v9942_v47 = vadd.f32 %v9910_v31, %v19198_v5  ;;  %v13642_v43 = vld [vmem:[%s19703_s3 + $0x200] sm:$0xff] }
 0xd7d   :  { %v9974_v48 = vmax.f32 %v9942_v47, 0.0  ;;  %v13664_v47 = vld [vmem:[%s19703_s3 + $0x2b0] sm:$0xff] }
 0xd7e   :  { %v9556_v18 = vpop.f32.mrf.mxu2 }
 0xd7f   :  { %v9557_v17 = vadd.f32 %v19318_v49, %v9556_v18 }
 0xd80   :  { %v9826_v60 = vpop.f32.mrf.mxu3 }
 0xd81   :  { %v9632_v7 = vmax.f32 %v9557_v17, 0.0  ;;  %v9911_v13 = vadd.f32 %v9826_v60, %v19006_v54  ;;  %v13645_v54 = vld [vmem:[%s19703_s3 + $0x218] sm:$0xff] }
 0xd82   :  { %v9305_v22 = vpop.f32.mrf.mxu1  ;;  %11152 = vmatpush.bf16.msra.mxu0 %v13645_v54  ;;  %v13653_v60 = vld [vmem:[%s19703_s3 + $0x258] sm:$0xff]  ;;  %v13662_v54 = vld [vmem:[%s19703_s3 + $0x2a0] sm:$0xff] }
 0xd83   :  { %v9665_v24 = vpack.c.bf16 %v9632_v7, %v9631_v12  ;;  %v9943_v44 = vadd.f32 %v9911_v13, %v19204_v0  ;;  %11072 = vmatmul.bf16.vlgmr.msra.gmra.mxu2 %v19254_v10  ;;  %v13657_v10 = vld [vmem:[%s19703_s3 + $0x278] sm:$0xff]  ;;  %v13652_v12 = vld [vmem:[%s19703_s3 + $0x250] sm:$0xff]  ;;  %v13603_v13 = vld [vmem:[%s19703_s3 + $0xc8] sm:$0xff] }
 0xd84   :  { %11162 = vmatpush.bf16.msra.mxu1 %v13657_v10  ;;  %11176 = vmatpush.bf16.msra.mxu2 %v13665_v52 }
 0xd85   :  { %v9975_v33 = vmax.f32 %v9943_v44, 0.0  ;;  %12882 = vmatmul.msk.bf16.gmra.mxu3 %vm888_vm1, %v9665_v24 }
 0xd86   :  { %v9559_v8 = vpop.f32.mrf.mxu2  ;;  %11153 = vmatpush.bf16.msra.mxu0 %v13644_v39  ;;  %11084 = vmatpush.bf16.msra.mxu3 %v13603_v13  ;;  %v13660_v39 = vld [vmem:[%s19703_s3 + $0x290] sm:$0xff] }
 0xd87   :  { %v10000_v45 = vpack.c.bf16 %v9975_v33, %v9974_v48  ;;  %v9560_v19 = vadd.f32 %v19309_v26, %v9559_v8  ;;  %v13663_v48 = vld [vmem:[%s19703_s3 + $0x2a8] sm:$0xff] }
 0xd88   :  { %v9829_v3 = vpop.f32.mrf.mxu3  ;;  %11163 = vmatpush.bf16.msra.mxu1 %v13656_v37  ;;  %11177 = vmatpush.bf16.msra.mxu2 %v13664_v47 }
 0xd89   :  { %v9912_v42 = vadd.f32 %v9829_v3, %v19017_v9  ;;  %v13643_v9 = vld [vmem:[%s19703_s3 + $0x208] sm:$0xff]  ;;  %v9633_v40 = vmax.f32 %v9560_v19, 0.0  ;;  %v13650_v3 = vld [vmem:[%s19703_s3 + $0x240] sm:$0xff] }
 0xd8a   :  { %v9306_v58 = vpop.f32.mrf.mxu1  ;;  %11154 = vmatpush.bf16.msra.mxu0 %v13643_v9  ;;  %v13659_v9 = vld [vmem:[%s19703_s3 + $0x288] sm:$0xff] }
 0xd8b   :  { %v9944_v23 = vadd.f32 %v9912_v42, %v19198_v5  ;;  %v13661_v58 = vld [vmem:[%s19703_s3 + $0x298] sm:$0xff] }
 0xd8c   :  { %11164 = vmatpush.bf16.msra.mxu1 %v13655_v59  ;;  %11178 = vmatpush.bf16.msra.mxu2 %v13663_v48 }
 0xd8d   :  { %v9976_v16 = vmax.f32 %v9944_v23, 0.0 }
 0xd8e   :  { %v9561_v61 = vpop.f32.mrf.mxu2  ;;  %11155 = vmatpush.bf16.msra.mxu0 %v13642_v43 }
 0xd8f   :  { %v9562_v15 = vadd.f32 %v19318_v49, %v9561_v61 }
 0xd90   :  { %v9831_v53 = vpop.f32.mrf.mxu3  ;;  %11165 = vmatpush.bf16.msra.mxu1 %v13654_v27  ;;  %11179 = vmatpush.bf16.msra.mxu2 %v13662_v54 }
 0xd91   :  { %v9634_v41 = vmax.f32 %v9562_v15, 0.0  ;;  %v9913_v36 = vadd.f32 %v9831_v53, %v19026_v20 }
 0xd93   :  { %v9666_v51 = vpack.c.bf16 %v9634_v41, %v9633_v40  ;;  %v9945_v46 = vadd.f32 %v9913_v36, %v19204_v0  ;;  %11128 = vmatmul.bf16.vlgmr.msrb.gmra.mxu2 %v10000_v45 }
 0xd94   :  { %11166 = vmatpush.bf16.msra.mxu1 %v13653_v60  ;;  %11180 = vmatpush.bf16.msra.mxu2 %v13661_v58  ;;  %v13679_v58 = vld [vmem:[%s19703_s3 + $0x328] sm:$0xff] }
 0xd95   :  { %v9977_v31 = vmax.f32 %v9945_v46, 0.0  ;;  %12883 = vmatmul.msk.bf16.gmra.mxu3 %vm888_vm1, %v9666_v51 }
 0xd96   :  { %v9564_v18 = vpop.f32.mrf.mxu2 }
 0xd97   :  { %v19428_v20 = vpack.c.bf16 %v9977_v31, %v9976_v16  ;;  %v9565_v7 = vadd.f32 %v19309_v26, %v9564_v18 }
 0xd98   :  { %v9834_v17 = vpop.f32.mrf.mxu3  ;;  %11167 = vmatpush.bf16.msra.mxu1 %v13652_v12  ;;  %11181 = vmatpush.bf16.msra.mxu2 %v13660_v39 }
 0xd99   :  { %v9635_v33 = vmax.f32 %v9565_v7, 0.0 }
 0xd9c   :  { %11168 = vmatpush.bf16.msra.mxu1 %v13651_v1  ;;  %11182 = vmatpush.bf16.msra.mxu2 %v13659_v9  ;;  %v13678_v9 = vld [vmem:[%s19703_s3 + $0x320] sm:$0xff] }
 0xd9e   :  { %v9566_v24 = vpop.f32.mrf.mxu2 }
 0xd9f   :  { %v9567_v44 = vadd.f32 %v19318_v49, %v9566_v24 }
 0xda0   :  { %v9835_v22 = vpop.f32.mrf.mxu3  ;;  %11169 = vmatpush.bf16.msra.mxu1 %v13650_v3 }
 0xda1   :  { %v9636_v8 = vmax.f32 %v9567_v44, 0.0 }
 0xda3   :  { %v9667_v45 = vpack.c.bf16 %v9636_v8, %v9635_v33  ;;  %v13681_v8 = vld [vmem:[%s19703_s3 + $0x338] sm:$0xff] }
 0xda4   :  { %11204 = vmatpush.bf16.msrb.mxu0 %v13681_v8  ;;  %v13637_v8 = vld [vmem:[%s19703_s3 + $0x1d8] sm:$0xff] }
 0xda5   :  { %12884 = vmatmul.msk.bf16.gmra.mxu3 %vm888_vm1, %v9667_v45 }
 0xda6   :  { %v9569_v10 = vpop.f32.mrf.mxu2 }
 0xda7   :  { %v9570_v37 = vadd.f32 %v19309_v26, %v9569_v10 }
 0xda8   :  { %v9837_v42 = vpop.f32.mrf.mxu3 }
 0xda9   :  { %v9914_v19 = vadd.f32 %v9837_v42, %v19060_v34  ;;  %v9637_v59 = vmax.f32 %v9570_v37, 0.0  ;;  %v13658_v34 = vld [vmem:[%s19703_s3 + $0x280] sm:$0xff] }
 0xdaa   :  { %11183 = vmatpush.bf16.msra.mxu2 %v13658_v34  ;;  %v13689_v34 = vld [vmem:[%s19703_s3 + $0x378] sm:$0xff] }
 0xdab   :  { %v9946_v40 = vadd.f32 %v9914_v19, %v19198_v5  ;;  %11218 = vmatpush.bf16.msrb.mxu1 %v13689_v34  ;;  %v13693_v34 = vld [vmem:[%s19703_s3 + $0x398] sm:$0xff] }
 0xdad   :  { %v9978_v46 = vmax.f32 %v9946_v40, 0.0 }
 0xdae   :  { %v9571_v61 = vpop.f32.mrf.mxu2 }
 0xdaf   :  { %v9572_v15 = vadd.f32 %v19318_v49, %v9571_v61 }
 0xdb0   :  { %v9839_v53 = vpop.f32.mrf.mxu3 }
 0xdb1   :  { %v9638_v23 = vmax.f32 %v9572_v15, 0.0  ;;  %v9915_v41 = vadd.f32 %v9839_v53, %v19068_v11 }
 0xdb3   :  { %v9668_v36 = vpack.c.bf16 %v9638_v23, %v9637_v59  ;;  %v9947_v51 = vadd.f32 %v9915_v41, %v19204_v0 }
 0xdb5   :  { %v9979_v43 = vmax.f32 %v9947_v51, 0.0  ;;  %12885 = vmatmul.msk.bf16.gmra.mxu3 %vm888_vm1, %v9668_v36  ;;  %v13677_v51 = vld [vmem:[%s19703_s3 + $0x318] sm:$0xff] }
 0xdb6   :  { %v9574_v27 = vpop.f32.mrf.mxu2 }
 0xdb7   :  { %v10002_v16 = vpack.c.bf16 %v9979_v43, %v9978_v46  ;;  %v9575_v18 = vadd.f32 %v19309_v26, %v9574_v27  ;;  %v13640_v43 = vld [vmem:[%s19703_s3 + $0x1f0] sm:$0xff] }
 0xdb8   :  { %v9842_v31 = vpop.f32.mrf.mxu3  ;;  %v13676_v27 = vld [vmem:[%s19703_s3 + $0x310] sm:$0xff] }
 0xdb9   :  { %11156 = vmatmul.bf16.vlgmr.msra.gmra.mxu0 %v10002_v16  ;;  %v9916_v11 = vadd.f32 %v9842_v31, %v19077_v30  ;;  %v9639_v12 = vmax.f32 %v9575_v18, 0.0  ;;  %v13688_v16 = vld [vmem:[%s19703_s3 + $0x370] sm:$0xff] }
 0xdba   :  { %11219 = vmatpush.bf16.msrb.mxu1 %v13688_v16 }
 0xdbb   :  { %v9948_v47 = vadd.f32 %v9916_v11, %v19198_v5  ;;  %v9331_v11 = vadd.f32 %v19121_v2, %v18939_v38  ;;  %v13638_v38 = vld [vmem:[%s19703_s3 + $0x1e0] sm:$0xff] }
 0xdbd   :  { %v9980_v22 = vmax.f32 %v9948_v47, 0.0 }
 0xdbe   :  { %v9576_v17 = vpop.f32.mrf.mxu2 }
 0xdbf   :  { %v9577_v60 = vadd.f32 %v19318_v49, %v9576_v17 }
 0xdc0   :  { %v9844_v52 = vpop.f32.mrf.mxu3 }
 0xdc1   :  { %v9640_v7 = vmax.f32 %v9577_v60, 0.0  ;;  %v9917_v13 = vadd.f32 %v9844_v52, %v19082_v32  ;;  %v13680_v32 = vld [vmem:[%s19703_s3 + $0x330] sm:$0xff]  ;;  %v13675_v52 = vld [vmem:[%s19703_s3 + $0x308] sm:$0xff] }
 0xdc2   :  { %11205 = vmatpush.bf16.msrb.mxu0 %v13680_v32 }
 0xdc3   :  { %v9669_v24 = vpack.c.bf16 %v9640_v7, %v9639_v12  ;;  %v9949_v44 = vadd.f32 %v9917_v13, %v19204_v0  ;;  %v13687_v12 = vld [vmem:[%s19703_s3 + $0x368] sm:$0xff] }
 0xdc4   :  { %11220 = vmatpush.bf16.msrb.mxu1 %v13687_v12 }
 0xdc5   :  { %v9981_v1 = vmax.f32 %v9949_v44, 0.0  ;;  %12886 = vmatmul.msk.bf16.gmra.mxu3 %vm888_vm1, %v9669_v24 }
 0xdc6   :  { %v9579_v48 = vpop.f32.mrf.mxu2  ;;  %11206 = vmatpush.bf16.msrb.mxu0 %v13679_v58  ;;  %v13696_v58 = vld [vmem:[%s19703_s3 + $0x3b0] sm:$0xff] }
 0xdc7   :  { %v10003_v33 = vpack.c.bf16 %v9981_v1, %v9980_v22  ;;  %v9580_v45 = vadd.f32 %v19309_v26, %v9579_v48  ;;  %v13674_v22 = vld [vmem:[%s19703_s3 + $0x300] sm:$0xff] }
 0xdc8   :  { %v9847_v30 = vpop.f32.mrf.mxu3  ;;  %v13686_v1 = vld [vmem:[%s19703_s3 + $0x360] sm:$0xff] }
 0xdc9   :  { %11170 = vmatmul.bf16.vlgmr.msra.gmra.mxu1 %v10003_v33  ;;  %v9918_v3 = vadd.f32 %v9847_v30, %v19091_v55  ;;  %v9641_v39 = vmax.f32 %v9580_v45, 0.0  ;;  %v13602_v55 = vld [vmem:[%s19703_s3 + $0xc0] sm:$0xff] }
 0xdca   :  { %11085 = vmatpush.bf16.msra.mxu3 %v13602_v55  ;;  %11207 = vmatpush.bf16.msrb.mxu0 %v13678_v9  ;;  %v13695_v55 = vld [vmem:[%s19703_s3 + $0x3a8] sm:$0xff] }
 0xdcb   :  { %v9950_v37 = vadd.f32 %v9918_v3, %v19198_v5  ;;  %11221 = vmatpush.bf16.msrb.mxu1 %v13686_v1  ;;  %v13685_v3 = vld [vmem:[%s19703_s3 + $0x358] sm:$0xff] }
 0xdcd   :  { %v9982_v59 = vmax.f32 %v9950_v37, 0.0 }
 0xdce   :  { %v9581_v54 = vpop.f32.mrf.mxu2  ;;  %11208 = vmatpush.bf16.msrb.mxu0 %v13677_v51 }
 0xdcf   :  { %v9582_v10 = vadd.f32 %v19318_v49, %v9581_v54  ;;  %v13697_v54 = vld [vmem:[%s19703_s3 + $0x3b8] sm:$0xff]  ;;  %11222 = vmatpush.bf16.msrb.mxu1 %v13685_v3 }
 0xdd0   :  { %v9849_v42 = vpop.f32.mrf.mxu3  ;;  %11232 = vmatpush.bf16.msrb.mxu2 %v13697_v54 }
 0xdd1   :  { %v9642_v19 = vmax.f32 %v9582_v10, 0.0  ;;  %v9919_v61 = vadd.f32 %v9849_v42, %v19096_v21  ;;  %v13641_v21 = vld [vmem:[%s19703_s3 + $0x1f8] sm:$0xff]  ;;  %v13636_v10 = vld [vmem:[%s19703_s3 + $0x1d0] sm:$0xff] }
 0xdd2   :  { %11134 = vmatpush.bf16.msrb.mxu3 %v13641_v21  ;;  %11209 = vmatpush.bf16.msrb.mxu0 %v13676_v27  ;;  %v13684_v42 = vld [vmem:[%s19703_s3 + $0x350] sm:$0xff]  ;;  %v13682_v21 = vld [vmem:[%s19703_s3 + $0x340] sm:$0xff] }
 0xdd3   :  { %v9670_v15 = vpack.c.bf16 %v9642_v19, %v9641_v39  ;;  %v9951_v53 = vadd.f32 %v9919_v61, %v19204_v0  ;;  %11223 = vmatpush.bf16.msrb.mxu1 %v13684_v42  ;;  %v13635_v19 = vld [vmem:[%s19703_s3 + $0x1c8] sm:$0xff]  ;;  %v13692_v27 = vld [vmem:[%s19703_s3 + $0x390] sm:$0xff] }
 0xdd4   :  { %11233 = vmatpush.bf16.msrb.mxu2 %v13696_v58 }
 0xdd5   :  { %v9983_v40 = vmax.f32 %v9951_v53, 0.0  ;;  %12887 = vmatmul.msk.bf16.gmra.mxu3 %vm888_vm1, %v9670_v15  ;;  %v13683_v53 = vld [vmem:[%s19703_s3 + $0x348] sm:$0xff] }
 0xdd6   :  { %v9584_v23 = vpop.f32.mrf.mxu2  ;;  %11135 = vmatpush.bf16.msrb.mxu3 %v13640_v43  ;;  %11210 = vmatpush.bf16.msrb.mxu0 %v13675_v52 }
 0xdd7   :  { %v10004_v41 = vpack.c.bf16 %v9983_v40, %v9982_v59  ;;  %v9585_v31 = vadd.f32 %v19309_v26, %v9584_v23  ;;  %11224 = vmatpush.bf16.msrb.mxu1 %v13683_v53  ;;  %v13634_v40 = vld [vmem:[%s19703_s3 + $0x1c0] sm:$0xff] }
 0xdd8   :  { %v9852_v36 = vpop.f32.mrf.mxu3  ;;  %11234 = vmatpush.bf16.msrb.mxu2 %v13695_v55 }
 0xdd9   :  { %v9920_v46 = vadd.f32 %v9852_v36, %v19108_v57  ;;  %11184 = vmatmul.bf16.vlgmr.msra.gmra.mxu2 %v10004_v41  ;;  %v13639_v57 = vld [vmem:[%s19703_s3 + $0x1e8] sm:$0xff]  ;;  %v9643_v47 = vmax.f32 %v9585_v31, 0.0  ;;  %v13694_v41 = vld [vmem:[%s19703_s3 + $0x3a0] sm:$0xff]  ;;  %v9333_v31 = vadd.f32 %v19163_v56, %v18979_v29 }
 0xdda   :  { %11136 = vmatpush.bf16.msrb.mxu3 %v13639_v57  ;;  %11211 = vmatpush.bf16.msrb.mxu0 %v13674_v22  ;;  %v13690_v29 = vld [vmem:[%s19703_s3 + $0x380] sm:$0xff]  ;;  %v13673_v22 = vld [vmem:[%s19703_s3 + $0x2f8] sm:$0xff] }
 0xddb   :  { %v9952_v7 = vadd.f32 %v9920_v46, %v19198_v5  ;;  %11225 = vmatpush.bf16.msrb.mxu1 %v13682_v21 }
 0xddc   :  { %11235 = vmatpush.bf16.msrb.mxu2 %v13694_v41 }
 0xddd   :  { %v9984_v48 = vmax.f32 %v9952_v7, 0.0 }
 0xdde   :  { %v9586_v18 = vpop.f32.mrf.mxu2  ;;  %11137 = vmatpush.bf16.msrb.mxu3 %v13638_v38 }
 0xddf   :  { %v9587_v17 = vadd.f32 %v19318_v49, %v9586_v18 }
 0xde0   :  { %v9854_v60 = vpop.f32.mrf.mxu3  ;;  %11236 = vmatpush.bf16.msrb.mxu2 %v13693_v34 }
 0xde1   :  { %v9644_v13 = vmax.f32 %v9587_v17, 0.0  ;;  %v9921_v24 = vadd.f32 %v9854_v60, %v9331_v11 }
 0xde2   :  { %11138 = vmatpush.bf16.msrb.mxu3 %v13637_v8 }
 0xde3   :  { %v9671_v2 = vpack.c.bf16 %v9644_v13, %v9643_v47  ;;  %v9953_v44 = vadd.f32 %v9921_v24, %v19204_v0  ;;  %v9335_v24 = vadd.f32 %v19191_v35, %v19012_v28 }
 0xde4   :  { %11237 = vmatpush.bf16.msrb.mxu2 %v13692_v27 }
 0xde5   :  { %v9985_v33 = vmax.f32 %v9953_v44, 0.0  ;;  %12888 = vmatmul.msk.bf16.gmra.mxu3 %vm888_vm1, %v9671_v2 }
 0xde6   :  { %v9589_v30 = vpop.f32.mrf.mxu2  ;;  %11139 = vmatpush.bf16.msrb.mxu3 %v13636_v10  ;;  %v13669_v10 = vld [vmem:[%s19703_s3 + $0x2d8] sm:$0xff] }
 0xde7   :  { %v19555_v32 = vpack.c.bf16 %v9985_v33, %v9984_v48  ;;  %v9590_v39 = vadd.f32 %v19309_v26, %v9589_v30  ;;  %v13671_v30 = vld [vmem:[%s19703_s3 + $0x2e8] sm:$0xff] }
 0xde8   :  { %v9857_v45 = vpop.f32.mrf.mxu3 }
 0xde9   :  { %v9645_v9 = vmax.f32 %v9590_v39, 0.0 }
 0xdea   :  { %11140 = vmatpush.bf16.msrb.mxu3 %v13635_v19 }
 0xdee   :  { %v9591_v37 = vpop.f32.mrf.mxu2  ;;  %11141 = vmatpush.bf16.msrb.mxu3 %v13634_v40 }
 0xdef   :  { %v9592_v61 = vadd.f32 %v19318_v49, %v9591_v37 }
 0xdf0   :  { %v9858_v15 = vpop.f32.mrf.mxu3 }
 0xdf1   :  { %v9646_v59 = vmax.f32 %v9592_v61, 0.0  ;;  %v13705_v15 = vld [vmem:[%s19703_s3 + $0x3f8] sm:$0xff] }
 0xdf3   :  { %v9672_v23 = vpack.c.bf16 %v9646_v59, %v9645_v9 }
 0xdf5   :  { %12889 = vmatmul.msk.bf16.gmra.mxu3 %vm888_vm1, %v9672_v23 }
 0xdf6   :  { %v9594_v36 = vpop.f32.mrf.mxu2 }
 0xdf7   :  { %v9595_v46 = vadd.f32 %v19309_v26, %v9594_v36 }
 0xdf8   :  { %v9860_v51 = vpop.f32.mrf.mxu3 }
 0xdf9   :  { %v9922_v43 = vadd.f32 %v9860_v51, %v19150_v25  ;;  %v9647_v11 = vmax.f32 %v9595_v46, 0.0  ;;  %v13691_v25 = vld [vmem:[%s19703_s3 + $0x388] sm:$0xff]  ;;  %v13698_v46 = vld [vmem:[%s19703_s3 + $0x3c0] sm:$0xff] }
 0xdfa   :  { %11238 = vmatpush.bf16.msrb.mxu2 %v13691_v25  ;;  %v13699_v51 = vld [vmem:[%s19703_s3 + $0x3c8] sm:$0xff]  ;;  %v11059_v25 = vpop.f32.mrf.mxu1 }
 0xdfb   :  { %v9954_v17 = vadd.f32 %v9922_v43, %v19198_v5 }
 0xdfd   :  { %v9986_v47 = vmax.f32 %v9954_v17, 0.0 }
 0xdfe   :  { %v9596_v16 = vpop.f32.mrf.mxu2  ;;  %11239 = vmatpush.bf16.msrb.mxu2 %v13690_v29 }
 0xdff   :  { %v9597_v18 = vadd.f32 %v19318_v49, %v9596_v16 }
 0xe00   :  { %v9862_v57 = vpop.f32.mrf.mxu3 }
 0xe01   :  { %v9648_v60 = vmax.f32 %v9597_v18, 0.0  ;;  %v9923_v52 = vadd.f32 %v9862_v57, %v9333_v31 }
 0xe03   :  { %v9673_v26 = vpack.c.bf16 %v9648_v60, %v9647_v11  ;;  %v9955_v12 = vadd.f32 %v9923_v52, %v19204_v0  ;;  %v11045_v52 = vpop.f32.mrf.mxu0 }
 0xe05   :  { %v9987_v7 = vmax.f32 %v9955_v12, 0.0  ;;  %12890 = vmatmul.msk.bf16.gmra.mxu3 %vm888_vm1, %v9673_v26 }
 0xe06   :  { %v11073_v26 = vpop.f32.mrf.mxu2 }
 0xe07   :  { %v10006_v56 = vpack.c.bf16 %v9987_v7, %v9986_v47  ;;  %v11061_v7 = vpop.f32.mrf.mxu1 }
 0xe08   :  { %v9865_v49 = vpop.f32.mrf.mxu3 }
 0xe09   :  { %11212 = vmatmul.bf16.vlgmr.msrb.gmra.mxu0 %v10006_v56  ;;  %v9924_v13 = vadd.f32 %v9865_v49, %v19178_v4  ;;  %v13672_v4 = vld [vmem:[%s19703_s3 + $0x2f0] sm:$0xff]  ;;  %v13707_v56 = vld [vmem:[%s19706_s4 + $0x8] sm:$0xff] }
 0xe0a   :  { %11292 = vmatpush.bf16.msra.mxu0 %v13707_v56  ;;  %v13711_v56 = vld [vmem:[%s19705_s8] ss:$0 sm:$0xff] }
 0xe0b   :  { %v9956_v2 = vadd.f32 %v9924_v13, %v19198_v5  ;;  %v11047_v47 = vpop.f32.mrf.mxu0 }
 0xe0d   :  { %v9988_v48 = vmax.f32 %v9956_v2, 0.0  ;;  %v10267_v2 = vld [vmem:[%s19707_s7 + $0x8] sm:$0xff] }
 0xe0e   :  { %v11075_v29 = vpop.f32.mrf.mxu2 }
 0xe10   :  { %v9867_v38 = vpop.f32.mrf.mxu3 }
 0xe11   :  { %v9925_v44 = vadd.f32 %v9867_v38, %v9335_v24  ;;  %v10266_v24 = vld [vmem:[%s19707_s7] sm:$0xff]  ;;  %v11115_v38 = vpop.f32.mrf.mxu1 }
 0xe13   :  { %v9957_v1 = vadd.f32 %v9925_v44, %v19204_v0  ;;  %v11101_v49 = vpop.f32.mrf.mxu0  ;;  %v11046_v44 = vadd.f32 %v11045_v52, %v10266_v24 }
 0xe15   :  { %v9989_v33 = vmax.f32 %v9957_v1, 0.0  ;;  %11086 = vmatmul.bf16.vlgmr.msra.gmra.mxu3 %v19295_v63  ;;  %v13670_v63 = vld [vmem:[%s19703_s3 + $0x2e0] sm:$0xff]  ;;  %v11048_v1 = vadd.f32 %v11047_v47, %v10267_v2 }
 0xe16   :  { %11190 = vmatpush.bf16.msra.mxu3 %v13673_v22  ;;  %v11129_v22 = vpop.f32.mrf.mxu2 }
 0xe17   :  { %v10007_v28 = vpack.c.bf16 %v9989_v33, %v9988_v48  ;;  %v11060_v48 = vadd.f32 %v11059_v25, %v11046_v44 }
 0xe18   :  { %v9870_v35 = vpop.f32.mrf.mxu3 }
 0xe19   :  { %11226 = vmatmul.bf16.vlgmr.msrb.gmra.mxu1 %v10007_v28  ;;  %v9926_v8 = vadd.f32 %v9870_v35, %v19212_v62  ;;  %v13668_v62 = vld [vmem:[%s19703_s3 + $0x2d0] sm:$0xff]  ;;  %v11062_v28 = vadd.f32 %v11061_v7, %v11048_v1  ;;  %v11074_v35 = vadd.f32 %v11073_v26, %v11060_v48 }
 0xe1a   :  { %11191 = vmatpush.bf16.msra.mxu3 %v13672_v4 }
 0xe1b   :  { %v9958_v3 = vadd.f32 %v9926_v8, %v19198_v5  ;;  %v11103_v33 = vpop.f32.mrf.mxu0 }
 0xe1d   :  { %v9990_v58 = vmax.f32 %v9958_v3, 0.0 }
 0xe1e   :  { %11192 = vmatpush.bf16.msra.mxu3 %v13671_v30  ;;  %v11076_v30 = vadd.f32 %v11075_v29, %v11062_v28 }
 0xe20   :  { %v9872_v45 = vpop.f32.mrf.mxu3 }
 0xe21   :  { %v9927_v54 = vadd.f32 %v9872_v45, %v19216_v50  ;;  %v13667_v50 = vld [vmem:[%s19703_s3 + $0x2c8] sm:$0xff] }
 0xe22   :  { %11193 = vmatpush.bf16.msra.mxu3 %v13670_v63  ;;  %v11117_v63 = vpop.f32.mrf.mxu1 }
 0xe23   :  { %v9959_v42 = vadd.f32 %v9927_v54, %v19204_v0  ;;  %v11131_v54 = vpop.f32.mrf.mxu2 }
 0xe25   :  { %v9991_v39 = vmax.f32 %v9959_v42, 0.0  ;;  %11142 = vmatmul.bf16.vlgmr.msrb.gmra.mxu3 %v19428_v20  ;;  %v13666_v20 = vld [vmem:[%s19703_s3 + $0x2c0] sm:$0xff] }
 0xe26   :  { %11194 = vmatpush.bf16.msra.mxu3 %v13669_v10 }
 0xe27   :  { %v10008_v37 = vpack.c.bf16 %v9991_v39, %v9990_v58  ;;  %v13706_v58 = vld [vmem:[%s19706_s4] sm:$0xff] }
 0xe28   :  { %v9875_v19 = vpop.f32.mrf.mxu3  ;;  %11293 = vmatpush.bf16.msra.mxu0 %v13706_v58 }
 0xe29   :  { %11240 = vmatmul.bf16.vlgmr.msrb.gmra.mxu2 %v10008_v37  ;;  %v9928_v61 = vadd.f32 %v9875_v19, %v19227_v14  ;;  %v13704_v14 = vld [vmem:[%s19703_s3 + $0x3f0] sm:$0xff] }
 0xe2a   :  { %11195 = vmatpush.bf16.msra.mxu3 %v13668_v62 }
 0xe2b   :  { %v9960_v55 = vadd.f32 %v9928_v61, %v19198_v5  ;;  %v13703_v5 = vld [vmem:[%s19703_s3 + $0x3e8] sm:$0xff] }
 0xe2d   :  { %v9992_v40 = vmax.f32 %v9960_v55, 0.0 }
 0xe2e   :  { %11196 = vmatpush.bf16.msra.mxu3 %v13667_v50 }
 0xe30   :  { %v9877_v53 = vpop.f32.mrf.mxu3 }
 0xe31   :  { %v9929_v9 = vadd.f32 %v9877_v53, %v19235_v6  ;;  %v13701_v6 = vld [vmem:[%s19703_s3 + $0x3d8] sm:$0xff] }
 0xe32   :  { %11197 = vmatpush.bf16.msra.mxu3 %v13666_v20 }
 0xe33   :  { %v9961_v59 = vadd.f32 %v9929_v9, %v19204_v0  ;;  %v13702_v0 = vld [vmem:[%s19703_s3 + $0x3e0] sm:$0xff] }
 0xe35   :  { %v9993_v23 = vmax.f32 %v9961_v59, 0.0  ;;  %11198 = vmatmul.bf16.vlgmr.msra.gmra.mxu3 %v19555_v32  ;;  %v13700_v32 = vld [vmem:[%s19703_s3 + $0x3d0] sm:$0xff] }
 0xe36   :  { %11246 = vmatpush.bf16.msrb.mxu3 %v13705_v15  ;;  %v11157_v10 = vpop.f32.mrf.mxu0 }
 0xe37   :  { %v10009_v21 = vpack.c.bf16 %v9993_v23, %v9992_v40 }
 0xe38   :  { %v9880_v41 = vpop.f32.mrf.mxu3 }
 0xe3a   :  { %11247 = vmatpush.bf16.msrb.mxu3 %v13704_v14 }
 0xe3e   :  { %11248 = vmatpush.bf16.msrb.mxu3 %v13703_v5  ;;  %v11159_v53 = vpop.f32.mrf.mxu0 }
 0xe40   :  { %v9881_v36 = vpop.f32.mrf.mxu3 }
 0xe42   :  { %11249 = vmatpush.bf16.msrb.mxu3 %v13702_v0 }
 0xe46   :  { %11250 = vmatpush.bf16.msrb.mxu3 %v13701_v6  ;;  %v11171_v37 = vpop.f32.mrf.mxu1 }
 0xe48   :  { %v9883_v34 = vpop.f32.mrf.mxu3 }
 0xe4a   :  { %11251 = vmatpush.bf16.msrb.mxu3 %v13700_v32 }
 0xe4e   :  { %11252 = vmatpush.bf16.msrb.mxu3 %v13699_v51  ;;  %v11173_v14 = vpop.f32.mrf.mxu1 }
 0xe50   :  { %v9884_v43 = vpop.f32.mrf.mxu3 }
 0xe52   :  { %11253 = vmatpush.bf16.msrb.mxu3 %v13698_v46 }
 0xe55   :  { %11254 = vmatmul.bf16.vlgmr.msrb.gmra.mxu3 %v10009_v21 }
 0xe58   :  { %v9886_v27 = vpop.f32.mrf.mxu3 }
 0xe5c   :  { %v11185_v61 = vpop.f32.mrf.mxu2 }
 0xe60   :  { %v9887_v16 = vpop.f32.mrf.mxu3 }
 0xe64   :  { %v11187_v21 = vpop.f32.mrf.mxu2 }
 0xe68   :  { %v9889_v31 = vpop.f32.mrf.mxu3 }
 0xe70   :  { %v9890_v18 = vpop.f32.mrf.mxu3 }
 0xe78   :  { %v9892_v57 = vpop.f32.mrf.mxu3 }
 0xe80   :  { %v9893_v11 = vpop.f32.mrf.mxu3 }
 0xe86   :  { %v11213_v5 = vpop.f32.mrf.mxu0 }
 0xe88   :  { %v9895_v17 = vpop.f32.mrf.mxu3 }
 0xe8e   :  { %v11215_v27 = vpop.f32.mrf.mxu0 }
 0xe90   :  { %v9896_v60 = vpop.f32.mrf.mxu3 }
 0xe96   :  { %v11227_v6 = vpop.f32.mrf.mxu1 }
 0xe98   :  { %v11087_v12 = vpop.f32.mrf.mxu3 }
 0xe99   :  { %v11088_v8 = vadd.f32 %v11087_v12, %v11074_v35 }
 0xe9b   :  { %v11102_v3 = vadd.f32 %v11101_v49, %v11088_v8 }
 0xe9d   :  { %v11116_v62 = vadd.f32 %v11115_v38, %v11102_v3 }
 0xe9e   :  { %v11229_v57 = vpop.f32.mrf.mxu1 }
 0xe9f   :  { %v11130_v50 = vadd.f32 %v11129_v22, %v11116_v62 }
 0xea0   :  { %v11089_v13 = vpop.f32.mrf.mxu3 }
 0xea1   :  { %v11090_v45 = vadd.f32 %v11089_v13, %v11076_v30 }
 0xea3   :  { %v11104_v42 = vadd.f32 %v11103_v33, %v11090_v45 }
 0xea5   :  { %v11118_v19 = vadd.f32 %v11117_v63, %v11104_v42 }
 0xea7   :  { %v11132_v15 = vadd.f32 %v11131_v54, %v11118_v19 }
 0xea8   :  { %v11143_v4 = vpop.f32.mrf.mxu3 }
 0xea9   :  { %v11144_v20 = vadd.f32 %v11143_v4, %v11130_v50 }
 0xeab   :  { %v11158_v59 = vadd.f32 %v11157_v10, %v11144_v20 }
 0xeac   :  { %v11241_v46 = vpop.f32.mrf.mxu2 }
 0xead   :  { %v11172_v23 = vadd.f32 %v11171_v37, %v11158_v59 }
 0xeaf   :  { %v11186_v0 = vadd.f32 %v11185_v61, %v11172_v23 }
 0xeb0   :  { %v11145_v39 = vpop.f32.mrf.mxu3 }
 0xeb1   :  { %v11146_v55 = vadd.f32 %v11145_v39, %v11132_v15 }
 0xeb3   :  { %v11160_v40 = vadd.f32 %v11159_v53, %v11146_v55 }
 0xeb4   :  { %v11243_v60 = vpop.f32.mrf.mxu2 }
 0xeb5   :  { %v11174_v41 = vadd.f32 %v11173_v14, %v11160_v40 }
 0xeb7   :  { %v11188_v51 = vadd.f32 %v11187_v21, %v11174_v41 }
 0xeb8   :  { %v11199_v9 = vpop.f32.mrf.mxu3 }
 0xeb9   :  { %v11200_v32 = vadd.f32 %v11199_v9, %v11186_v0 }
 0xebb   :  { %v11214_v43 = vadd.f32 %v11213_v5, %v11200_v32 }
 0xebd   :  { %v11228_v18 = vadd.f32 %v11227_v6, %v11214_v43 }
 0xebf   :  { %v11242_v17 = vadd.f32 %v11241_v46, %v11228_v18 }
 0xec0   :  { %v11201_v36 = vpop.f32.mrf.mxu3 }
 0xec1   :  { %v11202_v34 = vadd.f32 %v11201_v36, %v11188_v51 }
 0xec3   :  { %v11216_v16 = vadd.f32 %v11215_v27, %v11202_v34 }
 0xec5   :  { %v11230_v11 = vadd.f32 %v11229_v57, %v11216_v16 }
 0xec7   :  { %v11244_v25 = vadd.f32 %v11243_v60, %v11230_v11 }
 0xed8   :  { %v11255_v31 = vpop.f32.mrf.mxu3 }
 0xed9   :  { %v11256_v52 = vadd.f32 %v11255_v31, %v11242_v17 }
 0xedb   :  { %v11260_v47 = vmax.f32 %v11256_v52, 0.0 }
 0xee0   :  { %v11257_v26 = vpop.f32.mrf.mxu3 }
 0xee1   :  { %v11258_v12 = vadd.f32 %v11257_v26, %v11244_v25 }
 0xee3   :  { %v11261_v7 = vmax.f32 %v11258_v12, 0.0 }
 0xee5   :  { %v11262_v29 = vpack.c.bf16 %v11261_v7, %v11260_v47 }
 0xee7   :  { %13411 = vmatmul.msk.bf16.vlgmr.msra.gmra.mxu0 %vm228_vm0, %v11262_v29 }
 0xf64   :  { %v11295_v49 = vpop.f32.mrf.mxu0 }
 0xf65   :  { %v11296_v13 = vadd.f32 %v13711_v56, %v11295_v49 }
 0xf67   :  { %11301 = vst.msk [vmem:[%s19708_s9] sm:$0xff] %vm11300_vm2, %v11296_v13 }
 0xf6c   :  { %v11297_v24 = vpop.f32.mrf.mxu0 }
 0xf6d   :  { %v11298_v38 = vadd.f32 %v13711_v56, %v11297_v24 }
 0xf6f   :  { %11302 = vst.msk [vmem:[%s19708_s9 + $0x8] sm:$0xff] %vm11300_vm2, %v11298_v38 }

</bundles_post_ra>
